<compile_context>
chip_gen: v6e
topology: v6e:2x2x1
jax: 0.10.0
libtpu: 0.0.40
codegen_flags: <defaults>
</compile_context>

<pallas_src>
import functools

import jax
import jax.numpy as jnp
from jax.experimental import pallas as pl
from jax.experimental.pallas import tpu as pltpu

NUM_FILTERS = 250   # fixed by the PyTorch module
C_PAD = 256         # channel axis padded to a lane-friendly multiple of 128


# ------------------------------ fused kernel -------------------------------- #

def _dpcnn_kernel(B, cols_ref, wr_ref, br_ref, wc_ref, bc_ref,
                  wfc_ref, bfc_ref, o_ref):
    """Whole DPCNN forward for one batch of B sequences.

    Activation layout everywhere: 2-D (H*B, Cp) with row index = h*B + b
    (H-major, batch interleaved), Cp = padded channel count on the lane axis.

    cols_ref : (H0*B, Kr)   im2col'd embeddings (Kr = padded 3*E)
    wr_ref   : (Kr, Cp)     flattened region-conv weight
    br_ref   : (1, Cp)
    wc_ref   : (3, Cp, Cp)  per-tap (3,1) conv weight
    bc_ref   : (1, Cp)
    wfc_ref  : (Cp, NC)
    bfc_ref  : (1, NC)
    o_ref    : (B, NC)
    """
    Cp = wc_ref.shape[-1]

    def conv3(xp):
        # xp: ((H+2)*B, Cp), already padded by one zero row-block top/bottom
        # and already ReLU'd.  out[h*B+b] = sum_k wc[k]^T . xp[(h+k)*B+b].
        Hh = xp.shape[0] // B - 2
        acc = jnp.dot(xp[0:Hh * B, :], wc_ref[0],
                      preferred_element_type=jnp.float32)
        acc = acc + jnp.dot(xp[B:(Hh + 1) * B, :], wc_ref[1],
                            preferred_element_type=jnp.float32)
        acc = acc + jnp.dot(xp[2 * B:(Hh + 2) * B, :], wc_ref[2],
                            preferred_element_type=jnp.float32)
        return acc + bc_ref[...]

    def pad1_relu_conv(x):
        # padding1 (1 zero row-block top & bottom) -> ReLU -> conv (3,1).
        # (pad of zeros commutes with ReLU, so relu-then-pad is identical.)
        zrow = jnp.zeros((B, Cp), jnp.float32)
        xp = jnp.concatenate([zrow, jnp.maximum(x, 0.0), zrow], axis=0)
        return conv3(xp)

    def pool3s2(x):
        # padding2 (1 zero row-block at the bottom) + MaxPool2d((3,1), stride 2).
        Hh = x.shape[0] // B
        xpad = jnp.concatenate([x, jnp.zeros((B, Cp), jnp.float32)], axis=0)
        Hout = (Hh + 1 - 3) // 2 + 1
        blocks = []
        for j in range(Hout):   # Hout <= 7, statically unrolled
            a = xpad[(2 * j) * B:(2 * j + 1) * B, :]
            c = xpad[(2 * j + 1) * B:(2 * j + 2) * B, :]
            d = xpad[(2 * j + 2) * B:(2 * j + 3) * B, :]
            blocks.append(jnp.maximum(jnp.maximum(a, c), d))
        return jnp.concatenate(blocks, axis=0) if Hout > 1 else blocks[0]

    # region conv: one K = 3E matmul over the im2col'd embeddings.
    x = jnp.dot(cols_ref[...], wr_ref[...],
                preferred_element_type=jnp.float32) + br_ref[...]   # (H0*B, Cp)

    # two pad1 + relu + conv layers
    x = pad1_relu_conv(x)
    x = pad1_relu_conv(x)

    # DPCNN blocks, statically unrolled over the known H schedule (14->7->3->1)
    while x.shape[0] // B > 1:
        px = pool3s2(x)
        y = pad1_relu_conv(px)
        y = pad1_relu_conv(y)
        x = y + px

    # H == 1: x is exactly (B, Cp) in batch order.  Final FC fused in-kernel.
    o_ref[...] = (jnp.dot(x, wfc_ref[...], preferred_element_type=jnp.float32)
                  + bfc_ref[...])


# ------------------------------ forward wrapper ----------------------------- #

def dpcnn_forward(input_ids, params):
    B, L = input_ids.shape
    emb = jnp.take(params["embed"], input_ids, axis=0)            # (B, L, E)
    E = emb.shape[-1]
    H0 = L - 2

    # im2col (glue): (B, H0, 3E), then interleave batch -> (H0*B, 3E), pad K.
    cols = jnp.concatenate([emb[:, k:k + H0, :] for k in range(3)], axis=-1)
    cols = jnp.transpose(cols, (1, 0, 2)).reshape(H0 * B, 3 * E)
    Kr = params["w_region"].shape[0]
    cols = jnp.pad(cols, ((0, 0), (0, Kr - 3 * E)))

    NC = params["w_fc"].shape[1]
    vmem = pl.BlockSpec(memory_space=pltpu.MemorySpace.VMEM)
    kern = functools.partial(_dpcnn_kernel, B)

    # TODO(synk): for B == 1 torch's x.squeeze() also drops the batch dim;
    # this path keeps shape (1, num_classes).
    return pl.pallas_call(
        kern,
        out_shape=jax.ShapeDtypeStruct((B, NC), jnp.float32),
        in_specs=[vmem] * 7,
        out_specs=vmem,
    )(cols, params["w_region"], params["b_region"],
      params["w_conv"], params["b_conv"], params["w_fc"], params["b_fc"])


# --------------------------- params / reference ----------------------------- #

def init_params(key, vocab, embed_dim, num_filters, num_classes, c_pad=C_PAD):
    ks = jax.random.split(key, 7)
    C, Cp = num_filters, c_pad
    k_pad = ((3 * embed_dim + 127) // 128) * 128

    embed = jax.random.normal(ks[0], (vocab, embed_dim), jnp.float32)
    w_region_oihw = jax.random.normal(
        ks[1], (C, 1, 3, embed_dim), jnp.float32) * (2.0 / (3 * embed_dim)) ** 0.5
    b_region = jax.random.normal(ks[2], (C,), jnp.float32) * 0.01
    w_conv_oihw = jax.random.normal(
        ks[3], (C, C, 3, 1), jnp.float32) * (2.0 / (3 * C)) ** 0.5
    b_conv = jax.random.normal(ks[4], (C,), jnp.float32) * 0.01
    w_fc = jax.random.normal(ks[5], (C, num_classes), jnp.float32) * (1.0 / C) ** 0.5
    b_fc = jax.random.normal(ks[6], (num_classes,), jnp.float32) * 0.01

    # kernel layouts ---------------------------------------------------------
    # region conv: (C,1,3,E) -> (3,E,C) -> flattened (3E, C) -> pad to (Kr, Cp)
    w_region_k = jnp.transpose(w_region_oihw[:, 0], (1, 2, 0)).reshape(3 * embed_dim, C)
    w_region_k = jnp.pad(w_region_k, ((0, k_pad - 3 * embed_dim), (0, Cp - C)))
    # (3,1) conv: (C_out, C_in, 3, 1) -> per-tap (3, C_in, C_out) -> pad to Cp
    w_conv_k = jnp.transpose(w_conv_oihw[:, :, :, 0], (2, 1, 0))
    w_conv_k = jnp.pad(w_conv_k, ((0, 0), (0, Cp - C), (0, Cp - C)))
    w_fc_k = jnp.pad(w_fc, ((0, Cp - C), (0, 0)))

    return {
        "embed": embed,
        # PyTorch-layout originals (used by the pure-JAX reference)
        "w_region_oihw": w_region_oihw, "b_region_raw": b_region,
        "w_conv_oihw": w_conv_oihw, "b_conv_raw": b_conv,
        "w_fc_raw": w_fc, "b_fc_raw": b_fc,
        # fused-kernel layouts (channel axis padded to Cp)
        "w_region": w_region_k,
        "b_region": jnp.pad(b_region, (0, Cp - C)).reshape(1, Cp),
        "w_conv": w_conv_k,
        "b_conv": jnp.pad(b_conv, (0, Cp - C)).reshape(1, Cp),
        "w_fc": w_fc_k,
        "b_fc": b_fc.reshape(1, num_classes),
    }


def reference_forward(input_ids, params):
    """Pure-JAX NCHW reference mirroring the PyTorch module."""
    emb = jnp.take(params["embed"], input_ids, axis=0)
    x = emb[:, None, :, :]                                           # (B,1,L,E)

    def conv2d(t, w_oihw, b):
        y = jax.lax.conv_general_dilated(
            t, w_oihw, window_strides=(1, 1), padding="VALID",
            dimension_numbers=("NCHW", "OIHW", "NCHW"),
            precision=jax.lax.Precision.HIGHEST)
        return y + b.reshape(1, -1, 1, 1)

    pad1 = lambda t: jnp.pad(t, ((0, 0), (0, 0), (1, 1), (0, 0)))
    pad2 = lambda t: jnp.pad(t, ((0, 0), (0, 0), (0, 1), (0, 0)))
    relu = lambda t: jnp.maximum(t, 0.0)
    wr, br = params["w_region_oihw"], params["b_region_raw"]
    wc, bc = params["w_conv_oihw"], params["b_conv_raw"]

    x = conv2d(x, wr, br)
    x = conv2d(relu(pad1(x)), wc, bc)
    x = conv2d(relu(pad1(x)), wc, bc)
    while x.shape[2] > 1:
        px = jax.lax.reduce_window(pad2(x), -jnp.inf, jax.lax.max,
                                   (1, 1, 3, 1), (1, 1, 2, 2), "VALID")
        x = conv2d(relu(pad1(px)), wc, bc)
        x = conv2d(relu(pad1(x)), wc, bc)
        x = x + px
    x = x.reshape(x.shape[0], -1)
    return (jnp.dot(x, params["w_fc_raw"], precision=jax.lax.Precision.HIGHEST)
            + params["b_fc_raw"])


# ----------------------------------- main ------------------------------------ #

if __name__ == "__main__":
    B, L, E, VOCAB, NUM_CLASSES = 2, 16, 32, 100, 5

    key = jax.random.PRNGKey(0)
    pkey, ikey = jax.random.split(key)
    params = init_params(pkey, VOCAB, E, NUM_FILTERS, NUM_CLASSES)
    input_ids = jax.random.randint(ikey, (B, L), 0, VOCAB, dtype=jnp.int32)

    fwd = jax.jit(dpcnn_forward)
    out = jax.block_until_ready(fwd(input_ids, params))

    ref = jax.block_until_ready(reference_forward(input_ids, params))
    assert out.shape == (B, NUM_CLASSES), out.shape
    assert jnp.allclose(out, ref, rtol=5e-3, atol=5e-3), (out, ref)

    print("KERNEL_OK")
</pallas_src>

<mosaic_0001>
module attributes {stable_mosaic.version = 11 : i64} {
  func.func @_dpcnn_kernel(%arg0: memref<28x128xf32, #tpu.memory_space<vmem>>, %arg1: memref<128x256xf32, #tpu.memory_space<vmem>>, %arg2: memref<1x256xf32, #tpu.memory_space<vmem>>, %arg3: memref<3x256x256xf32, #tpu.memory_space<vmem>>, %arg4: memref<1x256xf32, #tpu.memory_space<vmem>>, %arg5: memref<256x5xf32, #tpu.memory_space<vmem>>, %arg6: memref<1x5xf32, #tpu.memory_space<vmem>>, %arg7: memref<2x5xf32, #tpu.memory_space<vmem>>) attributes {dimension_semantics = [], scalar_prefetch = 0 : i64, scratch_operands = 0 : i64, tpu.core_type = #tpu.core_type<tc>} {
    %c0 = arith.constant 0 : index
    %c0_0 = arith.constant 0 : index
    %0 = vector.load %arg0[%c0, %c0_0] : memref<28x128xf32, #tpu.memory_space<vmem>>, vector<28x128xf32>
    %c0_1 = arith.constant 0 : index
    %c0_2 = arith.constant 0 : index
    %1 = vector.load %arg1[%c0_1, %c0_2] : memref<128x256xf32, #tpu.memory_space<vmem>>, vector<128x256xf32>
    %cst = arith.constant dense<0.000000e+00> : vector<28x256xf32>
    %2 = tpu.matmul %0, %1, %cst {dimension_numbers = #tpu.dot_dimension_numbers<[1], [0], [0], [1], [0, 0, 1, 1], [], []>} : vector<28x128xf32>, vector<128x256xf32>, vector<28x256xf32> -> vector<28x256xf32>
    %c0_3 = arith.constant 0 : index
    %c0_4 = arith.constant 0 : index
    %3 = vector.load %arg2[%c0_3, %c0_4] : memref<1x256xf32, #tpu.memory_space<vmem>>, vector<1x256xf32>
    %4 = vector.broadcast %3 : vector<1x256xf32> to vector<28x256xf32>
    %5 = arith.addf %2, %4 : vector<28x256xf32>
    %cst_5 = arith.constant 0.000000e+00 : f32
    %6 = vector.broadcast %cst_5 : f32 to vector<2x256xf32>
    %cst_6 = arith.constant 0.000000e+00 : f32
    %7 = vector.broadcast %cst_6 : f32 to vector<28x256xf32>
    %8 = arith.maximumf %5, %7 : vector<28x256xf32>
    %9 = tpu.concatenate %6, %8, %6 in 0 : vector<2x256xf32>, vector<28x256xf32>, vector<2x256xf32> -> vector<32x256xf32>
    %10 = vector.extract_strided_slice %9 {offsets = [0, 0], sizes = [28, 256], strides = [1, 1]} : vector<32x256xf32> to vector<28x256xf32>
    %c0_7 = arith.constant 0 : index
    %c0_8 = arith.constant 0 : index
    %c0_9 = arith.constant 0 : index
    %11 = vector.load %arg3[%c0_7, %c0_8, %c0_9] : memref<3x256x256xf32, #tpu.memory_space<vmem>>, vector<1x256x256xf32>
    %12 = vector.shape_cast %11 : vector<1x256x256xf32> to vector<256x256xf32>
    %cst_10 = arith.constant dense<0.000000e+00> : vector<28x256xf32>
    %13 = tpu.matmul %10, %12, %cst_10 {dimension_numbers = #tpu.dot_dimension_numbers<[1], [0], [0], [1], [0, 0, 1, 1], [], []>} : vector<28x256xf32>, vector<256x256xf32>, vector<28x256xf32> -> vector<28x256xf32>
    %14 = vector.extract_strided_slice %9 {offsets = [2, 0], sizes = [28, 256], strides = [1, 1]} : vector<32x256xf32> to vector<28x256xf32>
    %c1 = arith.constant 1 : index
    %c0_11 = arith.constant 0 : index
    %c0_12 = arith.constant 0 : index
    %15 = vector.load %arg3[%c1, %c0_11, %c0_12] : memref<3x256x256xf32, #tpu.memory_space<vmem>>, vector<1x256x256xf32>
    %16 = vector.shape_cast %15 : vector<1x256x256xf32> to vector<256x256xf32>
    %cst_13 = arith.constant dense<0.000000e+00> : vector<28x256xf32>
    %17 = tpu.matmul %14, %16, %cst_13 {dimension_numbers = #tpu.dot_dimension_numbers<[1], [0], [0], [1], [0, 0, 1, 1], [], []>} : vector<28x256xf32>, vector<256x256xf32>, vector<28x256xf32> -> vector<28x256xf32>
    %18 = arith.addf %13, %17 : vector<28x256xf32>
    %19 = vector.extract_strided_slice %9 {offsets = [4, 0], sizes = [28, 256], strides = [1, 1]} : vector<32x256xf32> to vector<28x256xf32>
    %c2 = arith.constant 2 : index
    %c0_14 = arith.constant 0 : index
    %c0_15 = arith.constant 0 : index
    %20 = vector.load %arg3[%c2, %c0_14, %c0_15] : memref<3x256x256xf32, #tpu.memory_space<vmem>>, vector<1x256x256xf32>
    %21 = vector.shape_cast %20 : vector<1x256x256xf32> to vector<256x256xf32>
    %cst_16 = arith.constant dense<0.000000e+00> : vector<28x256xf32>
    %22 = tpu.matmul %19, %21, %cst_16 {dimension_numbers = #tpu.dot_dimension_numbers<[1], [0], [0], [1], [0, 0, 1, 1], [], []>} : vector<28x256xf32>, vector<256x256xf32>, vector<28x256xf32> -> vector<28x256xf32>
    %23 = arith.addf %18, %22 : vector<28x256xf32>
    %c0_17 = arith.constant 0 : index
    %c0_18 = arith.constant 0 : index
    %24 = vector.load %arg4[%c0_17, %c0_18] : memref<1x256xf32, #tpu.memory_space<vmem>>, vector<1x256xf32>
    %25 = vector.broadcast %24 : vector<1x256xf32> to vector<28x256xf32>
    %26 = arith.addf %23, %25 : vector<28x256xf32>
    %cst_19 = arith.constant 0.000000e+00 : f32
    %27 = vector.broadcast %cst_19 : f32 to vector<2x256xf32>
    %cst_20 = arith.constant 0.000000e+00 : f32
    %28 = vector.broadcast %cst_20 : f32 to vector<28x256xf32>
    %29 = arith.maximumf %26, %28 : vector<28x256xf32>
    %30 = tpu.concatenate %27, %29, %27 in 0 : vector<2x256xf32>, vector<28x256xf32>, vector<2x256xf32> -> vector<32x256xf32>
    %31 = vector.extract_strided_slice %30 {offsets = [0, 0], sizes = [28, 256], strides = [1, 1]} : vector<32x256xf32> to vector<28x256xf32>
    %c0_21 = arith.constant 0 : index
    %c0_22 = arith.constant 0 : index
    %c0_23 = arith.constant 0 : index
    %32 = vector.load %arg3[%c0_21, %c0_22, %c0_23] : memref<3x256x256xf32, #tpu.memory_space<vmem>>, vector<1x256x256xf32>
    %33 = vector.shape_cast %32 : vector<1x256x256xf32> to vector<256x256xf32>
    %cst_24 = arith.constant dense<0.000000e+00> : vector<28x256xf32>
    %34 = tpu.matmul %31, %33, %cst_24 {dimension_numbers = #tpu.dot_dimension_numbers<[1], [0], [0], [1], [0, 0, 1, 1], [], []>} : vector<28x256xf32>, vector<256x256xf32>, vector<28x256xf32> -> vector<28x256xf32>
    %35 = vector.extract_strided_slice %30 {offsets = [2, 0], sizes = [28, 256], strides = [1, 1]} : vector<32x256xf32> to vector<28x256xf32>
    %c1_25 = arith.constant 1 : index
    %c0_26 = arith.constant 0 : index
    %c0_27 = arith.constant 0 : index
    %36 = vector.load %arg3[%c1_25, %c0_26, %c0_27] : memref<3x256x256xf32, #tpu.memory_space<vmem>>, vector<1x256x256xf32>
    %37 = vector.shape_cast %36 : vector<1x256x256xf32> to vector<256x256xf32>
    %cst_28 = arith.constant dense<0.000000e+00> : vector<28x256xf32>
    %38 = tpu.matmul %35, %37, %cst_28 {dimension_numbers = #tpu.dot_dimension_numbers<[1], [0], [0], [1], [0, 0, 1, 1], [], []>} : vector<28x256xf32>, vector<256x256xf32>, vector<28x256xf32> -> vector<28x256xf32>
    %39 = arith.addf %34, %38 : vector<28x256xf32>
    %40 = vector.extract_strided_slice %30 {offsets = [4, 0], sizes = [28, 256], strides = [1, 1]} : vector<32x256xf32> to vector<28x256xf32>
    %c2_29 = arith.constant 2 : index
    %c0_30 = arith.constant 0 : index
    %c0_31 = arith.constant 0 : index
    %41 = vector.load %arg3[%c2_29, %c0_30, %c0_31] : memref<3x256x256xf32, #tpu.memory_space<vmem>>, vector<1x256x256xf32>
    %42 = vector.shape_cast %41 : vector<1x256x256xf32> to vector<256x256xf32>
    %cst_32 = arith.constant dense<0.000000e+00> : vector<28x256xf32>
    %43 = tpu.matmul %40, %42, %cst_32 {dimension_numbers = #tpu.dot_dimension_numbers<[1], [0], [0], [1], [0, 0, 1, 1], [], []>} : vector<28x256xf32>, vector<256x256xf32>, vector<28x256xf32> -> vector<28x256xf32>
    %44 = arith.addf %39, %43 : vector<28x256xf32>
    %c0_33 = arith.constant 0 : index
    %c0_34 = arith.constant 0 : index
    %45 = vector.load %arg4[%c0_33, %c0_34] : memref<1x256xf32, #tpu.memory_space<vmem>>, vector<1x256xf32>
    %46 = vector.broadcast %45 : vector<1x256xf32> to vector<28x256xf32>
    %47 = arith.addf %44, %46 : vector<28x256xf32>
    %cst_35 = arith.constant 0.000000e+00 : f32
    %48 = vector.broadcast %cst_35 : f32 to vector<2x256xf32>
    %49 = tpu.concatenate %47, %48 in 0 : vector<28x256xf32>, vector<2x256xf32> -> vector<30x256xf32>
    %50 = vector.extract_strided_slice %49 {offsets = [0, 0], sizes = [2, 256], strides = [1, 1]} : vector<30x256xf32> to vector<2x256xf32>
    %51 = vector.extract_strided_slice %49 {offsets = [2, 0], sizes = [2, 256], strides = [1, 1]} : vector<30x256xf32> to vector<2x256xf32>
    %52 = vector.extract_strided_slice %49 {offsets = [4, 0], sizes = [2, 256], strides = [1, 1]} : vector<30x256xf32> to vector<2x256xf32>
    %53 = arith.maximumf %50, %51 : vector<2x256xf32>
    %54 = arith.maximumf %53, %52 : vector<2x256xf32>
    %55 = vector.extract_strided_slice %49 {offsets = [4, 0], sizes = [2, 256], strides = [1, 1]} : vector<30x256xf32> to vector<2x256xf32>
    %56 = vector.extract_strided_slice %49 {offsets = [6, 0], sizes = [2, 256], strides = [1, 1]} : vector<30x256xf32> to vector<2x256xf32>
    %57 = vector.extract_strided_slice %49 {offsets = [8, 0], sizes = [2, 256], strides = [1, 1]} : vector<30x256xf32> to vector<2x256xf32>
    %58 = arith.maximumf %55, %56 : vector<2x256xf32>
    %59 = arith.maximumf %58, %57 : vector<2x256xf32>
    %60 = vector.extract_strided_slice %49 {offsets = [8, 0], sizes = [2, 256], strides = [1, 1]} : vector<30x256xf32> to vector<2x256xf32>
    %61 = vector.extract_strided_slice %49 {offsets = [10, 0], sizes = [2, 256], strides = [1, 1]} : vector<30x256xf32> to vector<2x256xf32>
    %62 = vector.extract_strided_slice %49 {offsets = [12, 0], sizes = [2, 256], strides = [1, 1]} : vector<30x256xf32> to vector<2x256xf32>
    %63 = arith.maximumf %60, %61 : vector<2x256xf32>
    %64 = arith.maximumf %63, %62 : vector<2x256xf32>
    %65 = vector.extract_strided_slice %49 {offsets = [12, 0], sizes = [2, 256], strides = [1, 1]} : vector<30x256xf32> to vector<2x256xf32>
    %66 = vector.extract_strided_slice %49 {offsets = [14, 0], sizes = [2, 256], strides = [1, 1]} : vector<30x256xf32> to vector<2x256xf32>
    %67 = vector.extract_strided_slice %49 {offsets = [16, 0], sizes = [2, 256], strides = [1, 1]} : vector<30x256xf32> to vector<2x256xf32>
    %68 = arith.maximumf %65, %66 : vector<2x256xf32>
    %69 = arith.maximumf %68, %67 : vector<2x256xf32>
    %70 = vector.extract_strided_slice %49 {offsets = [16, 0], sizes = [2, 256], strides = [1, 1]} : vector<30x256xf32> to vector<2x256xf32>
    %71 = vector.extract_strided_slice %49 {offsets = [18, 0], sizes = [2, 256], strides = [1, 1]} : vector<30x256xf32> to vector<2x256xf32>
    %72 = vector.extract_strided_slice %49 {offsets = [20, 0], sizes = [2, 256], strides = [1, 1]} : vector<30x256xf32> to vector<2x256xf32>
    %73 = arith.maximumf %70, %71 : vector<2x256xf32>
    %74 = arith.maximumf %73, %72 : vector<2x256xf32>
    %75 = vector.extract_strided_slice %49 {offsets = [20, 0], sizes = [2, 256], strides = [1, 1]} : vector<30x256xf32> to vector<2x256xf32>
    %76 = vector.extract_strided_slice %49 {offsets = [22, 0], sizes = [2, 256], strides = [1, 1]} : vector<30x256xf32> to vector<2x256xf32>
    %77 = vector.extract_strided_slice %49 {offsets = [24, 0], sizes = [2, 256], strides = [1, 1]} : vector<30x256xf32> to vector<2x256xf32>
    %78 = arith.maximumf %75, %76 : vector<2x256xf32>
    %79 = arith.maximumf %78, %77 : vector<2x256xf32>
    %80 = vector.extract_strided_slice %49 {offsets = [24, 0], sizes = [2, 256], strides = [1, 1]} : vector<30x256xf32> to vector<2x256xf32>
    %81 = vector.extract_strided_slice %49 {offsets = [26, 0], sizes = [2, 256], strides = [1, 1]} : vector<30x256xf32> to vector<2x256xf32>
    %82 = vector.extract_strided_slice %49 {offsets = [28, 0], sizes = [2, 256], strides = [1, 1]} : vector<30x256xf32> to vector<2x256xf32>
    %83 = arith.maximumf %80, %81 : vector<2x256xf32>
    %84 = arith.maximumf %83, %82 : vector<2x256xf32>
    %85 = tpu.concatenate %54, %59, %64, %69, %74, %79, %84 in 0 : vector<2x256xf32>, vector<2x256xf32>, vector<2x256xf32>, vector<2x256xf32>, vector<2x256xf32>, vector<2x256xf32>, vector<2x256xf32> -> vector<14x256xf32>
    %cst_36 = arith.constant 0.000000e+00 : f32
    %86 = vector.broadcast %cst_36 : f32 to vector<2x256xf32>
    %cst_37 = arith.constant 0.000000e+00 : f32
    %87 = vector.broadcast %cst_37 : f32 to vector<14x256xf32>
    %88 = arith.maximumf %85, %87 : vector<14x256xf32>
    %89 = tpu.concatenate %86, %88, %86 in 0 : vector<2x256xf32>, vector<14x256xf32>, vector<2x256xf32> -> vector<18x256xf32>
    %90 = vector.extract_strided_slice %89 {offsets = [0, 0], sizes = [14, 256], strides = [1, 1]} : vector<18x256xf32> to vector<14x256xf32>
    %c0_38 = arith.constant 0 : index
    %c0_39 = arith.constant 0 : index
    %c0_40 = arith.constant 0 : index
    %91 = vector.load %arg3[%c0_38, %c0_39, %c0_40] : memref<3x256x256xf32, #tpu.memory_space<vmem>>, vector<1x256x256xf32>
    %92 = vector.shape_cast %91 : vector<1x256x256xf32> to vector<256x256xf32>
    %cst_41 = arith.constant dense<0.000000e+00> : vector<14x256xf32>
    %93 = tpu.matmul %90, %92, %cst_41 {dimension_numbers = #tpu.dot_dimension_numbers<[1], [0], [0], [1], [0, 0, 1, 1], [], []>} : vector<14x256xf32>, vector<256x256xf32>, vector<14x256xf32> -> vector<14x256xf32>
    %94 = vector.extract_strided_slice %89 {offsets = [2, 0], sizes = [14, 256], strides = [1, 1]} : vector<18x256xf32> to vector<14x256xf32>
    %c1_42 = arith.constant 1 : index
    %c0_43 = arith.constant 0 : index
    %c0_44 = arith.constant 0 : index
    %95 = vector.load %arg3[%c1_42, %c0_43, %c0_44] : memref<3x256x256xf32, #tpu.memory_space<vmem>>, vector<1x256x256xf32>
    %96 = vector.shape_cast %95 : vector<1x256x256xf32> to vector<256x256xf32>
    %cst_45 = arith.constant dense<0.000000e+00> : vector<14x256xf32>
    %97 = tpu.matmul %94, %96, %cst_45 {dimension_numbers = #tpu.dot_dimension_numbers<[1], [0], [0], [1], [0, 0, 1, 1], [], []>} : vector<14x256xf32>, vector<256x256xf32>, vector<14x256xf32> -> vector<14x256xf32>
    %98 = arith.addf %93, %97 : vector<14x256xf32>
    %99 = vector.extract_strided_slice %89 {offsets = [4, 0], sizes = [14, 256], strides = [1, 1]} : vector<18x256xf32> to vector<14x256xf32>
    %c2_46 = arith.constant 2 : index
    %c0_47 = arith.constant 0 : index
    %c0_48 = arith.constant 0 : index
    %100 = vector.load %arg3[%c2_46, %c0_47, %c0_48] : memref<3x256x256xf32, #tpu.memory_space<vmem>>, vector<1x256x256xf32>
    %101 = vector.shape_cast %100 : vector<1x256x256xf32> to vector<256x256xf32>
    %cst_49 = arith.constant dense<0.000000e+00> : vector<14x256xf32>
    %102 = tpu.matmul %99, %101, %cst_49 {dimension_numbers = #tpu.dot_dimension_numbers<[1], [0], [0], [1], [0, 0, 1, 1], [], []>} : vector<14x256xf32>, vector<256x256xf32>, vector<14x256xf32> -> vector<14x256xf32>
    %103 = arith.addf %98, %102 : vector<14x256xf32>
    %c0_50 = arith.constant 0 : index
    %c0_51 = arith.constant 0 : index
    %104 = vector.load %arg4[%c0_50, %c0_51] : memref<1x256xf32, #tpu.memory_space<vmem>>, vector<1x256xf32>
    %105 = vector.broadcast %104 : vector<1x256xf32> to vector<14x256xf32>
    %106 = arith.addf %103, %105 : vector<14x256xf32>
    %cst_52 = arith.constant 0.000000e+00 : f32
    %107 = vector.broadcast %cst_52 : f32 to vector<2x256xf32>
    %cst_53 = arith.constant 0.000000e+00 : f32
    %108 = vector.broadcast %cst_53 : f32 to vector<14x256xf32>
    %109 = arith.maximumf %106, %108 : vector<14x256xf32>
    %110 = tpu.concatenate %107, %109, %107 in 0 : vector<2x256xf32>, vector<14x256xf32>, vector<2x256xf32> -> vector<18x256xf32>
    %111 = vector.extract_strided_slice %110 {offsets = [0, 0], sizes = [14, 256], strides = [1, 1]} : vector<18x256xf32> to vector<14x256xf32>
    %c0_54 = arith.constant 0 : index
    %c0_55 = arith.constant 0 : index
    %c0_56 = arith.constant 0 : index
    %112 = vector.load %arg3[%c0_54, %c0_55, %c0_56] : memref<3x256x256xf32, #tpu.memory_space<vmem>>, vector<1x256x256xf32>
    %113 = vector.shape_cast %112 : vector<1x256x256xf32> to vector<256x256xf32>
    %cst_57 = arith.constant dense<0.000000e+00> : vector<14x256xf32>
    %114 = tpu.matmul %111, %113, %cst_57 {dimension_numbers = #tpu.dot_dimension_numbers<[1], [0], [0], [1], [0, 0, 1, 1], [], []>} : vector<14x256xf32>, vector<256x256xf32>, vector<14x256xf32> -> vector<14x256xf32>
    %115 = vector.extract_strided_slice %110 {offsets = [2, 0], sizes = [14, 256], strides = [1, 1]} : vector<18x256xf32> to vector<14x256xf32>
    %c1_58 = arith.constant 1 : index
    %c0_59 = arith.constant 0 : index
    %c0_60 = arith.constant 0 : index
    %116 = vector.load %arg3[%c1_58, %c0_59, %c0_60] : memref<3x256x256xf32, #tpu.memory_space<vmem>>, vector<1x256x256xf32>
    %117 = vector.shape_cast %116 : vector<1x256x256xf32> to vector<256x256xf32>
    %cst_61 = arith.constant dense<0.000000e+00> : vector<14x256xf32>
    %118 = tpu.matmul %115, %117, %cst_61 {dimension_numbers = #tpu.dot_dimension_numbers<[1], [0], [0], [1], [0, 0, 1, 1], [], []>} : vector<14x256xf32>, vector<256x256xf32>, vector<14x256xf32> -> vector<14x256xf32>
    %119 = arith.addf %114, %118 : vector<14x256xf32>
    %120 = vector.extract_strided_slice %110 {offsets = [4, 0], sizes = [14, 256], strides = [1, 1]} : vector<18x256xf32> to vector<14x256xf32>
    %c2_62 = arith.constant 2 : index
    %c0_63 = arith.constant 0 : index
    %c0_64 = arith.constant 0 : index
    %121 = vector.load %arg3[%c2_62, %c0_63, %c0_64] : memref<3x256x256xf32, #tpu.memory_space<vmem>>, vector<1x256x256xf32>
    %122 = vector.shape_cast %121 : vector<1x256x256xf32> to vector<256x256xf32>
    %cst_65 = arith.constant dense<0.000000e+00> : vector<14x256xf32>
    %123 = tpu.matmul %120, %122, %cst_65 {dimension_numbers = #tpu.dot_dimension_numbers<[1], [0], [0], [1], [0, 0, 1, 1], [], []>} : vector<14x256xf32>, vector<256x256xf32>, vector<14x256xf32> -> vector<14x256xf32>
    %124 = arith.addf %119, %123 : vector<14x256xf32>
    %c0_66 = arith.constant 0 : index
    %c0_67 = arith.constant 0 : index
    %125 = vector.load %arg4[%c0_66, %c0_67] : memref<1x256xf32, #tpu.memory_space<vmem>>, vector<1x256xf32>
    %126 = vector.broadcast %125 : vector<1x256xf32> to vector<14x256xf32>
    %127 = arith.addf %124, %126 : vector<14x256xf32>
    %128 = arith.addf %127, %85 : vector<14x256xf32>
    %cst_68 = arith.constant 0.000000e+00 : f32
    %129 = vector.broadcast %cst_68 : f32 to vector<2x256xf32>
    %130 = tpu.concatenate %128, %129 in 0 : vector<14x256xf32>, vector<2x256xf32> -> vector<16x256xf32>
    %131 = vector.extract_strided_slice %130 {offsets = [0, 0], sizes = [2, 256], strides = [1, 1]} : vector<16x256xf32> to vector<2x256xf32>
    %132 = vector.extract_strided_slice %130 {offsets = [2, 0], sizes = [2, 256], strides = [1, 1]} : vector<16x256xf32> to vector<2x256xf32>
    %133 = vector.extract_strided_slice %130 {offsets = [4, 0], sizes = [2, 256], strides = [1, 1]} : vector<16x256xf32> to vector<2x256xf32>
    %134 = arith.maximumf %131, %132 : vector<2x256xf32>
    %135 = arith.maximumf %134, %133 : vector<2x256xf32>
    %136 = vector.extract_strided_slice %130 {offsets = [4, 0], sizes = [2, 256], strides = [1, 1]} : vector<16x256xf32> to vector<2x256xf32>
    %137 = vector.extract_strided_slice %130 {offsets = [6, 0], sizes = [2, 256], strides = [1, 1]} : vector<16x256xf32> to vector<2x256xf32>
    %138 = vector.extract_strided_slice %130 {offsets = [8, 0], sizes = [2, 256], strides = [1, 1]} : vector<16x256xf32> to vector<2x256xf32>
    %139 = arith.maximumf %136, %137 : vector<2x256xf32>
    %140 = arith.maximumf %139, %138 : vector<2x256xf32>
    %141 = vector.extract_strided_slice %130 {offsets = [8, 0], sizes = [2, 256], strides = [1, 1]} : vector<16x256xf32> to vector<2x256xf32>
    %142 = vector.extract_strided_slice %130 {offsets = [10, 0], sizes = [2, 256], strides = [1, 1]} : vector<16x256xf32> to vector<2x256xf32>
    %143 = vector.extract_strided_slice %130 {offsets = [12, 0], sizes = [2, 256], strides = [1, 1]} : vector<16x256xf32> to vector<2x256xf32>
    %144 = arith.maximumf %141, %142 : vector<2x256xf32>
    %145 = arith.maximumf %144, %143 : vector<2x256xf32>
    %146 = tpu.concatenate %135, %140, %145 in 0 : vector<2x256xf32>, vector<2x256xf32>, vector<2x256xf32> -> vector<6x256xf32>
    %cst_69 = arith.constant 0.000000e+00 : f32
    %147 = vector.broadcast %cst_69 : f32 to vector<2x256xf32>
    %cst_70 = arith.constant 0.000000e+00 : f32
    %148 = vector.broadcast %cst_70 : f32 to vector<6x256xf32>
    %149 = arith.maximumf %146, %148 : vector<6x256xf32>
    %150 = tpu.concatenate %147, %149, %147 in 0 : vector<2x256xf32>, vector<6x256xf32>, vector<2x256xf32> -> vector<10x256xf32>
    %151 = vector.extract_strided_slice %150 {offsets = [0, 0], sizes = [6, 256], strides = [1, 1]} : vector<10x256xf32> to vector<6x256xf32>
    %c0_71 = arith.constant 0 : index
    %c0_72 = arith.constant 0 : index
    %c0_73 = arith.constant 0 : index
    %152 = vector.load %arg3[%c0_71, %c0_72, %c0_73] : memref<3x256x256xf32, #tpu.memory_space<vmem>>, vector<1x256x256xf32>
    %153 = vector.shape_cast %152 : vector<1x256x256xf32> to vector<256x256xf32>
    %cst_74 = arith.constant dense<0.000000e+00> : vector<6x256xf32>
    %154 = tpu.matmul %151, %153, %cst_74 {dimension_numbers = #tpu.dot_dimension_numbers<[1], [0], [0], [1], [0, 0, 1, 1], [], []>} : vector<6x256xf32>, vector<256x256xf32>, vector<6x256xf32> -> vector<6x256xf32>
    %155 = vector.extract_strided_slice %150 {offsets = [2, 0], sizes = [6, 256], strides = [1, 1]} : vector<10x256xf32> to vector<6x256xf32>
    %c1_75 = arith.constant 1 : index
    %c0_76 = arith.constant 0 : index
    %c0_77 = arith.constant 0 : index
    %156 = vector.load %arg3[%c1_75, %c0_76, %c0_77] : memref<3x256x256xf32, #tpu.memory_space<vmem>>, vector<1x256x256xf32>
    %157 = vector.shape_cast %156 : vector<1x256x256xf32> to vector<256x256xf32>
    %cst_78 = arith.constant dense<0.000000e+00> : vector<6x256xf32>
    %158 = tpu.matmul %155, %157, %cst_78 {dimension_numbers = #tpu.dot_dimension_numbers<[1], [0], [0], [1], [0, 0, 1, 1], [], []>} : vector<6x256xf32>, vector<256x256xf32>, vector<6x256xf32> -> vector<6x256xf32>
    %159 = arith.addf %154, %158 : vector<6x256xf32>
    %160 = vector.extract_strided_slice %150 {offsets = [4, 0], sizes = [6, 256], strides = [1, 1]} : vector<10x256xf32> to vector<6x256xf32>
    %c2_79 = arith.constant 2 : index
    %c0_80 = arith.constant 0 : index
    %c0_81 = arith.constant 0 : index
    %161 = vector.load %arg3[%c2_79, %c0_80, %c0_81] : memref<3x256x256xf32, #tpu.memory_space<vmem>>, vector<1x256x256xf32>
    %162 = vector.shape_cast %161 : vector<1x256x256xf32> to vector<256x256xf32>
    %cst_82 = arith.constant dense<0.000000e+00> : vector<6x256xf32>
    %163 = tpu.matmul %160, %162, %cst_82 {dimension_numbers = #tpu.dot_dimension_numbers<[1], [0], [0], [1], [0, 0, 1, 1], [], []>} : vector<6x256xf32>, vector<256x256xf32>, vector<6x256xf32> -> vector<6x256xf32>
    %164 = arith.addf %159, %163 : vector<6x256xf32>
    %c0_83 = arith.constant 0 : index
    %c0_84 = arith.constant 0 : index
    %165 = vector.load %arg4[%c0_83, %c0_84] : memref<1x256xf32, #tpu.memory_space<vmem>>, vector<1x256xf32>
    %166 = vector.broadcast %165 : vector<1x256xf32> to vector<6x256xf32>
    %167 = arith.addf %164, %166 : vector<6x256xf32>
    %cst_85 = arith.constant 0.000000e+00 : f32
    %168 = vector.broadcast %cst_85 : f32 to vector<2x256xf32>
    %cst_86 = arith.constant 0.000000e+00 : f32
    %169 = vector.broadcast %cst_86 : f32 to vector<6x256xf32>
    %170 = arith.maximumf %167, %169 : vector<6x256xf32>
    %171 = tpu.concatenate %168, %170, %168 in 0 : vector<2x256xf32>, vector<6x256xf32>, vector<2x256xf32> -> vector<10x256xf32>
    %172 = vector.extract_strided_slice %171 {offsets = [0, 0], sizes = [6, 256], strides = [1, 1]} : vector<10x256xf32> to vector<6x256xf32>
    %c0_87 = arith.constant 0 : index
    %c0_88 = arith.constant 0 : index
    %c0_89 = arith.constant 0 : index
    %173 = vector.load %arg3[%c0_87, %c0_88, %c0_89] : memref<3x256x256xf32, #tpu.memory_space<vmem>>, vector<1x256x256xf32>
    %174 = vector.shape_cast %173 : vector<1x256x256xf32> to vector<256x256xf32>
    %cst_90 = arith.constant dense<0.000000e+00> : vector<6x256xf32>
    %175 = tpu.matmul %172, %174, %cst_90 {dimension_numbers = #tpu.dot_dimension_numbers<[1], [0], [0], [1], [0, 0, 1, 1], [], []>} : vector<6x256xf32>, vector<256x256xf32>, vector<6x256xf32> -> vector<6x256xf32>
    %176 = vector.extract_strided_slice %171 {offsets = [2, 0], sizes = [6, 256], strides = [1, 1]} : vector<10x256xf32> to vector<6x256xf32>
    %c1_91 = arith.constant 1 : index
    %c0_92 = arith.constant 0 : index
    %c0_93 = arith.constant 0 : index
    %177 = vector.load %arg3[%c1_91, %c0_92, %c0_93] : memref<3x256x256xf32, #tpu.memory_space<vmem>>, vector<1x256x256xf32>
    %178 = vector.shape_cast %177 : vector<1x256x256xf32> to vector<256x256xf32>
    %cst_94 = arith.constant dense<0.000000e+00> : vector<6x256xf32>
    %179 = tpu.matmul %176, %178, %cst_94 {dimension_numbers = #tpu.dot_dimension_numbers<[1], [0], [0], [1], [0, 0, 1, 1], [], []>} : vector<6x256xf32>, vector<256x256xf32>, vector<6x256xf32> -> vector<6x256xf32>
    %180 = arith.addf %175, %179 : vector<6x256xf32>
    %181 = vector.extract_strided_slice %171 {offsets = [4, 0], sizes = [6, 256], strides = [1, 1]} : vector<10x256xf32> to vector<6x256xf32>
    %c2_95 = arith.constant 2 : index
    %c0_96 = arith.constant 0 : index
    %c0_97 = arith.constant 0 : index
    %182 = vector.load %arg3[%c2_95, %c0_96, %c0_97] : memref<3x256x256xf32, #tpu.memory_space<vmem>>, vector<1x256x256xf32>
    %183 = vector.shape_cast %182 : vector<1x256x256xf32> to vector<256x256xf32>
    %cst_98 = arith.constant dense<0.000000e+00> : vector<6x256xf32>
    %184 = tpu.matmul %181, %183, %cst_98 {dimension_numbers = #tpu.dot_dimension_numbers<[1], [0], [0], [1], [0, 0, 1, 1], [], []>} : vector<6x256xf32>, vector<256x256xf32>, vector<6x256xf32> -> vector<6x256xf32>
    %185 = arith.addf %180, %184 : vector<6x256xf32>
    %c0_99 = arith.constant 0 : index
    %c0_100 = arith.constant 0 : index
    %186 = vector.load %arg4[%c0_99, %c0_100] : memref<1x256xf32, #tpu.memory_space<vmem>>, vector<1x256xf32>
    %187 = vector.broadcast %186 : vector<1x256xf32> to vector<6x256xf32>
    %188 = arith.addf %185, %187 : vector<6x256xf32>
    %189 = arith.addf %188, %146 : vector<6x256xf32>
    %cst_101 = arith.constant 0.000000e+00 : f32
    %190 = vector.broadcast %cst_101 : f32 to vector<2x256xf32>
    %191 = tpu.concatenate %189, %190 in 0 : vector<6x256xf32>, vector<2x256xf32> -> vector<8x256xf32>
    %192 = vector.extract_strided_slice %191 {offsets = [0, 0], sizes = [2, 256], strides = [1, 1]} : vector<8x256xf32> to vector<2x256xf32>
    %193 = vector.extract_strided_slice %191 {offsets = [2, 0], sizes = [2, 256], strides = [1, 1]} : vector<8x256xf32> to vector<2x256xf32>
    %194 = vector.extract_strided_slice %191 {offsets = [4, 0], sizes = [2, 256], strides = [1, 1]} : vector<8x256xf32> to vector<2x256xf32>
    %195 = arith.maximumf %192, %193 : vector<2x256xf32>
    %196 = arith.maximumf %195, %194 : vector<2x256xf32>
    %cst_102 = arith.constant 0.000000e+00 : f32
    %197 = vector.broadcast %cst_102 : f32 to vector<2x256xf32>
    %cst_103 = arith.constant 0.000000e+00 : f32
    %198 = vector.broadcast %cst_103 : f32 to vector<2x256xf32>
    %199 = arith.maximumf %196, %198 : vector<2x256xf32>
    %200 = tpu.concatenate %197, %199, %197 in 0 : vector<2x256xf32>, vector<2x256xf32>, vector<2x256xf32> -> vector<6x256xf32>
    %201 = vector.extract_strided_slice %200 {offsets = [0, 0], sizes = [2, 256], strides = [1, 1]} : vector<6x256xf32> to vector<2x256xf32>
    %c0_104 = arith.constant 0 : index
    %c0_105 = arith.constant 0 : index
    %c0_106 = arith.constant 0 : index
    %202 = vector.load %arg3[%c0_104, %c0_105, %c0_106] : memref<3x256x256xf32, #tpu.memory_space<vmem>>, vector<1x256x256xf32>
    %203 = vector.shape_cast %202 : vector<1x256x256xf32> to vector<256x256xf32>
    %cst_107 = arith.constant dense<0.000000e+00> : vector<2x256xf32>
    %204 = tpu.matmul %201, %203, %cst_107 {dimension_numbers = #tpu.dot_dimension_numbers<[1], [0], [0], [1], [0, 0, 1, 1], [], []>} : vector<2x256xf32>, vector<256x256xf32>, vector<2x256xf32> -> vector<2x256xf32>
    %205 = vector.extract_strided_slice %200 {offsets = [2, 0], sizes = [2, 256], strides = [1, 1]} : vector<6x256xf32> to vector<2x256xf32>
    %c1_108 = arith.constant 1 : index
    %c0_109 = arith.constant 0 : index
    %c0_110 = arith.constant 0 : index
    %206 = vector.load %arg3[%c1_108, %c0_109, %c0_110] : memref<3x256x256xf32, #tpu.memory_space<vmem>>, vector<1x256x256xf32>
    %207 = vector.shape_cast %206 : vector<1x256x256xf32> to vector<256x256xf32>
    %cst_111 = arith.constant dense<0.000000e+00> : vector<2x256xf32>
    %208 = tpu.matmul %205, %207, %cst_111 {dimension_numbers = #tpu.dot_dimension_numbers<[1], [0], [0], [1], [0, 0, 1, 1], [], []>} : vector<2x256xf32>, vector<256x256xf32>, vector<2x256xf32> -> vector<2x256xf32>
    %209 = arith.addf %204, %208 : vector<2x256xf32>
    %210 = vector.extract_strided_slice %200 {offsets = [4, 0], sizes = [2, 256], strides = [1, 1]} : vector<6x256xf32> to vector<2x256xf32>
    %c2_112 = arith.constant 2 : index
    %c0_113 = arith.constant 0 : index
    %c0_114 = arith.constant 0 : index
    %211 = vector.load %arg3[%c2_112, %c0_113, %c0_114] : memref<3x256x256xf32, #tpu.memory_space<vmem>>, vector<1x256x256xf32>
    %212 = vector.shape_cast %211 : vector<1x256x256xf32> to vector<256x256xf32>
    %cst_115 = arith.constant dense<0.000000e+00> : vector<2x256xf32>
    %213 = tpu.matmul %210, %212, %cst_115 {dimension_numbers = #tpu.dot_dimension_numbers<[1], [0], [0], [1], [0, 0, 1, 1], [], []>} : vector<2x256xf32>, vector<256x256xf32>, vector<2x256xf32> -> vector<2x256xf32>
    %214 = arith.addf %209, %213 : vector<2x256xf32>
    %c0_116 = arith.constant 0 : index
    %c0_117 = arith.constant 0 : index
    %215 = vector.load %arg4[%c0_116, %c0_117] : memref<1x256xf32, #tpu.memory_space<vmem>>, vector<1x256xf32>
    %216 = vector.broadcast %215 : vector<1x256xf32> to vector<2x256xf32>
    %217 = arith.addf %214, %216 : vector<2x256xf32>
    %cst_118 = arith.constant 0.000000e+00 : f32
    %218 = vector.broadcast %cst_118 : f32 to vector<2x256xf32>
    %cst_119 = arith.constant 0.000000e+00 : f32
    %219 = vector.broadcast %cst_119 : f32 to vector<2x256xf32>
    %220 = arith.maximumf %217, %219 : vector<2x256xf32>
    %221 = tpu.concatenate %218, %220, %218 in 0 : vector<2x256xf32>, vector<2x256xf32>, vector<2x256xf32> -> vector<6x256xf32>
    %222 = vector.extract_strided_slice %221 {offsets = [0, 0], sizes = [2, 256], strides = [1, 1]} : vector<6x256xf32> to vector<2x256xf32>
    %c0_120 = arith.constant 0 : index
    %c0_121 = arith.constant 0 : index
    %c0_122 = arith.constant 0 : index
    %223 = vector.load %arg3[%c0_120, %c0_121, %c0_122] : memref<3x256x256xf32, #tpu.memory_space<vmem>>, vector<1x256x256xf32>
    %224 = vector.shape_cast %223 : vector<1x256x256xf32> to vector<256x256xf32>
    %cst_123 = arith.constant dense<0.000000e+00> : vector<2x256xf32>
    %225 = tpu.matmul %222, %224, %cst_123 {dimension_numbers = #tpu.dot_dimension_numbers<[1], [0], [0], [1], [0, 0, 1, 1], [], []>} : vector<2x256xf32>, vector<256x256xf32>, vector<2x256xf32> -> vector<2x256xf32>
    %226 = vector.extract_strided_slice %221 {offsets = [2, 0], sizes = [2, 256], strides = [1, 1]} : vector<6x256xf32> to vector<2x256xf32>
    %c1_124 = arith.constant 1 : index
    %c0_125 = arith.constant 0 : index
    %c0_126 = arith.constant 0 : index
    %227 = vector.load %arg3[%c1_124, %c0_125, %c0_126] : memref<3x256x256xf32, #tpu.memory_space<vmem>>, vector<1x256x256xf32>
    %228 = vector.shape_cast %227 : vector<1x256x256xf32> to vector<256x256xf32>
    %cst_127 = arith.constant dense<0.000000e+00> : vector<2x256xf32>
    %229 = tpu.matmul %226, %228, %cst_127 {dimension_numbers = #tpu.dot_dimension_numbers<[1], [0], [0], [1], [0, 0, 1, 1], [], []>} : vector<2x256xf32>, vector<256x256xf32>, vector<2x256xf32> -> vector<2x256xf32>
    %230 = arith.addf %225, %229 : vector<2x256xf32>
    %231 = vector.extract_strided_slice %221 {offsets = [4, 0], sizes = [2, 256], strides = [1, 1]} : vector<6x256xf32> to vector<2x256xf32>
    %c2_128 = arith.constant 2 : index
    %c0_129 = arith.constant 0 : index
    %c0_130 = arith.constant 0 : index
    %232 = vector.load %arg3[%c2_128, %c0_129, %c0_130] : memref<3x256x256xf32, #tpu.memory_space<vmem>>, vector<1x256x256xf32>
    %233 = vector.shape_cast %232 : vector<1x256x256xf32> to vector<256x256xf32>
    %cst_131 = arith.constant dense<0.000000e+00> : vector<2x256xf32>
    %234 = tpu.matmul %231, %233, %cst_131 {dimension_numbers = #tpu.dot_dimension_numbers<[1], [0], [0], [1], [0, 0, 1, 1], [], []>} : vector<2x256xf32>, vector<256x256xf32>, vector<2x256xf32> -> vector<2x256xf32>
    %235 = arith.addf %230, %234 : vector<2x256xf32>
    %c0_132 = arith.constant 0 : index
    %c0_133 = arith.constant 0 : index
    %236 = vector.load %arg4[%c0_132, %c0_133] : memref<1x256xf32, #tpu.memory_space<vmem>>, vector<1x256xf32>
    %237 = vector.broadcast %236 : vector<1x256xf32> to vector<2x256xf32>
    %238 = arith.addf %235, %237 : vector<2x256xf32>
    %239 = arith.addf %238, %196 : vector<2x256xf32>
    %c0_134 = arith.constant 0 : index
    %c0_135 = arith.constant 0 : index
    %240 = vector.load %arg5[%c0_134, %c0_135] : memref<256x5xf32, #tpu.memory_space<vmem>>, vector<256x5xf32>
    %cst_136 = arith.constant dense<0.000000e+00> : vector<2x5xf32>
    %241 = tpu.matmul %239, %240, %cst_136 {dimension_numbers = #tpu.dot_dimension_numbers<[1], [0], [0], [1], [0, 0, 1, 1], [], []>} : vector<2x256xf32>, vector<256x5xf32>, vector<2x5xf32> -> vector<2x5xf32>
    %c0_137 = arith.constant 0 : index
    %c0_138 = arith.constant 0 : index
    %242 = vector.load %arg6[%c0_137, %c0_138] : memref<1x5xf32, #tpu.memory_space<vmem>>, vector<1x5xf32>
    %243 = vector.broadcast %242 : vector<1x5xf32> to vector<2x5xf32>
    %244 = arith.addf %241, %243 : vector<2x5xf32>
    %c0_139 = arith.constant 0 : index
    %c0_140 = arith.constant 0 : index
    %245 = vector.load %arg7[%c0_139, %c0_140] : memref<2x5xf32, #tpu.memory_space<vmem>>, vector<2x5xf32>
    tpu.vector_store %arg7[%c0_139, %c0_140], %244 {strides = array<i32>} : memref<2x5xf32, #tpu.memory_space<vmem>>, vector<2x5xf32>,
    return
  }
}

</mosaic_0001>

<bundles_post_ra>
// kernel: dpcnn_forward.1
= control target key start
LH: loop header
LB: loop body
LE: loop exit
PB: predicated region body
PF: predicated region fallthrough
CT: control target
= control target key end

     0   :  { %12 = vsyncpa [#allocation3], 0  ;;  %s6787_s0 = inlined_call_operand.vmem [shape: f32[28,128], index: 0, kind: input, shape index: {}]   ;;  %s6788_s1 = inlined_call_operand.vmem [shape: f32[128,256], index: 1, kind: input, shape index: {}]   ;;  %s6789_s2 = inlined_call_operand.vmem [shape: f32[1,256], index: 2, kind: input, shape index: {}]   ;;  %s6790_s3 = inlined_call_operand.hbm [shape: f32[3,256,256], index: 3, kind: input, shape index: {}]   ;;  %s6791_s4 = inlined_call_operand.vmem [shape: f32[1,256], index: 4, kind: input, shape index: {}]   ;;  %s6792_s5 = inlined_call_operand.vmem [shape: f32[256,5], index: 5, kind: input, shape index: {}]   ;;  %s6793_s6 = inlined_call_operand.vmem [shape: f32[1,5], index: 6, kind: input, shape index: {}]   ;;  %s6794_s7 = inlined_call_operand.hbm [shape: f32[2,5], index: 7, kind: output, shape index: {}]  }
   0x1   :  { %13 = vsyncpa [#allocation4], 0  ;;  %s3652_s24 = smov [#allocation2]  }
   0x2   :  { %s25_s25 = sshll.u32 %s3652_s24, 4  ;;  %s26_s25 = int_to_ptr.vmem [resolvable:$true] %s25_s25 }
   0x3   :  { %s3616_s26 = scalar_lea.vmem %s26_s25, 24576  ;;  %p3621_p1 = scmp.lt.s32.totalorder %s26_s25, %s26_s25 }
   0x4   :  { %p3617_p0 = scmp.ne.s32.totalorder %s26_s25, %s3616_s26  ;;  %p3622_p2 = scmp.lt.s32.totalorder %s3616_s26, %s3616_s26 }
   0x6   :  { %p3623_p3 = por %p3622_p2, %p3621_p1 }
   0x8   :  { %p3624_p4 = pnand %p3623_p3, %p3617_p0 }
   0xa   :  { %3627 = shalt.err (!%p3624_p4)
}
   0xb   :  { %s3653_s27 = smov 256   ;;  %s3654_s28 = smov 16  }
   0xc   :  { %31 = dma.hbm_to_vmem [thread:$0]  %s6790_s3, 24576, %s26_s25, [#allocation3], %s3653_s27, %s3653_s27, %s3654_s28  }
   0xd   :  { %3648 = dma.done.wait [#allocation3], 24576  }
   0xe   :  { %3649 = vsyncadd [#allocation3], 4294942720  ;;  %v6795_v0 = vmov 0.0   ;;  %v76_v1 = vld [vmem:[%s6788_s1 + $0xf8] sm:$0xff]  ;;  %v75_v2 = vld [vmem:[%s6788_s1 + $0xf0] sm:$0xff]  ;;  %vm194_vm0 = vcmask 1041408  }
   0xf   :  { %153 = vmatprep.mubr.f32.mxu0 %v6795_v0  ;;  %v74_v3 = vld [vmem:[%s6788_s1 + $0xe8] sm:$0xff]  ;;  %89 = vmatprep.subr.mxu0 %v76_v1  ;;  %v73_v4 = vld [vmem:[%s6788_s1 + $0xe0] sm:$0xff]  ;;  %v72_v5 = vld [vmem:[%s6788_s1 + $0xd8] sm:$0xff]  ;;  %vm620_vm2 = vcmask 1043456   ;;  %vm219_vm3 = vcmask 1045504   ;;  %s3656_s16 = smov [#allocation5]  }
  0x10   :  { %90 = vmatpush1.msra.mxu0 %v75_v2  ;;  %v71_v6 = vld [vmem:[%s6788_s1 + $0xd0] sm:$0xff]  ;;  %v70_v7 = vld [vmem:[%s6788_s1 + $0xc8] sm:$0xff]  ;;  %v69_v8 = vld [vmem:[%s6788_s1 + $0xc0] sm:$0xff]  ;;  %s2950_s17 = sshll.u32 %s3656_s16, 4  ;;  %vm2942_vm4 = vcmask 33792   ;;  %s2951_s17 = int_to_ptr.vmem [resolvable:$true] %s2950_s17 }
  0x11   :  { %91 = vmatprep.subr.mxu0 %v74_v3  ;;  %v68_v9 = vld [vmem:[%s6788_s1 + $0xb8] sm:$0xff]  ;;  %v67_v10 = vld [vmem:[%s6788_s1 + $0xb0] sm:$0xff]  ;;  %v66_v11 = vld [vmem:[%s6788_s1 + $0xa8] sm:$0xff]  ;;  %s3628_s18 = scalar_lea.vmem %s2951_s17, 32  ;;  %p3633_p6 = scmp.lt.s32.totalorder %s2951_s17, %s2951_s17 }
  0x12   :  { %92 = vmatpush1.msra.mxu0 %v73_v4  ;;  %v65_v12 = vld [vmem:[%s6788_s1 + $0xa0] sm:$0xff]  ;;  %v64_v13 = vld [vmem:[%s6788_s1 + $0x98] sm:$0xff]  ;;  %v63_v14 = vld [vmem:[%s6788_s1 + $0x90] sm:$0xff]  ;;  %p3629_p5 = scmp.ne.s32.totalorder %s2951_s17, %s3628_s18  ;;  %p3634_p7 = scmp.lt.s32.totalorder %s3628_s18, %s3628_s18 }
  0x13   :  { %93 = vmatprep.subr.mxu0 %v72_v5  ;;  %v62_v15 = vld [vmem:[%s6788_s1 + $0x88] sm:$0xff]  ;;  %v61_v16 = vld [vmem:[%s6788_s1 + $0x80] sm:$0xff]  ;;  %v60_v17 = vld [vmem:[%s6788_s1 + $0x78] sm:$0xff] }
  0x14   :  { %94 = vmatpush1.msra.mxu0 %v71_v6  ;;  %v3752_v18 = vld [vmem:[#allocation2 + $0x2f8] sm:$0xff]  ;;  %v59_v19 = vld [vmem:[%s6788_s1 + $0x70] sm:$0xff]  ;;  %v3760_v21 = vld [vmem:[#allocation2 + $0x2e8] sm:$0xff]  ;;  %p3635_p8 = por %p3634_p7, %p3633_p6 }
  0x15   :  { %95 = vmatprep.subr.mxu0 %v70_v7  ;;  %377 = vmatprep.subr.mxu1 %v3752_v18  ;;  %v3758_v20 = vld [vmem:[#allocation2 + $0x2f0] sm:$0xff]  ;;  %v58_v22 = vld [vmem:[%s6788_s1 + $0x68] sm:$0xff]  ;;  %v3766_v23 = vld [vmem:[#allocation2 + $0x2e0] sm:$0xff] }
  0x16   :  { %96 = vmatpush1.msra.mxu0 %v69_v8  ;;  %378 = vmatpush1.msra.mxu1 %v3758_v20  ;;  %v57_v24 = vld [vmem:[%s6788_s1 + $0x60] sm:$0xff]  ;;  %v3772_v25 = vld [vmem:[#allocation2 + $0x2d8] sm:$0xff]  ;;  %v3774_v26 = vld [vmem:[#allocation2 + $0x2d0] sm:$0xff]  ;;  %p3636_p9 = pnand %p3635_p8, %p3629_p5 }
  0x17   :  { %97 = vmatprep.subr.mxu0 %v68_v9  ;;  %379 = vmatprep.subr.mxu1 %v3760_v21  ;;  %v56_v27 = vld [vmem:[%s6788_s1 + $0x58] sm:$0xff]  ;;  %v3780_v28 = vld [vmem:[#allocation2 + $0x2c8] sm:$0xff]  ;;  %v55_v29 = vld [vmem:[%s6788_s1 + $0x50] sm:$0xff] }
  0x18   :  { %98 = vmatpush1.msra.mxu0 %v67_v10  ;;  %380 = vmatpush1.msra.mxu1 %v3766_v23  ;;  %v3786_v30 = vld [vmem:[#allocation2 + $0x2c0] sm:$0xff]  ;;  %v54_v31 = vld [vmem:[%s6788_s1 + $0x48] sm:$0xff]  ;;  %v3792_v32 = vld [vmem:[#allocation2 + $0x2b8] sm:$0xff] }
  0x19   :  { %99 = vmatprep.subr.mxu0 %v66_v11  ;;  %381 = vmatprep.subr.mxu1 %v3772_v25  ;;  %v53_v33 = vld [vmem:[%s6788_s1 + $0x40] sm:$0xff]  ;;  %v3798_v34 = vld [vmem:[#allocation2 + $0x2b0] sm:$0xff]  ;;  %v52_v35 = vld [vmem:[%s6788_s1 + $0x38] sm:$0xff] }
  0x1a   :  { %100 = vmatpush1.msra.mxu0 %v65_v12  ;;  %382 = vmatpush1.msra.mxu1 %v3774_v26  ;;  %v3804_v36 = vld [vmem:[#allocation2 + $0x2a8] sm:$0xff]  ;;  %v51_v37 = vld [vmem:[%s6788_s1 + $0x30] sm:$0xff]  ;;  %v3810_v38 = vld [vmem:[#allocation2 + $0x2a0] sm:$0xff] }
  0x1b   :  { %101 = vmatprep.subr.mxu0 %v64_v13  ;;  %383 = vmatprep.subr.mxu1 %v3780_v28  ;;  %v50_v39 = vld [vmem:[%s6788_s1 + $0x28] sm:$0xff]  ;;  %v3816_v40 = vld [vmem:[#allocation2 + $0x298] sm:$0xff]  ;;  %v49_v41 = vld [vmem:[%s6788_s1 + $0x20] sm:$0xff] }
  0x1c   :  { %102 = vmatpush1.msra.mxu0 %v63_v14  ;;  %384 = vmatpush1.msra.mxu1 %v3786_v30  ;;  %v3822_v42 = vld [vmem:[#allocation2 + $0x290] sm:$0xff]  ;;  %v48_v43 = vld [vmem:[%s6788_s1 + $0x18] sm:$0xff]  ;;  %v3828_v44 = vld [vmem:[#allocation2 + $0x288] sm:$0xff] }
  0x1d   :  { %103 = vmatprep.subr.mxu0 %v62_v15  ;;  %385 = vmatprep.subr.mxu1 %v3792_v32  ;;  %v47_v45 = vld [vmem:[%s6788_s1 + $0x10] sm:$0xff]  ;;  %v3834_v46 = vld [vmem:[#allocation2 + $0x280] sm:$0xff]  ;;  %v46_v47 = vld [vmem:[%s6788_s1 + $0x8] sm:$0xff] }
  0x1e   :  { %104 = vmatpush1.msra.mxu0 %v61_v16  ;;  %386 = vmatpush1.msra.mxu1 %v3798_v34  ;;  %v3840_v48 = vld [vmem:[#allocation2 + $0x278] sm:$0xff]  ;;  %v45_v49 = vld [vmem:[%s6788_s1] sm:$0xff]  ;;  %v3846_v50 = vld [vmem:[#allocation2 + $0x270] sm:$0xff] }
  0x1f   :  { %105 = vmatprep.subr.mxu0 %v60_v17  ;;  %387 = vmatprep.subr.mxu1 %v3804_v36  ;;  %v41_v51 = vld [vmem:[%s6787_s0] sm:$0xff]  ;;  %v253_v52 = vld [vmem:[#allocation2 + $0xf8] sm:$0xff]  ;;  %v252_v53 = vld [vmem:[#allocation2 + $0xf0] sm:$0xff] }
  0x20   :  { %106 = vmatpush1.msra.mxu0 %v59_v19  ;;  %388 = vmatpush1.msra.mxu1 %v3810_v38  ;;  %v251_v54 = vld [vmem:[#allocation2 + $0xe8] sm:$0xff]  ;;  %v250_v56 = vld [vmem:[#allocation2 + $0xe0] sm:$0xff]  ;;  %v249_v59 = vld [vmem:[#allocation2 + $0xd8] sm:$0xff] }
  0x21   :  { %107 = vmatprep.subr.mxu0 %v58_v22  ;;  %389 = vmatprep.subr.mxu1 %v3816_v40  ;;  %v3854_v55 = vld [vmem:[#allocation2 + $0x268] sm:$0xff]  ;;  %v3856_v57 = vld [vmem:[#allocation2 + $0x260] sm:$0xff]  ;;  %v248_v60 = vld [vmem:[#allocation2 + $0xd0] sm:$0xff] }
  0x22   :  { %108 = vmatpush1.msra.mxu0 %v57_v24  ;;  %390 = vmatpush1.msra.mxu1 %v3822_v42  ;;  %v42_v58 = vld [vmem:[%s6787_s0 + $0x8] sm:$0xff]  ;;  %v3866_v62 = vld [vmem:[#allocation2 + $0x258] sm:$0xff]  ;;  %v3868_v63 = vld [vmem:[#allocation2 + $0xc0] sm:$0xff] }
  0x23   :  { %109 = vmatprep.subr.mxu0 %v56_v27  ;;  %391 = vmatprep.subr.mxu1 %v3828_v44  ;;  %v3863_v61 = vld [vmem:[#allocation2 + $0xc8] sm:$0xff]  ;;  %7353 = vst [vmem:[#allocation9_spill] sm:$0xff] %v3868_v63  ;;  %v3870_v1 = vld [vmem:[#allocation2 + $0x250] sm:$0xff]  ;;  %v3876_v3 = vld [vmem:[#allocation2 + $0xb8] sm:$0xff] }
  0x24   :  { %110 = vmatpush1.msra.mxu0 %v55_v29  ;;  %392 = vmatpush1.msra.mxu1 %v3834_v46  ;;  %7352 = vst [vmem:[#allocation8_spill] sm:$0xff] %v3863_v61  ;;  %v43_v2 = vld [vmem:[%s6787_s0 + $0x10] sm:$0xff]  ;;  %7354 = vst [vmem:[#allocation10_spill] sm:$0xff] %v3876_v3  ;;  %v3883_v5 = vld [vmem:[#allocation2 + $0xa8] sm:$0xff] }
  0x25   :  { %111 = vmatprep.subr.mxu0 %v54_v31  ;;  %393 = vmatprep.subr.mxu1 %v3840_v48  ;;  %v3879_v4 = vld [vmem:[#allocation2 + $0xb0] sm:$0xff]  ;;  %7356 = vst [vmem:[#allocation12_spill] sm:$0xff] %v3883_v5  ;;  %v3886_v6 = vld [vmem:[#allocation2 + $0x248] sm:$0xff]  ;;  %v3889_v7 = vld [vmem:[#allocation2 + $0xa0] sm:$0xff] }
  0x26   :  { %112 = vmatpush1.msra.mxu0 %v53_v33  ;;  %394 = vmatpush1.msra.mxu1 %v3846_v50  ;;  %7355 = vst [vmem:[#allocation11_spill] sm:$0xff] %v3879_v4  ;;  %7357 = vst [vmem:[#allocation13_spill] sm:$0xff] %v3889_v7  ;;  %v3891_v8 = vld [vmem:[#allocation2 + $0x240] sm:$0xff]  ;;  %v44_v9 = vld [vmem:[%s6787_s0 + $0x18] sm:$0xf] }
  0x27   :  { %113 = vmatprep.subr.mxu0 %v52_v35  ;;  %395 = vmatprep.subr.mxu1 %v3854_v55  ;;  %v3898_v10 = vld [vmem:[#allocation2 + $0x98] sm:$0xff]  ;;  %v3901_v11 = vld [vmem:[#allocation2 + $0x90] sm:$0xff]  ;;  %v3907_v13 = vld [vmem:[#allocation2 + $0x88] sm:$0xff] }
  0x28   :  { %114 = vmatpush1.msra.mxu0 %v51_v37  ;;  %396 = vmatpush1.msra.mxu1 %v3856_v57  ;;  %7358 = vst [vmem:[#allocation14_spill] sm:$0xff] %v3898_v10  ;;  %7359 = vst [vmem:[#allocation15_spill] sm:$0xff] %v3901_v11  ;;  %v3904_v12 = vld [vmem:[#allocation2 + $0x238] sm:$0xff]  ;;  %v3910_v14 = vld [vmem:[#allocation2 + $0x230] sm:$0xff] }
  0x29   :  { %115 = vmatprep.subr.mxu0 %v50_v39  ;;  %397 = vmatprep.subr.mxu1 %v3866_v62  ;;  %7360 = vst [vmem:[#allocation16_spill] sm:$0xff] %v3907_v13  ;;  %v3913_v15 = vld [vmem:[#allocation2 + $0x80] sm:$0xff]  ;;  %v3915_v16 = vld [vmem:[#allocation2 + $0x228] sm:$0xff]  ;;  %v3918_v17 = vld [vmem:[#allocation2 + $0x78] sm:$0xff] }
  0x2a   :  { %116 = vmatpush1.msra.mxu0 %v49_v41  ;;  %398 = vmatpush1.msra.mxu1 %v3870_v1  ;;  %7361 = vst [vmem:[#allocation17_spill] sm:$0xff] %v3913_v15  ;;  %7362 = vst [vmem:[#allocation18_spill] sm:$0xff] %v3918_v17  ;;  %v3921_v19 = vld [vmem:[#allocation2 + $0x220] sm:$0xff]  ;;  %v3924_v22 = vld [vmem:[#allocation2 + $0x70] sm:$0xff] }
  0x2b   :  { %117 = vmatprep.subr.mxu0 %v48_v43  ;;  %399 = vmatprep.subr.mxu1 %v3886_v6  ;;  %7363 = vst [vmem:[#allocation19_spill] sm:$0xff] %v3924_v22  ;;  %v3927_v24 = vld [vmem:[#allocation2 + $0x218] sm:$0xff]  ;;  %v3930_v27 = vld [vmem:[#allocation2 + $0x68] sm:$0xff]  ;;  %v3933_v29 = vld [vmem:[#allocation2 + $0x210] sm:$0xff] }
  0x2c   :  { %118 = vmatpush1.msra.mxu0 %v47_v45  ;;  %400 = vmatpush1.msra.mxu1 %v3891_v8  ;;  %7364 = vst [vmem:[#allocation20_spill] sm:$0xff] %v3930_v27  ;;  %v3936_v31 = vld [vmem:[#allocation2 + $0x60] sm:$0xff]  ;;  %v3939_v33 = vld [vmem:[#allocation2 + $0x208] sm:$0xff]  ;;  %v3942_v35 = vld [vmem:[#allocation2 + $0x58] sm:$0xff] }
  0x2d   :  { %119 = vmatprep.subr.mxu0 %v46_v47  ;;  %401 = vmatprep.subr.mxu1 %v3904_v12  ;;  %7365 = vst [vmem:[#allocation21_spill] sm:$0xff] %v3936_v31  ;;  %7366 = vst [vmem:[#allocation22_spill] sm:$0xff] %v3942_v35  ;;  %v3945_v37 = vld [vmem:[#allocation2 + $0x200] sm:$0xff]  ;;  %v3948_v39 = vld [vmem:[#allocation2 + $0x50] sm:$0xff] }
  0x2e   :  { %120 = vmatpush1.msra.mxu0 %v45_v49  ;;  %402 = vmatpush1.msra.mxu1 %v3910_v14  ;;  %7367 = vst [vmem:[#allocation23_spill] sm:$0xff] %v3948_v39  ;;  %v3951_v41 = vld [vmem:[#allocation2 + $0x3f8] sm:$0xff]  ;;  %v3954_v43 = vld [vmem:[#allocation2 + $0x48] sm:$0xff]  ;;  %v3957_v45 = vld [vmem:[#allocation2 + $0x3f0] sm:$0xff] }
  0x2f   :  { %154 = vmatmul.mubr.f32.vlgmr.msra.gmra.mxu0 %v41_v51  ;;  %466 = vmatprep.subr.mxu0 %v253_v52  ;;  %7368 = vst [vmem:[#allocation24_spill] sm:$0xff] %v3954_v43  ;;  %v3960_v47 = vld [vmem:[#allocation2 + $0x40] sm:$0xff]  ;;  %v3963_v49 = vld [vmem:[#allocation2 + $0x3e8] sm:$0xff]  ;;  %v3966_v51 = vld [vmem:[#allocation2 + $0x38] sm:$0xff] }
  0x30   :  { %159 = vmatprep.mubr.f32.mxu0 %v6795_v0  ;;  %467 = vmatpush1.msra.mxu0 %v252_v53  ;;  %7369 = vst [vmem:[#allocation25_spill] sm:$0xff] %v3960_v47  ;;  %7370 = vst [vmem:[#allocation26_spill] sm:$0xff] %v3966_v51  ;;  %v3969_v52 = vld [vmem:[#allocation2 + $0x3e0] sm:$0xff]  ;;  %v3972_v53 = vld [vmem:[#allocation2 + $0x30] sm:$0xff] }
  0x31   :  { %468 = vmatprep.subr.mxu0 %v251_v54  ;;  %403 = vmatprep.subr.mxu1 %v3915_v16  ;;  %7371 = vst [vmem:[#allocation27_spill] sm:$0xff] %v3972_v53  ;;  %v3975_v54 = vld [vmem:[#allocation2 + $0x3d8] sm:$0xff]  ;;  %vm4194_vm1 = vmneg %vm194_vm0 }
  0x32   :  { %469 = vmatpush1.msra.mxu0 %v250_v56  ;;  %404 = vmatpush1.msra.mxu1 %v3921_v19  ;;  %v3978_v56 = vld [vmem:[#allocation2 + $0x28] sm:$0xff] }
  0x33   :  { %160 = vmatmul.mubr.f32.gmra.mxu0 %v42_v58  ;;  %470 = vmatprep.subr.mxu0 %v249_v59  ;;  %7372 = vst [vmem:[#allocation28_spill] sm:$0xff] %v3978_v56  ;;  %v3981_v58 = vld [vmem:[#allocation2 + $0x3d0] sm:$0xff]  ;;  %v3984_v59 = vld [vmem:[#allocation2 + $0x20] sm:$0xff] }
  0x34   :  { %165 = vmatprep.mubr.f32.mxu0 %v6795_v0  ;;  %471 = vmatpush1.msra.mxu0 %v248_v60  ;;  %7373 = vst [vmem:[#allocation29_spill] sm:$0xff] %v3984_v59  ;;  %v3987_v60 = vld [vmem:[#allocation2 + $0x3c8] sm:$0xff] }
  0x35   :  { %472 = vmatprep.subr.mxu0 %v3863_v61  ;;  %405 = vmatprep.subr.mxu1 %v3927_v24  ;;  %v4176_v61 = vld [vmem:[#allocation2 + $0x300] sm:$0xff] }
  0x36   :  { %473 = vmatpush1.msra.mxu0 %v3868_v63  ;;  %406 = vmatpush1.msra.mxu1 %v3933_v29  ;;  %v4170_v63 = vld [vmem:[#allocation2 + $0x310] sm:$0xff]  ;;  %7430 = vst [vmem:[#allocation86_spill] sm:$0xff] %v4176_v61 }
  0x37   :  { %166 = vmatmul.mubr.f32.gmra.mxu0 %v43_v2  ;;  %474 = vmatprep.subr.mxu0 %v3876_v3  ;;  %v3990_v2 = vld [vmem:[#allocation2 + $0x18] sm:$0xff]  ;;  %v4164_v3 = vld [vmem:[#allocation2 + $0x320] sm:$0xff]  ;;  %7428 = vst [vmem:[#allocation84_spill] sm:$0xff] %v4170_v63 }
  0x38   :  { %171 = vmatprep.mubr.f32.mxu0 %v6795_v0  ;;  %475 = vmatpush1.msra.mxu0 %v3879_v4  ;;  %7374 = vst [vmem:[#allocation30_spill] sm:$0xff] %v3990_v2  ;;  %v3996_v0 = vld [vmem:[#allocation2 + $0x10] sm:$0xff]  ;;  %v4153_v4 = vld [vmem:[#allocation2 + $0x100] sm:$0xff]  ;;  %7426 = vst [vmem:[#allocation82_spill] sm:$0xff] %v4164_v3 }
  0x39   :  { %476 = vmatprep.subr.mxu0 %v3883_v5  ;;  %407 = vmatprep.subr.mxu1 %v3939_v33  ;;  %7375 = vst [vmem:[#allocation31_spill] sm:$0xff] %v3996_v0  ;;  %v4147_v5 = vld [vmem:[#allocation2 + $0x108] sm:$0xff]  ;;  %7423 = vst [vmem:[#allocation79_spill] sm:$0xff] %v4153_v4 }
  0x3a   :  { %477 = vmatpush1.msra.mxu0 %v3889_v7  ;;  %408 = vmatpush1.msra.mxu1 %v3945_v37  ;;  %v4141_v7 = vld [vmem:[#allocation2 + $0x110] sm:$0xff]  ;;  %7421 = vst [vmem:[#allocation77_spill] sm:$0xff] %v4147_v5 }
  0x3b   :  { %172 = vmatmul.mubr.f32.gmra.mxu0 %v44_v9  ;;  %478 = vmatprep.subr.mxu0 %v3898_v10  ;;  %v3993_v9 = vld [vmem:[#allocation2 + $0x3c0] sm:$0xff]  ;;  %v4135_v10 = vld [vmem:[#allocation2 + $0x118] sm:$0xff]  ;;  %7419 = vst [vmem:[#allocation75_spill] sm:$0xff] %v4141_v7 }
  0x3c   :  { %479 = vmatpush1.msra.mxu0 %v3901_v11  ;;  %409 = vmatprep.subr.mxu1 %v3951_v41  ;;  %v4129_v11 = vld [vmem:[#allocation2 + $0x120] sm:$0xff]  ;;  %7417 = vst [vmem:[#allocation73_spill] sm:$0xff] %v4135_v10 }
  0x3d   :  { %480 = vmatprep.subr.mxu0 %v3907_v13  ;;  %410 = vmatpush2.msra.mxu1 %v3957_v45  ;;  %v4123_v13 = vld [vmem:[#allocation2 + $0x128] sm:$0xff]  ;;  %7415 = vst [vmem:[#allocation71_spill] sm:$0xff] %v4129_v11 }
  0x3e   :  { %481 = vmatpush1.msra.mxu0 %v3913_v15  ;;  %411 = vmatprep.subr.mxu1 %v3963_v49  ;;  %v4059_v15 = vld [vmem:[#allocation2 + $0x1a8] sm:$0xff]  ;;  %7413 = vst [vmem:[#allocation69_spill] sm:$0xff] %v4123_v13 }
  0x3f   :  { %482 = vmatprep.subr.mxu0 %v3918_v17  ;;  %412 = vmatpush2.msra.mxu1 %v3969_v52  ;;  %v4050_v17 = vld [vmem:[#allocation2 + $0x1c0] sm:$0xff]  ;;  %7392 = vst [vmem:[#allocation48_spill] sm:$0xff] %v4059_v15 }
  0x40   :  { %483 = vmatpush1.msra.mxu0 %v3924_v22  ;;  %413 = vmatprep.subr.mxu1 %v3975_v54  ;;  %v4038_v22 = vld [vmem:[#allocation2 + $0x1d8] sm:$0xff]  ;;  %7389 = vst [vmem:[#allocation45_spill] sm:$0xff] %v4050_v17 }
  0x41   :  { %484 = vmatprep.subr.mxu0 %v3930_v27  ;;  %414 = vmatpush2.msra.mxu1 %v3981_v58  ;;  %v4032_v27 = vld [vmem:[#allocation2 + $0x1e0] sm:$0xff]  ;;  %7386 = vst [vmem:[#allocation42_spill] sm:$0xff] %v4038_v22 }
  0x42   :  { %485 = vmatpush1.msra.mxu0 %v3936_v31  ;;  %415 = vmatprep.subr.mxu1 %v3987_v60  ;;  %v4026_v31 = vld [vmem:[#allocation2 + $0x1e8] sm:$0xff]  ;;  %7384 = vst [vmem:[#allocation40_spill] sm:$0xff] %v4032_v27 }
  0x43   :  { %486 = vmatprep.subr.mxu0 %v3942_v35  ;;  %416 = vmatpush2.msra.mxu1 %v3993_v9  ;;  %v4020_v35 = vld [vmem:[#allocation2 + $0x1f0] sm:$0xff]  ;;  %7382 = vst [vmem:[#allocation38_spill] sm:$0xff] %v4026_v31 }
  0x44   :  { %487 = vmatpush1.msra.mxu0 %v3948_v39  ;;  %v4014_v39 = vld [vmem:[#allocation2 + $0x1f8] sm:$0xff]  ;;  %7380 = vst [vmem:[#allocation36_spill] sm:$0xff] %v4020_v35 }
  0x45   :  { %488 = vmatprep.subr.mxu0 %v3954_v43  ;;  %v4008_v43 = vld [vmem:[#allocation2] sm:$0xff]  ;;  %7378 = vst [vmem:[#allocation34_spill] sm:$0xff] %v4014_v39 }
  0x46   :  { %489 = vmatpush1.msra.mxu0 %v3960_v47  ;;  %v4002_v47 = vld [vmem:[#allocation2 + $0x8] sm:$0xff]  ;;  %7377 = vst [vmem:[#allocation33_spill] sm:$0xff] %v4008_v43 }
  0x47   :  { %490 = vmatprep.subr.mxu0 %v3966_v51  ;;  %v3999_v51 = vld [vmem:[#allocation2 + $0x3b8] sm:$0xff]  ;;  %7376 = vst [vmem:[#allocation32_spill] sm:$0xff] %v4002_v47 }
  0x48   :  { %491 = vmatpush1.msra.mxu0 %v3972_v53  ;;  %v4005_v53 = vld [vmem:[#allocation2 + $0x3b0] sm:$0xff]  ;;  %417 = vmatprep.subr.mxu1 %v3999_v51 }
  0x49   :  { %492 = vmatprep.subr.mxu0 %v3978_v56  ;;  %v4011_v56 = vld [vmem:[#allocation2 + $0x3a8] sm:$0xff]  ;;  %418 = vmatpush2.msra.mxu1 %v4005_v53 }
  0x4a   :  { %493 = vmatpush1.msra.mxu0 %v3984_v59  ;;  %v4017_v59 = vld [vmem:[#allocation2 + $0x3a0] sm:$0xff]  ;;  %419 = vmatprep.subr.mxu1 %v4011_v56 }
  0x4b   :  { %494 = vmatprep.subr.mxu0 %v3990_v2  ;;  %7379 = vst [vmem:[#allocation35_spill] sm:$0xff] %v4017_v59  ;;  %v4023_v2 = vld [vmem:[#allocation2 + $0x398] sm:$0xff]  ;;  %420 = vmatpush2.msra.mxu1 %v4017_v59 }
  0x4c   :  { %495 = vmatpush1.msra.mxu0 %v3996_v0  ;;  %7381 = vst [vmem:[#allocation37_spill] sm:$0xff] %v4023_v2  ;;  %v4029_v0 = vld [vmem:[#allocation2 + $0x390] sm:$0xff]  ;;  %421 = vmatprep.subr.mxu1 %v4023_v2 }
  0x4d   :  { %496 = vmatprep.subr.mxu0 %v4002_v47  ;;  %7383 = vst [vmem:[#allocation39_spill] sm:$0xff] %v4029_v0  ;;  %v4035_v47 = vld [vmem:[#allocation2 + $0x388] sm:$0xff]  ;;  %422 = vmatpush2.msra.mxu1 %v4029_v0 }
  0x4e   :  { %497 = vmatpush1.msra.mxu0 %v4008_v43  ;;  %7385 = vst [vmem:[#allocation41_spill] sm:$0xff] %v4035_v47  ;;  %v4042_v43 = vld [vmem:[#allocation2 + $0x1d0] sm:$0xff]  ;;  %423 = vmatprep.subr.mxu1 %v4035_v47 }
  0x4f   :  { %498 = vmatprep.subr.mxu0 %v4014_v39  ;;  %7387 = vst [vmem:[#allocation43_spill] sm:$0xff] %v4042_v43  ;;  %v4046_v39 = vld [vmem:[#allocation2 + $0x1c8] sm:$0xff] }
  0x50   :  { %499 = vmatpush2.msra.mxu0 %v4020_v35  ;;  %7388 = vst [vmem:[#allocation44_spill] sm:$0xff] %v4046_v39  ;;  %v4053_v35 = vld [vmem:[#allocation2 + $0x1b8] sm:$0xff] }
  0x51   :  { %500 = vmatprep.subr.mxu0 %v4026_v31  ;;  %7390 = vst [vmem:[#allocation46_spill] sm:$0xff] %v4053_v35  ;;  %v4056_v31 = vld [vmem:[#allocation2 + $0x1b0] sm:$0xff] }
  0x52   :  { %501 = vmatpush2.msra.mxu0 %v4032_v27  ;;  %7391 = vst [vmem:[#allocation47_spill] sm:$0xff] %v4056_v31  ;;  %v4062_v27 = vld [vmem:[#allocation2 + $0x1a0] sm:$0xff] }
  0x53   :  { %502 = vmatprep.subr.mxu0 %v4038_v22  ;;  %7393 = vst [vmem:[#allocation49_spill] sm:$0xff] %v4062_v27  ;;  %v4065_v22 = vld [vmem:[#allocation2 + $0x198] sm:$0xff] }
  0x54   :  { %503 = vmatpush2.msra.mxu0 %v4042_v43  ;;  %7394 = vst [vmem:[#allocation50_spill] sm:$0xff] %v4065_v22  ;;  %v4068_v43 = vld [vmem:[#allocation2 + $0x190] sm:$0xff] }
  0x55   :  { %504 = vmatprep.subr.mxu0 %v4046_v39  ;;  %7395 = vst [vmem:[#allocation51_spill] sm:$0xff] %v4068_v43  ;;  %v4071_v39 = vld [vmem:[#allocation2 + $0x188] sm:$0xff] }
  0x56   :  { %505 = vmatpush2.msra.mxu0 %v4050_v17  ;;  %7396 = vst [vmem:[#allocation52_spill] sm:$0xff] %v4071_v39  ;;  %v4074_v17 = vld [vmem:[#allocation2 + $0x180] sm:$0xff] }
  0x57   :  { %506 = vmatprep.subr.mxu0 %v4053_v35  ;;  %7397 = vst [vmem:[#allocation53_spill] sm:$0xff] %v4074_v17  ;;  %v4077_v35 = vld [vmem:[#allocation2 + $0x178] sm:$0xff] }
  0x58   :  { %507 = vmatpush2.msra.mxu0 %v4056_v31  ;;  %7398 = vst [vmem:[#allocation54_spill] sm:$0xff] %v4077_v35  ;;  %v4080_v31 = vld [vmem:[#allocation2 + $0x170] sm:$0xff] }
  0x59   :  { %508 = vmatprep.subr.mxu0 %v4059_v15  ;;  %7399 = vst [vmem:[#allocation55_spill] sm:$0xff] %v4080_v31  ;;  %v4083_v15 = vld [vmem:[#allocation2 + $0x168] sm:$0xff] }
  0x5a   :  { %509 = vmatpush2.msra.mxu0 %v4062_v27  ;;  %7400 = vst [vmem:[#allocation56_spill] sm:$0xff] %v4083_v15  ;;  %v4086_v27 = vld [vmem:[#allocation2 + $0x160] sm:$0xff] }
  0x5b   :  { %510 = vmatprep.subr.mxu0 %v4065_v22  ;;  %7401 = vst [vmem:[#allocation57_spill] sm:$0xff] %v4086_v27  ;;  %v4089_v22 = vld [vmem:[#allocation2 + $0x158] sm:$0xff] }
  0x5c   :  { %511 = vmatpush2.msra.mxu0 %v4068_v43  ;;  %7402 = vst [vmem:[#allocation58_spill] sm:$0xff] %v4089_v22  ;;  %v4092_v43 = vld [vmem:[#allocation2 + $0x150] sm:$0xff] }
  0x5d   :  { %512 = vmatprep.subr.mxu0 %v4071_v39  ;;  %7403 = vst [vmem:[#allocation59_spill] sm:$0xff] %v4092_v43  ;;  %v4099_v39 = vld [vmem:[#allocation2 + $0x148] sm:$0xff] }
  0x5e   :  { %513 = vmatpush2.msra.mxu0 %v4074_v17  ;;  %v4097_v17 = vld [vmem:[#allocation2 + $0x380] sm:$0xff]  ;;  %7405 = vst [vmem:[#allocation61_spill] sm:$0xff] %v4099_v39 }
  0x5f   :  { %514 = vmatprep.subr.mxu0 %v4077_v35  ;;  %7404 = vst [vmem:[#allocation60_spill] sm:$0xff] %v4097_v17  ;;  %424 = vmatpush2.msra.mxu1 %v4097_v17  ;;  %v4105_v35 = vld [vmem:[#allocation2 + $0x140] sm:$0xff] }
  0x60   :  { %515 = vmatpush2.msra.mxu0 %v4080_v31  ;;  %v4103_v31 = vld [vmem:[#allocation2 + $0x378] sm:$0xff]  ;;  %7407 = vst [vmem:[#allocation63_spill] sm:$0xff] %v4105_v35 }
  0x61   :  { %516 = vmatprep.subr.mxu0 %v4083_v15  ;;  %7406 = vst [vmem:[#allocation62_spill] sm:$0xff] %v4103_v31  ;;  %425 = vmatprep.subr.mxu1 %v4103_v31  ;;  %v4117_v15 = vld [vmem:[#allocation2 + $0x130] sm:$0xff]  ;;  %v7433_v31 = vmov 0 }
  0x62   :  { %517 = vmatpush2.msra.mxu0 %v4086_v27  ;;  %v4109_v27 = vld [vmem:[#allocation2 + $0x370] sm:$0xff]  ;;  %7411 = vst [vmem:[#allocation67_spill] sm:$0xff] %v4117_v15  ;;  %v7434_v31 = vsel %vm4194_vm1, 4294967295, %v7433_v31 }
  0x63   :  { %518 = vmatprep.subr.mxu0 %v4089_v22  ;;  %7408 = vst [vmem:[#allocation64_spill] sm:$0xff] %v4109_v27  ;;  %v4111_v22 = vld [vmem:[#allocation2 + $0x138] sm:$0xff]  ;;  %426 = vmatpush2.msra.mxu1 %v4109_v27  ;;  %7435 = vst [vmem:[#allocation89_spill] sm:$0xff] %v7434_v31 }
  0x64   :  { %519 = vmatpush2.msra.mxu0 %v4092_v43  ;;  %7409 = vst [vmem:[#allocation65_spill] sm:$0xff] %v4111_v22  ;;  %v4115_v43 = vld [vmem:[#allocation2 + $0x368] sm:$0xff] }
  0x65   :  { %520 = vmatprep.subr.mxu0 %v4099_v39  ;;  %7410 = vst [vmem:[#allocation66_spill] sm:$0xff] %v4115_v43  ;;  %427 = vmatprep.subr.mxu1 %v4115_v43  ;;  %v4121_v39 = vld [vmem:[#allocation2 + $0x360] sm:$0xff] }
  0x66   :  { %521 = vmatpush2.msra.mxu0 %v4105_v35  ;;  %7412 = vst [vmem:[#allocation68_spill] sm:$0xff] %v4121_v39  ;;  %428 = vmatpush2.msra.mxu1 %v4121_v39  ;;  %v4127_v35 = vld [vmem:[#allocation2 + $0x358] sm:$0xff] }
  0x67   :  { %522 = vmatprep.subr.mxu0 %v4111_v22  ;;  %7414 = vst [vmem:[#allocation70_spill] sm:$0xff] %v4127_v35  ;;  %429 = vmatprep.subr.mxu1 %v4127_v35  ;;  %v4133_v22 = vld [vmem:[#allocation2 + $0x350] sm:$0xff] }
  0x68   :  { %523 = vmatpush2.msra.mxu0 %v4117_v15  ;;  %7416 = vst [vmem:[#allocation72_spill] sm:$0xff] %v4133_v22  ;;  %430 = vmatpush2.msra.mxu1 %v4133_v22  ;;  %v4139_v15 = vld [vmem:[#allocation2 + $0x348] sm:$0xff] }
  0x69   :  { %524 = vmatprep.subr.mxu0 %v4123_v13  ;;  %7418 = vst [vmem:[#allocation74_spill] sm:$0xff] %v4139_v15  ;;  %431 = vmatprep.subr.mxu1 %v4139_v15  ;;  %v4145_v13 = vld [vmem:[#allocation2 + $0x340] sm:$0xff] }
  0x6a   :  { %525 = vmatpush2.msra.mxu0 %v4129_v11  ;;  %7420 = vst [vmem:[#allocation76_spill] sm:$0xff] %v4145_v13  ;;  %432 = vmatpush2.msra.mxu1 %v4145_v13  ;;  %v4151_v11 = vld [vmem:[#allocation2 + $0x338] sm:$0xff] }
  0x6b   :  { %526 = vmatprep.subr.mxu0 %v4135_v10  ;;  %7422 = vst [vmem:[#allocation78_spill] sm:$0xff] %v4151_v11  ;;  %433 = vmatprep.subr.mxu1 %v4151_v11  ;;  %v4157_v10 = vld [vmem:[#allocation2 + $0x330] sm:$0xff] }
  0x6c   :  { %527 = vmatpush2.msra.mxu0 %v4141_v7  ;;  %7424 = vst [vmem:[#allocation80_spill] sm:$0xff] %v4157_v10  ;;  %434 = vmatpush2.msra.mxu1 %v4157_v10  ;;  %v4160_v7 = vld [vmem:[#allocation2 + $0x328] sm:$0xff] }
  0x6d   :  { %528 = vmatprep.subr.mxu0 %v4147_v5  ;;  %7425 = vst [vmem:[#allocation81_spill] sm:$0xff] %v4160_v7  ;;  %435 = vmatprep.subr.mxu1 %v4160_v7  ;;  %v4167_v5 = vld [vmem:[#allocation2 + $0x318] sm:$0xff] }
  0x6e   :  { %529 = vmatpush2.msra.mxu0 %v4153_v4  ;;  %436 = vmatpush2.msra.mxu1 %v4164_v3  ;;  %7427 = vst [vmem:[#allocation83_spill] sm:$0xff] %v4167_v5  ;;  %v4173_v4 = vld [vmem:[#allocation2 + $0x308] sm:$0xff]  ;;  %v79_v3 = vlaneseq }
  0x6f   :  { %828 = vmatprep.subr.mxu0 %v3752_v18  ;;  %437 = vmatprep.subr.mxu1 %v4167_v5  ;;  %7429 = vst [vmem:[#allocation85_spill] sm:$0xff] %v4173_v4  ;;  %v4179_v18 = vld [vmem:[#allocation2 + $0x4f8] sm:$0xff] }
  0x70   :  { %438 = vmatpush2.msra.mxu1 %v4170_v63  ;;  %7431 = vst [vmem:[#allocation87_spill] sm:$0xff] %v4179_v18  ;;  %v4182_v7 = vshrl.u32 %v79_v3, 7  ;;  %v77_v63 = vld [vmem:[%s6789_s2] sm:$0x3] }
  0x71   :  { %439 = vmatprep.subr.mxu1 %v4173_v4 }
  0x72   :  { %440 = vmatpush2.msra.mxu1 %v4176_v61  ;;  %7432 = vst [vmem:[#allocation88_spill] sm:$0xff] %v4182_v7  ;;  %v6871_v5 = vsub.s32 0, %v4182_v7  ;;  %v6875_v10 = vsub.s32 1, %v4182_v7 }
  0x73   :  { %643 = vmatprep.subr.mxu1 %v4179_v18 }
  0x74   :  { %v82_v4 = vrot.slane %v77_v63, %v6871_v5  ;;  %v86_v61 = vrot.slane %v77_v63, %v6875_v10 }
  0xef   :  { %v155_v11 = vpop.f32.mrf.mxu0 }
  0xf0   :  { %v156_v13 = vadd.f32 %v155_v11, %v82_v4 }
  0xf1   :  { %v157_v18 = vpop.f32.mrf.mxu0 }
  0xf2   :  { %v178_v15 = vmax.f32 %v156_v13, 0.0  ;;  %v158_v3 = vadd.f32 %v157_v18, %v86_v61 }
  0xf3   :  { %v161_v22 = vpop.f32.mrf.mxu0 }
  0xf4   :  { %v195_v35 = vrot.slane %v178_v15, 6  ;;  %v179_v39 = vmax.f32 %v158_v3, 0.0  ;;  %v162_v43 = vadd.f32 %v161_v22, %v82_v4 }
  0xf5   :  { %v163_v27 = vpop.f32.mrf.mxu0 }
  0xf6   :  { %v196_v5 = vrot.slane %v179_v39, 6  ;;  %v180_v17 = vmax.f32 %v162_v43, 0.0  ;;  %v164_v7 = vadd.f32 %v163_v27, %v86_v61  ;;  %v217_v11 = vsel %vm194_vm0, 0.0, %v195_v35 }
  0xf7   :  { %v167_v63 = vpop.f32.mrf.mxu0 }
  0xf8   :  { %v197_v10 = vrot.slane %v180_v17, 6  ;;  %v181_v13 = vmax.f32 %v164_v7, 0.0  ;;  %v168_v47 = vadd.f32 %v167_v63, %v82_v4  ;;  %2960 = vmatprep.mubr.msk.f32.mxu0 %vm4194_vm1, %v196_v5  ;;  %v4204_v22 = vsel %vm194_vm0, 0.0, %v196_v5 }
  0xf9   :  { %v169_v15 = vpop.f32.mrf.mxu0  ;;  %2962 = vmatmul.mubr.msk.f32.vlgmr.msra.gmra.mxu0 %vm4194_vm1, %v195_v35  ;;  %v621_v7 = vrot.slane %v217_v11, 4 }
  0xfa   :  { %v199_v39 = vrot.slane %v181_v13, 6  ;;  %v182_v43 = vmax.f32 %v168_v47, 0.0  ;;  %v170_v27 = vadd.f32 %v169_v15, %v86_v61  ;;  %v198_v18 = vsel %vm194_vm0, %v195_v35, %v197_v10  ;;  %829 = vmatpush1.msra.mxu0 %v3758_v20 }
  0xfb   :  { %v173_v17 = vpop.f32.mrf.mxu0  ;;  %v356_v3 = vrot.slane %v198_v18, 2  ;;  %v622_v63 = vrot.slane %v198_v18, 4  ;;  %830 = vmatprep.subr.mxu0 %v3760_v21  ;;  %v358_v20 = vrot.slane %v4204_v22, 2  ;;  %v355_v13 = vrot.slane %v217_v11, 2 }
  0xfc   :  { %v201_v31 = vrot.slane %v182_v43, 6  ;;  %v183_v0 = vmax.f32 %v170_v27, 0.0  ;;  %v174_v2 = vadd.f32 %v173_v17, %v82_v4  ;;  %v4210_v59 = vsel %vm194_vm0, %v196_v5, %v199_v39  ;;  %831 = vmatpush1.msra.mxu0 %v3766_v23  ;;  %v4225_v17 = vld [vmem:[#allocation2 + $0x4f0] sm:$0xff] }
  0xfd   :  { %v175_v47 = vpop.f32.mrf.mxu0  ;;  %v359_v35 = vrot.slane %v4210_v59, 2  ;;  %536 = vmatprep.mubr.f32.mxu0 %v4210_v59  ;;  %v4217_v15 = vsel %vm620_vm2, %v621_v7, %v622_v63  ;;  %832 = vmatprep.subr.mxu0 %v3772_v25  ;;  %v357_v27 = vsel %vm219_vm3, %v355_v13, %v356_v3  ;;  %v4255_v13 = vld [vmem:[#allocation2 + $0x4d0] sm:$0xff] }
  0xfe   :  { %7436 = vst [vmem:[#allocation90_spill] sm:$0xff] %v4217_v15  ;;  %v203_v21 = vrot.slane %v183_v0, 6  ;;  %v184_v4 = vmax.f32 %v174_v2, 0.0  ;;  %v176_v43 = vadd.f32 %v175_v47, %v86_v61  ;;  %537 = vmatmul.mubr.f32.gmra.mxu0 %v198_v18  ;;  %v4221_v5 = vsel %vm194_vm0, %v197_v10, %v201_v31  ;;  %v4233_v61 = vld [vmem:[#allocation2 + $0x4e8] sm:$0xff]  ;;  %v4238_v2 = vld [vmem:[#allocation2 + $0x4e0] sm:$0xff] }
  0xff   :  { %v360_v23 = vsel %vm219_vm3, %v358_v20, %v359_v35  ;;  %v6882_v11 = vrot.slane %v4221_v5, 4  ;;  %833 = vmatpush1.msra.mxu0 %v3774_v26  ;;  %v361_v25 = vrot.slane %v4221_v5, 2 }
 0x100   :  { %v205_v7 = vrot.slane %v184_v4, 6  ;;  %v185_v15 = vmax.f32 %v176_v43, 0.0  ;;  %441 = vmatprep.mubr.f32.mxu1 %v360_v23  ;;  %v4230_v0 = vsel %vm194_vm0, %v199_v39, %v203_v21  ;;  %834 = vmatprep.subr.mxu0 %v3780_v28  ;;  %v4248_v28 = vld [vmem:[#allocation2 + $0x4d8] sm:$0xff] }
 0x101   :  { %442 = vmatmul.mubr.f32.vlgmr.msra.gmra.mxu1 %v357_v27  ;;  %v363_v10 = vrot.slane %v4230_v0, 2  ;;  %542 = vmatprep.mubr.f32.mxu0 %v4230_v0  ;;  %v4243_v26 = vsel %vm620_vm2, %v622_v63, %v6882_v11  ;;  %v362_v63 = vsel %vm219_vm3, %v356_v3, %v361_v25  ;;  %v4276_v3 = vld [vmem:[#allocation2 + $0x4b0] sm:$0xff]  ;;  %v4281_v27 = vld [vmem:[#allocation2 + $0x4a8] sm:$0xff] }
 0x102   :  { %v206_v39 = vsel %vm194_vm0, %v201_v31, %v205_v7  ;;  %v207_v18 = vrot.slane %v185_v15, 6  ;;  %644 = vmatpush1.msra.mxu1 %v4225_v17  ;;  %543 = vmatmul.mubr.f32.gmra.mxu0 %v4221_v5  ;;  %v4261_v15 = vld [vmem:[#allocation2 + $0x4c8] sm:$0xff]  ;;  %v4285_v7 = vld [vmem:[#allocation2 + $0x4a0] sm:$0xff] }
 0x103   :  { %v4251_v47 = vsel %vm219_vm3, %v206_v39, 0.0  ;;  %645 = vmatprep.subr.mxu1 %v4233_v61  ;;  %v364_v20 = vsel %vm219_vm3, %v359_v35, %v363_v10  ;;  %835 = vmatpush1.msra.mxu0 %v3786_v30  ;;  %v4267_v35 = vld [vmem:[#allocation2 + $0x4c0] sm:$0xff]  ;;  %v4270_v30 = vld [vmem:[#allocation2 + $0x4b8] sm:$0xff]  ;;  %v7462_v11 = vld [vmem:[#allocation41_spill] sm:$0xff] }
 0x104   :  { %v208_v31 = vsel %vm194_vm0, %v203_v21, %v207_v18  ;;  %646 = vmatpush1.msra.mxu1 %v4238_v2  ;;  %447 = vmatprep.mubr.f32.mxu1 %v364_v20  ;;  %v365_v43 = vrot.slane %v4251_v47, 2  ;;  %v4289_v20 = vld [vmem:[#allocation2 + $0x498] sm:$0xff] }
 0x105   :  { %v4264_v4 = vsel %vm219_vm3, %v208_v31, 0.0  ;;  %647 = vmatprep.subr.mxu1 %v4248_v28  ;;  %448 = vmatmul.mubr.f32.gmra.mxu1 %v362_v63 }
 0x106   :  { %648 = vmatpush1.msra.mxu1 %v4255_v13  ;;  %v367_v21 = vrot.slane %v4264_v4, 2  ;;  %2963 = vmatprep.mubr.msk.f32.mxu0 %vm219_vm3, %v208_v31  ;;  %v366_v18 = vsel %vm219_vm3, %v361_v25, %v365_v43  ;;  %v4300_v31 = vld [vmem:[#allocation2 + $0x480] sm:$0xff]  ;;  %v624_v25 = vrot.slane %v4204_v22, 4  ;;  %v4315_v22 = vld [vmem:[#allocation2 + $0x468] sm:$0xff] }
 0x107   :  { %649 = vmatprep.subr.mxu1 %v4261_v15  ;;  %2964 = vmatmul.mubr.msk.f32.gmra.mxu0 %vm219_vm3, %v206_v39  ;;  %v6883_v39 = vrot.slane %v4210_v59, 4 }
 0x108   :  { %650 = vmatpush1.msra.mxu1 %v4267_v35  ;;  %v368_v23 = vsel %vm219_vm3, %v363_v10, %v367_v21  ;;  %836 = vmatprep.subr.mxu0 %v3792_v32  ;;  %v4294_v10 = vld [vmem:[#allocation2 + $0x490] sm:$0xff]  ;;  %v4297_v32 = vld [vmem:[#allocation2 + $0x488] sm:$0xff] }
 0x109   :  { %651 = vmatprep.subr.mxu1 %v4270_v30  ;;  %453 = vmatprep.mubr.f32.mxu1 %v368_v23  ;;  %v626_v63 = vsel %vm620_vm2, %v624_v25, %v6883_v39  ;;  %v4330_v23 = vld [vmem:[#allocation2 + $0x448] sm:$0xff] }
 0x10a   :  { %652 = vmatpush1.msra.mxu1 %v4276_v3  ;;  %837 = vmatpush1.msra.mxu0 %v3798_v34  ;;  %v4305_v34 = vld [vmem:[#allocation2 + $0x478] sm:$0xff]  ;;  %v7458_v25 = vld [vmem:[#allocation37_spill] sm:$0xff]  ;;  %v7464_v39 = vld [vmem:[#allocation60_spill] sm:$0xff] }
 0x10b   :  { %454 = vmatmul.mubr.f32.gmra.mxu1 %v366_v18  ;;  %653 = vmatprep.subr.mxu1 %v4281_v27  ;;  %v7456_v18 = vld [vmem:[#allocation35_spill] sm:$0xff] }
 0x10c   :  { %654 = vmatpush1.msra.mxu1 %v4285_v7  ;;  %459 = vmatprep.mubr.f32.mxu1 %v367_v21  ;;  %v4312_v21 = vld [vmem:[#allocation2 + $0x470] sm:$0xff] }
 0x10d   :  { %655 = vmatprep.subr.mxu1 %v4289_v20  ;;  %838 = vmatprep.subr.mxu0 %v3804_v36  ;;  %v4318_v36 = vld [vmem:[#allocation2 + $0x460] sm:$0xff] }
 0x10e   :  { %656 = vmatpush1.msra.mxu1 %v4294_v10  ;;  %839 = vmatpush1.msra.mxu0 %v3810_v38  ;;  %v4322_v38 = vld [vmem:[#allocation2 + $0x458] sm:$0xff] }
 0x10f   :  { %460 = vmatmul.mubr.f32.gmra.mxu1 %v365_v43  ;;  %657 = vmatprep.subr.mxu1 %v4297_v32  ;;  %v4326_v43 = vld [vmem:[#allocation2 + $0x450] sm:$0xff] }
 0x110   :  { %658 = vmatpush1.msra.mxu1 %v4300_v31  ;;  %707 = vmatprep.mubr.f32.mxu1 %v626_v63  ;;  %v7460_v63 = vld [vmem:[#allocation39_spill] sm:$0xff] }
 0x111   :  { %659 = vmatprep.subr.mxu1 %v4305_v34  ;;  %840 = vmatprep.subr.mxu0 %v3816_v40  ;;  %v4334_v40 = vld [vmem:[#allocation2 + $0x440] sm:$0xff] }
 0x112   :  { %660 = vmatpush1.msra.mxu1 %v4312_v21  ;;  %841 = vmatpush1.msra.mxu0 %v3822_v42  ;;  %v4338_v42 = vld [vmem:[#allocation2 + $0x438] sm:$0xff] }
 0x113   :  { %661 = vmatprep.subr.mxu1 %v4315_v22  ;;  %842 = vmatprep.subr.mxu0 %v3828_v44  ;;  %v4342_v44 = vld [vmem:[#allocation2 + $0x430] sm:$0xff] }
 0x114   :  { %662 = vmatpush1.msra.mxu1 %v4318_v36  ;;  %843 = vmatpush1.msra.mxu0 %v3834_v46  ;;  %v4346_v46 = vld [vmem:[#allocation2 + $0x428] sm:$0xff] }
 0x115   :  { %663 = vmatprep.subr.mxu1 %v4322_v38  ;;  %844 = vmatprep.subr.mxu0 %v3840_v48  ;;  %v4350_v48 = vld [vmem:[#allocation2 + $0x420] sm:$0xff] }
 0x116   :  { %664 = vmatpush1.msra.mxu1 %v4326_v43  ;;  %845 = vmatpush1.msra.mxu0 %v3846_v50  ;;  %v4354_v50 = vld [vmem:[#allocation2 + $0x418] sm:$0xff] }
 0x117   :  { %665 = vmatprep.subr.mxu1 %v4330_v23  ;;  %846 = vmatprep.subr.mxu0 %v3854_v55  ;;  %v4358_v55 = vld [vmem:[#allocation2 + $0x410] sm:$0xff] }
 0x118   :  { %666 = vmatpush1.msra.mxu1 %v4334_v40  ;;  %847 = vmatpush1.msra.mxu0 %v3856_v57  ;;  %v4362_v57 = vld [vmem:[#allocation2 + $0x408] sm:$0xff] }
 0x119   :  { %667 = vmatprep.subr.mxu1 %v4338_v42  ;;  %848 = vmatprep.subr.mxu0 %v3866_v62  ;;  %v4366_v62 = vld [vmem:[#allocation2 + $0x400] sm:$0xff] }
 0x11a   :  { %668 = vmatpush1.msra.mxu1 %v4342_v44  ;;  %849 = vmatpush1.msra.mxu0 %v3870_v1  ;;  %v4370_v1 = vld [vmem:[#allocation2 + $0x5f8] sm:$0xff] }
 0x11b   :  { %669 = vmatprep.subr.mxu1 %v4346_v46  ;;  %850 = vmatprep.subr.mxu0 %v3886_v6  ;;  %7437 = vst [vmem:[#allocation91_spill] sm:$0xff] %v4370_v1  ;;  %v4374_v6 = vld [vmem:[#allocation2 + $0x5f0] sm:$0xff] }
 0x11c   :  { %670 = vmatpush1.msra.mxu1 %v4350_v48  ;;  %851 = vmatpush1.msra.mxu0 %v3891_v8  ;;  %7438 = vst [vmem:[#allocation92_spill] sm:$0xff] %v4374_v6  ;;  %v4378_v8 = vld [vmem:[#allocation2 + $0x5e8] sm:$0xff] }
 0x11d   :  { %671 = vmatprep.subr.mxu1 %v4354_v50  ;;  %852 = vmatprep.subr.mxu0 %v3904_v12  ;;  %7439 = vst [vmem:[#allocation93_spill] sm:$0xff] %v4378_v8  ;;  %v4382_v12 = vld [vmem:[#allocation2 + $0x5e0] sm:$0xff] }
 0x11e   :  { %672 = vmatpush1.msra.mxu1 %v4358_v55  ;;  %853 = vmatpush1.msra.mxu0 %v3910_v14  ;;  %7440 = vst [vmem:[#allocation94_spill] sm:$0xff] %v4382_v12  ;;  %v4386_v14 = vld [vmem:[#allocation2 + $0x5d8] sm:$0xff] }
 0x11f   :  { %673 = vmatprep.subr.mxu1 %v4362_v57  ;;  %854 = vmatprep.subr.mxu0 %v3915_v16  ;;  %7441 = vst [vmem:[#allocation95_spill] sm:$0xff] %v4386_v14  ;;  %v4390_v16 = vld [vmem:[#allocation2 + $0x5d0] sm:$0xff] }
 0x120   :  { %674 = vmatpush1.msra.mxu1 %v4366_v62  ;;  %855 = vmatpush1.msra.mxu0 %v3921_v19  ;;  %7442 = vst [vmem:[#allocation96_spill] sm:$0xff] %v4390_v16  ;;  %v4394_v19 = vld [vmem:[#allocation2 + $0x5c8] sm:$0xff] }
 0x121   :  { %675 = vmatprep.subr.mxu1 %v4370_v1  ;;  %856 = vmatprep.subr.mxu0 %v3927_v24  ;;  %7443 = vst [vmem:[#allocation97_spill] sm:$0xff] %v4394_v19  ;;  %v4398_v24 = vld [vmem:[#allocation2 + $0x5c0] sm:$0xff] }
 0x122   :  { %676 = vmatpush2.msra.mxu1 %v4374_v6  ;;  %857 = vmatpush1.msra.mxu0 %v3933_v29  ;;  %7444 = vst [vmem:[#allocation98_spill] sm:$0xff] %v4398_v24  ;;  %v4402_v29 = vld [vmem:[#allocation2 + $0x5b8] sm:$0xff] }
 0x123   :  { %677 = vmatprep.subr.mxu1 %v4378_v8  ;;  %858 = vmatprep.subr.mxu0 %v3939_v33  ;;  %7445 = vst [vmem:[#allocation99_spill] sm:$0xff] %v4402_v29  ;;  %v4406_v33 = vld [vmem:[#allocation2 + $0x5b0] sm:$0xff] }
 0x124   :  { %678 = vmatpush2.msra.mxu1 %v4382_v12  ;;  %859 = vmatpush1.msra.mxu0 %v3945_v37  ;;  %7446 = vst [vmem:[#allocation100_spill] sm:$0xff] %v4406_v33  ;;  %v4410_v37 = vld [vmem:[#allocation2 + $0x5a8] sm:$0xff] }
 0x125   :  { %679 = vmatprep.subr.mxu1 %v4386_v14  ;;  %860 = vmatprep.subr.mxu0 %v3951_v41  ;;  %7447 = vst [vmem:[#allocation101_spill] sm:$0xff] %v4410_v37  ;;  %v4414_v41 = vld [vmem:[#allocation2 + $0x5a0] sm:$0xff] }
 0x126   :  { %680 = vmatpush2.msra.mxu1 %v4390_v16  ;;  %861 = vmatpush2.msra.mxu0 %v3957_v45  ;;  %7448 = vst [vmem:[#allocation102_spill] sm:$0xff] %v4414_v41  ;;  %v4418_v45 = vld [vmem:[#allocation2 + $0x598] sm:$0xff] }
 0x127   :  { %681 = vmatprep.subr.mxu1 %v4394_v19  ;;  %862 = vmatprep.subr.mxu0 %v3963_v49  ;;  %7449 = vst [vmem:[#allocation103_spill] sm:$0xff] %v4418_v45  ;;  %v4422_v49 = vld [vmem:[#allocation2 + $0x590] sm:$0xff] }
 0x128   :  { %682 = vmatpush2.msra.mxu1 %v4398_v24  ;;  %863 = vmatpush2.msra.mxu0 %v3969_v52  ;;  %7450 = vst [vmem:[#allocation104_spill] sm:$0xff] %v4422_v49  ;;  %v4426_v52 = vld [vmem:[#allocation2 + $0x588] sm:$0xff] }
 0x129   :  { %683 = vmatprep.subr.mxu1 %v4402_v29  ;;  %864 = vmatprep.subr.mxu0 %v3975_v54  ;;  %7451 = vst [vmem:[#allocation105_spill] sm:$0xff] %v4426_v52  ;;  %v4430_v54 = vld [vmem:[#allocation2 + $0x580] sm:$0xff] }
 0x12a   :  { %684 = vmatpush2.msra.mxu1 %v4406_v33  ;;  %865 = vmatpush2.msra.mxu0 %v3981_v58  ;;  %7452 = vst [vmem:[#allocation106_spill] sm:$0xff] %v4430_v54  ;;  %v4434_v58 = vld [vmem:[#allocation2 + $0x578] sm:$0xff] }
 0x12b   :  { %685 = vmatprep.subr.mxu1 %v4410_v37  ;;  %866 = vmatprep.subr.mxu0 %v3987_v60  ;;  %7453 = vst [vmem:[#allocation107_spill] sm:$0xff] %v4434_v58  ;;  %v4438_v60 = vld [vmem:[#allocation2 + $0x570] sm:$0xff] }
 0x12c   :  { %686 = vmatpush2.msra.mxu1 %v4414_v41  ;;  %867 = vmatpush2.msra.mxu0 %v3993_v9  ;;  %7454 = vst [vmem:[#allocation108_spill] sm:$0xff] %v4438_v60  ;;  %v4442_v9 = vld [vmem:[#allocation2 + $0x568] sm:$0xff] }
 0x12d   :  { %687 = vmatprep.subr.mxu1 %v4418_v45  ;;  %868 = vmatprep.subr.mxu0 %v3999_v51  ;;  %7455 = vst [vmem:[#allocation109_spill] sm:$0xff] %v4442_v9  ;;  %v4446_v51 = vld [vmem:[#allocation2 + $0x560] sm:$0xff] }
 0x12e   :  { %688 = vmatpush2.msra.mxu1 %v4422_v49  ;;  %869 = vmatpush2.msra.mxu0 %v4005_v53  ;;  %7457 = vst [vmem:[#allocation35_spill] sm:$0xff] %v4446_v51  ;;  %v4450_v53 = vld [vmem:[#allocation2 + $0x558] sm:$0xff] }
 0x12f   :  { %689 = vmatprep.subr.mxu1 %v4426_v52  ;;  %870 = vmatprep.subr.mxu0 %v4011_v56  ;;  %7459 = vst [vmem:[#allocation37_spill] sm:$0xff] %v4450_v53  ;;  %v4454_v56 = vld [vmem:[#allocation2 + $0x550] sm:$0xff] }
 0x130   :  { %690 = vmatpush2.msra.mxu1 %v4430_v54  ;;  %871 = vmatpush2.msra.mxu0 %v7456_v18  ;;  %7461 = vst [vmem:[#allocation39_spill] sm:$0xff] %v4454_v56  ;;  %v4458_v18 = vld [vmem:[#allocation2 + $0x548] sm:$0xff] }
 0x131   :  { %691 = vmatprep.subr.mxu1 %v4434_v58  ;;  %872 = vmatprep.subr.mxu0 %v7458_v25  ;;  %7463 = vst [vmem:[#allocation41_spill] sm:$0xff] %v4458_v18  ;;  %v4462_v25 = vld [vmem:[#allocation2 + $0x540] sm:$0xff]  ;;  %v7482_v58 = vld [vmem:[#allocation78_spill] sm:$0xff] }
 0x132   :  { %692 = vmatpush2.msra.mxu1 %v4438_v60  ;;  %873 = vmatpush2.msra.mxu0 %v7460_v63  ;;  %7465 = vst [vmem:[#allocation60_spill] sm:$0xff] %v4462_v25  ;;  %v7466_v60 = vld [vmem:[#allocation62_spill] sm:$0xff] }
 0x133   :  { %693 = vmatprep.subr.mxu1 %v4442_v9  ;;  %874 = vmatprep.subr.mxu0 %v7462_v11  ;;  %v4466_v63 = vld [vmem:[#allocation2 + $0x538] sm:$0xff]  ;;  %v7468_v9 = vld [vmem:[#allocation64_spill] sm:$0xff]  ;;  %v4470_v11 = vld [vmem:[#allocation2 + $0x530] sm:$0xff] }
 0x134   :  { %694 = vmatpush2.msra.mxu1 %v4446_v51  ;;  %875 = vmatpush2.msra.mxu0 %v7464_v39  ;;  %7467 = vst [vmem:[#allocation62_spill] sm:$0xff] %v4466_v63  ;;  %7469 = vst [vmem:[#allocation64_spill] sm:$0xff] %v4470_v11  ;;  %v7470_v51 = vld [vmem:[#allocation66_spill] sm:$0xff]  ;;  %v4474_v39 = vld [vmem:[#allocation2 + $0x528] sm:$0xff] }
 0x135   :  { %695 = vmatprep.subr.mxu1 %v4450_v53  ;;  %876 = vmatprep.subr.mxu0 %v7466_v60  ;;  %7471 = vst [vmem:[#allocation66_spill] sm:$0xff] %v4474_v39  ;;  %v7472_v53 = vld [vmem:[#allocation68_spill] sm:$0xff] }
 0x136   :  { %696 = vmatpush2.msra.mxu1 %v4454_v56  ;;  %877 = vmatpush2.msra.mxu0 %v7468_v9  ;;  %v4478_v60 = vld [vmem:[#allocation2 + $0x520] sm:$0xff]  ;;  %v7474_v56 = vld [vmem:[#allocation70_spill] sm:$0xff] }
 0x137   :  { %697 = vmatprep.subr.mxu1 %v4458_v18  ;;  %878 = vmatprep.subr.mxu0 %v7470_v51  ;;  %7473 = vst [vmem:[#allocation68_spill] sm:$0xff] %v4478_v60  ;;  %v4482_v9 = vld [vmem:[#allocation2 + $0x518] sm:$0xff]  ;;  %v7476_v18 = vld [vmem:[#allocation72_spill] sm:$0xff]  ;;  %v4486_v51 = vld [vmem:[#allocation2 + $0x510] sm:$0xff] }
 0x138   :  { %698 = vmatpush2.msra.mxu1 %v4462_v25  ;;  %879 = vmatpush2.msra.mxu0 %v7472_v53  ;;  %7475 = vst [vmem:[#allocation70_spill] sm:$0xff] %v4482_v9  ;;  %7477 = vst [vmem:[#allocation72_spill] sm:$0xff] %v4486_v51  ;;  %v7478_v25 = vld [vmem:[#allocation74_spill] sm:$0xff]  ;;  %v4490_v53 = vld [vmem:[#allocation2 + $0x508] sm:$0xff] }
 0x139   :  { %699 = vmatprep.subr.mxu1 %v4466_v63  ;;  %880 = vmatprep.subr.mxu0 %v7474_v56  ;;  %7479 = vst [vmem:[#allocation74_spill] sm:$0xff] %v4490_v53  ;;  %v7480_v63 = vld [vmem:[#allocation76_spill] sm:$0xff]  ;;  %v629_v56 = vrot.slane %v4230_v0, 4  ;;  %v7487_v0 = vrot.slane %v4210_v59, 4  ;;  %v631_v59 = vrot.slane %v4251_v47, 4 }
 0x13a   :  { %700 = vmatpush2.msra.mxu1 %v4470_v11  ;;  %881 = vmatpush2.msra.mxu0 %v7476_v18  ;;  %v4495_v11 = vld [vmem:[#allocation2 + $0x500] sm:$0xff] }
 0x13b   :  { %701 = vmatprep.subr.mxu1 %v4474_v39  ;;  %882 = vmatprep.subr.mxu0 %v7478_v25  ;;  %7481 = vst [vmem:[#allocation76_spill] sm:$0xff] %v4495_v11  ;;  %v7483_v18 = vld [vmem:[#allocation80_spill] sm:$0xff]  ;;  %v7484_v25 = vld [vmem:[#allocation81_spill] sm:$0xff]  ;;  %v4509_v39 = vld [vmem:[#allocation2 + $0xf8] sm:$0xff] }
 0x13c   :  { %702 = vmatpush2.msra.mxu1 %v4478_v60  ;;  %883 = vmatpush2.msra.mxu0 %v7480_v63  ;;  %v7485_v60 = vld [vmem:[#allocation82_spill] sm:$0xff]  ;;  %7488 = vst [vmem:[#allocation78_spill] sm:$0xff] %v4509_v39  ;;  %v7496_v47 = vld [vmem:[#allocation8_spill] sm:$0xff] }
 0x13d   :  { %703 = vmatprep.subr.mxu1 %v4482_v9  ;;  %884 = vmatprep.subr.mxu0 %v7482_v58  ;;  %v7486_v63 = vld [vmem:[#allocation90_spill] sm:$0xff]  ;;  %v630_v9 = vsel %vm620_vm2, %v7487_v0, %v629_v56  ;;  %v633_v58 = vrot.slane %v4264_v4, 4  ;;  %v7493_v4 = vld [vmem:[#allocation84_spill] sm:$0xff] }
 0x13e   :  { %704 = vmatpush2.msra.mxu1 %v4486_v51  ;;  %885 = vmatpush2.msra.mxu0 %v7483_v18  ;;  %v4512_v18 = vld [vmem:[#allocation2 + $0xf0] sm:$0xff]  ;;  %v4526_v0 = vld [vmem:[#allocation2 + $0xd8] sm:$0xff] }
 0x13f   :  { %705 = vmatprep.subr.mxu1 %v4490_v53  ;;  %886 = vmatprep.subr.mxu0 %v7484_v25  ;;  %7489 = vst [vmem:[#allocation80_spill] sm:$0xff] %v4512_v18  ;;  %v4515_v25 = vld [vmem:[#allocation2 + $0xe8] sm:$0xff]  ;;  %7494 = vst [vmem:[#allocation90_spill] sm:$0xff] %v4526_v0 }
 0x140   :  { %706 = vmatpush2.msra.mxu1 %v4495_v11  ;;  %887 = vmatpush2.msra.mxu0 %v7485_v60  ;;  %7490 = vst [vmem:[#allocation81_spill] sm:$0xff] %v4515_v25  ;;  %v7491_v60 = vld [vmem:[#allocation83_spill] sm:$0xff] }
 0x141   :  { %708 = vmatmul.mubr.f32.vlgmr.msra.gmra.mxu1 %v7486_v63  ;;  %917 = vmatprep.subr.mxu1 %v4509_v39  ;;  %v4520_v63 = vld [vmem:[#allocation2 + $0xe0] sm:$0xff] }
 0x142   :  { %713 = vmatprep.mubr.f32.mxu1 %v630_v9  ;;  %918 = vmatpush1.msra.mxu1 %v4512_v18  ;;  %7492 = vst [vmem:[#allocation82_spill] sm:$0xff] %v4520_v63  ;;  %v634_v9 = vsel %vm620_vm2, %v629_v56, %v633_v58  ;;  %v7500_v56 = vld [vmem:[#allocation86_spill] sm:$0xff] }
 0x143   :  { %919 = vmatprep.subr.mxu1 %v4515_v25  ;;  %888 = vmatprep.subr.mxu0 %v7491_v60  ;;  %v4529_v25 = vld [vmem:[#allocation2 + $0xd0] sm:$0xff] }
 0x144   :  { %920 = vmatpush1.msra.mxu1 %v4520_v63  ;;  %889 = vmatpush2.msra.mxu0 %v7493_v4  ;;  %7495 = vst [vmem:[#allocation83_spill] sm:$0xff] %v4529_v25  ;;  %v7497_v60 = vld [vmem:[#allocation85_spill] sm:$0xff]  ;;  %v7498_v63 = vrot.slane %v4221_v5, 4  ;;  %v7501_v18 = vld [vmem:[#allocation10_spill] sm:$0xff] }
 0x145   :  { %714 = vmatmul.mubr.f32.gmra.mxu1 %v4243_v26  ;;  %921 = vmatprep.subr.mxu1 %v4526_v0  ;;  %v7499_v26 = vld [vmem:[#allocation9_spill] sm:$0xff]  ;;  %v7503_v0 = vld [vmem:[#allocation12_spill] sm:$0xff]  ;;  %v7506_v5 = vld [vmem:[#allocation14_spill] sm:$0xff] }
 0x146   :  { %719 = vmatprep.mubr.f32.mxu1 %v634_v9  ;;  %922 = vmatpush1.msra.mxu1 %v4529_v25  ;;  %v632_v4 = vsel %vm620_vm2, %v7498_v63, %v631_v59  ;;  %v7502_v9 = vld [vmem:[#allocation11_spill] sm:$0xff] }
 0x147   :  { %923 = vmatprep.subr.mxu1 %v7496_v47  ;;  %890 = vmatprep.subr.mxu0 %v7497_v60  ;;  %v7504_v25 = vld [vmem:[#allocation87_spill] sm:$0xff]  ;;  %v7505_v47 = vld [vmem:[#allocation13_spill] sm:$0xff]  ;;  %v7508_v60 = vld [vmem:[#allocation16_spill] sm:$0xff] }
 0x148   :  { %924 = vmatpush1.msra.mxu1 %v7499_v26  ;;  %891 = vmatpush2.msra.mxu0 %v7500_v56  ;;  %v7507_v63 = vld [vmem:[#allocation15_spill] sm:$0xff]  ;;  %v7509_v26 = vld [vmem:[#allocation17_spill] sm:$0xff] }
 0x149   :  { %720 = vmatmul.mubr.f32.gmra.mxu1 %v632_v4  ;;  %925 = vmatprep.subr.mxu1 %v7501_v18  ;;  %v7510_v4 = vld [vmem:[#allocation18_spill] sm:$0xff]  ;;  %v7512_v18 = vld [vmem:[#allocation20_spill] sm:$0xff]  ;;  %v7515_v56 = vld [vmem:[#allocation23_spill] sm:$0xff] }
 0x14a   :  { %725 = vmatprep.mubr.f32.mxu1 %v633_v58  ;;  %926 = vmatpush1.msra.mxu1 %v7502_v9  ;;  %v7511_v58 = vld [vmem:[#allocation19_spill] sm:$0xff]  ;;  %v7517_v9 = vld [vmem:[#allocation25_spill] sm:$0xff] }
 0x14b   :  { %927 = vmatprep.subr.mxu1 %v7503_v0  ;;  %1028 = vmatprep.subr.mxu0 %v7504_v25  ;;  %v7513_v0 = vld [vmem:[#allocation21_spill] sm:$0xff]  ;;  %v7514_v25 = vld [vmem:[#allocation22_spill] sm:$0xff] }
 0x14c   :  { %928 = vmatpush1.msra.mxu1 %v7505_v47  ;;  %v7518_v47 = vld [vmem:[#allocation26_spill] sm:$0xff] }
 0x14d   :  { %726 = vmatmul.mubr.f32.gmra.mxu1 %v631_v59  ;;  %929 = vmatprep.subr.mxu1 %v7506_v5  ;;  %v7516_v59 = vld [vmem:[#allocation24_spill] sm:$0xff]  ;;  %v7519_v5 = vld [vmem:[#allocation27_spill] sm:$0xff] }
 0x14e   :  { %930 = vmatpush1.msra.mxu1 %v7507_v63  ;;  %v7520_v63 = vld [vmem:[#allocation28_spill] sm:$0xff] }
 0x14f   :  { %931 = vmatprep.subr.mxu1 %v7508_v60  ;;  %v7521_v60 = vld [vmem:[#allocation29_spill] sm:$0xff] }
 0x150   :  { %932 = vmatpush1.msra.mxu1 %v7509_v26  ;;  %v7522_v26 = vld [vmem:[#allocation30_spill] sm:$0xff] }
 0x151   :  { %933 = vmatprep.subr.mxu1 %v7510_v4  ;;  %v7523_v4 = vld [vmem:[#allocation31_spill] sm:$0xff] }
 0x152   :  { %934 = vmatpush1.msra.mxu1 %v7511_v58  ;;  %v7524_v58 = vld [vmem:[#allocation32_spill] sm:$0xff] }
 0x153   :  { %935 = vmatprep.subr.mxu1 %v7512_v18  ;;  %v7525_v18 = vld [vmem:[#allocation33_spill] sm:$0xff] }
 0x154   :  { %936 = vmatpush1.msra.mxu1 %v7513_v0  ;;  %v7526_v0 = vld [vmem:[#allocation34_spill] sm:$0xff] }
 0x155   :  { %937 = vmatprep.subr.mxu1 %v7514_v25  ;;  %v7527_v25 = vld [vmem:[#allocation36_spill] sm:$0xff] }
 0x156   :  { %938 = vmatpush1.msra.mxu1 %v7515_v56  ;;  %v7528_v56 = vld [vmem:[#allocation38_spill] sm:$0xff] }
 0x157   :  { %939 = vmatprep.subr.mxu1 %v7516_v59  ;;  %v7529_v59 = vld [vmem:[#allocation40_spill] sm:$0xff] }
 0x158   :  { %940 = vmatpush1.msra.mxu1 %v7517_v9  ;;  %v7530_v9 = vld [vmem:[#allocation42_spill] sm:$0xff] }
 0x159   :  { %941 = vmatprep.subr.mxu1 %v7518_v47  ;;  %v7531_v47 = vld [vmem:[#allocation43_spill] sm:$0xff] }
 0x15a   :  { %942 = vmatpush1.msra.mxu1 %v7519_v5  ;;  %v7532_v5 = vld [vmem:[#allocation44_spill] sm:$0xff] }
 0x15b   :  { %943 = vmatprep.subr.mxu1 %v7520_v63  ;;  %v7533_v63 = vld [vmem:[#allocation45_spill] sm:$0xff] }
 0x15c   :  { %944 = vmatpush1.msra.mxu1 %v7521_v60  ;;  %v7534_v60 = vld [vmem:[#allocation46_spill] sm:$0xff] }
 0x15d   :  { %945 = vmatprep.subr.mxu1 %v7522_v26  ;;  %v7535_v26 = vld [vmem:[#allocation47_spill] sm:$0xff] }
 0x15e   :  { %946 = vmatpush1.msra.mxu1 %v7523_v4  ;;  %v7536_v4 = vld [vmem:[#allocation48_spill] sm:$0xff] }
 0x15f   :  { %947 = vmatprep.subr.mxu1 %v7524_v58  ;;  %v7537_v58 = vld [vmem:[#allocation49_spill] sm:$0xff] }
 0x160   :  { %948 = vmatpush1.msra.mxu1 %v7525_v18  ;;  %v7538_v18 = vld [vmem:[#allocation50_spill] sm:$0xff] }
 0x161   :  { %949 = vmatprep.subr.mxu1 %v7526_v0  ;;  %v7539_v0 = vld [vmem:[#allocation51_spill] sm:$0xff] }
 0x162   :  { %950 = vmatpush2.msra.mxu1 %v7527_v25  ;;  %v7540_v25 = vld [vmem:[#allocation52_spill] sm:$0xff] }
 0x163   :  { %951 = vmatprep.subr.mxu1 %v7528_v56  ;;  %v7541_v56 = vld [vmem:[#allocation53_spill] sm:$0xff] }
 0x164   :  { %952 = vmatpush2.msra.mxu1 %v7529_v59  ;;  %v7542_v59 = vld [vmem:[#allocation54_spill] sm:$0xff] }
 0x165   :  { %953 = vmatprep.subr.mxu1 %v7530_v9  ;;  %v7543_v9 = vld [vmem:[#allocation55_spill] sm:$0xff] }
 0x166   :  { %954 = vmatpush2.msra.mxu1 %v7531_v47  ;;  %v7544_v47 = vld [vmem:[#allocation56_spill] sm:$0xff] }
 0x167   :  { %955 = vmatprep.subr.mxu1 %v7532_v5  ;;  %v7545_v5 = vld [vmem:[#allocation57_spill] sm:$0xff] }
 0x168   :  { %956 = vmatpush2.msra.mxu1 %v7533_v63  ;;  %v7546_v63 = vld [vmem:[#allocation58_spill] sm:$0xff] }
 0x169   :  { %957 = vmatprep.subr.mxu1 %v7534_v60  ;;  %v7547_v60 = vld [vmem:[#allocation59_spill] sm:$0xff] }
 0x16a   :  { %958 = vmatpush2.msra.mxu1 %v7535_v26  ;;  %v7548_v26 = vld [vmem:[#allocation61_spill] sm:$0xff] }
 0x16b   :  { %959 = vmatprep.subr.mxu1 %v7536_v4  ;;  %v7549_v4 = vld [vmem:[#allocation63_spill] sm:$0xff] }
 0x16c   :  { %960 = vmatpush2.msra.mxu1 %v7537_v58  ;;  %v7550_v58 = vld [vmem:[#allocation65_spill] sm:$0xff] }
 0x16d   :  { %961 = vmatprep.subr.mxu1 %v7538_v18  ;;  %v7551_v18 = vld [vmem:[#allocation67_spill] sm:$0xff] }
 0x16e   :  { %962 = vmatpush2.msra.mxu1 %v7539_v0  ;;  %v7552_v0 = vld [vmem:[#allocation69_spill] sm:$0xff] }
 0x16f   :  { %963 = vmatprep.subr.mxu1 %v7540_v25  ;;  %v7553_v25 = vld [vmem:[#allocation71_spill] sm:$0xff] }
 0x170   :  { %964 = vmatpush2.msra.mxu1 %v7541_v56  ;;  %v7554_v56 = vld [vmem:[#allocation73_spill] sm:$0xff] }
 0x171   :  { %965 = vmatprep.subr.mxu1 %v7542_v59  ;;  %v7555_v59 = vld [vmem:[#allocation75_spill] sm:$0xff] }
 0x172   :  { %966 = vmatpush2.msra.mxu1 %v7543_v9  ;;  %v7556_v9 = vld [vmem:[#allocation77_spill] sm:$0xff] }
 0x173   :  { %967 = vmatprep.subr.mxu1 %v7544_v47  ;;  %v7557_v47 = vld [vmem:[#allocation79_spill] sm:$0xff] }
 0x174   :  { %968 = vmatpush2.msra.mxu1 %v7545_v5  ;;  %v4596_v5 = vld [vmem:[#allocation2 + $0x2f8] sm:$0xff] }
 0x175   :  { %969 = vmatprep.subr.mxu1 %v7546_v63  ;;  %7558 = vst [vmem:[#allocation84_spill] sm:$0xff] %v4596_v5 }
 0x176   :  { %970 = vmatpush2.msra.mxu1 %v7547_v60 }
 0x177   :  { %971 = vmatprep.subr.mxu1 %v7548_v26 }
 0x178   :  { %972 = vmatpush2.msra.mxu1 %v7549_v4 }
 0x179   :  { %973 = vmatprep.subr.mxu1 %v7550_v58 }
 0x17a   :  { %974 = vmatpush2.msra.mxu1 %v7551_v18 }
 0x17b   :  { %975 = vmatprep.subr.mxu1 %v7552_v0 }
 0x17c   :  { %976 = vmatpush2.msra.mxu1 %v7553_v25 }
 0x17d   :  { %977 = vmatprep.subr.mxu1 %v7554_v56 }
 0x17e   :  { %978 = vmatpush2.msra.mxu1 %v7555_v59  ;;  %v740_v59 = vld [vmem:[%s6791_s4] sm:$0x3] }
 0x17f   :  { %979 = vmatprep.subr.mxu1 %v7556_v9 }
 0x180   :  { %980 = vmatpush2.msra.mxu1 %v7557_v47  ;;  %v7559_v47 = vld [vmem:[#allocation88_spill] sm:$0xff] }
 0x181   :  { %1269 = vmatprep.subr.mxu1 %v4596_v5  ;;  %v7560_v53 = vsub.s32 0, %v7559_v47  ;;  %v7562_v49 = vsub.s32 1, %v7559_v47 }
 0x183   :  { %v4604_v51 = vrot.slane %v740_v59, %v7560_v53  ;;  %v4608_v45 = vrot.slane %v740_v59, %v7562_v49 }
 0x185   :  { %7561 = vst [vmem:[#allocation8_spill] sm:$0xff] %v4604_v51  ;;  %7563 = vst [vmem:[#allocation85_spill] sm:$0xff] %v4608_v45 }
 0x1b9   :  { %v532_v4 = vpop.f32.mrf.mxu0 }
 0x1bb   :  { %v534_v18 = vpop.f32.mrf.mxu0 }
 0x1be   :  { %v538_v25 = vpop.f32.mrf.mxu0 }
 0x1c0   :  { %v540_v11 = vpop.f32.mrf.mxu0 }
 0x1c1   :  { %v443_v63 = vpop.f32.mrf.mxu1 }
 0x1c2   :  { %v533_v5 = vadd.f32 %v532_v4, %v443_v63  ;;  %v544_v54 = vpop.f32.mrf.mxu0 }
 0x1c3   :  { %v445_v60 = vpop.f32.mrf.mxu1 }
 0x1c4   :  { %v535_v41 = vadd.f32 %v534_v18, %v445_v60  ;;  %v546_v29 = vpop.f32.mrf.mxu0 }
 0x1c5   :  { %v449_v26 = vpop.f32.mrf.mxu1 }
 0x1c6   :  { %v539_v24 = vadd.f32 %v538_v25, %v449_v26 }
 0x1c7   :  { %v451_v58 = vpop.f32.mrf.mxu1  ;;  %v550_v8 = vpop.f32.mrf.mxu0 }
 0x1c8   :  { %v541_v12 = vadd.f32 %v540_v11, %v451_v58 }
 0x1c9   :  { %v552_v26 = vpop.f32.mrf.mxu0 }
 0x1cb   :  { %v455_v0 = vpop.f32.mrf.mxu1 }
 0x1cd   :  { %v457_v39 = vpop.f32.mrf.mxu1 }
 0x1ce   :  { %v547_v18 = vadd.f32 %v546_v29, %v457_v39 }
 0x1cf   :  { %v461_v56 = vpop.f32.mrf.mxu1 }
 0x1d1   :  { %v463_v9 = vpop.f32.mrf.mxu1 }
 0x201   :  { %v709_v52 = vpop.f32.mrf.mxu1 }
 0x202   :  { %v732_v37 = vadd.f32 %v709_v52, %v533_v5  ;;  %v545_v52 = vadd.f32 %v544_v54, %v455_v0 }
 0x203   :  { %v711_v33 = vpop.f32.mrf.mxu1 }
 0x204   :  { %v752_v19 = vadd.f32 %v4604_v51, %v732_v37  ;;  %v733_v16 = vadd.f32 %v711_v33, %v535_v41  ;;  %v551_v41 = vadd.f32 %v550_v8, %v461_v56 }
 0x205   :  { %v715_v14 = vpop.f32.mrf.mxu1 }
 0x206   :  { %v760_v53 = vmax.f32 %v752_v19, 0.0  ;;  %v753_v63 = vadd.f32 %v4608_v45, %v733_v16  ;;  %v734_v4 = vadd.f32 %v715_v14, %v539_v24 }
 0x207   :  { %v717_v6 = vpop.f32.mrf.mxu1 }
 0x208   :  { %v776_v1 = vrot.slane %v760_v53, 6  ;;  %v761_v47 = vmax.f32 %v753_v63, 0.0  ;;  %v754_v49 = vadd.f32 %v4604_v51, %v734_v4  ;;  %v735_v60 = vadd.f32 %v717_v6, %v541_v12  ;;  %v4625_v53 = vld [vmem:[#allocation2 + $0x2f0] sm:$0xff] }
 0x209   :  { %v721_v5 = vpop.f32.mrf.mxu1  ;;  %v553_v6 = vadd.f32 %v552_v26, %v463_v9 }
 0x20a   :  { %v777_v25 = vrot.slane %v761_v47, 6  ;;  %v762_v37 = vmax.f32 %v754_v49, 0.0  ;;  %v755_v33 = vadd.f32 %v4608_v45, %v735_v60  ;;  %v736_v11 = vadd.f32 %v721_v5, %v545_v52  ;;  %v4628_v60 = vld [vmem:[#allocation2 + $0x2e8] sm:$0xff] }
 0x20b   :  { %v723_v19 = vpop.f32.mrf.mxu1  ;;  %v798_v16 = vsel %vm194_vm0, 0.0, %v776_v1 }
 0x20c   :  { %v778_v14 = vrot.slane %v762_v37, 6  ;;  %v763_v24 = vmax.f32 %v755_v33, 0.0  ;;  %v737_v58 = vadd.f32 %v723_v19, %v547_v18  ;;  %2966 = vmatprep.mubr.msk.f32.mxu1 %vm4194_vm1, %v777_v25  ;;  %v756_v12 = vadd.f32 %v4604_v51, %v736_v11  ;;  %v4641_v19 = vld [vmem:[#allocation2 + $0x2d8] sm:$0xff] }
 0x20d   :  { %v727_v29 = vpop.f32.mrf.mxu1  ;;  %2968 = vmatmul.mubr.msk.f32.vlgmr.msra.gmra.mxu1 %vm4194_vm1, %v776_v1  ;;  %v4621_v54 = vsel %vm194_vm0, 0.0, %v777_v25  ;;  %v1006_v9 = vrot.slane %v798_v16, 4  ;;  %v806_v37 = vrot.slane %v798_v16, 2 }
 0x20e   :  { %v780_v8 = vrot.slane %v763_v24, 6  ;;  %v757_v39 = vadd.f32 %v4608_v45, %v737_v58  ;;  %v738_v0 = vadd.f32 %v727_v29, %v551_v41  ;;  %v779_v56 = vsel %vm194_vm0, %v776_v1, %v778_v14  ;;  %1270 = vmatpush1.msra.mxu1 %v4625_v53  ;;  %v4635_v1 = vld [vmem:[#allocation2 + $0x2e0] sm:$0xff] }
 0x20f   :  { %v764_v63 = vmax.f32 %v756_v12, 0.0  ;;  %v729_v4 = vpop.f32.mrf.mxu1  ;;  %v807_v47 = vrot.slane %v779_v56, 2  ;;  %v1007_v49 = vrot.slane %v779_v56, 4  ;;  %1271 = vmatprep.subr.mxu1 %v4628_v60  ;;  %v809_v11 = vrot.slane %v4621_v54, 2 }
 0x210   :  { %v765_v52 = vmax.f32 %v757_v39, 0.0  ;;  %v758_v5 = vadd.f32 %v4604_v51, %v738_v0  ;;  %v739_v18 = vadd.f32 %v729_v4, %v553_v6  ;;  %v4633_v26 = vsel %vm194_vm0, %v777_v25, %v780_v8  ;;  %1272 = vmatpush1.msra.mxu1 %v4635_v1  ;;  %v4653_v39 = vld [vmem:[#allocation2 + $0x2d0] sm:$0xff] }
 0x211   :  { %v782_v33 = vrot.slane %v764_v63, 6  ;;  %v810_v41 = vrot.slane %v4633_v26, 2  ;;  %987 = vmatprep.mubr.f32.mxu1 %v4633_v26  ;;  %1273 = vmatprep.subr.mxu1 %v4641_v19  ;;  %v4646_v6 = vsel %vm620_vm2, %v1006_v9, %v1007_v49  ;;  %v808_v12 = vsel %vm219_vm3, %v806_v37, %v807_v47  ;;  %v4660_v9 = vld [vmem:[#allocation2 + $0x2c8] sm:$0xff] }
 0x212   :  { %v784_v24 = vrot.slane %v765_v52, 6  ;;  %v766_v58 = vmax.f32 %v758_v5, 0.0  ;;  %v759_v25 = vadd.f32 %v4608_v45, %v739_v18  ;;  %988 = vmatmul.mubr.f32.gmra.mxu1 %v779_v56 }
 0x213   :  { %v811_v16 = vsel %vm219_vm3, %v809_v11, %v810_v41  ;;  %v4651_v29 = vsel %vm194_vm0, %v778_v14, %v782_v33  ;;  %1274 = vmatpush1.msra.mxu1 %v4653_v39 }
 0x214   :  { %v786_v0 = vrot.slane %v766_v58, 6  ;;  %v767_v63 = vmax.f32 %v759_v25, 0.0  ;;  %892 = vmatprep.mubr.f32.mxu0 %v811_v16  ;;  %v4657_v4 = vsel %vm194_vm0, %v780_v8, %v784_v24  ;;  %v812_v56 = vrot.slane %v4651_v29, 2  ;;  %1275 = vmatprep.subr.mxu1 %v4660_v9  ;;  %v4679_v58 = vld [vmem:[#allocation2 + $0x2c0] sm:$0xff] }
 0x215   :  { %893 = vmatmul.mubr.f32.vlgmr.msra.gmra.mxu0 %v808_v12  ;;  %v814_v14 = vrot.slane %v4657_v4, 2  ;;  %993 = vmatprep.mubr.f32.mxu1 %v4657_v4  ;;  %v6923_v52 = vrot.slane %v4651_v29, 4  ;;  %v4800_v25 = vld [vmem:[#allocation2 + $0x200] sm:$0xff]  ;;  %v4804_v12 = vld [vmem:[#allocation2 + $0x3f8] sm:$0xff] }
 0x216   :  { %v788_v5 = vrot.slane %v767_v63, 6  ;;  %1029 = vmatpush1.msra.mxu0 %v4225_v17  ;;  %994 = vmatmul.mubr.f32.gmra.mxu1 %v4651_v29  ;;  %v787_v8 = vsel %vm194_vm0, %v782_v33, %v786_v0  ;;  %v813_v17 = vsel %vm219_vm3, %v807_v47, %v812_v56  ;;  %v4703_v47 = vld [vmem:[#allocation2 + $0x2b0] sm:$0xff]  ;;  %7571 = vst [vmem:[#allocation10_spill] sm:$0xff] %v4800_v25  ;;  %v7572_v16 = vld [vmem:[#allocation95_spill] sm:$0xff]  ;;  %7573 = vst [vmem:[#allocation11_spill] sm:$0xff] %v4804_v12 }
 0x217   :  { %1030 = vmatprep.subr.mxu0 %v4233_v61  ;;  %v815_v18 = vsel %vm219_vm3, %v810_v41, %v814_v14  ;;  %v4672_v37 = vsel %vm219_vm3, %v787_v8, 0.0  ;;  %v4677_v11 = vsel %vm620_vm2, %v1007_v49, %v6923_v52  ;;  %1276 = vmatpush1.msra.mxu1 %v4679_v58  ;;  %v7574_v0 = vld [vmem:[#allocation96_spill] sm:$0xff]  ;;  %v4808_v63 = vld [vmem:[#allocation2 + $0x3f0] sm:$0xff] }
 0x218   :  { %1031 = vmatpush1.msra.mxu0 %v4238_v2  ;;  %898 = vmatprep.mubr.f32.mxu0 %v815_v18  ;;  %v789_v61 = vsel %vm194_vm0, %v784_v24, %v788_v5  ;;  %v816_v41 = vrot.slane %v4672_v37, 2  ;;  %v4796_v24 = vld [vmem:[#allocation2 + $0x208] sm:$0xff]  ;;  %7575 = vst [vmem:[#allocation12_spill] sm:$0xff] %v4808_v63  ;;  %v7578_v5 = vld [vmem:[#allocation98_spill] sm:$0xff]  ;;  %v7580_v18 = vld [vmem:[#allocation99_spill] sm:$0xff] }
 0x219   :  { %1032 = vmatprep.subr.mxu0 %v4248_v28  ;;  %899 = vmatmul.mubr.f32.gmra.mxu0 %v813_v17  ;;  %v4687_v33 = vsel %vm219_vm3, %v789_v61, 0.0  ;;  %v4697_v28 = vld [vmem:[#allocation2 + $0x2b8] sm:$0xff]  ;;  %7569 = vst [vmem:[#allocation86_spill] sm:$0xff] %v4796_v24  ;;  %v4872_v52 = vld [vmem:[#allocation2 + $0x370] sm:$0xff] }
 0x21a   :  { %v818_v49 = vrot.slane %v4687_v33, 2  ;;  %2969 = vmatprep.mubr.msk.f32.mxu1 %vm219_vm3, %v789_v61  ;;  %1033 = vmatpush1.msra.mxu0 %v4255_v13  ;;  %v817_v13 = vsel %vm219_vm3, %v812_v56, %v816_v41  ;;  %v7576_v56 = vld [vmem:[#allocation97_spill] sm:$0xff]  ;;  %v4820_v17 = vld [vmem:[#allocation2 + $0x3d8] sm:$0xff]  ;;  %v7582_v61 = vld [vmem:[#allocation100_spill] sm:$0xff]  ;;  %7607 = vst [vmem:[#allocation27_spill] sm:$0xff] %v4872_v52 }
 0x21b   :  { %2970 = vmatmul.mubr.msk.f32.gmra.mxu1 %vm219_vm3, %v787_v8  ;;  %1034 = vmatprep.subr.mxu0 %v4261_v15  ;;  %v6924_v15 = vrot.slane %v4633_v26, 4  ;;  %v4816_v8 = vld [vmem:[#allocation2 + $0x3e0] sm:$0xff]  ;;  %7581 = vst [vmem:[#allocation14_spill] sm:$0xff] %v4820_v17 }
 0x21c   :  { %1035 = vmatpush1.msra.mxu0 %v4267_v35  ;;  %v819_v2 = vsel %vm219_vm3, %v814_v14, %v818_v49  ;;  %1277 = vmatprep.subr.mxu1 %v4697_v28  ;;  %v1009_v35 = vrot.slane %v4621_v54, 4  ;;  %v4792_v54 = vld [vmem:[#allocation2 + $0x210] sm:$0xff]  ;;  %v4812_v14 = vld [vmem:[#allocation2 + $0x3e8] sm:$0xff]  ;;  %7579 = vst [vmem:[#allocation13_spill] sm:$0xff] %v4816_v8 }
 0x21d   :  { %1036 = vmatprep.subr.mxu0 %v4270_v30  ;;  %904 = vmatprep.mubr.f32.mxu0 %v819_v2  ;;  %v4711_v30 = vld [vmem:[#allocation2 + $0x2a8] sm:$0xff]  ;;  %7567 = vst [vmem:[#allocation9_spill] sm:$0xff] %v4792_v54  ;;  %7577 = vst [vmem:[#allocation87_spill] sm:$0xff] %v4812_v14 }
 0x21e   :  { %1037 = vmatpush1.msra.mxu0 %v4276_v3  ;;  %1278 = vmatpush1.msra.mxu1 %v4703_v47  ;;  %v4715_v3 = vld [vmem:[#allocation2 + $0x2a0] sm:$0xff]  ;;  %v4828_v2 = vld [vmem:[#allocation2 + $0x3c8] sm:$0xff] }
 0x21f   :  { %905 = vmatmul.mubr.f32.gmra.mxu0 %v817_v13  ;;  %1038 = vmatprep.subr.mxu0 %v4281_v27  ;;  %v1011_v27 = vsel %vm620_vm2, %v1009_v35, %v6924_v15  ;;  %7585 = vst [vmem:[#allocation16_spill] sm:$0xff] %v4828_v2  ;;  %v7586_v13 = vld [vmem:[#allocation102_spill] sm:$0xff]  ;;  %v4832_v35 = vld [vmem:[#allocation2 + $0x3c0] sm:$0xff]  ;;  %v4876_v15 = vld [vmem:[#allocation2 + $0x368] sm:$0xff] }
 0x220   :  { %910 = vmatprep.mubr.f32.mxu0 %v818_v49  ;;  %1039 = vmatpush1.msra.mxu0 %v4285_v7  ;;  %v4724_v7 = vld [vmem:[#allocation2 + $0x298] sm:$0xff]  ;;  %v4824_v49 = vld [vmem:[#allocation2 + $0x3d0] sm:$0xff]  ;;  %7587 = vst [vmem:[#allocation17_spill] sm:$0xff] %v4832_v35  ;;  %7609 = vst [vmem:[#allocation28_spill] sm:$0xff] %v4876_v15 }
 0x221   :  { %1040 = vmatprep.subr.mxu0 %v4289_v20  ;;  %1279 = vmatprep.subr.mxu1 %v4711_v30  ;;  %v4728_v20 = vld [vmem:[#allocation2 + $0x290] sm:$0xff]  ;;  %7583 = vst [vmem:[#allocation15_spill] sm:$0xff] %v4824_v49 }
 0x222   :  { %1041 = vmatpush1.msra.mxu0 %v4294_v10  ;;  %1280 = vmatpush1.msra.mxu1 %v4715_v3  ;;  %v4732_v10 = vld [vmem:[#allocation2 + $0x288] sm:$0xff] }
 0x223   :  { %911 = vmatmul.mubr.f32.gmra.mxu0 %v816_v41  ;;  %1042 = vmatprep.subr.mxu0 %v4297_v32  ;;  %v4736_v32 = vld [vmem:[#allocation2 + $0x280] sm:$0xff]  ;;  %v7584_v41 = vld [vmem:[#allocation101_spill] sm:$0xff] }
 0x224   :  { %1043 = vmatpush1.msra.mxu0 %v4300_v31  ;;  %1092 = vmatprep.mubr.f32.mxu0 %v1011_v27  ;;  %v4740_v31 = vld [vmem:[#allocation2 + $0x278] sm:$0xff] }
 0x225   :  { %1044 = vmatprep.subr.mxu0 %v4305_v34  ;;  %1281 = vmatprep.subr.mxu1 %v4724_v7  ;;  %v4744_v34 = vld [vmem:[#allocation2 + $0x270] sm:$0xff]  ;;  %v7588_v27 = vld [vmem:[#allocation103_spill] sm:$0xff] }
 0x226   :  { %1045 = vmatpush1.msra.mxu0 %v4312_v21  ;;  %1282 = vmatpush1.msra.mxu1 %v4728_v20  ;;  %v4748_v21 = vld [vmem:[#allocation2 + $0x268] sm:$0xff] }
 0x227   :  { %1046 = vmatprep.subr.mxu0 %v4315_v22  ;;  %1283 = vmatprep.subr.mxu1 %v4732_v10  ;;  %v4752_v22 = vld [vmem:[#allocation2 + $0x260] sm:$0xff] }
 0x228   :  { %1047 = vmatpush1.msra.mxu0 %v4318_v36  ;;  %1284 = vmatpush1.msra.mxu1 %v4736_v32  ;;  %v4756_v36 = vld [vmem:[#allocation2 + $0x258] sm:$0xff] }
 0x229   :  { %1048 = vmatprep.subr.mxu0 %v4322_v38  ;;  %1285 = vmatprep.subr.mxu1 %v4740_v31  ;;  %v4760_v38 = vld [vmem:[#allocation2 + $0x250] sm:$0xff] }
 0x22a   :  { %1049 = vmatpush1.msra.mxu0 %v4326_v43  ;;  %1286 = vmatpush1.msra.mxu1 %v4744_v34  ;;  %v4764_v43 = vld [vmem:[#allocation2 + $0x248] sm:$0xff] }
 0x22b   :  { %1050 = vmatprep.subr.mxu0 %v4330_v23  ;;  %1287 = vmatprep.subr.mxu1 %v4748_v21  ;;  %v4768_v23 = vld [vmem:[#allocation2 + $0x240] sm:$0xff] }
 0x22c   :  { %1051 = vmatpush1.msra.mxu0 %v4334_v40  ;;  %1288 = vmatpush1.msra.mxu1 %v4752_v22  ;;  %v4772_v40 = vld [vmem:[#allocation2 + $0x238] sm:$0xff] }
 0x22d   :  { %1052 = vmatprep.subr.mxu0 %v4338_v42  ;;  %1289 = vmatprep.subr.mxu1 %v4756_v36  ;;  %v4776_v42 = vld [vmem:[#allocation2 + $0x230] sm:$0xff] }
 0x22e   :  { %1053 = vmatpush1.msra.mxu0 %v4342_v44  ;;  %1290 = vmatpush1.msra.mxu1 %v4760_v38  ;;  %v4780_v44 = vld [vmem:[#allocation2 + $0x228] sm:$0xff] }
 0x22f   :  { %1054 = vmatprep.subr.mxu0 %v4346_v46  ;;  %1291 = vmatprep.subr.mxu1 %v4764_v43  ;;  %v4784_v46 = vld [vmem:[#allocation2 + $0x220] sm:$0xff] }
 0x230   :  { %1055 = vmatpush1.msra.mxu0 %v4350_v48  ;;  %1292 = vmatpush1.msra.mxu1 %v4768_v23  ;;  %v7565_v48 = vld [vmem:[#allocation91_spill] sm:$0xff] }
 0x231   :  { %1056 = vmatprep.subr.mxu0 %v4354_v50  ;;  %1293 = vmatprep.subr.mxu1 %v4772_v40  ;;  %v4788_v50 = vld [vmem:[#allocation2 + $0x218] sm:$0xff] }
 0x232   :  { %1057 = vmatpush1.msra.mxu0 %v4358_v55  ;;  %1294 = vmatpush1.msra.mxu1 %v4776_v42  ;;  %v7566_v55 = vld [vmem:[#allocation92_spill] sm:$0xff] }
 0x233   :  { %1058 = vmatprep.subr.mxu0 %v4362_v57  ;;  %1295 = vmatprep.subr.mxu1 %v4780_v44  ;;  %v7568_v57 = vld [vmem:[#allocation93_spill] sm:$0xff] }
 0x234   :  { %1059 = vmatpush1.msra.mxu0 %v4366_v62  ;;  %1296 = vmatpush1.msra.mxu1 %v4784_v46  ;;  %v7570_v62 = vld [vmem:[#allocation94_spill] sm:$0xff] }
 0x235   :  { %1060 = vmatprep.subr.mxu0 %v7565_v48  ;;  %1297 = vmatprep.subr.mxu1 %v4788_v50  ;;  %v4836_v48 = vld [vmem:[#allocation2 + $0x3b8] sm:$0xff] }
 0x236   :  { %1061 = vmatpush2.msra.mxu0 %v7566_v55  ;;  %1298 = vmatpush1.msra.mxu1 %v4792_v54  ;;  %7589 = vst [vmem:[#allocation18_spill] sm:$0xff] %v4836_v48  ;;  %v7590_v55 = vld [vmem:[#allocation104_spill] sm:$0xff] }
 0x237   :  { %1062 = vmatprep.subr.mxu0 %v7568_v57  ;;  %1299 = vmatprep.subr.mxu1 %v4796_v24  ;;  %v4840_v57 = vld [vmem:[#allocation2 + $0x3b0] sm:$0xff] }
 0x238   :  { %1063 = vmatpush2.msra.mxu0 %v7570_v62  ;;  %1300 = vmatpush1.msra.mxu1 %v4800_v25  ;;  %7591 = vst [vmem:[#allocation19_spill] sm:$0xff] %v4840_v57  ;;  %v7592_v62 = vld [vmem:[#allocation105_spill] sm:$0xff] }
 0x239   :  { %1064 = vmatprep.subr.mxu0 %v7572_v16  ;;  %1301 = vmatprep.subr.mxu1 %v4804_v12  ;;  %v4844_v16 = vld [vmem:[#allocation2 + $0x3a8] sm:$0xff] }
 0x23a   :  { %1065 = vmatpush2.msra.mxu0 %v7574_v0  ;;  %1302 = vmatpush2.msra.mxu1 %v4808_v63  ;;  %7593 = vst [vmem:[#allocation20_spill] sm:$0xff] %v4844_v16  ;;  %v7594_v0 = vld [vmem:[#allocation106_spill] sm:$0xff] }
 0x23b   :  { %1066 = vmatprep.subr.mxu0 %v7576_v56  ;;  %1303 = vmatprep.subr.mxu1 %v4812_v14  ;;  %v4848_v56 = vld [vmem:[#allocation2 + $0x3a0] sm:$0xff] }
 0x23c   :  { %1067 = vmatpush2.msra.mxu0 %v7578_v5  ;;  %1304 = vmatpush2.msra.mxu1 %v4816_v8  ;;  %7595 = vst [vmem:[#allocation21_spill] sm:$0xff] %v4848_v56  ;;  %v7596_v5 = vld [vmem:[#allocation107_spill] sm:$0xff] }
 0x23d   :  { %1068 = vmatprep.subr.mxu0 %v7580_v18  ;;  %1305 = vmatprep.subr.mxu1 %v4820_v17  ;;  %v4852_v18 = vld [vmem:[#allocation2 + $0x398] sm:$0xff] }
 0x23e   :  { %1069 = vmatpush2.msra.mxu0 %v7582_v61  ;;  %1306 = vmatpush2.msra.mxu1 %v4824_v49  ;;  %7597 = vst [vmem:[#allocation22_spill] sm:$0xff] %v4852_v18  ;;  %v7598_v61 = vld [vmem:[#allocation108_spill] sm:$0xff] }
 0x23f   :  { %1070 = vmatprep.subr.mxu0 %v7584_v41  ;;  %1307 = vmatprep.subr.mxu1 %v4828_v2  ;;  %v4856_v41 = vld [vmem:[#allocation2 + $0x390] sm:$0xff] }
 0x240   :  { %1071 = vmatpush2.msra.mxu0 %v7586_v13  ;;  %1308 = vmatpush2.msra.mxu1 %v4832_v35  ;;  %7599 = vst [vmem:[#allocation23_spill] sm:$0xff] %v4856_v41  ;;  %v7600_v13 = vld [vmem:[#allocation109_spill] sm:$0xff] }
 0x241   :  { %1072 = vmatprep.subr.mxu0 %v7588_v27  ;;  %1309 = vmatprep.subr.mxu1 %v4836_v48  ;;  %v4860_v27 = vld [vmem:[#allocation2 + $0x388] sm:$0xff] }
 0x242   :  { %1073 = vmatpush2.msra.mxu0 %v7590_v55  ;;  %1310 = vmatpush2.msra.mxu1 %v4840_v57  ;;  %7601 = vst [vmem:[#allocation24_spill] sm:$0xff] %v4860_v27  ;;  %v7602_v55 = vld [vmem:[#allocation35_spill] sm:$0xff] }
 0x243   :  { %1074 = vmatprep.subr.mxu0 %v7592_v62  ;;  %1311 = vmatprep.subr.mxu1 %v4844_v16  ;;  %v4864_v62 = vld [vmem:[#allocation2 + $0x380] sm:$0xff] }
 0x244   :  { %1075 = vmatpush2.msra.mxu0 %v7594_v0  ;;  %1312 = vmatpush2.msra.mxu1 %v4848_v56  ;;  %7603 = vst [vmem:[#allocation25_spill] sm:$0xff] %v4864_v62  ;;  %v7604_v0 = vld [vmem:[#allocation37_spill] sm:$0xff] }
 0x245   :  { %1076 = vmatprep.subr.mxu0 %v7596_v5  ;;  %1313 = vmatprep.subr.mxu1 %v4852_v18  ;;  %v4868_v5 = vld [vmem:[#allocation2 + $0x378] sm:$0xff] }
 0x246   :  { %1077 = vmatpush2.msra.mxu0 %v7598_v61  ;;  %1314 = vmatpush2.msra.mxu1 %v4856_v41  ;;  %7605 = vst [vmem:[#allocation26_spill] sm:$0xff] %v4868_v5  ;;  %v7606_v61 = vld [vmem:[#allocation39_spill] sm:$0xff] }
 0x247   :  { %1078 = vmatprep.subr.mxu0 %v7600_v13  ;;  %1315 = vmatprep.subr.mxu1 %v4860_v27  ;;  %v7608_v13 = vld [vmem:[#allocation41_spill] sm:$0xff] }
 0x248   :  { %1079 = vmatpush2.msra.mxu0 %v7602_v55  ;;  %1316 = vmatpush2.msra.mxu1 %v4864_v62  ;;  %v7610_v55 = vld [vmem:[#allocation60_spill] sm:$0xff] }
 0x249   :  { %1080 = vmatprep.subr.mxu0 %v7604_v0  ;;  %1317 = vmatprep.subr.mxu1 %v4868_v5  ;;  %v4880_v62 = vld [vmem:[#allocation2 + $0x360] sm:$0xff]  ;;  %v7612_v0 = vld [vmem:[#allocation62_spill] sm:$0xff] }
 0x24a   :  { %1081 = vmatpush2.msra.mxu0 %v7606_v61  ;;  %1318 = vmatpush2.msra.mxu1 %v4872_v52  ;;  %7611 = vst [vmem:[#allocation29_spill] sm:$0xff] %v4880_v62  ;;  %v4884_v5 = vld [vmem:[#allocation2 + $0x358] sm:$0xff]  ;;  %v7614_v61 = vld [vmem:[#allocation64_spill] sm:$0xff]  ;;  %v4888_v52 = vld [vmem:[#allocation2 + $0x350] sm:$0xff] }
 0x24b   :  { %1082 = vmatprep.subr.mxu0 %v7608_v13  ;;  %1319 = vmatprep.subr.mxu1 %v4876_v15  ;;  %7613 = vst [vmem:[#allocation30_spill] sm:$0xff] %v4884_v5  ;;  %7615 = vst [vmem:[#allocation31_spill] sm:$0xff] %v4888_v52  ;;  %v7616_v13 = vld [vmem:[#allocation66_spill] sm:$0xff]  ;;  %v4892_v15 = vld [vmem:[#allocation2 + $0x348] sm:$0xff] }
 0x24c   :  { %1083 = vmatpush2.msra.mxu0 %v7610_v55  ;;  %1320 = vmatpush2.msra.mxu1 %v4880_v62  ;;  %7617 = vst [vmem:[#allocation32_spill] sm:$0xff] %v4892_v15  ;;  %v7618_v55 = vld [vmem:[#allocation68_spill] sm:$0xff] }
 0x24d   :  { %1084 = vmatprep.subr.mxu0 %v7612_v0  ;;  %1321 = vmatprep.subr.mxu1 %v4884_v5  ;;  %v4896_v62 = vld [vmem:[#allocation2 + $0x340] sm:$0xff]  ;;  %v1014_v0 = vrot.slane %v4657_v4, 4  ;;  %v7620_v5 = vld [vmem:[#allocation70_spill] sm:$0xff] }
 0x24e   :  { %1085 = vmatpush2.msra.mxu0 %v7614_v61  ;;  %1322 = vmatpush2.msra.mxu1 %v4888_v52  ;;  %7619 = vst [vmem:[#allocation33_spill] sm:$0xff] %v4896_v62  ;;  %v4901_v61 = vld [vmem:[#allocation2 + $0x338] sm:$0xff]  ;;  %v7622_v52 = vld [vmem:[#allocation72_spill] sm:$0xff] }
 0x24f   :  { %1086 = vmatprep.subr.mxu0 %v7616_v13  ;;  %1323 = vmatprep.subr.mxu1 %v4892_v15  ;;  %7621 = vst [vmem:[#allocation34_spill] sm:$0xff] %v4901_v61  ;;  %v4905_v13 = vld [vmem:[#allocation2 + $0x330] sm:$0xff]  ;;  %v4913_v4 = vld [vmem:[#allocation2 + $0x320] sm:$0xff] }
 0x250   :  { %1087 = vmatpush2.msra.mxu0 %v7618_v55  ;;  %1324 = vmatpush2.msra.mxu1 %v4896_v62  ;;  %7623 = vst [vmem:[#allocation36_spill] sm:$0xff] %v4905_v13  ;;  %v7624_v15 = vld [vmem:[#allocation74_spill] sm:$0xff]  ;;  %v4909_v55 = vld [vmem:[#allocation2 + $0x328] sm:$0xff]  ;;  %7627 = vst [vmem:[#allocation40_spill] sm:$0xff] %v4913_v4 }
 0x251   :  { %1088 = vmatprep.subr.mxu0 %v7620_v5  ;;  %1325 = vmatprep.subr.mxu1 %v4901_v61  ;;  %7625 = vst [vmem:[#allocation38_spill] sm:$0xff] %v4909_v55  ;;  %v7626_v62 = vld [vmem:[#allocation76_spill] sm:$0xff]  ;;  %v1018_v5 = vrot.slane %v4687_v33, 4  ;;  %v7629_v61 = vld [vmem:[#allocation78_spill] sm:$0xff] }
 0x252   :  { %1089 = vmatpush2.msra.mxu0 %v7622_v52  ;;  %1326 = vmatpush2.msra.mxu1 %v4905_v13  ;;  %v7628_v52 = vrot.slane %v4633_v26, 4  ;;  %v7633_v33 = vld [vmem:[#allocation82_spill] sm:$0xff] }
 0x253   :  { %1090 = vmatprep.subr.mxu0 %v7624_v15  ;;  %1327 = vmatprep.subr.mxu1 %v4909_v55  ;;  %v7630_v15 = vld [vmem:[#allocation80_spill] sm:$0xff]  ;;  %v7631_v55 = vld [vmem:[#allocation81_spill] sm:$0xff]  ;;  %v1019_v26 = vsel %vm620_vm2, %v1014_v0, %v1018_v5 }
 0x254   :  { %1091 = vmatpush2.msra.mxu0 %v7626_v62  ;;  %1328 = vmatpush2.msra.mxu1 %v4913_v4  ;;  %v1015_v13 = vsel %vm620_vm2, %v7628_v52, %v1014_v0  ;;  %v4924_v62 = vld [vmem:[#allocation2 + $0x318] sm:$0xff]  ;;  %v1016_v4 = vrot.slane %v4672_v37, 4  ;;  %v4939_v37 = vld [vmem:[#allocation2 + $0x308] sm:$0xff]  ;;  %v7639_v52 = vrot.slane %v4651_v29, 4  ;;  %v4948_v0 = vld [vmem:[#allocation2 + $0x300] sm:$0xff] }
 0x255   :  { %1093 = vmatmul.mubr.f32.vlgmr.msra.gmra.mxu0 %v4646_v6  ;;  %1346 = vmatprep.subr.mxu0 %v7629_v61  ;;  %7632 = vst [vmem:[#allocation42_spill] sm:$0xff] %v4924_v62  ;;  %v4929_v6 = vld [vmem:[#allocation2 + $0x310] sm:$0xff]  ;;  %7638 = vst [vmem:[#allocation45_spill] sm:$0xff] %v4939_v37  ;;  %v4957_v29 = vld [vmem:[#allocation2 + $0xa8] sm:$0xff] }
 0x256   :  { %1098 = vmatprep.mubr.f32.mxu0 %v1015_v13  ;;  %1347 = vmatpush1.msra.mxu0 %v7630_v15  ;;  %7634 = vst [vmem:[#allocation43_spill] sm:$0xff] %v4929_v6  ;;  %v7635_v61 = vld [vmem:[#allocation90_spill] sm:$0xff]  ;;  %v7636_v13 = vld [vmem:[#allocation83_spill] sm:$0xff]  ;;  %v1017_v15 = vsel %vm620_vm2, %v7639_v52, %v1016_v4  ;;  %7641 = vst [vmem:[#allocation47_spill] sm:$0xff] %v4948_v0 }
 0x257   :  { %1348 = vmatprep.subr.mxu0 %v7631_v55  ;;  %1329 = vmatprep.subr.mxu1 %v4924_v62  ;;  %v4936_v55 = vld [vmem:[#allocation2 + $0xc8] sm:$0xff]  ;;  %7644 = vst [vmem:[#allocation50_spill] sm:$0xff] %v4957_v29  ;;  %v4966_v52 = vld [vmem:[#allocation2 + $0x98] sm:$0xff] }
 0x258   :  { %1349 = vmatpush1.msra.mxu0 %v7633_v33  ;;  %1330 = vmatpush2.msra.mxu1 %v4929_v6  ;;  %7637 = vst [vmem:[#allocation44_spill] sm:$0xff] %v4936_v55  ;;  %v4951_v33 = vld [vmem:[#allocation2 + $0xb8] sm:$0xff]  ;;  %7647 = vst [vmem:[#allocation53_spill] sm:$0xff] %v4966_v52 }
 0x259   :  { %1099 = vmatmul.mubr.f32.gmra.mxu0 %v4677_v11  ;;  %1350 = vmatprep.subr.mxu0 %v7635_v61  ;;  %v4945_v11 = vld [vmem:[#allocation2 + $0xc0] sm:$0xff]  ;;  %7642 = vst [vmem:[#allocation48_spill] sm:$0xff] %v4951_v33  ;;  %v4960_v61 = vld [vmem:[#allocation2 + $0x4f8] sm:$0xff] }
 0x25a   :  { %1104 = vmatprep.mubr.f32.mxu0 %v1019_v26  ;;  %1351 = vmatpush1.msra.mxu0 %v7636_v13  ;;  %7640 = vst [vmem:[#allocation46_spill] sm:$0xff] %v4945_v11  ;;  %v4954_v26 = vld [vmem:[#allocation2 + $0xb0] sm:$0xff]  ;;  %7645 = vst [vmem:[#allocation51_spill] sm:$0xff] %v4960_v61  ;;  %v4963_v13 = vld [vmem:[#allocation2 + $0xa0] sm:$0xff] }
 0x25b   :  { %1352 = vmatprep.subr.mxu0 %v4936_v55  ;;  %1331 = vmatprep.subr.mxu1 %v4939_v37  ;;  %7643 = vst [vmem:[#allocation49_spill] sm:$0xff] %v4954_v26  ;;  %7646 = vst [vmem:[#allocation52_spill] sm:$0xff] %v4963_v13 }
 0x25c   :  { %1353 = vmatpush1.msra.mxu0 %v4945_v11  ;;  %1332 = vmatpush2.msra.mxu1 %v4948_v0 }
 0x25d   :  { %1105 = vmatmul.mubr.f32.gmra.mxu0 %v1017_v15  ;;  %1354 = vmatprep.subr.mxu0 %v4951_v33  ;;  %v4972_v15 = vld [vmem:[#allocation2 + $0x88] sm:$0xff] }
 0x25e   :  { %1110 = vmatprep.mubr.f32.mxu0 %v1018_v5  ;;  %1355 = vmatpush1.msra.mxu0 %v4954_v26  ;;  %v4969_v5 = vld [vmem:[#allocation2 + $0x90] sm:$0xff]  ;;  %7649 = vst [vmem:[#allocation55_spill] sm:$0xff] %v4972_v15  ;;  %v4978_v26 = vld [vmem:[#allocation2 + $0x78] sm:$0xff] }
 0x25f   :  { %1356 = vmatprep.subr.mxu0 %v4957_v29  ;;  %1437 = vmatprep.subr.mxu1 %v4960_v61  ;;  %7648 = vst [vmem:[#allocation54_spill] sm:$0xff] %v4969_v5  ;;  %v4975_v29 = vld [vmem:[#allocation2 + $0x80] sm:$0xff]  ;;  %7651 = vst [vmem:[#allocation57_spill] sm:$0xff] %v4978_v26 }
 0x260   :  { %1357 = vmatpush1.msra.mxu0 %v4963_v13  ;;  %7650 = vst [vmem:[#allocation56_spill] sm:$0xff] %v4975_v29 }
 0x261   :  { %1111 = vmatmul.mubr.f32.gmra.mxu0 %v1016_v4  ;;  %1358 = vmatprep.subr.mxu0 %v4966_v52  ;;  %v4981_v4 = vld [vmem:[#allocation2 + $0x70] sm:$0xff]  ;;  %v4984_v52 = vld [vmem:[#allocation2 + $0x68] sm:$0xff] }
 0x262   :  { %1359 = vmatpush1.msra.mxu0 %v4969_v5  ;;  %7652 = vst [vmem:[#allocation58_spill] sm:$0xff] %v4981_v4  ;;  %7653 = vst [vmem:[#allocation59_spill] sm:$0xff] %v4984_v52  ;;  %v4987_v5 = vld [vmem:[#allocation2 + $0x60] sm:$0xff] }
 0x263   :  { %1360 = vmatprep.subr.mxu0 %v4972_v15  ;;  %7654 = vst [vmem:[#allocation61_spill] sm:$0xff] %v4987_v5  ;;  %v4990_v15 = vld [vmem:[#allocation2 + $0x58] sm:$0xff] }
 0x264   :  { %1361 = vmatpush1.msra.mxu0 %v4975_v29  ;;  %7655 = vst [vmem:[#allocation63_spill] sm:$0xff] %v4990_v15  ;;  %v4993_v29 = vld [vmem:[#allocation2 + $0x50] sm:$0xff] }
 0x265   :  { %1362 = vmatprep.subr.mxu0 %v4978_v26  ;;  %7656 = vst [vmem:[#allocation65_spill] sm:$0xff] %v4993_v29  ;;  %v4996_v26 = vld [vmem:[#allocation2 + $0x48] sm:$0xff] }
 0x266   :  { %1363 = vmatpush1.msra.mxu0 %v4981_v4  ;;  %7657 = vst [vmem:[#allocation67_spill] sm:$0xff] %v4996_v26  ;;  %v4999_v4 = vld [vmem:[#allocation2 + $0x40] sm:$0xff] }
 0x267   :  { %1364 = vmatprep.subr.mxu0 %v4984_v52  ;;  %7658 = vst [vmem:[#allocation69_spill] sm:$0xff] %v4999_v4  ;;  %v5002_v52 = vld [vmem:[#allocation2 + $0x38] sm:$0xff] }
 0x268   :  { %1365 = vmatpush1.msra.mxu0 %v4987_v5  ;;  %7659 = vst [vmem:[#allocation71_spill] sm:$0xff] %v5002_v52  ;;  %v5005_v5 = vld [vmem:[#allocation2 + $0x30] sm:$0xff] }
 0x269   :  { %1366 = vmatprep.subr.mxu0 %v4990_v15  ;;  %7660 = vst [vmem:[#allocation73_spill] sm:$0xff] %v5005_v5  ;;  %v5008_v15 = vld [vmem:[#allocation2 + $0x28] sm:$0xff] }
 0x26a   :  { %1367 = vmatpush1.msra.mxu0 %v4993_v29  ;;  %7661 = vst [vmem:[#allocation75_spill] sm:$0xff] %v5008_v15  ;;  %v5011_v29 = vld [vmem:[#allocation2 + $0x20] sm:$0xff] }
 0x26b   :  { %1368 = vmatprep.subr.mxu0 %v4996_v26  ;;  %7662 = vst [vmem:[#allocation77_spill] sm:$0xff] %v5011_v29  ;;  %v5014_v26 = vld [vmem:[#allocation2 + $0x18] sm:$0xff] }
 0x26c   :  { %1369 = vmatpush1.msra.mxu0 %v4999_v4  ;;  %7663 = vst [vmem:[#allocation79_spill] sm:$0xff] %v5014_v26  ;;  %v5017_v4 = vld [vmem:[#allocation2 + $0x10] sm:$0xff] }
 0x26d   :  { %1370 = vmatprep.subr.mxu0 %v5002_v52  ;;  %7664 = vst [vmem:[#allocation88_spill] sm:$0xff] %v5017_v4  ;;  %v5020_v52 = vld [vmem:[#allocation2 + $0x8] sm:$0xff] }
 0x26e   :  { %1371 = vmatpush1.msra.mxu0 %v5005_v5  ;;  %7665 = vst [vmem:[#allocation89_spill] sm:$0xff] %v5020_v52  ;;  %v5023_v5 = vld [vmem:[#allocation2] sm:$0xff] }
 0x26f   :  { %1372 = vmatprep.subr.mxu0 %v5008_v15  ;;  %7666 = vst [vmem:[#allocation91_spill] sm:$0xff] %v5023_v5  ;;  %v5026_v15 = vld [vmem:[#allocation2 + $0x1f8] sm:$0xff] }
 0x270   :  { %1373 = vmatpush1.msra.mxu0 %v5011_v29  ;;  %7667 = vst [vmem:[#allocation92_spill] sm:$0xff] %v5026_v15  ;;  %v5029_v29 = vld [vmem:[#allocation2 + $0x1f0] sm:$0xff] }
 0x271   :  { %1374 = vmatprep.subr.mxu0 %v5014_v26  ;;  %7668 = vst [vmem:[#allocation93_spill] sm:$0xff] %v5029_v29  ;;  %v5032_v26 = vld [vmem:[#allocation2 + $0x1e8] sm:$0xff] }
 0x272   :  { %1375 = vmatpush1.msra.mxu0 %v5017_v4  ;;  %7669 = vst [vmem:[#allocation94_spill] sm:$0xff] %v5032_v26  ;;  %v5035_v4 = vld [vmem:[#allocation2 + $0x1e0] sm:$0xff] }
 0x273   :  { %1376 = vmatprep.subr.mxu0 %v5020_v52  ;;  %7670 = vst [vmem:[#allocation95_spill] sm:$0xff] %v5035_v4  ;;  %v5038_v52 = vld [vmem:[#allocation2 + $0x1d8] sm:$0xff] }
 0x274   :  { %1377 = vmatpush1.msra.mxu0 %v5023_v5  ;;  %7671 = vst [vmem:[#allocation96_spill] sm:$0xff] %v5038_v52  ;;  %v5041_v5 = vld [vmem:[#allocation2 + $0x1d0] sm:$0xff] }
 0x275   :  { %1378 = vmatprep.subr.mxu0 %v5026_v15  ;;  %7672 = vst [vmem:[#allocation97_spill] sm:$0xff] %v5041_v5  ;;  %v5044_v15 = vld [vmem:[#allocation2 + $0x1c8] sm:$0xff] }
 0x276   :  { %1379 = vmatpush2.msra.mxu0 %v5029_v29  ;;  %7673 = vst [vmem:[#allocation98_spill] sm:$0xff] %v5044_v15  ;;  %v5047_v29 = vld [vmem:[#allocation2 + $0x1c0] sm:$0xff] }
 0x277   :  { %1380 = vmatprep.subr.mxu0 %v5032_v26  ;;  %7674 = vst [vmem:[#allocation99_spill] sm:$0xff] %v5047_v29  ;;  %v5050_v26 = vld [vmem:[#allocation2 + $0x1b8] sm:$0xff] }
 0x278   :  { %1381 = vmatpush2.msra.mxu0 %v5035_v4  ;;  %7675 = vst [vmem:[#allocation100_spill] sm:$0xff] %v5050_v26  ;;  %v5053_v4 = vld [vmem:[#allocation2 + $0x1b0] sm:$0xff] }
 0x279   :  { %1382 = vmatprep.subr.mxu0 %v5038_v52  ;;  %7676 = vst [vmem:[#allocation101_spill] sm:$0xff] %v5053_v4  ;;  %v5056_v52 = vld [vmem:[#allocation2 + $0x1a8] sm:$0xff] }
 0x27a   :  { %1383 = vmatpush2.msra.mxu0 %v5041_v5  ;;  %7677 = vst [vmem:[#allocation102_spill] sm:$0xff] %v5056_v52  ;;  %v5059_v5 = vld [vmem:[#allocation2 + $0x1a0] sm:$0xff] }
 0x27b   :  { %1384 = vmatprep.subr.mxu0 %v5044_v15  ;;  %7678 = vst [vmem:[#allocation103_spill] sm:$0xff] %v5059_v5  ;;  %v5062_v15 = vld [vmem:[#allocation2 + $0x198] sm:$0xff] }
 0x27c   :  { %1385 = vmatpush2.msra.mxu0 %v5047_v29  ;;  %7679 = vst [vmem:[#allocation104_spill] sm:$0xff] %v5062_v15  ;;  %v5065_v29 = vld [vmem:[#allocation2 + $0x190] sm:$0xff] }
 0x27d   :  { %1386 = vmatprep.subr.mxu0 %v5050_v26  ;;  %7680 = vst [vmem:[#allocation105_spill] sm:$0xff] %v5065_v29  ;;  %v5068_v26 = vld [vmem:[#allocation2 + $0x188] sm:$0xff] }
 0x27e   :  { %1387 = vmatpush2.msra.mxu0 %v5053_v4  ;;  %7681 = vst [vmem:[#allocation106_spill] sm:$0xff] %v5068_v26  ;;  %v5071_v4 = vld [vmem:[#allocation2 + $0x180] sm:$0xff] }
 0x27f   :  { %1388 = vmatprep.subr.mxu0 %v5056_v52  ;;  %7682 = vst [vmem:[#allocation107_spill] sm:$0xff] %v5071_v4  ;;  %v5074_v52 = vld [vmem:[#allocation2 + $0x178] sm:$0xff] }
 0x280   :  { %1389 = vmatpush2.msra.mxu0 %v5059_v5  ;;  %7683 = vst [vmem:[#allocation108_spill] sm:$0xff] %v5074_v52  ;;  %v5077_v5 = vld [vmem:[#allocation2 + $0x170] sm:$0xff] }
 0x281   :  { %1390 = vmatprep.subr.mxu0 %v5062_v15  ;;  %7684 = vst [vmem:[#allocation109_spill] sm:$0xff] %v5077_v5  ;;  %v5080_v15 = vld [vmem:[#allocation2 + $0x168] sm:$0xff] }
 0x282   :  { %1391 = vmatpush2.msra.mxu0 %v5065_v29  ;;  %7685 = vst [vmem:[#allocation35_spill] sm:$0xff] %v5080_v15  ;;  %v5083_v29 = vld [vmem:[#allocation2 + $0x160] sm:$0xff] }
 0x283   :  { %1392 = vmatprep.subr.mxu0 %v5068_v26  ;;  %7686 = vst [vmem:[#allocation37_spill] sm:$0xff] %v5083_v29  ;;  %v5086_v26 = vld [vmem:[#allocation2 + $0x158] sm:$0xff] }
 0x284   :  { %1393 = vmatpush2.msra.mxu0 %v5071_v4  ;;  %7687 = vst [vmem:[#allocation39_spill] sm:$0xff] %v5086_v26  ;;  %v5089_v4 = vld [vmem:[#allocation2 + $0x150] sm:$0xff] }
 0x285   :  { %1394 = vmatprep.subr.mxu0 %v5074_v52  ;;  %7688 = vst [vmem:[#allocation41_spill] sm:$0xff] %v5089_v4  ;;  %v5092_v52 = vld [vmem:[#allocation2 + $0x148] sm:$0xff] }
 0x286   :  { %1395 = vmatpush2.msra.mxu0 %v5077_v5  ;;  %7689 = vst [vmem:[#allocation60_spill] sm:$0xff] %v5092_v52  ;;  %v5095_v5 = vld [vmem:[#allocation2 + $0x140] sm:$0xff] }
 0x287   :  { %1396 = vmatprep.subr.mxu0 %v5080_v15  ;;  %7690 = vst [vmem:[#allocation62_spill] sm:$0xff] %v5095_v5  ;;  %v5098_v15 = vld [vmem:[#allocation2 + $0x138] sm:$0xff] }
 0x288   :  { %1397 = vmatpush2.msra.mxu0 %v5083_v29  ;;  %7691 = vst [vmem:[#allocation64_spill] sm:$0xff] %v5098_v15  ;;  %v5101_v29 = vld [vmem:[#allocation2 + $0x130] sm:$0xff] }
 0x289   :  { %1398 = vmatprep.subr.mxu0 %v5086_v26  ;;  %7692 = vst [vmem:[#allocation66_spill] sm:$0xff] %v5101_v29  ;;  %v5104_v26 = vld [vmem:[#allocation2 + $0x128] sm:$0xff] }
 0x28a   :  { %1399 = vmatpush2.msra.mxu0 %v5089_v4  ;;  %7693 = vst [vmem:[#allocation68_spill] sm:$0xff] %v5104_v26  ;;  %v5107_v4 = vld [vmem:[#allocation2 + $0x120] sm:$0xff] }
 0x28b   :  { %1400 = vmatprep.subr.mxu0 %v5092_v52  ;;  %7694 = vst [vmem:[#allocation70_spill] sm:$0xff] %v5107_v4  ;;  %v5110_v52 = vld [vmem:[#allocation2 + $0x118] sm:$0xff] }
 0x28c   :  { %1401 = vmatpush2.msra.mxu0 %v5095_v5  ;;  %7695 = vst [vmem:[#allocation72_spill] sm:$0xff] %v5110_v52  ;;  %v5113_v5 = vld [vmem:[#allocation2 + $0x110] sm:$0xff] }
 0x28d   :  { %1402 = vmatprep.subr.mxu0 %v5098_v15  ;;  %7696 = vst [vmem:[#allocation74_spill] sm:$0xff] %v5113_v5  ;;  %v5116_v15 = vld [vmem:[#allocation2 + $0x108] sm:$0xff] }
 0x28e   :  { %1403 = vmatpush2.msra.mxu0 %v5101_v29  ;;  %7697 = vst [vmem:[#allocation76_spill] sm:$0xff] %v5116_v15  ;;  %v5119_v29 = vld [vmem:[#allocation2 + $0x100] sm:$0xff] }
 0x28f   :  { %1404 = vmatprep.subr.mxu0 %v5104_v26  ;;  %7698 = vst [vmem:[#allocation78_spill] sm:$0xff] %v5119_v29  ;;  %v7699_v26 = vld [vmem:[#allocation84_spill] sm:$0xff] }
 0x290   :  { %1405 = vmatpush2.msra.mxu0 %v5107_v4 }
 0x291   :  { %1406 = vmatprep.subr.mxu0 %v5110_v52 }
 0x292   :  { %1407 = vmatpush2.msra.mxu0 %v5113_v5 }
 0x293   :  { %1408 = vmatprep.subr.mxu0 %v5116_v15 }
 0x294   :  { %1409 = vmatpush2.msra.mxu0 %v5119_v29 }
 0x295   :  { %1554 = vmatprep.subr.mxu0 %v7699_v26 }
 0x2cd   :  { %v983_v55 = vpop.f32.mrf.mxu1 }
 0x2cf   :  { %v985_v61 = vpop.f32.mrf.mxu1 }
 0x2d2   :  { %v989_v37 = vpop.f32.mrf.mxu1 }
 0x2d4   :  { %v991_v6 = vpop.f32.mrf.mxu1 }
 0x2d5   :  { %v894_v13 = vpop.f32.mrf.mxu0 }
 0x2d6   :  { %v984_v27 = vadd.f32 %v983_v55, %v894_v13  ;;  %v995_v41 = vpop.f32.mrf.mxu1 }
 0x2d7   :  { %v896_v4 = vpop.f32.mrf.mxu0 }
 0x2d8   :  { %v986_v18 = vadd.f32 %v985_v61, %v896_v4  ;;  %v997_v35 = vpop.f32.mrf.mxu1 }
 0x2d9   :  { %v900_v33 = vpop.f32.mrf.mxu0 }
 0x2da   :  { %v990_v16 = vadd.f32 %v989_v37, %v900_v33 }
 0x2db   :  { %v902_v11 = vpop.f32.mrf.mxu0 }
 0x2dc   :  { %v992_v8 = vadd.f32 %v991_v6, %v902_v11 }
 0x2df   :  { %v906_v52 = vpop.f32.mrf.mxu0 }
 0x2e0   :  { %v996_v13 = vadd.f32 %v995_v41, %v906_v52 }
 0x2e1   :  { %v908_v0 = vpop.f32.mrf.mxu0 }
 0x2e2   :  { %v998_v37 = vadd.f32 %v997_v35, %v908_v0 }
 0x2e3   :  { %v912_v5 = vpop.f32.mrf.mxu0 }
 0x2e5   :  { %v914_v62 = vpop.f32.mrf.mxu0 }
 0x315   :  { %v1094_v15 = vpop.f32.mrf.mxu0 }
 0x316   :  { %v1117_v56 = vadd.f32 %v1094_v15, %v984_v27  ;;  %v1001_v15 = vpop.f32.mrf.mxu1 }
 0x317   :  { %v1096_v29 = vpop.f32.mrf.mxu0 }
 0x318   :  { %v1125_v26 = vadd.f32 %v1117_v56, %v4604_v51  ;;  %v1118_v57 = vadd.f32 %v1096_v29, %v986_v18  ;;  %v1002_v29 = vadd.f32 %v1001_v15, %v912_v5 }
 0x319   :  { %v1100_v48 = vpop.f32.mrf.mxu0 }
 0x31a   :  { %v1137_v2 = vrot.slane %v1125_v26, 2  ;;  %v1126_v49 = vadd.f32 %v1118_v57, %v4608_v45  ;;  %v1119_v17 = vadd.f32 %v1100_v48, %v990_v16  ;;  %v1143_v33 = vrot.slane %v1125_v26, 4 }
 0x31b   :  { %v1102_v14 = vpop.f32.mrf.mxu0 }
 0x31c   :  { %v1141_v63 = vmax.f32 %v1125_v26, %v1137_v2  ;;  %v1127_v55 = vadd.f32 %v1119_v17, %v4604_v51  ;;  %v1138_v12 = vrot.slane %v1126_v49, 2  ;;  %v1120_v61 = vadd.f32 %v1102_v14, %v992_v8 }
 0x31d   :  { %v1106_v27 = vpop.f32.mrf.mxu0  ;;  %v1144_v5 = vrot.slane %v1126_v49, 4 }
 0x31e   :  { %v1151_v56 = vrot.slane %v1127_v55, 4  ;;  %v1157_v18 = vrot.slane %v1127_v55, 2  ;;  %v1128_v4 = vadd.f32 %v1120_v61, %v4608_v45  ;;  %v1121_v25 = vadd.f32 %v1106_v27, %v996_v13  ;;  %v1003_v27 = vpop.f32.mrf.mxu1 }
 0x31f   :  { %v1108_v57 = vpop.f32.mrf.mxu0  ;;  %v1147_v48 = vmax.f32 %v1141_v63, %v1143_v33  ;;  %v1142_v11 = vmax.f32 %v1126_v49, %v1138_v12 }
 0x320   :  { %v1155_v16 = vmax.f32 %v1141_v63, %v1151_v56  ;;  %v1161_v6 = vmax.f32 %v1127_v55, %v1157_v18  ;;  %v1122_v2 = vadd.f32 %v1108_v57, %v998_v37  ;;  %v1152_v17 = vrot.slane %v1128_v4, 4 }
 0x321   :  { %v1158_v41 = vrot.slane %v1128_v4, 2  ;;  %v1129_v14 = vadd.f32 %v1121_v25, %v4604_v51  ;;  %v1112_v8 = vpop.f32.mrf.mxu0  ;;  %v1004_v18 = vadd.f32 %v1003_v27, %v914_v62 }
 0x322   :  { %v1163_v52 = vmax.f32 %v1161_v6, %v1151_v56  ;;  %v1199_v35 = vrot.slane %v1155_v16, 2  ;;  %v1130_v0 = vadd.f32 %v1122_v2, %v4608_v45  ;;  %v1123_v26 = vadd.f32 %v1112_v8, %v1002_v29 }
 0x323   :  { %v1156_v15 = vmax.f32 %v1142_v11, %v1152_v17  ;;  %v1162_v61 = vmax.f32 %v1128_v4, %v1158_v41  ;;  %v1167_v13 = vrot.slane %v1129_v14, 4  ;;  %v1173_v55 = vrot.slane %v1129_v14, 2  ;;  %v1114_v37 = vpop.f32.mrf.mxu0 }
 0x324   :  { %v1205_v33 = vrot.slane %v1163_v52, 4  ;;  %v1227_v63 = vsel %vm194_vm0, %v1147_v48, %v1199_v35  ;;  %v1168_v12 = vrot.slane %v1130_v0, 4  ;;  %v1148_v56 = vmax.f32 %v1142_v11, %v1144_v5 }
 0x325   :  { %v1164_v57 = vmax.f32 %v1162_v61, %v1152_v17  ;;  %v1200_v25 = vrot.slane %v1156_v15, 2  ;;  %v1171_v24 = vmax.f32 %v1161_v6, %v1167_v13  ;;  %v1131_v49 = vadd.f32 %v1123_v26, %v4604_v51 }
 0x326   :  { %v1229_v16 = vsel %vm620_vm2, %v1227_v63, %v1205_v33  ;;  %v1172_v2 = vmax.f32 %v1162_v61, %v1168_v12  ;;  %v1174_v41 = vrot.slane %v1130_v0, 2  ;;  %v1124_v8 = vadd.f32 %v1114_v37, %v1004_v18 }
 0x327   :  { %v1206_v29 = vrot.slane %v1164_v57, 4  ;;  %v1211_v4 = vrot.slane %v1171_v24, 6  ;;  %v1177_v52 = vmax.f32 %v1129_v14, %v1173_v55  ;;  %v1133_v48 = vsel %vm620_vm2, %v1131_v49, 0.0 }
 0x328   :  { %v1212_v54 = vrot.slane %v1172_v2, 6  ;;  %v1228_v35 = vsel %vm194_vm0, %v1148_v56, %v1200_v25  ;;  %v1183_v6 = vrot.slane %v1133_v48, 4  ;;  %v1189_v11 = vrot.slane %v1133_v48, 2 }
 0x329   :  { %v5135_v62 = vsel %vm219_vm3, %v1229_v16, %v1211_v4  ;;  %v1132_v17 = vadd.f32 %v1124_v8, %v4608_v45  ;;  %v1230_v26 = vsel %vm620_vm2, %v1228_v35, %v1206_v29  ;;  %v1178_v27 = vmax.f32 %v1130_v0, %v1174_v41 }
 0x32a   :  { %7700 = vst [vmem:[#allocation80_spill] sm:$0xff] %v5135_v62  ;;  %v1237_v5 = vmax.f32 %v5135_v62, 0.0  ;;  %v1187_v24 = vmax.f32 %v1177_v52, %v1183_v6  ;;  %v1193_v15 = vmax.f32 %v1133_v48, %v1189_v11  ;;  %v5142_v61 = vsel %vm219_vm3, %v1230_v26, %v1212_v54  ;;  %v5405_v62 = vld [vmem:[#allocation2 + $0x548] sm:$0xff] }
 0x32b   :  { %v1134_v14 = vsel %vm620_vm2, %v1132_v17, 0.0  ;;  %7701 = vst [vmem:[#allocation81_spill] sm:$0xff] %v5142_v61  ;;  %v1238_v55 = vmax.f32 %v5142_v61, 0.0  ;;  %v1179_v37 = vmax.f32 %v1177_v52, %v1167_v13  ;;  %v1180_v4 = vmax.f32 %v1178_v27, %v1168_v12  ;;  %v5401_v61 = vld [vmem:[#allocation2 + $0x550] sm:$0xff] }
 0x32c   :  { %v1184_v33 = vrot.slane %v1134_v14, 4  ;;  %v1190_v63 = vrot.slane %v1134_v14, 2  ;;  %v1195_v18 = vmax.f32 %v1193_v15, %v1183_v6  ;;  %v1217_v57 = vrot.slane %v1187_v24, 2 }
 0x32d   :  { %v1246_v16 = vrot.slane %v1238_v55, 6  ;;  %v1245_v2 = vrot.slane %v1237_v5, 6  ;;  %v5229_v55 = vld [vmem:[#allocation2 + $0x4a8] sm:$0xff] }
 0x32e   :  { %v1188_v25 = vmax.f32 %v1178_v27, %v1184_v33  ;;  %v1194_v56 = vmax.f32 %v1134_v14, %v1190_v63  ;;  %v1223_v49 = vrot.slane %v1195_v18, 4  ;;  %v1233_v29 = vsel %vm194_vm0, %v1179_v37, %v1217_v57  ;;  %v5200_v14 = vld [vmem:[#allocation2 + $0x4e0] sm:$0xff]  ;;  %v5210_v27 = vld [vmem:[#allocation2 + $0x4d0] sm:$0xff]  ;;  %v5269_v37 = vld [vmem:[#allocation2 + $0x458] sm:$0xff] }
 0x32f   :  { %2972 = vmatprep.mubr.msk.f32.mxu0 %vm4194_vm1, %v1246_v16  ;;  %v1255_v35 = vsel %vm194_vm0, 0.0, %v1245_v2  ;;  %v1256_v17 = vsel %vm194_vm0, 0.0, %v1246_v16  ;;  %v5225_v63 = vld [vmem:[#allocation2 + $0x4b0] sm:$0xff]  ;;  %v5277_v57 = vld [vmem:[#allocation2 + $0x448] sm:$0xff] }
 0x330   :  { %v1196_v8 = vmax.f32 %v1194_v56, %v1184_v33  ;;  %v1218_v48 = vrot.slane %v1188_v25, 2  ;;  %2974 = vmatmul.mubr.msk.f32.vlgmr.msra.gmra.mxu0 %vm4194_vm1, %v1245_v2  ;;  %v5151_v54 = vsel %vm620_vm2, %v1233_v29, %v1223_v49  ;;  %v1424_v5 = vrot.slane %v1255_v35, 4  ;;  %v5221_v33 = vld [vmem:[#allocation2 + $0x4b8] sm:$0xff]  ;;  %v5273_v18 = vld [vmem:[#allocation2 + $0x450] sm:$0xff]  ;;  %v5281_v25 = vld [vmem:[#allocation2 + $0x440] sm:$0xff] }
 0x331   :  { %7702 = vst [vmem:[#allocation82_spill] sm:$0xff] %v5151_v54  ;;  %v1239_v41 = vmax.f32 %v5151_v54, 0.0  ;;  %1555 = vmatpush1.msra.mxu0 %v4625_v53  ;;  %v1262_v24 = vrot.slane %v1256_v17, 2  ;;  %v7708_v56 = vld [vmem:[#allocation12_spill] sm:$0xff]  ;;  %v5289_v49 = vld [vmem:[#allocation2 + $0x430] sm:$0xff]  ;;  %v5397_v54 = vld [vmem:[#allocation2 + $0x558] sm:$0xff] }
 0x332   :  { %v1224_v0 = vrot.slane %v1196_v8, 4  ;;  %v1234_v13 = vsel %vm194_vm0, %v1180_v4, %v1218_v48  ;;  %1556 = vmatprep.subr.mxu0 %v4628_v60  ;;  %v7710_v29 = vld [vmem:[#allocation13_spill] sm:$0xff]  ;;  %v7711_v8 = vld [vmem:[#allocation14_spill] sm:$0xff]  ;;  %v5297_v48 = vld [vmem:[#allocation2 + $0x420] sm:$0xff] }
 0x333   :  { %v1247_v52 = vrot.slane %v1239_v41, 6  ;;  %1557 = vmatpush1.msra.mxu0 %v4635_v1  ;;  %v5293_v4 = vld [vmem:[#allocation2 + $0x428] sm:$0xff] }
 0x334   :  { %v5158_v12 = vsel %vm620_vm2, %v1234_v13, %v1224_v0  ;;  %1558 = vmatprep.subr.mxu0 %v4641_v19  ;;  %v7712_v0 = vld [vmem:[#allocation15_spill] sm:$0xff]  ;;  %v7713_v41 = vld [vmem:[#allocation16_spill] sm:$0xff] }
 0x335   :  { %7703 = vst [vmem:[#allocation90_spill] sm:$0xff] %v5158_v12  ;;  %v1240_v6 = vmax.f32 %v5158_v12, 0.0  ;;  %v5165_v11 = vsel %vm194_vm0, %v1245_v2, %v1247_v52  ;;  %1559 = vmatpush1.msra.mxu0 %v4653_v39  ;;  %v7709_v2 = vld [vmem:[#allocation87_spill] sm:$0xff]  ;;  %v5305_v52 = vld [vmem:[#allocation2 + $0x410] sm:$0xff] }
 0x336   :  { %v7019_v60 = vrot.slane %v5165_v11, 4  ;;  %1560 = vmatprep.subr.mxu0 %v4660_v9  ;;  %v1260_v19 = vrot.slane %v5165_v11, 2  ;;  %v1259_v9 = vrot.slane %v1255_v35, 2  ;;  %v5301_v13 = vld [vmem:[#allocation2 + $0x418] sm:$0xff]  ;;  %v7714_v35 = vld [vmem:[#allocation17_spill] sm:$0xff]  ;;  %v5393_v12 = vld [vmem:[#allocation2 + $0x560] sm:$0xff] }
 0x337   :  { %v1249_v53 = vrot.slane %v1240_v6, 6  ;;  %1561 = vmatpush1.msra.mxu0 %v4679_v58  ;;  %v5309_v6 = vld [vmem:[#allocation2 + $0x408] sm:$0xff] }
 0x338   :  { %v5179_v26 = vsel %vm620_vm2, %v1424_v5, %v7019_v60  ;;  %1562 = vmatprep.subr.mxu0 %v4697_v28  ;;  %v1261_v15 = vsel %vm219_vm3, %v1259_v9, %v1260_v19  ;;  %v7716_v5 = vld [vmem:[#allocation19_spill] sm:$0xff]  ;;  %v7718_v9 = vld [vmem:[#allocation21_spill] sm:$0xff] }
 0x339   :  { %v5173_v1 = vsel %vm194_vm0, %v1246_v16, %v1249_v53  ;;  %1563 = vmatpush1.msra.mxu0 %v4703_v47  ;;  %v5193_v47 = vld [vmem:[#allocation2 + $0x4f0] sm:$0xff]  ;;  %v5285_v16 = vld [vmem:[#allocation2 + $0x438] sm:$0xff]  ;;  %7751 = vst [vmem:[#allocation19_spill] sm:$0xff] %v5397_v54  ;;  %7755 = vst [vmem:[#allocation21_spill] sm:$0xff] %v5405_v62 }
 0x33a   :  { %v1263_v39 = vrot.slane %v5173_v1, 2  ;;  %1416 = vmatprep.mubr.f32.mxu0 %v5173_v1  ;;  %1564 = vmatprep.subr.mxu0 %v4711_v30  ;;  %v7020_v28 = vrot.slane %v5173_v1, 4  ;;  %v5196_v30 = vld [vmem:[#allocation2 + $0x4e8] sm:$0xff]  ;;  %v7715_v53 = vld [vmem:[#allocation18_spill] sm:$0xff] }
 0x33b   :  { %1417 = vmatmul.mubr.f32.gmra.mxu0 %v5165_v11  ;;  %v5385_v60 = vld [vmem:[#allocation2 + $0x570] sm:$0xff]  ;;  %7749 = vst [vmem:[#allocation18_spill] sm:$0xff] %v5393_v12 }
 0x33c   :  { %v1264_v58 = vsel %vm219_vm3, %v1262_v24, %v1263_v39  ;;  %1565 = vmatpush1.msra.mxu0 %v4715_v3  ;;  %v1427_v3 = vrot.slane %v1256_v17, 4  ;;  %v5313_v17 = vld [vmem:[#allocation2 + $0x400] sm:$0xff]  ;;  %v5321_v24 = vld [vmem:[#allocation2 + $0x5f0] sm:$0xff]  ;;  %7745 = vst [vmem:[#allocation16_spill] sm:$0xff] %v5385_v60 }
 0x33d   :  { %1333 = vmatprep.mubr.f32.mxu1 %v1264_v58  ;;  %1566 = vmatprep.subr.mxu0 %v4724_v7  ;;  %v5204_v7 = vld [vmem:[#allocation2 + $0x4d8] sm:$0xff]  ;;  %v5325_v58 = vld [vmem:[#allocation2 + $0x5e8] sm:$0xff] }
 0x33e   :  { %1334 = vmatmul.mubr.f32.vlgmr.msra.gmra.mxu1 %v1261_v15  ;;  %1567 = vmatpush1.msra.mxu0 %v4728_v20  ;;  %v1429_v20 = vsel %vm620_vm2, %v1427_v3, %v7020_v28  ;;  %v7719_v15 = vld [vmem:[#allocation22_spill] sm:$0xff]  ;;  %v5329_v3 = vld [vmem:[#allocation2 + $0x5e0] sm:$0xff]  ;;  %v5389_v28 = vld [vmem:[#allocation2 + $0x568] sm:$0xff] }
 0x33f   :  { %1438 = vmatpush1.msra.mxu1 %v5193_v47  ;;  %1339 = vmatprep.mubr.f32.mxu1 %v1263_v39  ;;  %v7717_v39 = vld [vmem:[#allocation20_spill] sm:$0xff]  ;;  %7747 = vst [vmem:[#allocation17_spill] sm:$0xff] %v5389_v28 }
 0x340   :  { %1439 = vmatprep.subr.mxu1 %v5196_v30  ;;  %1568 = vmatprep.subr.mxu0 %v4732_v10  ;;  %v5213_v10 = vld [vmem:[#allocation2 + $0x4c8] sm:$0xff]  ;;  %7753 = vst [vmem:[#allocation20_spill] sm:$0xff] %v5401_v61 }
 0x341   :  { %1440 = vmatpush1.msra.mxu1 %v5200_v14  ;;  %1569 = vmatpush1.msra.mxu0 %v4736_v32  ;;  %v5217_v32 = vld [vmem:[#allocation2 + $0x4c0] sm:$0xff] }
 0x342   :  { %1441 = vmatprep.subr.mxu1 %v5204_v7  ;;  %1340 = vmatmul.mubr.f32.gmra.mxu1 %v1260_v19  ;;  %v5317_v19 = vld [vmem:[#allocation2 + $0x5f8] sm:$0xff] }
 0x343   :  { %1442 = vmatpush1.msra.mxu1 %v5210_v27  ;;  %1501 = vmatprep.mubr.f32.mxu1 %v1429_v20  ;;  %v7720_v20 = vld [vmem:[#allocation23_spill] sm:$0xff] }
 0x344   :  { %1443 = vmatprep.subr.mxu1 %v5213_v10  ;;  %1570 = vmatprep.subr.mxu0 %v4740_v31  ;;  %v5233_v31 = vld [vmem:[#allocation2 + $0x4a0] sm:$0xff] }
 0x345   :  { %1444 = vmatpush1.msra.mxu1 %v5217_v32  ;;  %1571 = vmatpush1.msra.mxu0 %v4744_v34  ;;  %v5237_v34 = vld [vmem:[#allocation2 + $0x498] sm:$0xff] }
 0x346   :  { %1445 = vmatprep.subr.mxu1 %v5221_v33  ;;  %1572 = vmatprep.subr.mxu0 %v4748_v21  ;;  %v5241_v21 = vld [vmem:[#allocation2 + $0x490] sm:$0xff] }
 0x347   :  { %1446 = vmatpush1.msra.mxu1 %v5225_v63  ;;  %1573 = vmatpush1.msra.mxu0 %v4752_v22  ;;  %v5245_v22 = vld [vmem:[#allocation2 + $0x488] sm:$0xff] }
 0x348   :  { %1447 = vmatprep.subr.mxu1 %v5229_v55  ;;  %1574 = vmatprep.subr.mxu0 %v4756_v36  ;;  %v5249_v36 = vld [vmem:[#allocation2 + $0x480] sm:$0xff] }
 0x349   :  { %1448 = vmatpush1.msra.mxu1 %v5233_v31  ;;  %1575 = vmatpush1.msra.mxu0 %v4760_v38  ;;  %v5253_v38 = vld [vmem:[#allocation2 + $0x478] sm:$0xff] }
 0x34a   :  { %1449 = vmatprep.subr.mxu1 %v5237_v34  ;;  %1576 = vmatprep.subr.mxu0 %v4764_v43  ;;  %v5257_v43 = vld [vmem:[#allocation2 + $0x470] sm:$0xff] }
 0x34b   :  { %1450 = vmatpush1.msra.mxu1 %v5241_v21  ;;  %1577 = vmatpush1.msra.mxu0 %v4768_v23  ;;  %v5261_v23 = vld [vmem:[#allocation2 + $0x468] sm:$0xff] }
 0x34c   :  { %1451 = vmatprep.subr.mxu1 %v5245_v22  ;;  %1578 = vmatprep.subr.mxu0 %v4772_v40  ;;  %v5265_v40 = vld [vmem:[#allocation2 + $0x460] sm:$0xff] }
 0x34d   :  { %1452 = vmatpush1.msra.mxu1 %v5249_v36  ;;  %1579 = vmatpush1.msra.mxu0 %v4776_v42  ;;  %v7704_v42 = vld [vmem:[#allocation9_spill] sm:$0xff] }
 0x34e   :  { %1453 = vmatprep.subr.mxu1 %v5253_v38  ;;  %1580 = vmatprep.subr.mxu0 %v4780_v44  ;;  %v7705_v44 = vld [vmem:[#allocation86_spill] sm:$0xff] }
 0x34f   :  { %1454 = vmatpush1.msra.mxu1 %v5257_v43  ;;  %1581 = vmatpush1.msra.mxu0 %v4784_v46  ;;  %v7706_v46 = vld [vmem:[#allocation10_spill] sm:$0xff] }
 0x350   :  { %1455 = vmatprep.subr.mxu1 %v5261_v23  ;;  %1582 = vmatprep.subr.mxu0 %v4788_v50  ;;  %v7707_v50 = vld [vmem:[#allocation11_spill] sm:$0xff] }
 0x351   :  { %1456 = vmatpush1.msra.mxu1 %v5265_v40  ;;  %1583 = vmatpush1.msra.mxu0 %v7704_v42  ;;  %v5333_v42 = vld [vmem:[#allocation2 + $0x5d8] sm:$0xff] }
 0x352   :  { %1457 = vmatprep.subr.mxu1 %v5269_v37  ;;  %1584 = vmatprep.subr.mxu0 %v7705_v44  ;;  %v7721_v44 = vld [vmem:[#allocation24_spill] sm:$0xff] }
 0x353   :  { %1458 = vmatpush1.msra.mxu1 %v5273_v18  ;;  %1585 = vmatpush1.msra.mxu0 %v7706_v46  ;;  %v5337_v46 = vld [vmem:[#allocation2 + $0x5d0] sm:$0xff] }
 0x354   :  { %1459 = vmatprep.subr.mxu1 %v5277_v57  ;;  %1586 = vmatprep.subr.mxu0 %v7707_v50  ;;  %v7722_v50 = vld [vmem:[#allocation25_spill] sm:$0xff] }
 0x355   :  { %1460 = vmatpush1.msra.mxu1 %v5281_v25  ;;  %1587 = vmatpush2.msra.mxu0 %v7708_v56  ;;  %v5341_v56 = vld [vmem:[#allocation2 + $0x5c8] sm:$0xff] }
 0x356   :  { %1461 = vmatprep.subr.mxu1 %v5285_v16  ;;  %1588 = vmatprep.subr.mxu0 %v7709_v2  ;;  %7723 = vst [vmem:[#allocation83_spill] sm:$0xff] %v5341_v56  ;;  %v7724_v2 = vld [vmem:[#allocation26_spill] sm:$0xff] }
 0x357   :  { %1462 = vmatpush1.msra.mxu1 %v5289_v49  ;;  %1589 = vmatpush2.msra.mxu0 %v7710_v29  ;;  %v5345_v29 = vld [vmem:[#allocation2 + $0x5c0] sm:$0xff] }
 0x358   :  { %1463 = vmatprep.subr.mxu1 %v5293_v4  ;;  %1590 = vmatprep.subr.mxu0 %v7711_v8  ;;  %7725 = vst [vmem:[#allocation84_spill] sm:$0xff] %v5345_v29  ;;  %v7726_v8 = vld [vmem:[#allocation27_spill] sm:$0xff] }
 0x359   :  { %1464 = vmatpush1.msra.mxu1 %v5297_v48  ;;  %1591 = vmatpush2.msra.mxu0 %v7712_v0  ;;  %v5349_v0 = vld [vmem:[#allocation2 + $0x5b8] sm:$0xff] }
 0x35a   :  { %1465 = vmatprep.subr.mxu1 %v5301_v13  ;;  %1592 = vmatprep.subr.mxu0 %v7713_v41  ;;  %7727 = vst [vmem:[#allocation9_spill] sm:$0xff] %v5349_v0  ;;  %v7728_v41 = vld [vmem:[#allocation28_spill] sm:$0xff] }
 0x35b   :  { %1466 = vmatpush1.msra.mxu1 %v5305_v52  ;;  %1593 = vmatpush2.msra.mxu0 %v7714_v35  ;;  %v5353_v35 = vld [vmem:[#allocation2 + $0x5b0] sm:$0xff] }
 0x35c   :  { %1467 = vmatprep.subr.mxu1 %v5309_v6  ;;  %1594 = vmatprep.subr.mxu0 %v7715_v53  ;;  %7729 = vst [vmem:[#allocation86_spill] sm:$0xff] %v5353_v35  ;;  %v7730_v53 = vld [vmem:[#allocation29_spill] sm:$0xff] }
 0x35d   :  { %1468 = vmatpush1.msra.mxu1 %v5313_v17  ;;  %1595 = vmatpush2.msra.mxu0 %v7716_v5  ;;  %v5357_v5 = vld [vmem:[#allocation2 + $0x5a8] sm:$0xff] }
 0x35e   :  { %1469 = vmatprep.subr.mxu1 %v5317_v19  ;;  %1596 = vmatprep.subr.mxu0 %v7717_v39  ;;  %7731 = vst [vmem:[#allocation10_spill] sm:$0xff] %v5357_v5  ;;  %v7732_v39 = vld [vmem:[#allocation30_spill] sm:$0xff] }
 0x35f   :  { %1470 = vmatpush2.msra.mxu1 %v5321_v24  ;;  %1597 = vmatpush2.msra.mxu0 %v7718_v9  ;;  %v5361_v9 = vld [vmem:[#allocation2 + $0x5a0] sm:$0xff] }
 0x360   :  { %1471 = vmatprep.subr.mxu1 %v5325_v58  ;;  %1598 = vmatprep.subr.mxu0 %v7719_v15  ;;  %7733 = vst [vmem:[#allocation11_spill] sm:$0xff] %v5361_v9  ;;  %v7734_v15 = vld [vmem:[#allocation31_spill] sm:$0xff] }
 0x361   :  { %1472 = vmatpush2.msra.mxu1 %v5329_v3  ;;  %1599 = vmatpush2.msra.mxu0 %v7720_v20  ;;  %v5365_v20 = vld [vmem:[#allocation2 + $0x598] sm:$0xff] }
 0x362   :  { %1473 = vmatprep.subr.mxu1 %v5333_v42  ;;  %1600 = vmatprep.subr.mxu0 %v7721_v44  ;;  %7735 = vst [vmem:[#allocation12_spill] sm:$0xff] %v5365_v20  ;;  %v7736_v44 = vld [vmem:[#allocation32_spill] sm:$0xff] }
 0x363   :  { %1474 = vmatpush2.msra.mxu1 %v5337_v46  ;;  %1601 = vmatpush2.msra.mxu0 %v7722_v50  ;;  %v5369_v50 = vld [vmem:[#allocation2 + $0x590] sm:$0xff] }
 0x364   :  { %1475 = vmatprep.subr.mxu1 %v5341_v56  ;;  %1602 = vmatprep.subr.mxu0 %v7724_v2  ;;  %7737 = vst [vmem:[#allocation87_spill] sm:$0xff] %v5369_v50  ;;  %v7738_v2 = vld [vmem:[#allocation33_spill] sm:$0xff] }
 0x365   :  { %1476 = vmatpush2.msra.mxu1 %v5345_v29  ;;  %1603 = vmatpush2.msra.mxu0 %v7726_v8  ;;  %v5373_v8 = vld [vmem:[#allocation2 + $0x588] sm:$0xff] }
 0x366   :  { %1477 = vmatprep.subr.mxu1 %v5349_v0  ;;  %1604 = vmatprep.subr.mxu0 %v7728_v41  ;;  %7739 = vst [vmem:[#allocation13_spill] sm:$0xff] %v5373_v8  ;;  %v7740_v41 = vld [vmem:[#allocation34_spill] sm:$0xff] }
 0x367   :  { %1478 = vmatpush2.msra.mxu1 %v5353_v35  ;;  %1605 = vmatpush2.msra.mxu0 %v7730_v53  ;;  %v5377_v53 = vld [vmem:[#allocation2 + $0x580] sm:$0xff] }
 0x368   :  { %1479 = vmatprep.subr.mxu1 %v5357_v5  ;;  %1606 = vmatprep.subr.mxu0 %v7732_v39  ;;  %7741 = vst [vmem:[#allocation14_spill] sm:$0xff] %v5377_v53  ;;  %v7742_v39 = vld [vmem:[#allocation36_spill] sm:$0xff] }
 0x369   :  { %1480 = vmatpush2.msra.mxu1 %v5361_v9  ;;  %1607 = vmatpush2.msra.mxu0 %v7734_v15  ;;  %v5381_v15 = vld [vmem:[#allocation2 + $0x578] sm:$0xff] }
 0x36a   :  { %1481 = vmatprep.subr.mxu1 %v5365_v20  ;;  %1608 = vmatprep.subr.mxu0 %v7736_v44  ;;  %7743 = vst [vmem:[#allocation15_spill] sm:$0xff] %v5381_v15  ;;  %v7744_v44 = vld [vmem:[#allocation38_spill] sm:$0xff] }
 0x36b   :  { %1482 = vmatpush2.msra.mxu1 %v5369_v50  ;;  %1609 = vmatpush2.msra.mxu0 %v7738_v2  ;;  %v7746_v2 = vld [vmem:[#allocation40_spill] sm:$0xff] }
 0x36c   :  { %1483 = vmatprep.subr.mxu1 %v5373_v8  ;;  %1610 = vmatprep.subr.mxu0 %v7740_v41  ;;  %v7748_v41 = vld [vmem:[#allocation42_spill] sm:$0xff] }
 0x36d   :  { %1484 = vmatpush2.msra.mxu1 %v5377_v53  ;;  %1611 = vmatpush2.msra.mxu0 %v7742_v39  ;;  %v7750_v39 = vld [vmem:[#allocation43_spill] sm:$0xff] }
 0x36e   :  { %1485 = vmatprep.subr.mxu1 %v5381_v15  ;;  %1612 = vmatprep.subr.mxu0 %v7744_v44  ;;  %v7752_v44 = vld [vmem:[#allocation45_spill] sm:$0xff] }
 0x36f   :  { %1486 = vmatpush2.msra.mxu1 %v5385_v60  ;;  %1613 = vmatpush2.msra.mxu0 %v7746_v2  ;;  %v7754_v2 = vld [vmem:[#allocation47_spill] sm:$0xff] }
 0x370   :  { %1487 = vmatprep.subr.mxu1 %v5389_v28  ;;  %1614 = vmatprep.subr.mxu0 %v7748_v41  ;;  %v7756_v41 = vld [vmem:[#allocation51_spill] sm:$0xff] }
 0x371   :  { %1488 = vmatpush2.msra.mxu1 %v5393_v12  ;;  %1615 = vmatpush2.msra.mxu0 %v7750_v39  ;;  %v5409_v12 = vld [vmem:[#allocation2 + $0x540] sm:$0xff]  ;;  %v5412_v39 = vld [vmem:[#allocation2 + $0x538] sm:$0xff] }
 0x372   :  { %1489 = vmatprep.subr.mxu1 %v5397_v54  ;;  %1616 = vmatprep.subr.mxu0 %v7752_v44  ;;  %7757 = vst [vmem:[#allocation22_spill] sm:$0xff] %v5409_v12  ;;  %7758 = vst [vmem:[#allocation23_spill] sm:$0xff] %v5412_v39  ;;  %v5415_v44 = vld [vmem:[#allocation2 + $0x530] sm:$0xff]  ;;  %v5444_v54 = vld [vmem:[#allocation2 + $0xf8] sm:$0xff] }
 0x373   :  { %1490 = vmatpush2.msra.mxu1 %v5401_v61  ;;  %1617 = vmatpush2.msra.mxu0 %v7754_v2  ;;  %7759 = vst [vmem:[#allocation24_spill] sm:$0xff] %v5415_v44  ;;  %v5418_v61 = vld [vmem:[#allocation2 + $0x528] sm:$0xff]  ;;  %v5421_v2 = vld [vmem:[#allocation2 + $0x520] sm:$0xff]  ;;  %7769 = vst [vmem:[#allocation32_spill] sm:$0xff] %v5444_v54 }
 0x374   :  { %1491 = vmatprep.subr.mxu1 %v5405_v62  ;;  %1720 = vmatprep.subr.mxu0 %v7756_v41  ;;  %7760 = vst [vmem:[#allocation25_spill] sm:$0xff] %v5418_v61  ;;  %7761 = vst [vmem:[#allocation26_spill] sm:$0xff] %v5421_v2  ;;  %v5424_v41 = vld [vmem:[#allocation2 + $0x518] sm:$0xff] }
 0x375   :  { %1492 = vmatpush2.msra.mxu1 %v5409_v12  ;;  %7762 = vst [vmem:[#allocation27_spill] sm:$0xff] %v5424_v41  ;;  %v5427_v12 = vld [vmem:[#allocation2 + $0x510] sm:$0xff] }
 0x376   :  { %1493 = vmatprep.subr.mxu1 %v5412_v39  ;;  %7763 = vst [vmem:[#allocation28_spill] sm:$0xff] %v5427_v12  ;;  %v7764_v39 = vmov 0.0  }
 0x377   :  { %1494 = vmatpush2.msra.mxu1 %v5415_v44  ;;  %v5431_v62 = vrot.slane %v7764_v39, 4  ;;  %v5433_v44 = vld [vmem:[#allocation2 + $0x508] sm:$0xff]  ;;  %v5447_v39 = vld [vmem:[#allocation2 + $0xf0] sm:$0xff] }
 0x378   :  { %1495 = vmatprep.subr.mxu1 %v5418_v61  ;;  %7766 = vst [vmem:[#allocation30_spill] sm:$0xff] %v5433_v44  ;;  %v5436_v61 = vld [vmem:[#allocation2 + $0x500] sm:$0xff]  ;;  %7770 = vst [vmem:[#allocation33_spill] sm:$0xff] %v5447_v39 }
 0x379   :  { %1496 = vmatpush2.msra.mxu1 %v5421_v2  ;;  %7765 = vst [vmem:[#allocation29_spill] sm:$0xff] %v5431_v62  ;;  %7767 = vst [vmem:[#allocation31_spill] sm:$0xff] %v5436_v61 }
 0x37a   :  { %1497 = vmatprep.subr.mxu1 %v5424_v41  ;;  %v7768_v41 = vrot.slane %v5173_v1, 4 }
 0x37b   :  { %1498 = vmatpush2.msra.mxu1 %v5427_v12  ;;  %v7785_v12 = vld [vmem:[#allocation56_spill] sm:$0xff] }
 0x37c   :  { %1499 = vmatprep.subr.mxu1 %v5433_v44  ;;  %v1432_v2 = vsel %vm620_vm2, %v7768_v41, %v5431_v62  ;;  %v5450_v44 = vld [vmem:[#allocation2 + $0xe8] sm:$0xff]  ;;  %v5460_v41 = vld [vmem:[#allocation2 + $0xd8] sm:$0xff] }
 0x37d   :  { %1500 = vmatpush2.msra.mxu1 %v5436_v61  ;;  %7771 = vst [vmem:[#allocation34_spill] sm:$0xff] %v5450_v44  ;;  %v5457_v61 = vld [vmem:[#allocation2 + $0xe0] sm:$0xff]  ;;  %7774 = vst [vmem:[#allocation38_spill] sm:$0xff] %v5460_v41 }
 0x37e   :  { %1502 = vmatmul.mubr.f32.vlgmr.msra.gmra.mxu1 %v5179_v26  ;;  %1631 = vmatprep.subr.mxu1 %v5444_v54  ;;  %v7772_v26 = vrot.slane %v5165_v11, 4  ;;  %7773 = vst [vmem:[#allocation36_spill] sm:$0xff] %v5457_v61  ;;  %v7778_v11 = vld [vmem:[#allocation48_spill] sm:$0xff]  ;;  %v7780_v54 = vld [vmem:[#allocation50_spill] sm:$0xff] }
 0x37f   :  { %1507 = vmatprep.mubr.f32.mxu1 %v1432_v2  ;;  %1632 = vmatpush1.msra.mxu1 %v5447_v39  ;;  %v5463_v2 = vld [vmem:[#allocation2 + $0xd0] sm:$0xff]  ;;  %v7776_v39 = vld [vmem:[#allocation44_spill] sm:$0xff] }
 0x380   :  { %1633 = vmatprep.subr.mxu1 %v5450_v44  ;;  %v1431_v1 = vsel %vm620_vm2, %v7772_v26, %v5431_v62  ;;  %7775 = vst [vmem:[#allocation40_spill] sm:$0xff] %v5463_v2  ;;  %v7777_v44 = vld [vmem:[#allocation46_spill] sm:$0xff]  ;;  %v7779_v26 = vld [vmem:[#allocation49_spill] sm:$0xff] }
 0x381   :  { %1634 = vmatpush1.msra.mxu1 %v5457_v61  ;;  %v7781_v61 = vld [vmem:[#allocation52_spill] sm:$0xff]  ;;  %v7783_v62 = vld [vmem:[#allocation54_spill] sm:$0xff] }
 0x382   :  { %1508 = vmatmul.mubr.f32.gmra.mxu1 %v1431_v1  ;;  %1635 = vmatprep.subr.mxu1 %v5460_v41  ;;  %v7782_v1 = vld [vmem:[#allocation53_spill] sm:$0xff]  ;;  %v7784_v41 = vld [vmem:[#allocation55_spill] sm:$0xff] }
 0x383   :  { %1636 = vmatpush1.msra.mxu1 %v5463_v2  ;;  %v7786_v2 = vld [vmem:[#allocation57_spill] sm:$0xff] }
 0x384   :  { %1637 = vmatprep.subr.mxu1 %v7776_v39  ;;  %v7787_v39 = vld [vmem:[#allocation58_spill] sm:$0xff] }
 0x385   :  { %1638 = vmatpush1.msra.mxu1 %v7777_v44  ;;  %v7788_v44 = vld [vmem:[#allocation59_spill] sm:$0xff] }
 0x386   :  { %1639 = vmatprep.subr.mxu1 %v7778_v11  ;;  %v7789_v11 = vld [vmem:[#allocation61_spill] sm:$0xff] }
 0x387   :  { %1640 = vmatpush1.msra.mxu1 %v7779_v26  ;;  %v7790_v26 = vld [vmem:[#allocation63_spill] sm:$0xff] }
 0x388   :  { %1641 = vmatprep.subr.mxu1 %v7780_v54  ;;  %v7791_v54 = vld [vmem:[#allocation65_spill] sm:$0xff] }
 0x389   :  { %1642 = vmatpush1.msra.mxu1 %v7781_v61  ;;  %v7792_v61 = vld [vmem:[#allocation67_spill] sm:$0xff] }
 0x38a   :  { %1643 = vmatprep.subr.mxu1 %v7782_v1  ;;  %v7793_v1 = vld [vmem:[#allocation69_spill] sm:$0xff] }
 0x38b   :  { %1644 = vmatpush1.msra.mxu1 %v7783_v62  ;;  %v7794_v62 = vld [vmem:[#allocation71_spill] sm:$0xff] }
 0x38c   :  { %1645 = vmatprep.subr.mxu1 %v7784_v41  ;;  %v7795_v41 = vld [vmem:[#allocation73_spill] sm:$0xff] }
 0x38d   :  { %1646 = vmatpush1.msra.mxu1 %v7785_v12  ;;  %v7796_v12 = vld [vmem:[#allocation75_spill] sm:$0xff] }
 0x38e   :  { %1647 = vmatprep.subr.mxu1 %v7786_v2  ;;  %v7797_v2 = vld [vmem:[#allocation77_spill] sm:$0xff] }
 0x38f   :  { %1648 = vmatpush1.msra.mxu1 %v7787_v39  ;;  %v7798_v39 = vld [vmem:[#allocation79_spill] sm:$0xff] }
 0x390   :  { %1649 = vmatprep.subr.mxu1 %v7788_v44  ;;  %v7799_v44 = vld [vmem:[#allocation88_spill] sm:$0xff] }
 0x391   :  { %1650 = vmatpush1.msra.mxu1 %v7789_v11  ;;  %v7800_v11 = vld [vmem:[#allocation89_spill] sm:$0xff] }
 0x392   :  { %1651 = vmatprep.subr.mxu1 %v7790_v26  ;;  %v7801_v26 = vld [vmem:[#allocation91_spill] sm:$0xff] }
 0x393   :  { %1652 = vmatpush1.msra.mxu1 %v7791_v54  ;;  %v7802_v54 = vld [vmem:[#allocation92_spill] sm:$0xff] }
 0x394   :  { %1653 = vmatprep.subr.mxu1 %v7792_v61  ;;  %v7803_v61 = vld [vmem:[#allocation93_spill] sm:$0xff] }
 0x395   :  { %1654 = vmatpush1.msra.mxu1 %v7793_v1  ;;  %v7804_v1 = vld [vmem:[#allocation94_spill] sm:$0xff] }
 0x396   :  { %1655 = vmatprep.subr.mxu1 %v7794_v62  ;;  %v7805_v62 = vld [vmem:[#allocation95_spill] sm:$0xff] }
 0x397   :  { %1656 = vmatpush1.msra.mxu1 %v7795_v41  ;;  %v7806_v41 = vld [vmem:[#allocation96_spill] sm:$0xff] }
 0x398   :  { %1657 = vmatprep.subr.mxu1 %v7796_v12  ;;  %v7807_v12 = vld [vmem:[#allocation97_spill] sm:$0xff] }
 0x399   :  { %1658 = vmatpush1.msra.mxu1 %v7797_v2  ;;  %v7808_v2 = vld [vmem:[#allocation98_spill] sm:$0xff] }
 0x39a   :  { %1659 = vmatprep.subr.mxu1 %v7798_v39  ;;  %v7809_v39 = vld [vmem:[#allocation99_spill] sm:$0xff] }
 0x39b   :  { %1660 = vmatpush1.msra.mxu1 %v7799_v44  ;;  %v7810_v44 = vld [vmem:[#allocation100_spill] sm:$0xff] }
 0x39c   :  { %1661 = vmatprep.subr.mxu1 %v7800_v11  ;;  %v7811_v11 = vld [vmem:[#allocation101_spill] sm:$0xff] }
 0x39d   :  { %1662 = vmatpush1.msra.mxu1 %v7801_v26  ;;  %v7812_v26 = vld [vmem:[#allocation102_spill] sm:$0xff] }
 0x39e   :  { %1663 = vmatprep.subr.mxu1 %v7802_v54  ;;  %v7813_v54 = vld [vmem:[#allocation103_spill] sm:$0xff] }
 0x39f   :  { %1664 = vmatpush2.msra.mxu1 %v7803_v61  ;;  %v7814_v61 = vld [vmem:[#allocation104_spill] sm:$0xff] }
 0x3a0   :  { %1665 = vmatprep.subr.mxu1 %v7804_v1  ;;  %v7815_v1 = vld [vmem:[#allocation105_spill] sm:$0xff] }
 0x3a1   :  { %1666 = vmatpush2.msra.mxu1 %v7805_v62  ;;  %v7816_v62 = vld [vmem:[#allocation106_spill] sm:$0xff] }
 0x3a2   :  { %1667 = vmatprep.subr.mxu1 %v7806_v41  ;;  %v7817_v41 = vld [vmem:[#allocation107_spill] sm:$0xff] }
 0x3a3   :  { %1668 = vmatpush2.msra.mxu1 %v7807_v12  ;;  %v7818_v12 = vld [vmem:[#allocation108_spill] sm:$0xff] }
 0x3a4   :  { %1669 = vmatprep.subr.mxu1 %v7808_v2  ;;  %v7819_v2 = vld [vmem:[#allocation109_spill] sm:$0xff] }
 0x3a5   :  { %1670 = vmatpush2.msra.mxu1 %v7809_v39  ;;  %v7820_v39 = vld [vmem:[#allocation35_spill] sm:$0xff] }
 0x3a6   :  { %1671 = vmatprep.subr.mxu1 %v7810_v44  ;;  %v7821_v44 = vld [vmem:[#allocation37_spill] sm:$0xff] }
 0x3a7   :  { %1672 = vmatpush2.msra.mxu1 %v7811_v11  ;;  %v7822_v11 = vld [vmem:[#allocation39_spill] sm:$0xff] }
 0x3a8   :  { %1673 = vmatprep.subr.mxu1 %v7812_v26  ;;  %v7823_v26 = vld [vmem:[#allocation41_spill] sm:$0xff] }
 0x3a9   :  { %1674 = vmatpush2.msra.mxu1 %v7813_v54  ;;  %v7824_v54 = vld [vmem:[#allocation60_spill] sm:$0xff] }
 0x3aa   :  { %1675 = vmatprep.subr.mxu1 %v7814_v61  ;;  %v7825_v61 = vld [vmem:[#allocation62_spill] sm:$0xff] }
 0x3ab   :  { %1676 = vmatpush2.msra.mxu1 %v7815_v1  ;;  %v7826_v1 = vld [vmem:[#allocation64_spill] sm:$0xff] }
 0x3ac   :  { %1677 = vmatprep.subr.mxu1 %v7816_v62  ;;  %v7827_v62 = vld [vmem:[#allocation66_spill] sm:$0xff] }
 0x3ad   :  { %1678 = vmatpush2.msra.mxu1 %v7817_v41  ;;  %v7828_v41 = vld [vmem:[#allocation68_spill] sm:$0xff] }
 0x3ae   :  { %1679 = vmatprep.subr.mxu1 %v7818_v12  ;;  %v7829_v12 = vld [vmem:[#allocation70_spill] sm:$0xff] }
 0x3af   :  { %1680 = vmatpush2.msra.mxu1 %v7819_v2  ;;  %v7830_v2 = vld [vmem:[#allocation72_spill] sm:$0xff] }
 0x3b0   :  { %1681 = vmatprep.subr.mxu1 %v7820_v39  ;;  %v7831_v39 = vld [vmem:[#allocation74_spill] sm:$0xff] }
 0x3b1   :  { %1682 = vmatpush2.msra.mxu1 %v7821_v44  ;;  %v7832_v44 = vld [vmem:[#allocation76_spill] sm:$0xff] }
 0x3b2   :  { %1683 = vmatprep.subr.mxu1 %v7822_v11  ;;  %v7833_v11 = vld [vmem:[#allocation78_spill] sm:$0xff] }
 0x3b3   :  { %1684 = vmatpush2.msra.mxu1 %v7823_v26  ;;  %v5524_v26 = vld [vmem:[#allocation2 + $0x2f8] sm:$0xff] }
 0x3b4   :  { %1685 = vmatprep.subr.mxu1 %v7824_v54  ;;  %7834 = vst [vmem:[#allocation42_spill] sm:$0xff] %v5524_v26 }
 0x3b5   :  { %1686 = vmatpush2.msra.mxu1 %v7825_v61 }
 0x3b6   :  { %1687 = vmatprep.subr.mxu1 %v7826_v1 }
 0x3b7   :  { %1688 = vmatpush2.msra.mxu1 %v7827_v62 }
 0x3b8   :  { %1689 = vmatprep.subr.mxu1 %v7828_v41 }
 0x3b9   :  { %1690 = vmatpush2.msra.mxu1 %v7829_v12 }
 0x3ba   :  { %1691 = vmatprep.subr.mxu1 %v7830_v2 }
 0x3bb   :  { %1692 = vmatpush2.msra.mxu1 %v7831_v39 }
 0x3bc   :  { %1693 = vmatprep.subr.mxu1 %v7832_v44 }
 0x3bd   :  { %1694 = vmatpush2.msra.mxu1 %v7833_v11 }
 0x3be   :  { %1873 = vmatprep.subr.mxu1 %v5524_v26 }
 0x3f0   :  { %v1412_v1 = vpop.f32.mrf.mxu0 }
 0x3f2   :  { %v1414_v28 = vpop.f32.mrf.mxu0 }
 0x3fb   :  { %v1418_v12 = vpop.f32.mrf.mxu0 }
 0x3fd   :  { %v1420_v50 = vpop.f32.mrf.mxu0 }
 0x3fe   :  { %v1335_v54 = vpop.f32.mrf.mxu1 }
 0x3ff   :  { %v1413_v60 = vadd.f32 %v1412_v1, %v1335_v54 }
 0x400   :  { %v1337_v61 = vpop.f32.mrf.mxu1 }
 0x401   :  { %v1415_v2 = vadd.f32 %v1414_v28, %v1337_v61 }
 0x402   :  { %v1341_v62 = vpop.f32.mrf.mxu1 }
 0x403   :  { %v1419_v8 = vadd.f32 %v1418_v12, %v1341_v62 }
 0x404   :  { %v1343_v41 = vpop.f32.mrf.mxu1 }
 0x405   :  { %v1421_v9 = vadd.f32 %v1420_v50, %v1343_v41  ;;  %v5544_v50 = vld [vmem:[#allocation2 + $0x2e8] sm:$0xff] }
 0x43e   :  { %v1503_v15 = vpop.f32.mrf.mxu1 }
 0x43f   :  { %v1514_v53 = vadd.f32 %v1503_v15, %v1413_v60 }
 0x440   :  { %v1505_v39 = vpop.f32.mrf.mxu1 }
 0x441   :  { %v1518_v44 = vadd.f32 %v1514_v53, %v4604_v51  ;;  %v1515_v11 = vadd.f32 %v1505_v39, %v1415_v2  ;;  %v5561_v39 = vld [vmem:[#allocation2 + $0x2d8] sm:$0xff] }
 0x442   :  { %v1509_v20 = vpop.f32.mrf.mxu1 }
 0x443   :  { %v1522_v26 = vmax.f32 %v1518_v44, 0.0  ;;  %v1519_v5 = vadd.f32 %v1515_v11, %v4608_v45  ;;  %v1516_v35 = vadd.f32 %v1509_v20, %v1419_v8 }
 0x444   :  { %v1511_v0 = vpop.f32.mrf.mxu1 }
 0x445   :  { %v1530_v29 = vrot.slane %v1522_v26, 6  ;;  %v1523_v56 = vmax.f32 %v1519_v5, 0.0  ;;  %v1520_v54 = vadd.f32 %v1516_v35, %v4604_v51  ;;  %v1517_v1 = vadd.f32 %v1511_v0, %v1421_v9 }
 0x447   :  { %v1531_v28 = vrot.slane %v1523_v56, 6  ;;  %v1524_v60 = vmax.f32 %v1520_v54, 0.0  ;;  %v1521_v15 = vadd.f32 %v1517_v1, %v4608_v45  ;;  %v1540_v53 = vsel %vm194_vm0, 0.0, %v1530_v29  ;;  %v5540_v56 = vld [vmem:[#allocation2 + $0x2f0] sm:$0xff] }
 0x448   :  { %v1708_v35 = vrot.slane %v1540_v53, 4  ;;  %v1544_v44 = vrot.slane %v1540_v53, 2  ;;  %v5566_v54 = vld [vmem:[#allocation2 + $0x2d0] sm:$0xff] }
 0x449   :  { %v1532_v61 = vrot.slane %v1524_v60, 6  ;;  %v1525_v62 = vmax.f32 %v1521_v15, 0.0  ;;  %2976 = vmatprep.mubr.msk.f32.mxu1 %vm4194_vm1, %v1531_v28  ;;  %v1541_v0 = vsel %vm194_vm0, 0.0, %v1531_v28  ;;  %v5574_v15 = vld [vmem:[#allocation2 + $0x2c0] sm:$0xff] }
 0x44a   :  { %2978 = vmatmul.mubr.msk.f32.vlgmr.msra.gmra.mxu1 %vm4194_vm1, %v1530_v29  ;;  %v1547_v12 = vrot.slane %v1541_v0, 2  ;;  %v1711_v53 = vrot.slane %v1541_v0, 4  ;;  %v5724_v0 = vld [vmem:[#allocation2 + $0x3a0] sm:$0xff] }
 0x44b   :  { %v1534_v20 = vrot.slane %v1525_v62, 6  ;;  %v5537_v5 = vsel %vm194_vm0, %v1530_v29, %v1532_v61  ;;  %1874 = vmatpush1.msra.mxu1 %v5540_v56  ;;  %v5551_v29 = vld [vmem:[#allocation2 + $0x2e0] sm:$0xff]  ;;  %v5579_v61 = vld [vmem:[#allocation2 + $0x2b8] sm:$0xff]  ;;  %v5583_v62 = vld [vmem:[#allocation2 + $0x2b0] sm:$0xff]  ;;  %7857 = vst [vmem:[#allocation67_spill] sm:$0xff] %v5724_v0 }
 0x44c   :  { %v7060_v9 = vrot.slane %v5537_v5, 4  ;;  %1875 = vmatprep.subr.mxu1 %v5544_v50  ;;  %v1545_v26 = vrot.slane %v5537_v5, 2 }
 0x44d   :  { %v5548_v8 = vsel %vm194_vm0, %v1531_v28, %v1534_v20  ;;  %1876 = vmatpush1.msra.mxu1 %v5551_v29  ;;  %v5570_v28 = vld [vmem:[#allocation2 + $0x2c8] sm:$0xff] }
 0x44e   :  { %v1548_v41 = vrot.slane %v5548_v8, 2  ;;  %1701 = vmatprep.mubr.f32.mxu1 %v5548_v8  ;;  %v5559_v2 = vsel %vm620_vm2, %v1708_v35, %v7060_v9  ;;  %1877 = vmatprep.subr.mxu1 %v5561_v39  ;;  %v1546_v1 = vsel %vm219_vm3, %v1544_v44, %v1545_v26  ;;  %v7061_v60 = vrot.slane %v5548_v8, 4  ;;  %v5720_v20 = vld [vmem:[#allocation2 + $0x3a8] sm:$0xff]  ;;  %v5728_v35 = vld [vmem:[#allocation2 + $0x398] sm:$0xff]  ;;  %v5764_v9 = vld [vmem:[#allocation2 + $0x350] sm:$0xff] }
 0x44f   :  { %1702 = vmatmul.mubr.f32.gmra.mxu1 %v5537_v5  ;;  %7855 = vst [vmem:[#allocation65_spill] sm:$0xff] %v5720_v20  ;;  %7859 = vst [vmem:[#allocation69_spill] sm:$0xff] %v5728_v35  ;;  %v7864_v44 = vld [vmem:[#allocation11_spill] sm:$0xff] }
 0x450   :  { %v1549_v11 = vsel %vm219_vm3, %v1547_v12, %v1548_v41  ;;  %1878 = vmatpush1.msra.mxu1 %v5566_v54  ;;  %v5736_v12 = vld [vmem:[#allocation2 + $0x388] sm:$0xff]  ;;  %7877 = vst [vmem:[#allocation92_spill] sm:$0xff] %v5764_v9 }
 0x451   :  { %1618 = vmatprep.mubr.f32.mxu0 %v1549_v11  ;;  %1879 = vmatprep.subr.mxu1 %v5570_v28  ;;  %7863 = vst [vmem:[#allocation73_spill] sm:$0xff] %v5736_v12  ;;  %v5740_v11 = vld [vmem:[#allocation2 + $0x380] sm:$0xff] }
 0x452   :  { %1619 = vmatmul.mubr.f32.vlgmr.msra.gmra.mxu0 %v1546_v1  ;;  %1880 = vmatpush1.msra.mxu1 %v5574_v15  ;;  %7865 = vst [vmem:[#allocation75_spill] sm:$0xff] %v5740_v11  ;;  %v7866_v1 = vld [vmem:[#allocation12_spill] sm:$0xff] }
 0x453   :  { %1721 = vmatpush1.msra.mxu0 %v5193_v47  ;;  %1624 = vmatprep.mubr.f32.mxu0 %v1548_v41  ;;  %v1713_v47 = vsel %vm620_vm2, %v1711_v53, %v7061_v60  ;;  %v7862_v41 = vld [vmem:[#allocation10_spill] sm:$0xff]  ;;  %v5768_v60 = vld [vmem:[#allocation2 + $0x348] sm:$0xff] }
 0x454   :  { %1722 = vmatprep.subr.mxu0 %v5196_v30  ;;  %1881 = vmatprep.subr.mxu1 %v5579_v61  ;;  %v5592_v30 = vld [vmem:[#allocation2 + $0x2a8] sm:$0xff]  ;;  %v5744_v53 = vld [vmem:[#allocation2 + $0x378] sm:$0xff]  ;;  %7879 = vst [vmem:[#allocation93_spill] sm:$0xff] %v5768_v60 }
 0x455   :  { %1723 = vmatpush1.msra.mxu0 %v5200_v14  ;;  %1882 = vmatpush1.msra.mxu1 %v5583_v62  ;;  %v5596_v14 = vld [vmem:[#allocation2 + $0x2a0] sm:$0xff]  ;;  %7867 = vst [vmem:[#allocation77_spill] sm:$0xff] %v5744_v53 }
 0x456   :  { %1724 = vmatprep.subr.mxu0 %v5204_v7  ;;  %1625 = vmatmul.mubr.f32.gmra.mxu0 %v1545_v26  ;;  %v5600_v7 = vld [vmem:[#allocation2 + $0x298] sm:$0xff]  ;;  %v5732_v26 = vld [vmem:[#allocation2 + $0x390] sm:$0xff] }
 0x457   :  { %1725 = vmatpush1.msra.mxu0 %v5210_v27  ;;  %1784 = vmatprep.mubr.f32.mxu0 %v1713_v47  ;;  %v5604_v27 = vld [vmem:[#allocation2 + $0x290] sm:$0xff]  ;;  %7861 = vst [vmem:[#allocation71_spill] sm:$0xff] %v5732_v26  ;;  %v7868_v47 = vld [vmem:[#allocation87_spill] sm:$0xff] }
 0x458   :  { %1726 = vmatprep.subr.mxu0 %v5213_v10  ;;  %1883 = vmatprep.subr.mxu1 %v5592_v30  ;;  %v5608_v10 = vld [vmem:[#allocation2 + $0x288] sm:$0xff] }
 0x459   :  { %1727 = vmatpush1.msra.mxu0 %v5217_v32  ;;  %1884 = vmatpush1.msra.mxu1 %v5596_v14  ;;  %v5612_v32 = vld [vmem:[#allocation2 + $0x280] sm:$0xff] }
 0x45a   :  { %1728 = vmatprep.subr.mxu0 %v5221_v33  ;;  %1885 = vmatprep.subr.mxu1 %v5600_v7  ;;  %v5616_v33 = vld [vmem:[#allocation2 + $0x278] sm:$0xff] }
 0x45b   :  { %1729 = vmatpush1.msra.mxu0 %v5225_v63  ;;  %1886 = vmatpush1.msra.mxu1 %v5604_v27  ;;  %v5620_v63 = vld [vmem:[#allocation2 + $0x270] sm:$0xff] }
 0x45c   :  { %1730 = vmatprep.subr.mxu0 %v5229_v55  ;;  %1887 = vmatprep.subr.mxu1 %v5608_v10  ;;  %v5624_v55 = vld [vmem:[#allocation2 + $0x268] sm:$0xff] }
 0x45d   :  { %1731 = vmatpush1.msra.mxu0 %v5233_v31  ;;  %1888 = vmatpush1.msra.mxu1 %v5612_v32  ;;  %v5628_v31 = vld [vmem:[#allocation2 + $0x260] sm:$0xff] }
 0x45e   :  { %1732 = vmatprep.subr.mxu0 %v5237_v34  ;;  %1889 = vmatprep.subr.mxu1 %v5616_v33  ;;  %v5632_v34 = vld [vmem:[#allocation2 + $0x258] sm:$0xff] }
 0x45f   :  { %1733 = vmatpush1.msra.mxu0 %v5241_v21  ;;  %1890 = vmatpush1.msra.mxu1 %v5620_v63  ;;  %v5636_v21 = vld [vmem:[#allocation2 + $0x250] sm:$0xff] }
 0x460   :  { %1734 = vmatprep.subr.mxu0 %v5245_v22  ;;  %1891 = vmatprep.subr.mxu1 %v5624_v55  ;;  %v5640_v22 = vld [vmem:[#allocation2 + $0x248] sm:$0xff] }
 0x461   :  { %1735 = vmatpush1.msra.mxu0 %v5249_v36  ;;  %1892 = vmatpush1.msra.mxu1 %v5628_v31  ;;  %v5644_v36 = vld [vmem:[#allocation2 + $0x240] sm:$0xff] }
 0x462   :  { %1736 = vmatprep.subr.mxu0 %v5253_v38  ;;  %1893 = vmatprep.subr.mxu1 %v5632_v34  ;;  %7835 = vst [vmem:[#allocation43_spill] sm:$0xff] %v5644_v36  ;;  %v5648_v38 = vld [vmem:[#allocation2 + $0x238] sm:$0xff] }
 0x463   :  { %1737 = vmatpush1.msra.mxu0 %v5257_v43  ;;  %1894 = vmatpush1.msra.mxu1 %v5636_v21  ;;  %7836 = vst [vmem:[#allocation45_spill] sm:$0xff] %v5648_v38  ;;  %v5652_v43 = vld [vmem:[#allocation2 + $0x230] sm:$0xff] }
 0x464   :  { %1738 = vmatprep.subr.mxu0 %v5261_v23  ;;  %1895 = vmatprep.subr.mxu1 %v5640_v22  ;;  %7837 = vst [vmem:[#allocation47_spill] sm:$0xff] %v5652_v43  ;;  %v5656_v23 = vld [vmem:[#allocation2 + $0x228] sm:$0xff] }
 0x465   :  { %1739 = vmatpush1.msra.mxu0 %v5265_v40  ;;  %1896 = vmatpush1.msra.mxu1 %v5644_v36  ;;  %7838 = vst [vmem:[#allocation51_spill] sm:$0xff] %v5656_v23  ;;  %v5660_v40 = vld [vmem:[#allocation2 + $0x220] sm:$0xff] }
 0x466   :  { %1740 = vmatprep.subr.mxu0 %v5269_v37  ;;  %1897 = vmatprep.subr.mxu1 %v5648_v38  ;;  %7839 = vst [vmem:[#allocation44_spill] sm:$0xff] %v5660_v40  ;;  %v5664_v37 = vld [vmem:[#allocation2 + $0x218] sm:$0xff] }
 0x467   :  { %1741 = vmatpush1.msra.mxu0 %v5273_v18  ;;  %1898 = vmatpush1.msra.mxu1 %v5652_v43  ;;  %7840 = vst [vmem:[#allocation46_spill] sm:$0xff] %v5664_v37  ;;  %v5668_v18 = vld [vmem:[#allocation2 + $0x210] sm:$0xff] }
 0x468   :  { %1742 = vmatprep.subr.mxu0 %v5277_v57  ;;  %1899 = vmatprep.subr.mxu1 %v5656_v23  ;;  %7841 = vst [vmem:[#allocation48_spill] sm:$0xff] %v5668_v18  ;;  %v5672_v57 = vld [vmem:[#allocation2 + $0x208] sm:$0xff] }
 0x469   :  { %1743 = vmatpush1.msra.mxu0 %v5281_v25  ;;  %1900 = vmatpush1.msra.mxu1 %v5660_v40  ;;  %7842 = vst [vmem:[#allocation49_spill] sm:$0xff] %v5672_v57  ;;  %v5676_v25 = vld [vmem:[#allocation2 + $0x200] sm:$0xff] }
 0x46a   :  { %1744 = vmatprep.subr.mxu0 %v5285_v16  ;;  %1901 = vmatprep.subr.mxu1 %v5664_v37  ;;  %7843 = vst [vmem:[#allocation50_spill] sm:$0xff] %v5676_v25  ;;  %v5680_v16 = vld [vmem:[#allocation2 + $0x3f8] sm:$0xff] }
 0x46b   :  { %1745 = vmatpush1.msra.mxu0 %v5289_v49  ;;  %1902 = vmatpush1.msra.mxu1 %v5668_v18  ;;  %7844 = vst [vmem:[#allocation52_spill] sm:$0xff] %v5680_v16  ;;  %v5684_v49 = vld [vmem:[#allocation2 + $0x3f0] sm:$0xff]  ;;  %v8115_v59 = vld [vmem:[#allocation43_spill] sm:$0xff] }
 0x46c   :  { %1746 = vmatprep.subr.mxu0 %v5293_v4  ;;  %1903 = vmatprep.subr.mxu1 %v5672_v57  ;;  %7845 = vst [vmem:[#allocation53_spill] sm:$0xff] %v5684_v49  ;;  %v5688_v4 = vld [vmem:[#allocation2 + $0x3e8] sm:$0xff] }
 0x46d   :  { %1747 = vmatpush1.msra.mxu0 %v5297_v48  ;;  %1904 = vmatpush1.msra.mxu1 %v5676_v25  ;;  %7846 = vst [vmem:[#allocation54_spill] sm:$0xff] %v5688_v4  ;;  %v5692_v48 = vld [vmem:[#allocation2 + $0x3e0] sm:$0xff] }
 0x46e   :  { %1748 = vmatprep.subr.mxu0 %v5301_v13  ;;  %1905 = vmatprep.subr.mxu1 %v5680_v16  ;;  %7847 = vst [vmem:[#allocation55_spill] sm:$0xff] %v5692_v48  ;;  %v5696_v13 = vld [vmem:[#allocation2 + $0x3d8] sm:$0xff] }
 0x46f   :  { %1749 = vmatpush1.msra.mxu0 %v5305_v52  ;;  %1906 = vmatpush2.msra.mxu1 %v5684_v49  ;;  %7848 = vst [vmem:[#allocation56_spill] sm:$0xff] %v5696_v13  ;;  %v5700_v52 = vld [vmem:[#allocation2 + $0x3d0] sm:$0xff] }
 0x470   :  { %1750 = vmatprep.subr.mxu0 %v5309_v6  ;;  %1907 = vmatprep.subr.mxu1 %v5688_v4  ;;  %7849 = vst [vmem:[#allocation57_spill] sm:$0xff] %v5700_v52  ;;  %v5704_v6 = vld [vmem:[#allocation2 + $0x3c8] sm:$0xff] }
 0x471   :  { %1751 = vmatpush1.msra.mxu0 %v5313_v17  ;;  %1908 = vmatpush2.msra.mxu1 %v5692_v48  ;;  %7850 = vst [vmem:[#allocation58_spill] sm:$0xff] %v5704_v6  ;;  %v5708_v17 = vld [vmem:[#allocation2 + $0x3c0] sm:$0xff] }
 0x472   :  { %1752 = vmatprep.subr.mxu0 %v5317_v19  ;;  %1909 = vmatprep.subr.mxu1 %v5696_v13  ;;  %7851 = vst [vmem:[#allocation59_spill] sm:$0xff] %v5708_v17  ;;  %v5712_v19 = vld [vmem:[#allocation2 + $0x3b8] sm:$0xff] }
 0x473   :  { %1753 = vmatpush2.msra.mxu0 %v5321_v24  ;;  %1910 = vmatpush2.msra.mxu1 %v5700_v52  ;;  %7852 = vst [vmem:[#allocation61_spill] sm:$0xff] %v5712_v19  ;;  %v5716_v24 = vld [vmem:[#allocation2 + $0x3b0] sm:$0xff] }
 0x474   :  { %1754 = vmatprep.subr.mxu0 %v5325_v58  ;;  %1911 = vmatprep.subr.mxu1 %v5704_v6  ;;  %7853 = vst [vmem:[#allocation63_spill] sm:$0xff] %v5716_v24  ;;  %v7854_v58 = vld [vmem:[#allocation83_spill] sm:$0xff]  ;;  %v7972_v52 = vld [vmem:[#allocation81_spill] sm:$0xff] }
 0x475   :  { %1755 = vmatpush2.msra.mxu0 %v5329_v3  ;;  %1912 = vmatpush2.msra.mxu1 %v5708_v17  ;;  %v7856_v3 = vld [vmem:[#allocation84_spill] sm:$0xff] }
 0x476   :  { %1756 = vmatprep.subr.mxu0 %v5333_v42  ;;  %1913 = vmatprep.subr.mxu1 %v5712_v19  ;;  %v7858_v42 = vld [vmem:[#allocation9_spill] sm:$0xff] }
 0x477   :  { %1757 = vmatpush2.msra.mxu0 %v5337_v46  ;;  %1914 = vmatpush2.msra.mxu1 %v5716_v24  ;;  %v7860_v46 = vld [vmem:[#allocation86_spill] sm:$0xff] }
 0x478   :  { %1758 = vmatprep.subr.mxu0 %v7854_v58  ;;  %1915 = vmatprep.subr.mxu1 %v5720_v20  ;;  %v5748_v58 = vld [vmem:[#allocation2 + $0x370] sm:$0xff]  ;;  %v7971_v20 = vld [vmem:[#allocation80_spill] sm:$0xff] }
 0x479   :  { %1759 = vmatpush2.msra.mxu0 %v7856_v3  ;;  %1916 = vmatpush2.msra.mxu1 %v5724_v0  ;;  %7869 = vst [vmem:[#allocation79_spill] sm:$0xff] %v5748_v58  ;;  %v7870_v3 = vld [vmem:[#allocation13_spill] sm:$0xff] }
 0x47a   :  { %1760 = vmatprep.subr.mxu0 %v7858_v42  ;;  %1917 = vmatprep.subr.mxu1 %v5728_v35  ;;  %v5752_v42 = vld [vmem:[#allocation2 + $0x368] sm:$0xff] }
 0x47b   :  { %1761 = vmatpush2.msra.mxu0 %v7860_v46  ;;  %1918 = vmatpush2.msra.mxu1 %v5732_v26  ;;  %7871 = vst [vmem:[#allocation88_spill] sm:$0xff] %v5752_v42  ;;  %v7872_v46 = vld [vmem:[#allocation14_spill] sm:$0xff] }
 0x47c   :  { %1762 = vmatprep.subr.mxu0 %v7862_v41  ;;  %1919 = vmatprep.subr.mxu1 %v5736_v12  ;;  %v5756_v41 = vld [vmem:[#allocation2 + $0x360] sm:$0xff] }
 0x47d   :  { %1763 = vmatpush2.msra.mxu0 %v7864_v44  ;;  %1920 = vmatpush2.msra.mxu1 %v5740_v11  ;;  %7873 = vst [vmem:[#allocation89_spill] sm:$0xff] %v5756_v41  ;;  %v7874_v44 = vld [vmem:[#allocation15_spill] sm:$0xff] }
 0x47e   :  { %1764 = vmatprep.subr.mxu0 %v7866_v1  ;;  %1921 = vmatprep.subr.mxu1 %v5744_v53  ;;  %v5760_v1 = vld [vmem:[#allocation2 + $0x358] sm:$0xff] }
 0x47f   :  { %1765 = vmatpush2.msra.mxu0 %v7868_v47  ;;  %1922 = vmatpush2.msra.mxu1 %v5748_v58  ;;  %7875 = vst [vmem:[#allocation91_spill] sm:$0xff] %v5760_v1  ;;  %v7876_v47 = vld [vmem:[#allocation16_spill] sm:$0xff]  ;;  %v7907_v58 = vld [vmem:[#allocation34_spill] sm:$0xff] }
 0x480   :  { %1766 = vmatprep.subr.mxu0 %v7870_v3  ;;  %1923 = vmatprep.subr.mxu1 %v5752_v42  ;;  %v7878_v3 = vld [vmem:[#allocation17_spill] sm:$0xff] }
 0x481   :  { %1767 = vmatpush2.msra.mxu0 %v7872_v46  ;;  %1924 = vmatpush2.msra.mxu1 %v5756_v41  ;;  %v7880_v46 = vld [vmem:[#allocation18_spill] sm:$0xff]  ;;  %v5772_v41 = vld [vmem:[#allocation2 + $0x340] sm:$0xff] }
 0x482   :  { %1768 = vmatprep.subr.mxu0 %v7874_v44  ;;  %1925 = vmatprep.subr.mxu1 %v5760_v1  ;;  %7881 = vst [vmem:[#allocation94_spill] sm:$0xff] %v5772_v41  ;;  %v7882_v44 = vld [vmem:[#allocation19_spill] sm:$0xff] }
 0x483   :  { %1769 = vmatpush2.msra.mxu0 %v7876_v47  ;;  %1926 = vmatpush2.msra.mxu1 %v5764_v9  ;;  %v5776_v1 = vld [vmem:[#allocation2 + $0x338] sm:$0xff]  ;;  %v7884_v47 = vld [vmem:[#allocation20_spill] sm:$0xff]  ;;  %v5780_v9 = vld [vmem:[#allocation2 + $0x330] sm:$0xff] }
 0x484   :  { %1770 = vmatprep.subr.mxu0 %v7878_v3  ;;  %1927 = vmatprep.subr.mxu1 %v5768_v60  ;;  %7883 = vst [vmem:[#allocation95_spill] sm:$0xff] %v5776_v1  ;;  %7885 = vst [vmem:[#allocation96_spill] sm:$0xff] %v5780_v9  ;;  %v7886_v3 = vld [vmem:[#allocation21_spill] sm:$0xff] }
 0x485   :  { %1771 = vmatpush2.msra.mxu0 %v7880_v46  ;;  %1928 = vmatpush2.msra.mxu1 %v5772_v41  ;;  %v5784_v60 = vld [vmem:[#allocation2 + $0x328] sm:$0xff]  ;;  %v7888_v46 = vld [vmem:[#allocation22_spill] sm:$0xff]  ;;  %v5788_v41 = vld [vmem:[#allocation2 + $0x320] sm:$0xff] }
 0x486   :  { %1772 = vmatprep.subr.mxu0 %v7882_v44  ;;  %1929 = vmatprep.subr.mxu1 %v5776_v1  ;;  %7887 = vst [vmem:[#allocation97_spill] sm:$0xff] %v5784_v60  ;;  %7889 = vst [vmem:[#allocation98_spill] sm:$0xff] %v5788_v41  ;;  %v7890_v44 = vld [vmem:[#allocation23_spill] sm:$0xff] }
 0x487   :  { %1773 = vmatpush2.msra.mxu0 %v7884_v47  ;;  %1930 = vmatpush2.msra.mxu1 %v5780_v9  ;;  %v5792_v1 = vld [vmem:[#allocation2 + $0x318] sm:$0xff]  ;;  %v7892_v47 = vld [vmem:[#allocation24_spill] sm:$0xff]  ;;  %v5796_v9 = vld [vmem:[#allocation2 + $0x310] sm:$0xff] }
 0x488   :  { %1774 = vmatprep.subr.mxu0 %v7886_v3  ;;  %1931 = vmatprep.subr.mxu1 %v5784_v60  ;;  %7891 = vst [vmem:[#allocation99_spill] sm:$0xff] %v5792_v1  ;;  %7893 = vst [vmem:[#allocation100_spill] sm:$0xff] %v5796_v9  ;;  %v7894_v3 = vld [vmem:[#allocation25_spill] sm:$0xff] }
 0x489   :  { %1775 = vmatpush2.msra.mxu0 %v7888_v46  ;;  %1932 = vmatpush2.msra.mxu1 %v5788_v41  ;;  %v5800_v60 = vld [vmem:[#allocation2 + $0x308] sm:$0xff]  ;;  %v7896_v46 = vld [vmem:[#allocation26_spill] sm:$0xff]  ;;  %v5804_v41 = vld [vmem:[#allocation2 + $0x300] sm:$0xff] }
 0x48a   :  { %1776 = vmatprep.subr.mxu0 %v7890_v44  ;;  %1933 = vmatprep.subr.mxu1 %v5792_v1  ;;  %7895 = vst [vmem:[#allocation101_spill] sm:$0xff] %v5800_v60  ;;  %7897 = vst [vmem:[#allocation102_spill] sm:$0xff] %v5804_v41  ;;  %v7898_v44 = vld [vmem:[#allocation27_spill] sm:$0xff] }
 0x48b   :  { %1777 = vmatpush2.msra.mxu0 %v7892_v47  ;;  %1934 = vmatpush2.msra.mxu1 %v5796_v9  ;;  %v5808_v1 = vld [vmem:[#allocation2 + $0x4f8] sm:$0xff]  ;;  %v7900_v47 = vld [vmem:[#allocation28_spill] sm:$0xff] }
 0x48c   :  { %1778 = vmatprep.subr.mxu0 %v7894_v3  ;;  %1935 = vmatprep.subr.mxu1 %v5800_v60  ;;  %7899 = vst [vmem:[#allocation103_spill] sm:$0xff] %v5808_v1  ;;  %v7901_v9 = vld [vmem:[#allocation30_spill] sm:$0xff]  ;;  %v7902_v3 = vld [vmem:[#allocation31_spill] sm:$0xff]  ;;  %v7903_v60 = vld [vmem:[#allocation29_spill] sm:$0xff] }
 0x48d   :  { %1779 = vmatpush2.msra.mxu0 %v7896_v46  ;;  %1936 = vmatpush2.msra.mxu1 %v5804_v41  ;;  %v7904_v46 = vrot.slane %v5548_v8, 4  ;;  %v7905_v41 = vld [vmem:[#allocation32_spill] sm:$0xff] }
 0x48e   :  { %1780 = vmatprep.subr.mxu0 %v7898_v44  ;;  %2021 = vmatprep.subr.mxu1 %v5808_v1  ;;  %v7906_v44 = vld [vmem:[#allocation33_spill] sm:$0xff]  ;;  %v7911_v8 = vld [vmem:[#allocation40_spill] sm:$0xff] }
 0x48f   :  { %1781 = vmatpush2.msra.mxu0 %v7900_v47  ;;  %v1715_v42 = vsel %vm620_vm2, %v7904_v46, %v7903_v60  ;;  %v7908_v47 = vrot.slane %v5537_v5, 4  ;;  %v5829_v46 = vld [vmem:[#allocation2 + $0xc8] sm:$0xff]  ;;  %v5838_v5 = vld [vmem:[#allocation2 + $0xb0] sm:$0xff] }
 0x490   :  { %1782 = vmatprep.subr.mxu0 %v7901_v9  ;;  %7912 = vst [vmem:[#allocation104_spill] sm:$0xff] %v5829_v46  ;;  %7915 = vst [vmem:[#allocation107_spill] sm:$0xff] %v5838_v5 }
 0x491   :  { %1783 = vmatpush2.msra.mxu0 %v7902_v3  ;;  %v1714_v9 = vsel %vm620_vm2, %v7908_v47, %v7903_v60  ;;  %v7909_v3 = vld [vmem:[#allocation36_spill] sm:$0xff]  ;;  %v5847_v47 = vld [vmem:[#allocation2 + $0x98] sm:$0xff] }
 0x492   :  { %1785 = vmatmul.mubr.f32.vlgmr.msra.gmra.mxu0 %v5559_v2  ;;  %1944 = vmatprep.subr.mxu0 %v7905_v41  ;;  %v7910_v2 = vld [vmem:[#allocation38_spill] sm:$0xff]  ;;  %v5841_v41 = vld [vmem:[#allocation2 + $0xa8] sm:$0xff]  ;;  %7918 = vst [vmem:[#allocation35_spill] sm:$0xff] %v5847_v47 }
 0x493   :  { %1790 = vmatprep.mubr.f32.mxu0 %v1715_v42  ;;  %1945 = vmatpush1.msra.mxu0 %v7906_v44  ;;  %v5832_v42 = vld [vmem:[#allocation2 + $0xc0] sm:$0xff]  ;;  %7916 = vst [vmem:[#allocation108_spill] sm:$0xff] %v5841_v41 }
 0x494   :  { %1946 = vmatprep.subr.mxu0 %v7907_v58  ;;  %7913 = vst [vmem:[#allocation105_spill] sm:$0xff] %v5832_v42  ;;  %v5835_v58 = vld [vmem:[#allocation2 + $0xb8] sm:$0xff]  ;;  %v5844_v44 = vld [vmem:[#allocation2 + $0xa0] sm:$0xff] }
 0x495   :  { %1947 = vmatpush1.msra.mxu0 %v7909_v3  ;;  %7914 = vst [vmem:[#allocation106_spill] sm:$0xff] %v5835_v58  ;;  %7917 = vst [vmem:[#allocation109_spill] sm:$0xff] %v5844_v44  ;;  %v5853_v3 = vld [vmem:[#allocation2 + $0x88] sm:$0xff] }
 0x496   :  { %1791 = vmatmul.mubr.f32.gmra.mxu0 %v1714_v9  ;;  %1948 = vmatprep.subr.mxu0 %v7910_v2  ;;  %v5850_v9 = vld [vmem:[#allocation2 + $0x90] sm:$0xff]  ;;  %7920 = vst [vmem:[#allocation39_spill] sm:$0xff] %v5853_v3  ;;  %v5856_v2 = vld [vmem:[#allocation2 + $0x80] sm:$0xff] }
 0x497   :  { %1949 = vmatpush1.msra.mxu0 %v7911_v8  ;;  %7919 = vst [vmem:[#allocation37_spill] sm:$0xff] %v5850_v9  ;;  %7921 = vst [vmem:[#allocation41_spill] sm:$0xff] %v5856_v2  ;;  %v5859_v8 = vld [vmem:[#allocation2 + $0x78] sm:$0xff] }
 0x498   :  { %1950 = vmatprep.subr.mxu0 %v5829_v46  ;;  %7922 = vst [vmem:[#allocation60_spill] sm:$0xff] %v5859_v8 }
 0x499   :  { %1951 = vmatpush1.msra.mxu0 %v5832_v42 }
 0x49a   :  { %1952 = vmatprep.subr.mxu0 %v5835_v58 }
 0x49b   :  { %1953 = vmatpush1.msra.mxu0 %v5838_v5 }
 0x49c   :  { %1954 = vmatprep.subr.mxu0 %v5841_v41 }
 0x49d   :  { %1955 = vmatpush1.msra.mxu0 %v5844_v44  ;;  %v5862_v44 = vld [vmem:[#allocation2 + $0x70] sm:$0xff] }
 0x49e   :  { %1956 = vmatprep.subr.mxu0 %v5847_v47  ;;  %7923 = vst [vmem:[#allocation62_spill] sm:$0xff] %v5862_v44  ;;  %v5865_v47 = vld [vmem:[#allocation2 + $0x68] sm:$0xff] }
 0x49f   :  { %1957 = vmatpush1.msra.mxu0 %v5850_v9  ;;  %7924 = vst [vmem:[#allocation64_spill] sm:$0xff] %v5865_v47  ;;  %v5868_v9 = vld [vmem:[#allocation2 + $0x60] sm:$0xff] }
 0x4a0   :  { %1958 = vmatprep.subr.mxu0 %v5853_v3  ;;  %7925 = vst [vmem:[#allocation66_spill] sm:$0xff] %v5868_v9  ;;  %v5871_v3 = vld [vmem:[#allocation2 + $0x58] sm:$0xff] }
 0x4a1   :  { %1959 = vmatpush1.msra.mxu0 %v5856_v2  ;;  %7926 = vst [vmem:[#allocation68_spill] sm:$0xff] %v5871_v3  ;;  %v5874_v2 = vld [vmem:[#allocation2 + $0x50] sm:$0xff] }
 0x4a2   :  { %1960 = vmatprep.subr.mxu0 %v5859_v8  ;;  %7927 = vst [vmem:[#allocation70_spill] sm:$0xff] %v5874_v2  ;;  %v5877_v8 = vld [vmem:[#allocation2 + $0x48] sm:$0xff] }
 0x4a3   :  { %1961 = vmatpush1.msra.mxu0 %v5862_v44  ;;  %7928 = vst [vmem:[#allocation72_spill] sm:$0xff] %v5877_v8  ;;  %v5880_v44 = vld [vmem:[#allocation2 + $0x40] sm:$0xff] }
 0x4a4   :  { %1962 = vmatprep.subr.mxu0 %v5865_v47  ;;  %7929 = vst [vmem:[#allocation74_spill] sm:$0xff] %v5880_v44  ;;  %v5883_v47 = vld [vmem:[#allocation2 + $0x38] sm:$0xff] }
 0x4a5   :  { %1963 = vmatpush1.msra.mxu0 %v5868_v9  ;;  %7930 = vst [vmem:[#allocation76_spill] sm:$0xff] %v5883_v47  ;;  %v5886_v9 = vld [vmem:[#allocation2 + $0x30] sm:$0xff] }
 0x4a6   :  { %1964 = vmatprep.subr.mxu0 %v5871_v3  ;;  %7931 = vst [vmem:[#allocation78_spill] sm:$0xff] %v5886_v9  ;;  %v5889_v3 = vld [vmem:[#allocation2 + $0x28] sm:$0xff] }
 0x4a7   :  { %1965 = vmatpush1.msra.mxu0 %v5874_v2  ;;  %7932 = vst [vmem:[#allocation83_spill] sm:$0xff] %v5889_v3  ;;  %v5892_v2 = vld [vmem:[#allocation2 + $0x20] sm:$0xff] }
 0x4a8   :  { %1966 = vmatprep.subr.mxu0 %v5877_v8  ;;  %7933 = vst [vmem:[#allocation84_spill] sm:$0xff] %v5892_v2  ;;  %v5895_v8 = vld [vmem:[#allocation2 + $0x18] sm:$0xff] }
 0x4a9   :  { %1967 = vmatpush1.msra.mxu0 %v5880_v44  ;;  %7934 = vst [vmem:[#allocation9_spill] sm:$0xff] %v5895_v8  ;;  %v5898_v44 = vld [vmem:[#allocation2 + $0x10] sm:$0xff] }
 0x4aa   :  { %1968 = vmatprep.subr.mxu0 %v5883_v47  ;;  %7935 = vst [vmem:[#allocation86_spill] sm:$0xff] %v5898_v44  ;;  %v5901_v47 = vld [vmem:[#allocation2 + $0x8] sm:$0xff] }
 0x4ab   :  { %1969 = vmatpush1.msra.mxu0 %v5886_v9  ;;  %7936 = vst [vmem:[#allocation10_spill] sm:$0xff] %v5901_v47  ;;  %v5904_v9 = vld [vmem:[#allocation2] sm:$0xff] }
 0x4ac   :  { %1970 = vmatprep.subr.mxu0 %v5889_v3  ;;  %7937 = vst [vmem:[#allocation11_spill] sm:$0xff] %v5904_v9  ;;  %v5907_v3 = vld [vmem:[#allocation2 + $0x1f8] sm:$0xff] }
 0x4ad   :  { %1971 = vmatpush1.msra.mxu0 %v5892_v2  ;;  %7938 = vst [vmem:[#allocation12_spill] sm:$0xff] %v5907_v3  ;;  %v5910_v2 = vld [vmem:[#allocation2 + $0x1f0] sm:$0xff] }
 0x4ae   :  { %1972 = vmatprep.subr.mxu0 %v5895_v8  ;;  %7939 = vst [vmem:[#allocation87_spill] sm:$0xff] %v5910_v2  ;;  %v5913_v8 = vld [vmem:[#allocation2 + $0x1e8] sm:$0xff] }
 0x4af   :  { %1973 = vmatpush1.msra.mxu0 %v5898_v44  ;;  %7940 = vst [vmem:[#allocation13_spill] sm:$0xff] %v5913_v8  ;;  %v5916_v44 = vld [vmem:[#allocation2 + $0x1e0] sm:$0xff] }
 0x4b0   :  { %1974 = vmatprep.subr.mxu0 %v5901_v47  ;;  %7941 = vst [vmem:[#allocation14_spill] sm:$0xff] %v5916_v44  ;;  %v5919_v47 = vld [vmem:[#allocation2 + $0x1d8] sm:$0xff] }
 0x4b1   :  { %1975 = vmatpush1.msra.mxu0 %v5904_v9  ;;  %7942 = vst [vmem:[#allocation15_spill] sm:$0xff] %v5919_v47  ;;  %v5922_v9 = vld [vmem:[#allocation2 + $0x1d0] sm:$0xff] }
 0x4b2   :  { %1976 = vmatprep.subr.mxu0 %v5907_v3  ;;  %7943 = vst [vmem:[#allocation16_spill] sm:$0xff] %v5922_v9  ;;  %v5925_v3 = vld [vmem:[#allocation2 + $0x1c8] sm:$0xff] }
 0x4b3   :  { %1977 = vmatpush2.msra.mxu0 %v5910_v2  ;;  %7944 = vst [vmem:[#allocation17_spill] sm:$0xff] %v5925_v3  ;;  %v5928_v2 = vld [vmem:[#allocation2 + $0x1c0] sm:$0xff] }
 0x4b4   :  { %1978 = vmatprep.subr.mxu0 %v5913_v8  ;;  %7945 = vst [vmem:[#allocation18_spill] sm:$0xff] %v5928_v2  ;;  %v5931_v8 = vld [vmem:[#allocation2 + $0x1b8] sm:$0xff] }
 0x4b5   :  { %1979 = vmatpush2.msra.mxu0 %v5916_v44  ;;  %7946 = vst [vmem:[#allocation19_spill] sm:$0xff] %v5931_v8  ;;  %v5934_v44 = vld [vmem:[#allocation2 + $0x1b0] sm:$0xff] }
 0x4b6   :  { %1980 = vmatprep.subr.mxu0 %v5919_v47  ;;  %7947 = vst [vmem:[#allocation20_spill] sm:$0xff] %v5934_v44  ;;  %v5937_v47 = vld [vmem:[#allocation2 + $0x1a8] sm:$0xff] }
 0x4b7   :  { %1981 = vmatpush2.msra.mxu0 %v5922_v9  ;;  %7948 = vst [vmem:[#allocation21_spill] sm:$0xff] %v5937_v47  ;;  %v5940_v9 = vld [vmem:[#allocation2 + $0x1a0] sm:$0xff] }
 0x4b8   :  { %1982 = vmatprep.subr.mxu0 %v5925_v3  ;;  %7949 = vst [vmem:[#allocation22_spill] sm:$0xff] %v5940_v9  ;;  %v5943_v3 = vld [vmem:[#allocation2 + $0x198] sm:$0xff] }
 0x4b9   :  { %1983 = vmatpush2.msra.mxu0 %v5928_v2  ;;  %7950 = vst [vmem:[#allocation23_spill] sm:$0xff] %v5943_v3  ;;  %v5946_v2 = vld [vmem:[#allocation2 + $0x190] sm:$0xff] }
 0x4ba   :  { %1984 = vmatprep.subr.mxu0 %v5931_v8  ;;  %7951 = vst [vmem:[#allocation24_spill] sm:$0xff] %v5946_v2  ;;  %v5949_v8 = vld [vmem:[#allocation2 + $0x188] sm:$0xff] }
 0x4bb   :  { %1985 = vmatpush2.msra.mxu0 %v5934_v44  ;;  %7952 = vst [vmem:[#allocation25_spill] sm:$0xff] %v5949_v8  ;;  %v5952_v44 = vld [vmem:[#allocation2 + $0x180] sm:$0xff] }
 0x4bc   :  { %1986 = vmatprep.subr.mxu0 %v5937_v47  ;;  %7953 = vst [vmem:[#allocation26_spill] sm:$0xff] %v5952_v44  ;;  %v5955_v47 = vld [vmem:[#allocation2 + $0x178] sm:$0xff] }
 0x4bd   :  { %1987 = vmatpush2.msra.mxu0 %v5940_v9  ;;  %7954 = vst [vmem:[#allocation27_spill] sm:$0xff] %v5955_v47  ;;  %v5958_v9 = vld [vmem:[#allocation2 + $0x170] sm:$0xff] }
 0x4be   :  { %1988 = vmatprep.subr.mxu0 %v5943_v3  ;;  %7955 = vst [vmem:[#allocation28_spill] sm:$0xff] %v5958_v9  ;;  %v5961_v3 = vld [vmem:[#allocation2 + $0x168] sm:$0xff] }
 0x4bf   :  { %1989 = vmatpush2.msra.mxu0 %v5946_v2  ;;  %7956 = vst [vmem:[#allocation30_spill] sm:$0xff] %v5961_v3  ;;  %v5964_v2 = vld [vmem:[#allocation2 + $0x160] sm:$0xff] }
 0x4c0   :  { %1990 = vmatprep.subr.mxu0 %v5949_v8  ;;  %7957 = vst [vmem:[#allocation31_spill] sm:$0xff] %v5964_v2  ;;  %v5967_v8 = vld [vmem:[#allocation2 + $0x158] sm:$0xff] }
 0x4c1   :  { %1991 = vmatpush2.msra.mxu0 %v5952_v44  ;;  %7958 = vst [vmem:[#allocation29_spill] sm:$0xff] %v5967_v8  ;;  %v5970_v44 = vld [vmem:[#allocation2 + $0x150] sm:$0xff] }
 0x4c2   :  { %1992 = vmatprep.subr.mxu0 %v5955_v47  ;;  %7959 = vst [vmem:[#allocation32_spill] sm:$0xff] %v5970_v44  ;;  %v5973_v47 = vld [vmem:[#allocation2 + $0x148] sm:$0xff] }
 0x4c3   :  { %1993 = vmatpush2.msra.mxu0 %v5958_v9  ;;  %7960 = vst [vmem:[#allocation33_spill] sm:$0xff] %v5973_v47  ;;  %v5976_v9 = vld [vmem:[#allocation2 + $0x140] sm:$0xff] }
 0x4c4   :  { %1994 = vmatprep.subr.mxu0 %v5961_v3  ;;  %7961 = vst [vmem:[#allocation34_spill] sm:$0xff] %v5976_v9  ;;  %v5979_v3 = vld [vmem:[#allocation2 + $0x138] sm:$0xff] }
 0x4c5   :  { %1995 = vmatpush2.msra.mxu0 %v5964_v2  ;;  %7962 = vst [vmem:[#allocation36_spill] sm:$0xff] %v5979_v3  ;;  %v5982_v2 = vld [vmem:[#allocation2 + $0x130] sm:$0xff] }
 0x4c6   :  { %1996 = vmatprep.subr.mxu0 %v5967_v8  ;;  %7963 = vst [vmem:[#allocation38_spill] sm:$0xff] %v5982_v2  ;;  %v5985_v8 = vld [vmem:[#allocation2 + $0x128] sm:$0xff] }
 0x4c7   :  { %1997 = vmatpush2.msra.mxu0 %v5970_v44  ;;  %7964 = vst [vmem:[#allocation40_spill] sm:$0xff] %v5985_v8  ;;  %v5988_v44 = vld [vmem:[#allocation2 + $0x120] sm:$0xff] }
 0x4c8   :  { %1998 = vmatprep.subr.mxu0 %v5973_v47  ;;  %7965 = vst [vmem:[#allocation110_spill] sm:$0xff] %v5988_v44  ;;  %v5991_v47 = vld [vmem:[#allocation2 + $0x118] sm:$0xff] }
 0x4c9   :  { %1999 = vmatpush2.msra.mxu0 %v5976_v9  ;;  %7966 = vst [vmem:[#allocation111_spill] sm:$0xff] %v5991_v47  ;;  %v5994_v9 = vld [vmem:[#allocation2 + $0x110] sm:$0xff] }
 0x4ca   :  { %2000 = vmatprep.subr.mxu0 %v5979_v3  ;;  %7967 = vst [vmem:[#allocation112_spill] sm:$0xff] %v5994_v9  ;;  %v5997_v3 = vld [vmem:[#allocation2 + $0x108] sm:$0xff] }
 0x4cb   :  { %2001 = vmatpush2.msra.mxu0 %v5982_v2  ;;  %7968 = vst [vmem:[#allocation113_spill] sm:$0xff] %v5997_v3  ;;  %v6000_v2 = vld [vmem:[#allocation2 + $0x100] sm:$0xff] }
 0x4cc   :  { %2002 = vmatprep.subr.mxu0 %v5985_v8  ;;  %7969 = vst [vmem:[#allocation114_spill] sm:$0xff] %v6000_v2  ;;  %v7970_v8 = vld [vmem:[#allocation42_spill] sm:$0xff] }
 0x4cd   :  { %2003 = vmatpush2.msra.mxu0 %v5988_v44 }
 0x4ce   :  { %2004 = vmatprep.subr.mxu0 %v5991_v47 }
 0x4cf   :  { %2005 = vmatpush2.msra.mxu0 %v5994_v9 }
 0x4d0   :  { %2006 = vmatprep.subr.mxu0 %v5997_v3 }
 0x4d1   :  { %2007 = vmatpush2.msra.mxu0 %v6000_v2 }
 0x4d2   :  { %2112 = vmatprep.subr.mxu0 %v7970_v8 }
 0x50a   :  { %v1697_v5 = vpop.f32.mrf.mxu1 }
 0x50c   :  { %v1699_v42 = vpop.f32.mrf.mxu1 }
 0x50f   :  { %v1703_v53 = vpop.f32.mrf.mxu1 }
 0x511   :  { %v1705_v2 = vpop.f32.mrf.mxu1 }
 0x512   :  { %v1620_v41 = vpop.f32.mrf.mxu0 }
 0x513   :  { %v1698_v46 = vadd.f32 %v1697_v5, %v1620_v41 }
 0x514   :  { %v1622_v44 = vpop.f32.mrf.mxu0 }
 0x515   :  { %v1700_v9 = vadd.f32 %v1699_v42, %v1622_v44 }
 0x516   :  { %v1626_v58 = vpop.f32.mrf.mxu0 }
 0x517   :  { %v1704_v26 = vadd.f32 %v1703_v53, %v1626_v58 }
 0x518   :  { %v1628_v47 = vpop.f32.mrf.mxu0 }
 0x519   :  { %v1706_v17 = vadd.f32 %v1705_v2, %v1628_v47 }
 0x552   :  { %v1786_v1 = vpop.f32.mrf.mxu0 }
 0x553   :  { %v1797_v11 = vadd.f32 %v1786_v1, %v1698_v46  ;;  %v7973_v46 = vld [vmem:[#allocation82_spill] sm:$0xff] }
 0x554   :  { %v1788_v12 = vpop.f32.mrf.mxu0 }
 0x555   :  { %v1801_v3 = vadd.f32 %v1797_v11, %v4604_v51  ;;  %v1798_v35 = vadd.f32 %v1788_v12, %v1700_v9 }
 0x556   :  { %v1792_v0 = vpop.f32.mrf.mxu0 }
 0x557   :  { %v1805_v8 = vadd.f32 %v1801_v3, %v7971_v20  ;;  %v1802_v24 = vadd.f32 %v1798_v35, %v4608_v45  ;;  %v1799_v19 = vadd.f32 %v1792_v0, %v1704_v26  ;;  %v7974_v35 = vld [vmem:[#allocation90_spill] sm:$0xff] }
 0x558   :  { %v1794_v6 = vpop.f32.mrf.mxu0 }
 0x559   :  { %v1806_v5 = vadd.f32 %v1802_v24, %v7972_v52  ;;  %v1803_v41 = vadd.f32 %v1799_v19, %v4604_v51  ;;  %v1813_v42 = vrot.slane %v1805_v8, 2  ;;  %v1800_v1 = vadd.f32 %v1794_v6, %v1706_v17 }
 0x55a   :  { %v1819_v26 = vrot.slane %v1805_v8, 4 }
 0x55b   :  { %v1807_v53 = vadd.f32 %v1803_v41, %v7973_v46  ;;  %v1804_v11 = vadd.f32 %v1800_v1, %v4608_v45  ;;  %v1814_v12 = vrot.slane %v1806_v5, 2  ;;  %v1817_v44 = vmax.f32 %v1805_v8, %v1813_v42 }
 0x55c   :  { %v1820_v1 = vrot.slane %v1806_v5, 4 }
 0x55d   :  { %v1809_v58 = vsel %vm219_vm3, %v1807_v53, 0.0  ;;  %v1808_v0 = vadd.f32 %v1804_v11, %v7974_v35  ;;  %v1818_v19 = vmax.f32 %v1806_v5, %v1814_v12  ;;  %v1823_v17 = vmax.f32 %v1817_v44, %v1819_v26 }
 0x55e   :  { %v1827_v20 = vrot.slane %v1809_v58, 4  ;;  %v1833_v9 = vrot.slane %v1809_v58, 2 }
 0x55f   :  { %v1810_v52 = vsel %vm219_vm3, %v1808_v0, 0.0  ;;  %v1824_v51 = vmax.f32 %v1818_v19, %v1820_v1  ;;  %v6069_v1 = vld [vmem:[#allocation2 + $0x4b0] sm:$0xff] }
 0x560   :  { %v1831_v47 = vmax.f32 %v1817_v44, %v1827_v20  ;;  %v1837_v3 = vmax.f32 %v1809_v58, %v1833_v9  ;;  %v1828_v24 = vrot.slane %v1810_v52, 4  ;;  %v1834_v6 = vrot.slane %v1810_v52, 2 }
 0x562   :  { %v1839_v2 = vmax.f32 %v1837_v3, %v1827_v20  ;;  %v1843_v41 = vrot.slane %v1831_v47, 2  ;;  %v1832_v46 = vmax.f32 %v1818_v19, %v1828_v24  ;;  %v1838_v45 = vmax.f32 %v1810_v52, %v1834_v6  ;;  %v6038_v3 = vld [vmem:[#allocation2 + $0x4f0] sm:$0xff]  ;;  %v6041_v52 = vld [vmem:[#allocation2 + $0x4e8] sm:$0xff]  ;;  %v6045_v19 = vld [vmem:[#allocation2 + $0x4e0] sm:$0xff] }
 0x563   :  { %v6053_v6 = vld [vmem:[#allocation2 + $0x4d0] sm:$0xff] }
 0x564   :  { %v1849_v53 = vrot.slane %v1839_v2, 4  ;;  %v1853_v42 = vsel %vm194_vm0, %v1823_v17, %v1843_v41  ;;  %v1840_v13 = vmax.f32 %v1838_v45, %v1828_v24  ;;  %v1844_v11 = vrot.slane %v1832_v46, 2  ;;  %v6049_v24 = vld [vmem:[#allocation2 + $0x4d8] sm:$0xff]  ;;  %v6057_v17 = vld [vmem:[#allocation2 + $0x4c8] sm:$0xff]  ;;  %v6061_v2 = vld [vmem:[#allocation2 + $0x4c0] sm:$0xff] }
 0x565   :  { %v6065_v41 = vld [vmem:[#allocation2 + $0x4b8] sm:$0xff]  ;;  %v6073_v46 = vld [vmem:[#allocation2 + $0x4a8] sm:$0xff] }
 0x566   :  { %v6016_v8 = vsel %vm620_vm2, %v1853_v42, %v1849_v53  ;;  %v1850_v12 = vrot.slane %v1840_v13, 4  ;;  %v1854_v9 = vsel %vm194_vm0, %v1824_v51, %v1844_v11  ;;  %v6077_v53 = vld [vmem:[#allocation2 + $0x4a0] sm:$0xff]  ;;  %v6081_v42 = vld [vmem:[#allocation2 + $0x498] sm:$0xff]  ;;  %v6085_v11 = vld [vmem:[#allocation2 + $0x490] sm:$0xff] }
 0x567   :  { %7975 = vst [vmem:[#allocation42_spill] sm:$0xff] %v6016_v8  ;;  %v1857_v58 = vmax.f32 %v6016_v8, 0.0  ;;  %v6137_v8 = vld [vmem:[#allocation2 + $0x428] sm:$0xff] }
 0x568   :  { %v6021_v20 = vsel %vm620_vm2, %v1854_v9, %v1850_v12  ;;  %v6093_v12 = vld [vmem:[#allocation2 + $0x480] sm:$0xff]  ;;  %v6097_v9 = vld [vmem:[#allocation2 + $0x478] sm:$0xff]  ;;  %7981 = vst [vmem:[#allocation116_spill] sm:$0xff] %v6137_v8 }
 0x569   :  { %v1861_v44 = vrot.slane %v1857_v58, 6  ;;  %7976 = vst [vmem:[#allocation80_spill] sm:$0xff] %v6021_v20  ;;  %v1858_v5 = vmax.f32 %v6021_v20, 0.0  ;;  %v6089_v58 = vld [vmem:[#allocation2 + $0x488] sm:$0xff]  ;;  %v6133_v20 = vld [vmem:[#allocation2 + $0x430] sm:$0xff] }
 0x56a   :  { %7980 = vst [vmem:[#allocation115_spill] sm:$0xff] %v6133_v20 }
 0x56b   :  { %v1862_v35 = vrot.slane %v1858_v5, 6  ;;  %v6025_v0 = vsel %vm194_vm0, 0.0, %v1861_v44  ;;  %v6105_v5 = vld [vmem:[#allocation2 + $0x468] sm:$0xff] }
 0x56c   :  { %v1869_v26 = vrot.slane %v6025_v0, 2 }
 0x56d   :  { %2980 = vmatprep.mubr.msk.f32.mxu0 %vm4194_vm1, %v1862_v35  ;;  %v1866_v45 = vsel %vm194_vm0, 0.0, %v1862_v35  ;;  %v6109_v35 = vld [vmem:[#allocation2 + $0x460] sm:$0xff] }
 0x56e   :  { %2982 = vmatmul.mubr.msk.f32.vlgmr.msra.gmra.mxu0 %vm4194_vm1, %v1861_v44  ;;  %v1870_v13 = vrot.slane %v1866_v45, 2  ;;  %v2017_v51 = vrot.slane %v1866_v45, 4  ;;  %v6101_v44 = vld [vmem:[#allocation2 + $0x470] sm:$0xff]  ;;  %v6113_v45 = vld [vmem:[#allocation2 + $0x458] sm:$0xff] }
 0x56f   :  { %2113 = vmatpush1.msra.mxu0 %v5540_v56 }
 0x570   :  { %1937 = vmatprep.mubr.f32.mxu1 %v1870_v13  ;;  %v2018_v47 = vsel %vm620_vm2, %v2017_v51, %v7903_v60  ;;  %2114 = vmatprep.subr.mxu0 %v5544_v50  ;;  %v6117_v13 = vld [vmem:[#allocation2 + $0x450] sm:$0xff]  ;;  %v6121_v51 = vld [vmem:[#allocation2 + $0x448] sm:$0xff] }
 0x571   :  { %1938 = vmatmul.mubr.f32.vlgmr.msra.gmra.mxu1 %v1869_v26  ;;  %2115 = vmatpush1.msra.mxu0 %v5551_v29  ;;  %7977 = vst [vmem:[#allocation81_spill] sm:$0xff] %v6121_v51  ;;  %v6125_v26 = vld [vmem:[#allocation2 + $0x440] sm:$0xff] }
 0x572   :  { %2022 = vmatpush1.msra.mxu1 %v6038_v3  ;;  %2085 = vmatprep.mubr.f32.mxu1 %v2018_v47  ;;  %7978 = vst [vmem:[#allocation82_spill] sm:$0xff] %v6125_v26  ;;  %v6129_v47 = vld [vmem:[#allocation2 + $0x438] sm:$0xff] }
 0x573   :  { %2023 = vmatprep.subr.mxu1 %v6041_v52  ;;  %2116 = vmatprep.subr.mxu0 %v5561_v39  ;;  %7979 = vst [vmem:[#allocation90_spill] sm:$0xff] %v6129_v47 }
 0x574   :  { %2024 = vmatpush1.msra.mxu1 %v6045_v19  ;;  %2117 = vmatpush1.msra.mxu0 %v5566_v54 }
 0x575   :  { %2025 = vmatprep.subr.mxu1 %v6049_v24  ;;  %2118 = vmatprep.subr.mxu0 %v5570_v28 }
 0x576   :  { %2026 = vmatpush1.msra.mxu1 %v6053_v6  ;;  %2119 = vmatpush1.msra.mxu0 %v5574_v15 }
 0x577   :  { %2027 = vmatprep.subr.mxu1 %v6057_v17  ;;  %2120 = vmatprep.subr.mxu0 %v5579_v61 }
 0x578   :  { %2028 = vmatpush1.msra.mxu1 %v6061_v2  ;;  %2121 = vmatpush1.msra.mxu0 %v5583_v62 }
 0x579   :  { %2029 = vmatprep.subr.mxu1 %v6065_v41  ;;  %2122 = vmatprep.subr.mxu0 %v5592_v30 }
 0x57a   :  { %2030 = vmatpush1.msra.mxu1 %v6069_v1  ;;  %2123 = vmatpush1.msra.mxu0 %v5596_v14 }
 0x57b   :  { %2031 = vmatprep.subr.mxu1 %v6073_v46  ;;  %2124 = vmatprep.subr.mxu0 %v5600_v7 }
 0x57c   :  { %2032 = vmatpush1.msra.mxu1 %v6077_v53  ;;  %2125 = vmatpush1.msra.mxu0 %v5604_v27 }
 0x57d   :  { %2033 = vmatprep.subr.mxu1 %v6081_v42  ;;  %2126 = vmatprep.subr.mxu0 %v5608_v10 }
 0x57e   :  { %2034 = vmatpush1.msra.mxu1 %v6085_v11  ;;  %2127 = vmatpush1.msra.mxu0 %v5612_v32 }
 0x57f   :  { %2035 = vmatprep.subr.mxu1 %v6089_v58  ;;  %2128 = vmatprep.subr.mxu0 %v5616_v33 }
 0x580   :  { %2036 = vmatpush1.msra.mxu1 %v6093_v12  ;;  %2129 = vmatpush1.msra.mxu0 %v5620_v63 }
 0x581   :  { %2037 = vmatprep.subr.mxu1 %v6097_v9  ;;  %2130 = vmatprep.subr.mxu0 %v5624_v55 }
 0x582   :  { %2038 = vmatpush1.msra.mxu1 %v6101_v44  ;;  %2131 = vmatpush1.msra.mxu0 %v5628_v31 }
 0x583   :  { %2039 = vmatprep.subr.mxu1 %v6105_v5  ;;  %2132 = vmatprep.subr.mxu0 %v5632_v34 }
 0x584   :  { %2040 = vmatpush1.msra.mxu1 %v6109_v35  ;;  %2133 = vmatpush1.msra.mxu0 %v5636_v21 }
 0x585   :  { %2041 = vmatprep.subr.mxu1 %v6113_v45  ;;  %2134 = vmatprep.subr.mxu0 %v5640_v22 }
 0x586   :  { %2042 = vmatpush1.msra.mxu1 %v6117_v13  ;;  %2135 = vmatpush1.msra.mxu0 %v5644_v36 }
 0x587   :  { %2043 = vmatprep.subr.mxu1 %v6121_v51  ;;  %2136 = vmatprep.subr.mxu0 %v5648_v38 }
 0x588   :  { %2044 = vmatpush1.msra.mxu1 %v6125_v26  ;;  %2137 = vmatpush1.msra.mxu0 %v5652_v43  ;;  %v6141_v26 = vld [vmem:[#allocation2 + $0x420] sm:$0xff] }
 0x589   :  { %2045 = vmatprep.subr.mxu1 %v6129_v47  ;;  %2138 = vmatprep.subr.mxu0 %v5656_v23  ;;  %7982 = vst [vmem:[#allocation117_spill] sm:$0xff] %v6141_v26  ;;  %v6145_v47 = vld [vmem:[#allocation2 + $0x418] sm:$0xff] }
 0x58a   :  { %2046 = vmatpush1.msra.mxu1 %v6133_v20  ;;  %2139 = vmatpush1.msra.mxu0 %v5660_v40  ;;  %7983 = vst [vmem:[#allocation118_spill] sm:$0xff] %v6145_v47  ;;  %v6149_v20 = vld [vmem:[#allocation2 + $0x410] sm:$0xff] }
 0x58b   :  { %2047 = vmatprep.subr.mxu1 %v6137_v8  ;;  %2140 = vmatprep.subr.mxu0 %v5664_v37  ;;  %7984 = vst [vmem:[#allocation119_spill] sm:$0xff] %v6149_v20  ;;  %v6153_v8 = vld [vmem:[#allocation2 + $0x408] sm:$0xff] }
 0x58c   :  { %2048 = vmatpush1.msra.mxu1 %v6141_v26  ;;  %2141 = vmatpush1.msra.mxu0 %v5668_v18  ;;  %7985 = vst [vmem:[#allocation120_spill] sm:$0xff] %v6153_v8  ;;  %v6157_v26 = vld [vmem:[#allocation2 + $0x400] sm:$0xff] }
 0x58d   :  { %2049 = vmatprep.subr.mxu1 %v6145_v47  ;;  %2142 = vmatprep.subr.mxu0 %v5672_v57  ;;  %7986 = vst [vmem:[#allocation121_spill] sm:$0xff] %v6157_v26  ;;  %v6161_v47 = vld [vmem:[#allocation2 + $0x5f8] sm:$0xff]  ;;  %v8063_v57 = vld [vmem:[#allocation41_spill] sm:$0xff] }
 0x58e   :  { %2050 = vmatpush1.msra.mxu1 %v6149_v20  ;;  %2143 = vmatpush1.msra.mxu0 %v5676_v25  ;;  %7987 = vst [vmem:[#allocation122_spill] sm:$0xff] %v6161_v47  ;;  %v6165_v20 = vld [vmem:[#allocation2 + $0x5f0] sm:$0xff] }
 0x58f   :  { %2051 = vmatprep.subr.mxu1 %v6153_v8  ;;  %2144 = vmatprep.subr.mxu0 %v5680_v16  ;;  %7988 = vst [vmem:[#allocation123_spill] sm:$0xff] %v6165_v20  ;;  %v6169_v8 = vld [vmem:[#allocation2 + $0x5e8] sm:$0xff] }
 0x590   :  { %2052 = vmatpush1.msra.mxu1 %v6157_v26  ;;  %2145 = vmatpush2.msra.mxu0 %v5684_v49  ;;  %7989 = vst [vmem:[#allocation124_spill] sm:$0xff] %v6169_v8  ;;  %v7990_v16 = vld [vmem:[#allocation56_spill] sm:$0xff]  ;;  %v7992_v49 = vld [vmem:[#allocation57_spill] sm:$0xff] }
 0x591   :  { %2053 = vmatprep.subr.mxu1 %v6161_v47  ;;  %2146 = vmatprep.subr.mxu0 %v5688_v4  ;;  %v6173_v26 = vld [vmem:[#allocation2 + $0x5e0] sm:$0xff]  ;;  %v6177_v47 = vld [vmem:[#allocation2 + $0x5d8] sm:$0xff]  ;;  %v8061_v25 = vld [vmem:[#allocation37_spill] sm:$0xff] }
 0x592   :  { %2054 = vmatpush2.msra.mxu1 %v6165_v20  ;;  %2147 = vmatpush2.msra.mxu0 %v5692_v48  ;;  %7991 = vst [vmem:[#allocation125_spill] sm:$0xff] %v6173_v26  ;;  %7993 = vst [vmem:[#allocation126_spill] sm:$0xff] %v6177_v47  ;;  %v7994_v4 = vld [vmem:[#allocation58_spill] sm:$0xff]  ;;  %v7996_v48 = vld [vmem:[#allocation59_spill] sm:$0xff] }
 0x593   :  { %2055 = vmatprep.subr.mxu1 %v6169_v8  ;;  %2148 = vmatprep.subr.mxu0 %v7990_v16  ;;  %v6181_v20 = vld [vmem:[#allocation2 + $0x5d0] sm:$0xff]  ;;  %v6185_v8 = vld [vmem:[#allocation2 + $0x5c8] sm:$0xff] }
 0x594   :  { %2056 = vmatpush2.msra.mxu1 %v6173_v26  ;;  %2149 = vmatpush2.msra.mxu0 %v7992_v49  ;;  %7995 = vst [vmem:[#allocation127_spill] sm:$0xff] %v6181_v20  ;;  %7997 = vst [vmem:[#allocation128_spill] sm:$0xff] %v6185_v8  ;;  %v7998_v16 = vld [vmem:[#allocation61_spill] sm:$0xff]  ;;  %v6189_v26 = vld [vmem:[#allocation2 + $0x5c0] sm:$0xff] }
 0x595   :  { %2057 = vmatprep.subr.mxu1 %v6177_v47  ;;  %2150 = vmatprep.subr.mxu0 %v7994_v4  ;;  %7999 = vst [vmem:[#allocation129_spill] sm:$0xff] %v6189_v26  ;;  %v8000_v49 = vld [vmem:[#allocation63_spill] sm:$0xff]  ;;  %v8002_v4 = vld [vmem:[#allocation65_spill] sm:$0xff] }
 0x596   :  { %2058 = vmatpush2.msra.mxu1 %v6181_v20  ;;  %2151 = vmatpush2.msra.mxu0 %v7996_v48  ;;  %v6193_v47 = vld [vmem:[#allocation2 + $0x5b8] sm:$0xff]  ;;  %v6197_v20 = vld [vmem:[#allocation2 + $0x5b0] sm:$0xff] }
 0x597   :  { %2059 = vmatprep.subr.mxu1 %v6185_v8  ;;  %2152 = vmatprep.subr.mxu0 %v7998_v16  ;;  %8001 = vst [vmem:[#allocation130_spill] sm:$0xff] %v6193_v47  ;;  %8003 = vst [vmem:[#allocation131_spill] sm:$0xff] %v6197_v20  ;;  %v8004_v48 = vld [vmem:[#allocation67_spill] sm:$0xff]  ;;  %v6201_v8 = vld [vmem:[#allocation2 + $0x5a8] sm:$0xff] }
 0x598   :  { %2060 = vmatpush2.msra.mxu1 %v6189_v26  ;;  %2153 = vmatpush2.msra.mxu0 %v8000_v49  ;;  %8005 = vst [vmem:[#allocation132_spill] sm:$0xff] %v6201_v8  ;;  %v8006_v16 = vld [vmem:[#allocation69_spill] sm:$0xff]  ;;  %v6205_v26 = vld [vmem:[#allocation2 + $0x5a0] sm:$0xff] }
 0x599   :  { %2061 = vmatprep.subr.mxu1 %v6193_v47  ;;  %2154 = vmatprep.subr.mxu0 %v8002_v4  ;;  %8007 = vst [vmem:[#allocation133_spill] sm:$0xff] %v6205_v26  ;;  %v8008_v49 = vld [vmem:[#allocation71_spill] sm:$0xff]  ;;  %v8010_v4 = vld [vmem:[#allocation73_spill] sm:$0xff] }
 0x59a   :  { %2062 = vmatpush2.msra.mxu1 %v6197_v20  ;;  %2155 = vmatpush2.msra.mxu0 %v8004_v48  ;;  %v6209_v47 = vld [vmem:[#allocation2 + $0x598] sm:$0xff]  ;;  %v6213_v20 = vld [vmem:[#allocation2 + $0x590] sm:$0xff] }
 0x59b   :  { %2063 = vmatprep.subr.mxu1 %v6201_v8  ;;  %2156 = vmatprep.subr.mxu0 %v8006_v16  ;;  %8009 = vst [vmem:[#allocation134_spill] sm:$0xff] %v6209_v47  ;;  %8011 = vst [vmem:[#allocation135_spill] sm:$0xff] %v6213_v20  ;;  %v8012_v48 = vld [vmem:[#allocation75_spill] sm:$0xff]  ;;  %v6217_v8 = vld [vmem:[#allocation2 + $0x588] sm:$0xff] }
 0x59c   :  { %2064 = vmatpush2.msra.mxu1 %v6205_v26  ;;  %2157 = vmatpush2.msra.mxu0 %v8008_v49  ;;  %8013 = vst [vmem:[#allocation136_spill] sm:$0xff] %v6217_v8  ;;  %v8014_v16 = vld [vmem:[#allocation77_spill] sm:$0xff]  ;;  %v6221_v26 = vld [vmem:[#allocation2 + $0x580] sm:$0xff] }
 0x59d   :  { %2065 = vmatprep.subr.mxu1 %v6209_v47  ;;  %2158 = vmatprep.subr.mxu0 %v8010_v4  ;;  %8015 = vst [vmem:[#allocation137_spill] sm:$0xff] %v6221_v26  ;;  %v8016_v49 = vld [vmem:[#allocation79_spill] sm:$0xff]  ;;  %v8018_v4 = vld [vmem:[#allocation88_spill] sm:$0xff] }
 0x59e   :  { %2066 = vmatpush2.msra.mxu1 %v6213_v20  ;;  %2159 = vmatpush2.msra.mxu0 %v8012_v48  ;;  %v6225_v47 = vld [vmem:[#allocation2 + $0x578] sm:$0xff]  ;;  %v6229_v20 = vld [vmem:[#allocation2 + $0x570] sm:$0xff] }
 0x59f   :  { %2067 = vmatprep.subr.mxu1 %v6217_v8  ;;  %2160 = vmatprep.subr.mxu0 %v8014_v16  ;;  %8017 = vst [vmem:[#allocation138_spill] sm:$0xff] %v6225_v47  ;;  %8019 = vst [vmem:[#allocation139_spill] sm:$0xff] %v6229_v20  ;;  %v8020_v48 = vld [vmem:[#allocation89_spill] sm:$0xff]  ;;  %v8022_v16 = vld [vmem:[#allocation91_spill] sm:$0xff] }
 0x5a0   :  { %2068 = vmatpush2.msra.mxu1 %v6221_v26  ;;  %2161 = vmatpush2.msra.mxu0 %v8016_v49  ;;  %v6233_v8 = vld [vmem:[#allocation2 + $0x568] sm:$0xff]  ;;  %v6237_v26 = vld [vmem:[#allocation2 + $0x560] sm:$0xff] }
 0x5a1   :  { %2069 = vmatprep.subr.mxu1 %v6225_v47  ;;  %2162 = vmatprep.subr.mxu0 %v8018_v4  ;;  %8021 = vst [vmem:[#allocation140_spill] sm:$0xff] %v6233_v8  ;;  %8023 = vst [vmem:[#allocation141_spill] sm:$0xff] %v6237_v26  ;;  %v8024_v49 = vld [vmem:[#allocation92_spill] sm:$0xff]  ;;  %v6241_v47 = vld [vmem:[#allocation2 + $0x558] sm:$0xff] }
 0x5a2   :  { %2070 = vmatpush2.msra.mxu1 %v6229_v20  ;;  %2163 = vmatpush2.msra.mxu0 %v8020_v48  ;;  %8025 = vst [vmem:[#allocation142_spill] sm:$0xff] %v6241_v47  ;;  %v8026_v4 = vld [vmem:[#allocation93_spill] sm:$0xff]  ;;  %v8028_v48 = vld [vmem:[#allocation94_spill] sm:$0xff] }
 0x5a3   :  { %2071 = vmatprep.subr.mxu1 %v6233_v8  ;;  %2164 = vmatprep.subr.mxu0 %v8022_v16  ;;  %v6245_v20 = vld [vmem:[#allocation2 + $0x550] sm:$0xff]  ;;  %v6249_v8 = vld [vmem:[#allocation2 + $0x548] sm:$0xff]  ;;  %v8030_v16 = vld [vmem:[#allocation95_spill] sm:$0xff] }
 0x5a4   :  { %2072 = vmatpush2.msra.mxu1 %v6237_v26  ;;  %2165 = vmatpush2.msra.mxu0 %v8024_v49  ;;  %8027 = vst [vmem:[#allocation143_spill] sm:$0xff] %v6245_v20  ;;  %8029 = vst [vmem:[#allocation144_spill] sm:$0xff] %v6249_v8  ;;  %v6253_v26 = vld [vmem:[#allocation2 + $0x540] sm:$0xff] }
 0x5a5   :  { %2073 = vmatprep.subr.mxu1 %v6241_v47  ;;  %2166 = vmatprep.subr.mxu0 %v8026_v4  ;;  %8031 = vst [vmem:[#allocation145_spill] sm:$0xff] %v6253_v26  ;;  %v8032_v49 = vld [vmem:[#allocation96_spill] sm:$0xff]  ;;  %v6257_v47 = vld [vmem:[#allocation2 + $0x538] sm:$0xff]  ;;  %v8034_v4 = vld [vmem:[#allocation97_spill] sm:$0xff] }
 0x5a6   :  { %2074 = vmatpush2.msra.mxu1 %v6245_v20  ;;  %2167 = vmatpush2.msra.mxu0 %v8028_v48  ;;  %8033 = vst [vmem:[#allocation146_spill] sm:$0xff] %v6257_v47  ;;  %v6261_v20 = vld [vmem:[#allocation2 + $0x530] sm:$0xff] }
 0x5a7   :  { %2075 = vmatprep.subr.mxu1 %v6249_v8  ;;  %2168 = vmatprep.subr.mxu0 %v8030_v16  ;;  %8035 = vst [vmem:[#allocation147_spill] sm:$0xff] %v6261_v20  ;;  %v8036_v48 = vld [vmem:[#allocation98_spill] sm:$0xff]  ;;  %v6265_v8 = vld [vmem:[#allocation2 + $0x528] sm:$0xff]  ;;  %v8038_v16 = vld [vmem:[#allocation99_spill] sm:$0xff] }
 0x5a8   :  { %2076 = vmatpush2.msra.mxu1 %v6253_v26  ;;  %2169 = vmatpush2.msra.mxu0 %v8032_v49  ;;  %8037 = vst [vmem:[#allocation148_spill] sm:$0xff] %v6265_v8  ;;  %v6269_v26 = vld [vmem:[#allocation2 + $0x520] sm:$0xff] }
 0x5a9   :  { %2077 = vmatprep.subr.mxu1 %v6257_v47  ;;  %2170 = vmatprep.subr.mxu0 %v8034_v4  ;;  %8039 = vst [vmem:[#allocation149_spill] sm:$0xff] %v6269_v26  ;;  %v2015_v47 = vrot.slane %v6025_v0, 4  ;;  %v8040_v49 = vld [vmem:[#allocation100_spill] sm:$0xff]  ;;  %v6274_v4 = vld [vmem:[#allocation2 + $0x518] sm:$0xff] }
 0x5aa   :  { %2078 = vmatpush2.msra.mxu1 %v6261_v20  ;;  %2171 = vmatpush2.msra.mxu0 %v8036_v48  ;;  %8041 = vst [vmem:[#allocation150_spill] sm:$0xff] %v6274_v4  ;;  %v8042_v20 = vld [vmem:[#allocation101_spill] sm:$0xff]  ;;  %v6286_v0 = vld [vmem:[#allocation2 + $0x500] sm:$0xff] }
 0x5ab   :  { %2079 = vmatprep.subr.mxu1 %v6265_v8  ;;  %2172 = vmatprep.subr.mxu0 %v8038_v16  ;;  %v6278_v48 = vld [vmem:[#allocation2 + $0x510] sm:$0xff]  ;;  %v6282_v16 = vld [vmem:[#allocation2 + $0x508] sm:$0xff]  ;;  %8047 = vst [vmem:[#allocation153_spill] sm:$0xff] %v6286_v0 }
 0x5ac   :  { %2080 = vmatpush2.msra.mxu1 %v6269_v26  ;;  %2173 = vmatpush2.msra.mxu0 %v8040_v49  ;;  %8043 = vst [vmem:[#allocation151_spill] sm:$0xff] %v6278_v48  ;;  %v8044_v8 = vld [vmem:[#allocation102_spill] sm:$0xff]  ;;  %8045 = vst [vmem:[#allocation152_spill] sm:$0xff] %v6282_v16  ;;  %v8046_v26 = vld [vmem:[#allocation103_spill] sm:$0xff] }
 0x5ad   :  { %2081 = vmatprep.subr.mxu1 %v6274_v4  ;;  %2174 = vmatprep.subr.mxu0 %v8042_v20  ;;  %v2016_v4 = vsel %vm620_vm2, %v2015_v47, %v7903_v60  ;;  %v6291_v20 = vld [vmem:[#allocation2 + $0xf8] sm:$0xff]  ;;  %v8054_v47 = vld [vmem:[#allocation104_spill] sm:$0xff]  ;;  %v8059_v49 = vld [vmem:[#allocation109_spill] sm:$0xff] }
 0x5ae   :  { %2082 = vmatpush2.msra.mxu1 %v6278_v48  ;;  %2175 = vmatpush2.msra.mxu0 %v8044_v8  ;;  %8048 = vst [vmem:[#allocation154_spill] sm:$0xff] %v6291_v20  ;;  %v6294_v48 = vld [vmem:[#allocation2 + $0xf0] sm:$0xff]  ;;  %v6297_v8 = vld [vmem:[#allocation2 + $0xe8] sm:$0xff] }
 0x5af   :  { %2083 = vmatprep.subr.mxu1 %v6282_v16  ;;  %2260 = vmatprep.subr.mxu0 %v8046_v26  ;;  %8049 = vst [vmem:[#allocation155_spill] sm:$0xff] %v6294_v48  ;;  %8050 = vst [vmem:[#allocation156_spill] sm:$0xff] %v6297_v8  ;;  %v6300_v26 = vld [vmem:[#allocation2 + $0xe0] sm:$0xff] }
 0x5b0   :  { %2084 = vmatpush2.msra.mxu1 %v6286_v0  ;;  %8051 = vst [vmem:[#allocation157_spill] sm:$0xff] %v6300_v26  ;;  %v6303_v0 = vld [vmem:[#allocation2 + $0xd8] sm:$0xff] }
 0x5b1   :  { %2086 = vmatmul.mubr.f32.vlgmr.msra.gmra.mxu1 %v2016_v4  ;;  %2183 = vmatprep.subr.mxu1 %v6291_v20  ;;  %8052 = vst [vmem:[#allocation158_spill] sm:$0xff] %v6303_v0  ;;  %v6306_v4 = vld [vmem:[#allocation2 + $0xd0] sm:$0xff]  ;;  %v8057_v16 = vld [vmem:[#allocation107_spill] sm:$0xff] }
 0x5b2   :  { %2184 = vmatpush1.msra.mxu1 %v6294_v48  ;;  %8053 = vst [vmem:[#allocation159_spill] sm:$0xff] %v6306_v4  ;;  %v8055_v20 = vld [vmem:[#allocation105_spill] sm:$0xff]  ;;  %v8056_v48 = vld [vmem:[#allocation106_spill] sm:$0xff] }
 0x5b3   :  { %2185 = vmatprep.subr.mxu1 %v6297_v8  ;;  %v8058_v8 = vld [vmem:[#allocation108_spill] sm:$0xff] }
 0x5b4   :  { %2186 = vmatpush1.msra.mxu1 %v6300_v26  ;;  %v8060_v26 = vld [vmem:[#allocation35_spill] sm:$0xff] }
 0x5b5   :  { %2187 = vmatprep.subr.mxu1 %v6303_v0  ;;  %v8062_v0 = vld [vmem:[#allocation39_spill] sm:$0xff] }
 0x5b6   :  { %2188 = vmatpush1.msra.mxu1 %v6306_v4  ;;  %v8064_v4 = vld [vmem:[#allocation60_spill] sm:$0xff] }
 0x5b7   :  { %2189 = vmatprep.subr.mxu1 %v8054_v47  ;;  %v8065_v47 = vld [vmem:[#allocation62_spill] sm:$0xff] }
 0x5b8   :  { %2190 = vmatpush1.msra.mxu1 %v8055_v20  ;;  %v8066_v20 = vld [vmem:[#allocation64_spill] sm:$0xff] }
 0x5b9   :  { %2191 = vmatprep.subr.mxu1 %v8056_v48  ;;  %v8067_v48 = vld [vmem:[#allocation66_spill] sm:$0xff] }
 0x5ba   :  { %2192 = vmatpush1.msra.mxu1 %v8057_v16  ;;  %v8068_v16 = vld [vmem:[#allocation68_spill] sm:$0xff] }
 0x5bb   :  { %2193 = vmatprep.subr.mxu1 %v8058_v8  ;;  %v8069_v8 = vld [vmem:[#allocation70_spill] sm:$0xff] }
 0x5bc   :  { %2194 = vmatpush1.msra.mxu1 %v8059_v49  ;;  %v8070_v49 = vld [vmem:[#allocation72_spill] sm:$0xff] }
 0x5bd   :  { %2195 = vmatprep.subr.mxu1 %v8060_v26  ;;  %v8071_v26 = vld [vmem:[#allocation74_spill] sm:$0xff] }
 0x5be   :  { %2196 = vmatpush1.msra.mxu1 %v8061_v25  ;;  %v8072_v25 = vld [vmem:[#allocation76_spill] sm:$0xff] }
 0x5bf   :  { %2197 = vmatprep.subr.mxu1 %v8062_v0  ;;  %v8073_v0 = vld [vmem:[#allocation78_spill] sm:$0xff] }
 0x5c0   :  { %2198 = vmatpush1.msra.mxu1 %v8063_v57  ;;  %v8074_v57 = vld [vmem:[#allocation83_spill] sm:$0xff] }
 0x5c1   :  { %2199 = vmatprep.subr.mxu1 %v8064_v4  ;;  %v8075_v4 = vld [vmem:[#allocation84_spill] sm:$0xff] }
 0x5c2   :  { %2200 = vmatpush1.msra.mxu1 %v8065_v47  ;;  %v8076_v47 = vld [vmem:[#allocation9_spill] sm:$0xff] }
 0x5c3   :  { %2201 = vmatprep.subr.mxu1 %v8066_v20  ;;  %v8077_v20 = vld [vmem:[#allocation86_spill] sm:$0xff] }
 0x5c4   :  { %2202 = vmatpush1.msra.mxu1 %v8067_v48  ;;  %v8078_v48 = vld [vmem:[#allocation10_spill] sm:$0xff] }
 0x5c5   :  { %2203 = vmatprep.subr.mxu1 %v8068_v16  ;;  %v8079_v16 = vld [vmem:[#allocation11_spill] sm:$0xff] }
 0x5c6   :  { %2204 = vmatpush1.msra.mxu1 %v8069_v8  ;;  %v8080_v8 = vld [vmem:[#allocation12_spill] sm:$0xff] }
 0x5c7   :  { %2205 = vmatprep.subr.mxu1 %v8070_v49  ;;  %v8081_v49 = vld [vmem:[#allocation87_spill] sm:$0xff] }
 0x5c8   :  { %2206 = vmatpush1.msra.mxu1 %v8071_v26  ;;  %v8082_v26 = vld [vmem:[#allocation13_spill] sm:$0xff] }
 0x5c9   :  { %2207 = vmatprep.subr.mxu1 %v8072_v25  ;;  %v8083_v25 = vld [vmem:[#allocation14_spill] sm:$0xff] }
 0x5ca   :  { %2208 = vmatpush1.msra.mxu1 %v8073_v0  ;;  %v8084_v0 = vld [vmem:[#allocation15_spill] sm:$0xff] }
 0x5cb   :  { %2209 = vmatprep.subr.mxu1 %v8074_v57  ;;  %v8085_v57 = vld [vmem:[#allocation16_spill] sm:$0xff] }
 0x5cc   :  { %2210 = vmatpush1.msra.mxu1 %v8075_v4  ;;  %v8086_v4 = vld [vmem:[#allocation17_spill] sm:$0xff] }
 0x5cd   :  { %2211 = vmatprep.subr.mxu1 %v8076_v47  ;;  %v8087_v47 = vld [vmem:[#allocation18_spill] sm:$0xff] }
 0x5ce   :  { %2212 = vmatpush1.msra.mxu1 %v8077_v20  ;;  %v8088_v20 = vld [vmem:[#allocation19_spill] sm:$0xff] }
 0x5cf   :  { %2213 = vmatprep.subr.mxu1 %v8078_v48  ;;  %v8089_v48 = vld [vmem:[#allocation20_spill] sm:$0xff] }
 0x5d0   :  { %2214 = vmatpush1.msra.mxu1 %v8079_v16  ;;  %v8090_v16 = vld [vmem:[#allocation21_spill] sm:$0xff] }
 0x5d1   :  { %2215 = vmatprep.subr.mxu1 %v8080_v8  ;;  %v8091_v8 = vld [vmem:[#allocation22_spill] sm:$0xff] }
 0x5d2   :  { %2216 = vmatpush2.msra.mxu1 %v8081_v49  ;;  %v8092_v49 = vld [vmem:[#allocation23_spill] sm:$0xff] }
 0x5d3   :  { %2217 = vmatprep.subr.mxu1 %v8082_v26  ;;  %v8093_v26 = vld [vmem:[#allocation24_spill] sm:$0xff] }
 0x5d4   :  { %2218 = vmatpush2.msra.mxu1 %v8083_v25  ;;  %v8094_v25 = vld [vmem:[#allocation25_spill] sm:$0xff] }
 0x5d5   :  { %2219 = vmatprep.subr.mxu1 %v8084_v0  ;;  %v8095_v0 = vld [vmem:[#allocation26_spill] sm:$0xff] }
 0x5d6   :  { %2220 = vmatpush2.msra.mxu1 %v8085_v57  ;;  %v8096_v57 = vld [vmem:[#allocation27_spill] sm:$0xff] }
 0x5d7   :  { %2221 = vmatprep.subr.mxu1 %v8086_v4  ;;  %v8097_v4 = vld [vmem:[#allocation28_spill] sm:$0xff] }
 0x5d8   :  { %2222 = vmatpush2.msra.mxu1 %v8087_v47  ;;  %v8098_v47 = vld [vmem:[#allocation30_spill] sm:$0xff] }
 0x5d9   :  { %2223 = vmatprep.subr.mxu1 %v8088_v20  ;;  %v8099_v20 = vld [vmem:[#allocation31_spill] sm:$0xff] }
 0x5da   :  { %2224 = vmatpush2.msra.mxu1 %v8089_v48  ;;  %v8100_v48 = vld [vmem:[#allocation29_spill] sm:$0xff] }
 0x5db   :  { %2225 = vmatprep.subr.mxu1 %v8090_v16  ;;  %v8101_v16 = vld [vmem:[#allocation32_spill] sm:$0xff] }
 0x5dc   :  { %2226 = vmatpush2.msra.mxu1 %v8091_v8  ;;  %v8102_v8 = vld [vmem:[#allocation33_spill] sm:$0xff] }
 0x5dd   :  { %2227 = vmatprep.subr.mxu1 %v8092_v49  ;;  %v8103_v49 = vld [vmem:[#allocation34_spill] sm:$0xff] }
 0x5de   :  { %2228 = vmatpush2.msra.mxu1 %v8093_v26  ;;  %v8104_v26 = vld [vmem:[#allocation36_spill] sm:$0xff] }
 0x5df   :  { %2229 = vmatprep.subr.mxu1 %v8094_v25  ;;  %v8105_v25 = vld [vmem:[#allocation38_spill] sm:$0xff] }
 0x5e0   :  { %2230 = vmatpush2.msra.mxu1 %v8095_v0  ;;  %v8106_v0 = vld [vmem:[#allocation40_spill] sm:$0xff] }
 0x5e1   :  { %2231 = vmatprep.subr.mxu1 %v8096_v57  ;;  %v8107_v57 = vld [vmem:[#allocation110_spill] sm:$0xff] }
 0x5e2   :  { %2232 = vmatpush2.msra.mxu1 %v8097_v4  ;;  %v8108_v4 = vld [vmem:[#allocation111_spill] sm:$0xff] }
 0x5e3   :  { %2233 = vmatprep.subr.mxu1 %v8098_v47  ;;  %v8109_v47 = vld [vmem:[#allocation112_spill] sm:$0xff] }
 0x5e4   :  { %2234 = vmatpush2.msra.mxu1 %v8099_v20  ;;  %v8110_v20 = vld [vmem:[#allocation113_spill] sm:$0xff] }
 0x5e5   :  { %2235 = vmatprep.subr.mxu1 %v8100_v48  ;;  %v8111_v48 = vld [vmem:[#allocation114_spill] sm:$0xff] }
 0x5e6   :  { %2236 = vmatpush2.msra.mxu1 %v8101_v16  ;;  %v6367_v16 = vld [vmem:[#allocation2 + $0x2f8] sm:$0xff] }
 0x5e7   :  { %2237 = vmatprep.subr.mxu1 %v8102_v8  ;;  %8112 = vst [vmem:[#allocation160_spill] sm:$0xff] %v6367_v16 }
 0x5e8   :  { %2238 = vmatpush2.msra.mxu1 %v8103_v49 }
 0x5e9   :  { %2239 = vmatprep.subr.mxu1 %v8104_v26 }
 0x5ea   :  { %2240 = vmatpush2.msra.mxu1 %v8105_v25 }
 0x5eb   :  { %2241 = vmatprep.subr.mxu1 %v8106_v0 }
 0x5ec   :  { %2242 = vmatpush2.msra.mxu1 %v8107_v57 }
 0x5ed   :  { %2243 = vmatprep.subr.mxu1 %v8108_v4  ;;  %v8113_v4 = vld [vmem:[#allocation8_spill] sm:$0xff] }
 0x5ee   :  { %2244 = vmatpush2.msra.mxu1 %v8109_v47 }
 0x5ef   :  { %2245 = vmatprep.subr.mxu1 %v8110_v20  ;;  %v8114_v20 = vld [vmem:[#allocation85_spill] sm:$0xff] }
 0x5f0   :  { %2246 = vmatpush2.msra.mxu1 %v8111_v48 }
 0x5f1   :  { %2371 = vmatprep.subr.mxu1 %v6367_v16 }
 0x62e   :  { %v2010_v26 = vpop.f32.mrf.mxu0 }
 0x630   :  { %v2012_v18 = vpop.f32.mrf.mxu0 }
 0x631   :  { %v1939_v49 = vpop.f32.mrf.mxu1 }
 0x632   :  { %v2011_v25 = vadd.f32 %v2010_v26, %v1939_v49  ;;  %v8146_v26 = vld [vmem:[#allocation127_spill] sm:$0xff] }
 0x633   :  { %v1941_v8 = vpop.f32.mrf.mxu1 }
 0x634   :  { %v2013_v37 = vadd.f32 %v2012_v18, %v1941_v8  ;;  %v8144_v8 = vld [vmem:[#allocation126_spill] sm:$0xff] }
 0x671   :  { %v2087_v0 = vpop.f32.mrf.mxu1 }
 0x672   :  { %v2092_v57 = vadd.f32 %v2087_v0, %v2011_v25  ;;  %v8142_v25 = vld [vmem:[#allocation125_spill] sm:$0xff]  ;;  %v8147_v0 = vld [vmem:[#allocation59_spill] sm:$0xff] }
 0x673   :  { %v2089_v40 = vpop.f32.mrf.mxu1 }
 0x674   :  { %v2094_v23 = vadd.f32 %v2092_v57, %v8113_v4  ;;  %v2093_v47 = vadd.f32 %v2089_v40, %v2013_v37  ;;  %v8140_v40 = vld [vmem:[#allocation124_spill] sm:$0xff] }
 0x675   :  { %v8141_v37 = vld [vmem:[#allocation56_spill] sm:$0xff] }
 0x676   :  { %v2096_v43 = vmax.f32 %v2094_v23, 0.0  ;;  %v2095_v38 = vadd.f32 %v2093_v47, %v8114_v20  ;;  %v8148_v47 = vld [vmem:[#allocation128_spill] sm:$0xff] }
 0x678   :  { %v2100_v48 = vrot.slane %v2096_v43, 6  ;;  %v2097_v51 = vmax.f32 %v2095_v38, 0.0  ;;  %v8139_v43 = vld [vmem:[#allocation55_spill] sm:$0xff] }
 0x67a   :  { %v2101_v36 = vrot.slane %v2097_v51, 6  ;;  %v6373_v16 = vsel %vm194_vm0, 0.0, %v2100_v48  ;;  %v8145_v51 = vld [vmem:[#allocation58_spill] sm:$0xff] }
 0x67b   :  { %v2108_v23 = vrot.slane %v6373_v16, 2 }
 0x67c   :  { %2984 = vmatprep.mubr.msk.f32.mxu1 %vm4194_vm1, %v2101_v36  ;;  %v2105_v49 = vsel %vm194_vm0, 0.0, %v2101_v36  ;;  %v8138_v36 = vld [vmem:[#allocation123_spill] sm:$0xff] }
 0x67d   :  { %2986 = vmatmul.mubr.msk.f32.vlgmr.msra.gmra.mxu1 %vm4194_vm1, %v2100_v48  ;;  %v2109_v18 = vrot.slane %v2105_v49, 2  ;;  %v2256_v57 = vrot.slane %v2105_v49, 4  ;;  %v8143_v48 = vld [vmem:[#allocation57_spill] sm:$0xff] }
 0x67e   :  { %2372 = vmatpush1.msra.mxu1 %v5540_v56  ;;  %v8116_v56 = vld [vmem:[#allocation81_spill] sm:$0xff] }
 0x67f   :  { %2176 = vmatprep.mubr.f32.mxu0 %v2109_v18  ;;  %v2257_v38 = vsel %vm620_vm2, %v2256_v57, %v7903_v60  ;;  %2373 = vmatprep.subr.mxu1 %v5544_v50  ;;  %v8117_v50 = vld [vmem:[#allocation45_spill] sm:$0xff]  ;;  %v8151_v57 = vld [vmem:[#allocation63_spill] sm:$0xff] }
 0x680   :  { %2177 = vmatmul.mubr.f32.vlgmr.msra.gmra.mxu0 %v2108_v23  ;;  %2374 = vmatpush1.msra.mxu1 %v5551_v29  ;;  %v8118_v29 = vld [vmem:[#allocation82_spill] sm:$0xff]  ;;  %v8149_v49 = vld [vmem:[#allocation61_spill] sm:$0xff] }
 0x681   :  { %2261 = vmatpush1.msra.mxu0 %v6038_v3  ;;  %2324 = vmatprep.mubr.f32.mxu0 %v2257_v38  ;;  %v8150_v18 = vld [vmem:[#allocation129_spill] sm:$0xff]  ;;  %v8152_v23 = vld [vmem:[#allocation130_spill] sm:$0xff] }
 0x682   :  { %2262 = vmatprep.subr.mxu0 %v6041_v52  ;;  %2375 = vmatprep.subr.mxu1 %v5561_v39  ;;  %v8119_v39 = vld [vmem:[#allocation47_spill] sm:$0xff]  ;;  %v8153_v38 = vld [vmem:[#allocation65_spill] sm:$0xff] }
 0x683   :  { %2263 = vmatpush1.msra.mxu0 %v6045_v19  ;;  %2376 = vmatpush1.msra.mxu1 %v5566_v54  ;;  %v8120_v54 = vld [vmem:[#allocation90_spill] sm:$0xff] }
 0x684   :  { %2264 = vmatprep.subr.mxu0 %v6049_v24  ;;  %2377 = vmatprep.subr.mxu1 %v5570_v28  ;;  %v8121_v28 = vld [vmem:[#allocation51_spill] sm:$0xff] }
 0x685   :  { %2265 = vmatpush1.msra.mxu0 %v6053_v6  ;;  %2378 = vmatpush1.msra.mxu1 %v5574_v15  ;;  %v8122_v15 = vld [vmem:[#allocation115_spill] sm:$0xff] }
 0x686   :  { %2266 = vmatprep.subr.mxu0 %v6057_v17  ;;  %2379 = vmatprep.subr.mxu1 %v5579_v61  ;;  %v8123_v61 = vld [vmem:[#allocation44_spill] sm:$0xff] }
 0x687   :  { %2267 = vmatpush1.msra.mxu0 %v6061_v2  ;;  %2380 = vmatpush1.msra.mxu1 %v5583_v62  ;;  %v8124_v62 = vld [vmem:[#allocation116_spill] sm:$0xff] }
 0x688   :  { %2268 = vmatprep.subr.mxu0 %v6065_v41  ;;  %2381 = vmatprep.subr.mxu1 %v5592_v30  ;;  %v8125_v30 = vld [vmem:[#allocation46_spill] sm:$0xff] }
 0x689   :  { %2269 = vmatpush1.msra.mxu0 %v6069_v1  ;;  %2382 = vmatpush1.msra.mxu1 %v5596_v14  ;;  %v8126_v14 = vld [vmem:[#allocation117_spill] sm:$0xff] }
 0x68a   :  { %2270 = vmatprep.subr.mxu0 %v6073_v46  ;;  %2383 = vmatprep.subr.mxu1 %v5600_v7  ;;  %v8127_v7 = vld [vmem:[#allocation48_spill] sm:$0xff] }
 0x68b   :  { %2271 = vmatpush1.msra.mxu0 %v6077_v53  ;;  %2384 = vmatpush1.msra.mxu1 %v5604_v27  ;;  %v8128_v27 = vld [vmem:[#allocation118_spill] sm:$0xff] }
 0x68c   :  { %2272 = vmatprep.subr.mxu0 %v6081_v42  ;;  %2385 = vmatprep.subr.mxu1 %v5608_v10  ;;  %v8129_v10 = vld [vmem:[#allocation49_spill] sm:$0xff] }
 0x68d   :  { %2273 = vmatpush1.msra.mxu0 %v6085_v11  ;;  %2386 = vmatpush1.msra.mxu1 %v5612_v32  ;;  %v8130_v32 = vld [vmem:[#allocation119_spill] sm:$0xff] }
 0x68e   :  { %2274 = vmatprep.subr.mxu0 %v6089_v58  ;;  %2387 = vmatprep.subr.mxu1 %v5616_v33  ;;  %v8131_v33 = vld [vmem:[#allocation50_spill] sm:$0xff] }
 0x68f   :  { %2275 = vmatpush1.msra.mxu0 %v6093_v12  ;;  %2388 = vmatpush1.msra.mxu1 %v5620_v63  ;;  %v8132_v63 = vld [vmem:[#allocation120_spill] sm:$0xff] }
 0x690   :  { %2276 = vmatprep.subr.mxu0 %v6097_v9  ;;  %2389 = vmatprep.subr.mxu1 %v5624_v55  ;;  %v8133_v55 = vld [vmem:[#allocation52_spill] sm:$0xff] }
 0x691   :  { %2277 = vmatpush1.msra.mxu0 %v6101_v44  ;;  %2390 = vmatpush1.msra.mxu1 %v5628_v31  ;;  %v8134_v31 = vld [vmem:[#allocation121_spill] sm:$0xff] }
 0x692   :  { %2278 = vmatprep.subr.mxu0 %v6105_v5  ;;  %2391 = vmatprep.subr.mxu1 %v5632_v34  ;;  %v8135_v34 = vld [vmem:[#allocation53_spill] sm:$0xff] }
 0x693   :  { %2279 = vmatpush1.msra.mxu0 %v6109_v35  ;;  %2392 = vmatpush1.msra.mxu1 %v5636_v21  ;;  %v8136_v21 = vld [vmem:[#allocation122_spill] sm:$0xff] }
 0x694   :  { %2280 = vmatprep.subr.mxu0 %v6113_v45  ;;  %2393 = vmatprep.subr.mxu1 %v5640_v22  ;;  %v8137_v22 = vld [vmem:[#allocation54_spill] sm:$0xff] }
 0x695   :  { %2281 = vmatpush1.msra.mxu0 %v6117_v13  ;;  %2394 = vmatpush1.msra.mxu1 %v8115_v59  ;;  %v8154_v59 = vld [vmem:[#allocation131_spill] sm:$0xff] }
 0x696   :  { %2282 = vmatprep.subr.mxu0 %v8116_v56  ;;  %2395 = vmatprep.subr.mxu1 %v8117_v50  ;;  %v8155_v50 = vld [vmem:[#allocation67_spill] sm:$0xff] }
 0x697   :  { %2283 = vmatpush1.msra.mxu0 %v8118_v29  ;;  %2396 = vmatpush1.msra.mxu1 %v8119_v39  ;;  %v8156_v39 = vld [vmem:[#allocation132_spill] sm:$0xff] }
 0x698   :  { %2284 = vmatprep.subr.mxu0 %v8120_v54  ;;  %2397 = vmatprep.subr.mxu1 %v8121_v28  ;;  %v8157_v28 = vld [vmem:[#allocation69_spill] sm:$0xff] }
 0x699   :  { %2285 = vmatpush1.msra.mxu0 %v8122_v15  ;;  %2398 = vmatpush1.msra.mxu1 %v8123_v61  ;;  %v8158_v61 = vld [vmem:[#allocation133_spill] sm:$0xff] }
 0x69a   :  { %2286 = vmatprep.subr.mxu0 %v8124_v62  ;;  %2399 = vmatprep.subr.mxu1 %v8125_v30  ;;  %v8159_v30 = vld [vmem:[#allocation71_spill] sm:$0xff] }
 0x69b   :  { %2287 = vmatpush1.msra.mxu0 %v8126_v14  ;;  %2400 = vmatpush1.msra.mxu1 %v8127_v7  ;;  %v8160_v7 = vld [vmem:[#allocation134_spill] sm:$0xff] }
 0x69c   :  { %2288 = vmatprep.subr.mxu0 %v8128_v27  ;;  %2401 = vmatprep.subr.mxu1 %v8129_v10  ;;  %v8161_v10 = vld [vmem:[#allocation73_spill] sm:$0xff] }
 0x69d   :  { %2289 = vmatpush1.msra.mxu0 %v8130_v32  ;;  %2402 = vmatpush1.msra.mxu1 %v8131_v33  ;;  %v8162_v33 = vld [vmem:[#allocation135_spill] sm:$0xff] }
 0x69e   :  { %2290 = vmatprep.subr.mxu0 %v8132_v63  ;;  %2403 = vmatprep.subr.mxu1 %v8133_v55  ;;  %v8163_v55 = vld [vmem:[#allocation75_spill] sm:$0xff] }
 0x69f   :  { %2291 = vmatpush1.msra.mxu0 %v8134_v31  ;;  %2404 = vmatpush2.msra.mxu1 %v8135_v34  ;;  %v8164_v34 = vld [vmem:[#allocation136_spill] sm:$0xff] }
 0x6a0   :  { %2292 = vmatprep.subr.mxu0 %v8136_v21  ;;  %2405 = vmatprep.subr.mxu1 %v8137_v22  ;;  %v8165_v22 = vld [vmem:[#allocation77_spill] sm:$0xff] }
 0x6a1   :  { %2293 = vmatpush2.msra.mxu0 %v8138_v36  ;;  %2406 = vmatpush2.msra.mxu1 %v8139_v43  ;;  %v8166_v43 = vld [vmem:[#allocation137_spill] sm:$0xff] }
 0x6a2   :  { %2294 = vmatprep.subr.mxu0 %v8140_v40  ;;  %2407 = vmatprep.subr.mxu1 %v8141_v37  ;;  %v8167_v37 = vld [vmem:[#allocation79_spill] sm:$0xff] }
 0x6a3   :  { %2295 = vmatpush2.msra.mxu0 %v8142_v25  ;;  %2408 = vmatpush2.msra.mxu1 %v8143_v48  ;;  %v8168_v48 = vld [vmem:[#allocation138_spill] sm:$0xff] }
 0x6a4   :  { %2296 = vmatprep.subr.mxu0 %v8144_v8  ;;  %2409 = vmatprep.subr.mxu1 %v8145_v51  ;;  %v8169_v51 = vld [vmem:[#allocation88_spill] sm:$0xff] }
 0x6a5   :  { %2297 = vmatpush2.msra.mxu0 %v8146_v26  ;;  %2410 = vmatpush2.msra.mxu1 %v8147_v0  ;;  %v8170_v0 = vld [vmem:[#allocation139_spill] sm:$0xff] }
 0x6a6   :  { %2298 = vmatprep.subr.mxu0 %v8148_v47  ;;  %2411 = vmatprep.subr.mxu1 %v8149_v49  ;;  %v8171_v49 = vld [vmem:[#allocation89_spill] sm:$0xff] }
 0x6a7   :  { %2299 = vmatpush2.msra.mxu0 %v8150_v18  ;;  %2412 = vmatpush2.msra.mxu1 %v8151_v57  ;;  %v8172_v57 = vld [vmem:[#allocation140_spill] sm:$0xff] }
 0x6a8   :  { %2300 = vmatprep.subr.mxu0 %v8152_v23  ;;  %2413 = vmatprep.subr.mxu1 %v8153_v38  ;;  %v8173_v38 = vld [vmem:[#allocation91_spill] sm:$0xff] }
 0x6a9   :  { %2301 = vmatpush2.msra.mxu0 %v8154_v59  ;;  %2414 = vmatpush2.msra.mxu1 %v8155_v50  ;;  %v8174_v50 = vld [vmem:[#allocation141_spill] sm:$0xff] }
 0x6aa   :  { %2302 = vmatprep.subr.mxu0 %v8156_v39  ;;  %2415 = vmatprep.subr.mxu1 %v8157_v28  ;;  %v8175_v28 = vld [vmem:[#allocation92_spill] sm:$0xff] }
 0x6ab   :  { %2303 = vmatpush2.msra.mxu0 %v8158_v61  ;;  %2416 = vmatpush2.msra.mxu1 %v8159_v30  ;;  %v8176_v30 = vld [vmem:[#allocation142_spill] sm:$0xff] }
 0x6ac   :  { %2304 = vmatprep.subr.mxu0 %v8160_v7  ;;  %2417 = vmatprep.subr.mxu1 %v8161_v10  ;;  %v8177_v10 = vld [vmem:[#allocation93_spill] sm:$0xff] }
 0x6ad   :  { %2305 = vmatpush2.msra.mxu0 %v8162_v33  ;;  %2418 = vmatpush2.msra.mxu1 %v8163_v55  ;;  %v8178_v55 = vld [vmem:[#allocation143_spill] sm:$0xff] }
 0x6ae   :  { %2306 = vmatprep.subr.mxu0 %v8164_v34  ;;  %2419 = vmatprep.subr.mxu1 %v8165_v22  ;;  %v8179_v22 = vld [vmem:[#allocation94_spill] sm:$0xff]  ;;  %v8265_v34 = vld [vmem:[#allocation80_spill] sm:$0xff] }
 0x6af   :  { %2307 = vmatpush2.msra.mxu0 %v8166_v43  ;;  %2420 = vmatpush2.msra.mxu1 %v8167_v37  ;;  %v8180_v37 = vld [vmem:[#allocation144_spill] sm:$0xff]  ;;  %v8264_v43 = vld [vmem:[#allocation42_spill] sm:$0xff] }
 0x6b0   :  { %2308 = vmatprep.subr.mxu0 %v8168_v48  ;;  %2421 = vmatprep.subr.mxu1 %v8169_v51  ;;  %v8181_v51 = vld [vmem:[#allocation95_spill] sm:$0xff] }
 0x6b1   :  { %2309 = vmatpush2.msra.mxu0 %v8170_v0  ;;  %2422 = vmatpush2.msra.mxu1 %v8171_v49  ;;  %v8182_v49 = vld [vmem:[#allocation145_spill] sm:$0xff] }
 0x6b2   :  { %2310 = vmatprep.subr.mxu0 %v8172_v57  ;;  %2423 = vmatprep.subr.mxu1 %v8173_v38  ;;  %v8183_v57 = vld [vmem:[#allocation96_spill] sm:$0xff]  ;;  %v8184_v38 = vld [vmem:[#allocation146_spill] sm:$0xff] }
 0x6b3   :  { %2311 = vmatpush2.msra.mxu0 %v8174_v50  ;;  %2424 = vmatpush2.msra.mxu1 %v8175_v28  ;;  %v8185_v50 = vld [vmem:[#allocation97_spill] sm:$0xff]  ;;  %v8186_v28 = vld [vmem:[#allocation147_spill] sm:$0xff] }
 0x6b4   :  { %2312 = vmatprep.subr.mxu0 %v8176_v30  ;;  %2425 = vmatprep.subr.mxu1 %v8177_v10  ;;  %v8187_v30 = vld [vmem:[#allocation98_spill] sm:$0xff]  ;;  %v8188_v10 = vld [vmem:[#allocation148_spill] sm:$0xff] }
 0x6b5   :  { %2313 = vmatpush2.msra.mxu0 %v8178_v55  ;;  %2426 = vmatpush2.msra.mxu1 %v8179_v22  ;;  %v8189_v55 = vld [vmem:[#allocation99_spill] sm:$0xff]  ;;  %v2254_v22 = vrot.slane %v6373_v16, 4 }
 0x6b6   :  { %2314 = vmatprep.subr.mxu0 %v8180_v37  ;;  %2427 = vmatprep.subr.mxu1 %v8181_v51  ;;  %v8190_v37 = vld [vmem:[#allocation149_spill] sm:$0xff]  ;;  %v8191_v51 = vld [vmem:[#allocation100_spill] sm:$0xff] }
 0x6b7   :  { %2315 = vmatpush2.msra.mxu0 %v8182_v49  ;;  %2428 = vmatpush2.msra.mxu1 %v8183_v57  ;;  %v8192_v49 = vld [vmem:[#allocation150_spill] sm:$0xff]  ;;  %v8193_v57 = vld [vmem:[#allocation101_spill] sm:$0xff]  ;;  %v2255_v16 = vsel %vm620_vm2, %v2254_v22, %v7903_v60  ;;  %v8208_v60 = vld [vmem:[#allocation107_spill] sm:$0xff] }
 0x6b8   :  { %2316 = vmatprep.subr.mxu0 %v8184_v38  ;;  %2429 = vmatprep.subr.mxu1 %v8185_v50  ;;  %v8194_v38 = vld [vmem:[#allocation151_spill] sm:$0xff]  ;;  %v8195_v50 = vld [vmem:[#allocation102_spill] sm:$0xff]  ;;  %v8209_v22 = vld [vmem:[#allocation108_spill] sm:$0xff] }
 0x6b9   :  { %2317 = vmatpush2.msra.mxu0 %v8186_v28  ;;  %2430 = vmatpush2.msra.mxu1 %v8187_v30  ;;  %v8196_v28 = vld [vmem:[#allocation152_spill] sm:$0xff]  ;;  %v8197_v30 = vld [vmem:[#allocation103_spill] sm:$0xff] }
 0x6ba   :  { %2318 = vmatprep.subr.mxu0 %v8188_v10  ;;  %2431 = vmatprep.subr.mxu1 %v8189_v55  ;;  %v8198_v10 = vld [vmem:[#allocation153_spill] sm:$0xff]  ;;  %v8199_v55 = vld [vmem:[#allocation154_spill] sm:$0xff] }
 0x6bb   :  { %2319 = vmatpush2.msra.mxu0 %v8190_v37  ;;  %2432 = vmatpush2.msra.mxu1 %v8191_v51  ;;  %v8200_v51 = vld [vmem:[#allocation155_spill] sm:$0xff] }
 0x6bc   :  { %2320 = vmatprep.subr.mxu0 %v8192_v49  ;;  %2433 = vmatprep.subr.mxu1 %v8193_v57  ;;  %v8201_v49 = vld [vmem:[#allocation156_spill] sm:$0xff]  ;;  %v8202_v57 = vld [vmem:[#allocation157_spill] sm:$0xff] }
 0x6bd   :  { %2321 = vmatpush2.msra.mxu0 %v8194_v38  ;;  %2434 = vmatpush2.msra.mxu1 %v8195_v50  ;;  %v8203_v38 = vld [vmem:[#allocation158_spill] sm:$0xff]  ;;  %v8204_v50 = vld [vmem:[#allocation159_spill] sm:$0xff] }
 0x6be   :  { %2322 = vmatprep.subr.mxu0 %v8196_v28  ;;  %2517 = vmatprep.subr.mxu1 %v8197_v30  ;;  %v8205_v28 = vld [vmem:[#allocation104_spill] sm:$0xff]  ;;  %v8206_v30 = vld [vmem:[#allocation105_spill] sm:$0xff] }
 0x6bf   :  { %2323 = vmatpush2.msra.mxu0 %v8198_v10  ;;  %v8207_v10 = vld [vmem:[#allocation106_spill] sm:$0xff] }
 0x6c0   :  { %2325 = vmatmul.mubr.f32.vlgmr.msra.gmra.mxu0 %v2255_v16  ;;  %2442 = vmatprep.subr.mxu0 %v8199_v55  ;;  %v8210_v16 = vld [vmem:[#allocation109_spill] sm:$0xff] }
 0x6c1   :  { %2443 = vmatpush1.msra.mxu0 %v8200_v51  ;;  %v8211_v51 = vld [vmem:[#allocation35_spill] sm:$0xff] }
 0x6c2   :  { %2444 = vmatprep.subr.mxu0 %v8201_v49  ;;  %v8212_v49 = vld [vmem:[#allocation37_spill] sm:$0xff] }
 0x6c3   :  { %2445 = vmatpush1.msra.mxu0 %v8202_v57  ;;  %v8213_v57 = vld [vmem:[#allocation39_spill] sm:$0xff] }
 0x6c4   :  { %2446 = vmatprep.subr.mxu0 %v8203_v38  ;;  %v8214_v38 = vld [vmem:[#allocation41_spill] sm:$0xff] }
 0x6c5   :  { %2447 = vmatpush1.msra.mxu0 %v8204_v50  ;;  %v8215_v50 = vld [vmem:[#allocation60_spill] sm:$0xff] }
 0x6c6   :  { %2448 = vmatprep.subr.mxu0 %v8205_v28  ;;  %v8216_v28 = vld [vmem:[#allocation62_spill] sm:$0xff] }
 0x6c7   :  { %2449 = vmatpush1.msra.mxu0 %v8206_v30  ;;  %v8217_v30 = vld [vmem:[#allocation64_spill] sm:$0xff] }
 0x6c8   :  { %2450 = vmatprep.subr.mxu0 %v8207_v10  ;;  %v8218_v10 = vld [vmem:[#allocation66_spill] sm:$0xff] }
 0x6c9   :  { %2451 = vmatpush1.msra.mxu0 %v8208_v60  ;;  %v8219_v60 = vld [vmem:[#allocation68_spill] sm:$0xff] }
 0x6ca   :  { %2452 = vmatprep.subr.mxu0 %v8209_v22  ;;  %v8220_v22 = vld [vmem:[#allocation70_spill] sm:$0xff] }
 0x6cb   :  { %2453 = vmatpush1.msra.mxu0 %v8210_v16  ;;  %v8221_v16 = vld [vmem:[#allocation72_spill] sm:$0xff] }
 0x6cc   :  { %2454 = vmatprep.subr.mxu0 %v8211_v51  ;;  %v8222_v51 = vld [vmem:[#allocation74_spill] sm:$0xff] }
 0x6cd   :  { %2455 = vmatpush1.msra.mxu0 %v8212_v49  ;;  %v8223_v49 = vld [vmem:[#allocation76_spill] sm:$0xff] }
 0x6ce   :  { %2456 = vmatprep.subr.mxu0 %v8213_v57  ;;  %v8224_v57 = vld [vmem:[#allocation78_spill] sm:$0xff] }
 0x6cf   :  { %2457 = vmatpush1.msra.mxu0 %v8214_v38  ;;  %v8225_v38 = vld [vmem:[#allocation83_spill] sm:$0xff] }
 0x6d0   :  { %2458 = vmatprep.subr.mxu0 %v8215_v50  ;;  %v8226_v50 = vld [vmem:[#allocation84_spill] sm:$0xff] }
 0x6d1   :  { %2459 = vmatpush1.msra.mxu0 %v8216_v28  ;;  %v8227_v28 = vld [vmem:[#allocation9_spill] sm:$0xff] }
 0x6d2   :  { %2460 = vmatprep.subr.mxu0 %v8217_v30  ;;  %v8228_v30 = vld [vmem:[#allocation86_spill] sm:$0xff] }
 0x6d3   :  { %2461 = vmatpush1.msra.mxu0 %v8218_v10  ;;  %v8229_v10 = vld [vmem:[#allocation10_spill] sm:$0xff] }
 0x6d4   :  { %2462 = vmatprep.subr.mxu0 %v8219_v60  ;;  %v8230_v60 = vld [vmem:[#allocation11_spill] sm:$0xff] }
 0x6d5   :  { %2463 = vmatpush1.msra.mxu0 %v8220_v22  ;;  %v8231_v22 = vld [vmem:[#allocation12_spill] sm:$0xff] }
 0x6d6   :  { %2464 = vmatprep.subr.mxu0 %v8221_v16  ;;  %v8232_v16 = vld [vmem:[#allocation87_spill] sm:$0xff] }
 0x6d7   :  { %2465 = vmatpush1.msra.mxu0 %v8222_v51  ;;  %v8233_v51 = vld [vmem:[#allocation13_spill] sm:$0xff] }
 0x6d8   :  { %2466 = vmatprep.subr.mxu0 %v8223_v49  ;;  %v8234_v49 = vld [vmem:[#allocation14_spill] sm:$0xff] }
 0x6d9   :  { %2467 = vmatpush1.msra.mxu0 %v8224_v57  ;;  %v8235_v57 = vld [vmem:[#allocation15_spill] sm:$0xff] }
 0x6da   :  { %2468 = vmatprep.subr.mxu0 %v8225_v38  ;;  %v8236_v38 = vld [vmem:[#allocation16_spill] sm:$0xff] }
 0x6db   :  { %2469 = vmatpush1.msra.mxu0 %v8226_v50  ;;  %v8237_v50 = vld [vmem:[#allocation17_spill] sm:$0xff] }
 0x6dc   :  { %2470 = vmatprep.subr.mxu0 %v8227_v28  ;;  %v8238_v28 = vld [vmem:[#allocation18_spill] sm:$0xff] }
 0x6dd   :  { %2471 = vmatpush1.msra.mxu0 %v8228_v30  ;;  %v8239_v30 = vld [vmem:[#allocation19_spill] sm:$0xff] }
 0x6de   :  { %2472 = vmatprep.subr.mxu0 %v8229_v10  ;;  %v8240_v10 = vld [vmem:[#allocation20_spill] sm:$0xff] }
 0x6df   :  { %2473 = vmatpush1.msra.mxu0 %v8230_v60  ;;  %v8241_v60 = vld [vmem:[#allocation21_spill] sm:$0xff] }
 0x6e0   :  { %2474 = vmatprep.subr.mxu0 %v8231_v22  ;;  %v8242_v22 = vld [vmem:[#allocation22_spill] sm:$0xff] }
 0x6e1   :  { %2475 = vmatpush2.msra.mxu0 %v8232_v16  ;;  %v8243_v16 = vld [vmem:[#allocation23_spill] sm:$0xff] }
 0x6e2   :  { %2476 = vmatprep.subr.mxu0 %v8233_v51  ;;  %v8244_v51 = vld [vmem:[#allocation24_spill] sm:$0xff] }
 0x6e3   :  { %2477 = vmatpush2.msra.mxu0 %v8234_v49  ;;  %v8245_v49 = vld [vmem:[#allocation25_spill] sm:$0xff] }
 0x6e4   :  { %2478 = vmatprep.subr.mxu0 %v8235_v57  ;;  %v8246_v57 = vld [vmem:[#allocation26_spill] sm:$0xff] }
 0x6e5   :  { %2479 = vmatpush2.msra.mxu0 %v8236_v38  ;;  %v8247_v38 = vld [vmem:[#allocation27_spill] sm:$0xff] }
 0x6e6   :  { %2480 = vmatprep.subr.mxu0 %v8237_v50  ;;  %v8248_v50 = vld [vmem:[#allocation28_spill] sm:$0xff] }
 0x6e7   :  { %2481 = vmatpush2.msra.mxu0 %v8238_v28  ;;  %v8249_v28 = vld [vmem:[#allocation30_spill] sm:$0xff] }
 0x6e8   :  { %2482 = vmatprep.subr.mxu0 %v8239_v30  ;;  %v8250_v30 = vld [vmem:[#allocation31_spill] sm:$0xff] }
 0x6e9   :  { %2483 = vmatpush2.msra.mxu0 %v8240_v10  ;;  %v8251_v10 = vld [vmem:[#allocation29_spill] sm:$0xff] }
 0x6ea   :  { %2484 = vmatprep.subr.mxu0 %v8241_v60  ;;  %v8252_v60 = vld [vmem:[#allocation32_spill] sm:$0xff] }
 0x6eb   :  { %2485 = vmatpush2.msra.mxu0 %v8242_v22  ;;  %v8253_v22 = vld [vmem:[#allocation33_spill] sm:$0xff] }
 0x6ec   :  { %2486 = vmatprep.subr.mxu0 %v8243_v16  ;;  %v8254_v16 = vld [vmem:[#allocation34_spill] sm:$0xff] }
 0x6ed   :  { %2487 = vmatpush2.msra.mxu0 %v8244_v51  ;;  %v8255_v51 = vld [vmem:[#allocation36_spill] sm:$0xff] }
 0x6ee   :  { %2488 = vmatprep.subr.mxu0 %v8245_v49  ;;  %v8256_v49 = vld [vmem:[#allocation38_spill] sm:$0xff] }
 0x6ef   :  { %2489 = vmatpush2.msra.mxu0 %v8246_v57  ;;  %v8257_v57 = vld [vmem:[#allocation40_spill] sm:$0xff] }
 0x6f0   :  { %2490 = vmatprep.subr.mxu0 %v8247_v38  ;;  %v8258_v38 = vld [vmem:[#allocation110_spill] sm:$0xff] }
 0x6f1   :  { %2491 = vmatpush2.msra.mxu0 %v8248_v50  ;;  %v8259_v50 = vld [vmem:[#allocation111_spill] sm:$0xff] }
 0x6f2   :  { %2492 = vmatprep.subr.mxu0 %v8249_v28  ;;  %v8260_v28 = vld [vmem:[#allocation112_spill] sm:$0xff] }
 0x6f3   :  { %2493 = vmatpush2.msra.mxu0 %v8250_v30  ;;  %v8261_v30 = vld [vmem:[#allocation113_spill] sm:$0xff] }
 0x6f4   :  { %2494 = vmatprep.subr.mxu0 %v8251_v10  ;;  %v8262_v10 = vld [vmem:[#allocation114_spill] sm:$0xff] }
 0x6f5   :  { %2495 = vmatpush2.msra.mxu0 %v8252_v60  ;;  %v8263_v60 = vld [vmem:[#allocation160_spill] sm:$0xff] }
 0x6f6   :  { %2496 = vmatprep.subr.mxu0 %v8253_v22 }
 0x6f7   :  { %2497 = vmatpush2.msra.mxu0 %v8254_v16 }
 0x6f8   :  { %2498 = vmatprep.subr.mxu0 %v8255_v51 }
 0x6f9   :  { %2499 = vmatpush2.msra.mxu0 %v8256_v49 }
 0x6fa   :  { %2500 = vmatprep.subr.mxu0 %v8257_v57 }
 0x6fb   :  { %2501 = vmatpush2.msra.mxu0 %v8258_v38 }
 0x6fc   :  { %2502 = vmatprep.subr.mxu0 %v8259_v50 }
 0x6fd   :  { %2503 = vmatpush2.msra.mxu0 %v8260_v28 }
 0x6fe   :  { %2504 = vmatprep.subr.mxu0 %v8261_v30 }
 0x6ff   :  { %2505 = vmatpush2.msra.mxu0 %v8262_v10 }
 0x700   :  { %2610 = vmatprep.subr.mxu0 %v8263_v60 }
 0x73d   :  { %v2249_v16 = vpop.f32.mrf.mxu1 }
 0x73f   :  { %v2251_v37 = vpop.f32.mrf.mxu1 }
 0x740   :  { %v2178_v22 = vpop.f32.mrf.mxu0 }
 0x741   :  { %v2250_v51 = vadd.f32 %v2249_v16, %v2178_v22 }
 0x742   :  { %v2180_v55 = vpop.f32.mrf.mxu0 }
 0x743   :  { %v2252_v0 = vadd.f32 %v2251_v37, %v2180_v55 }
 0x780   :  { %v2326_v49 = vpop.f32.mrf.mxu0 }
 0x781   :  { %v2331_v57 = vadd.f32 %v2326_v49, %v2250_v51 }
 0x782   :  { %v2328_v48 = vpop.f32.mrf.mxu0 }
 0x783   :  { %v2333_v38 = vadd.f32 %v2331_v57, %v8113_v4  ;;  %v2332_v50 = vadd.f32 %v2328_v48, %v2252_v0 }
 0x785   :  { %v2335_v28 = vadd.f32 %v2333_v38, %v8264_v43  ;;  %v2334_v30 = vadd.f32 %v2332_v50, %v8114_v20 }
 0x787   :  { %v2337_v10 = vsel %vm219_vm3, %v2335_v28, 0.0  ;;  %v2336_v60 = vadd.f32 %v2334_v30, %v8265_v34  ;;  %v3423_v28 = vld [vmem:[#allocation2 + $0x2f0] sm:$0xff] }
 0x788   :  { %v2341_v33 = vrot.slane %v2337_v10, 2  ;;  %v2347_v16 = vrot.slane %v2337_v10, 4 }
 0x789   :  { %v2338_v7 = vsel %vm219_vm3, %v2336_v60, 0.0  ;;  %v3425_v60 = vld [vmem:[#allocation2 + $0x2e0] sm:$0xff] }
 0x78a   :  { %v2345_v22 = vmax.f32 %v2337_v10, %v2341_v33  ;;  %v2342_v61 = vrot.slane %v2338_v7, 2  ;;  %v2348_v55 = vrot.slane %v2338_v7, 4  ;;  %v3424_v10 = vld [vmem:[#allocation2 + $0x2e8] sm:$0xff] }
 0x78c   :  { %v2346_v37 = vmax.f32 %v2338_v7, %v2342_v61  ;;  %v6584_v51 = vmax.f32 %v2345_v22, %v2347_v16  ;;  %v3426_v22 = vld [vmem:[#allocation2 + $0x2d8] sm:$0xff]  ;;  %v3427_v16 = vld [vmem:[#allocation2 + $0x2d0] sm:$0xff] }
 0x78e   :  { %v6586_v49 = vmax.f32 %v2346_v37, %v2348_v55  ;;  %v2353_v43 = vmax.f32 %v6584_v51, 0.0  ;;  %v3428_v37 = vld [vmem:[#allocation2 + $0x2c8] sm:$0xff]  ;;  %v3429_v55 = vld [vmem:[#allocation2 + $0x2c0] sm:$0xff] }
 0x790   :  { %v2354_v48 = vmax.f32 %v6586_v49, 0.0  ;;  %v2357_v0 = vrot.slane %v2353_v43, 6  ;;  %v8266_v43 = vld [vmem:[#allocation133_spill] sm:$0xff] }
 0x792   :  { %v2358_v57 = vrot.slane %v2354_v48, 6  ;;  %v2361_v34 = vsel %vm194_vm0, 0.0, %v2357_v0  ;;  %v8267_v48 = vld [vmem:[#allocation134_spill] sm:$0xff]  ;;  %v8268_v0 = vld [vmem:[#allocation135_spill] sm:$0xff] }
 0x793   :  { %v6593_v33 = vsel %vm620_vm2, %v2361_v34, 0.0 }
 0x794   :  { %v2362_v38 = vsel %vm194_vm0, 0.0, %v2358_v57  ;;  %v2367_v50 = vrot.slane %v6593_v33, 2  ;;  %v8269_v57 = vld [vmem:[#allocation136_spill] sm:$0xff] }
 0x795   :  { %v2364_v61 = vsel %vm620_vm2, %v2362_v38, 0.0  ;;  %2987 = vmatprep.mubr.msk.f32.mxu0 %vm620_vm2, %v2362_v38  ;;  %v8271_v38 = vld [vmem:[#allocation138_spill] sm:$0xff] }
 0x796   :  { %2988 = vmatmul.mubr.msk.f32.vlgmr.msra.gmra.mxu0 %vm620_vm2, %v2361_v34  ;;  %v2368_v7 = vrot.slane %v2364_v61, 2  ;;  %v2514_v30 = vrot.slane %v2364_v61, 4  ;;  %v8270_v34 = vld [vmem:[#allocation137_spill] sm:$0xff] }
 0x797   :  { %2611 = vmatpush1.msra.mxu0 %v3423_v28  ;;  %v3472_v61 = vld [vmem:[#allocation2 + $0x368] sm:$0xff] }
 0x798   :  { %2435 = vmatprep.mubr.f32.mxu1 %v2368_v7  ;;  %2612 = vmatprep.subr.mxu0 %v3424_v10  ;;  %v8272_v7 = vld [vmem:[#allocation139_spill] sm:$0xff]  ;;  %v8273_v28 = vld [vmem:[#allocation140_spill] sm:$0xff]  ;;  %v8274_v10 = vld [vmem:[#allocation141_spill] sm:$0xff] }
 0x799   :  { %2436 = vmatmul.mubr.f32.vlgmr.msra.gmra.mxu1 %v2367_v50  ;;  %2613 = vmatpush1.msra.mxu0 %v3425_v60  ;;  %v3473_v50 = vld [vmem:[#allocation2 + $0x360] sm:$0xff]  ;;  %v3475_v60 = vld [vmem:[#allocation2 + $0x350] sm:$0xff] }
 0x79a   :  { %2518 = vmatpush1.msra.mxu1 %v6038_v3  ;;  %2581 = vmatprep.mubr.f32.mxu1 %v2514_v30  ;;  %v3430_v3 = vld [vmem:[#allocation2 + $0x2b8] sm:$0xff] }
 0x79b   :  { %2519 = vmatprep.subr.mxu1 %v6041_v52  ;;  %2614 = vmatprep.subr.mxu0 %v3426_v22  ;;  %v3431_v52 = vld [vmem:[#allocation2 + $0x2b0] sm:$0xff]  ;;  %v3474_v30 = vld [vmem:[#allocation2 + $0x358] sm:$0xff] }
 0x79c   :  { %2520 = vmatpush1.msra.mxu1 %v6045_v19  ;;  %2615 = vmatpush1.msra.mxu0 %v3427_v16  ;;  %v3432_v19 = vld [vmem:[#allocation2 + $0x2a8] sm:$0xff]  ;;  %v8275_v22 = vld [vmem:[#allocation142_spill] sm:$0xff] }
 0x79d   :  { %2521 = vmatprep.subr.mxu1 %v6049_v24  ;;  %2616 = vmatprep.subr.mxu0 %v3428_v37  ;;  %v3433_v24 = vld [vmem:[#allocation2 + $0x2a0] sm:$0xff]  ;;  %v3476_v16 = vld [vmem:[#allocation2 + $0x348] sm:$0xff] }
 0x79e   :  { %2522 = vmatpush1.msra.mxu1 %v6053_v6  ;;  %2617 = vmatpush1.msra.mxu0 %v3429_v55  ;;  %v3434_v6 = vld [vmem:[#allocation2 + $0x298] sm:$0xff]  ;;  %v3477_v55 = vld [vmem:[#allocation2 + $0x340] sm:$0xff] }
 0x79f   :  { %2523 = vmatprep.subr.mxu1 %v6057_v17  ;;  %2618 = vmatprep.subr.mxu0 %v3430_v3  ;;  %v3435_v17 = vld [vmem:[#allocation2 + $0x290] sm:$0xff]  ;;  %v8276_v37 = vld [vmem:[#allocation143_spill] sm:$0xff]  ;;  %v8277_v3 = vld [vmem:[#allocation144_spill] sm:$0xff] }
 0x7a0   :  { %2524 = vmatpush1.msra.mxu1 %v6061_v2  ;;  %2619 = vmatpush1.msra.mxu0 %v3431_v52  ;;  %v3436_v2 = vld [vmem:[#allocation2 + $0x288] sm:$0xff]  ;;  %v3478_v52 = vld [vmem:[#allocation2 + $0x338] sm:$0xff] }
 0x7a1   :  { %2525 = vmatprep.subr.mxu1 %v6065_v41  ;;  %2620 = vmatprep.subr.mxu0 %v3432_v19  ;;  %v3437_v41 = vld [vmem:[#allocation2 + $0x280] sm:$0xff]  ;;  %v8278_v19 = vld [vmem:[#allocation145_spill] sm:$0xff] }
 0x7a2   :  { %2526 = vmatpush1.msra.mxu1 %v6069_v1  ;;  %2621 = vmatpush1.msra.mxu0 %v3433_v24  ;;  %v3438_v1 = vld [vmem:[#allocation2 + $0x278] sm:$0xff]  ;;  %v3479_v24 = vld [vmem:[#allocation2 + $0x330] sm:$0xff] }
 0x7a3   :  { %2527 = vmatprep.subr.mxu1 %v6073_v46  ;;  %2622 = vmatprep.subr.mxu0 %v3434_v6  ;;  %v3439_v46 = vld [vmem:[#allocation2 + $0x270] sm:$0xff] }
 0x7a4   :  { %2528 = vmatpush1.msra.mxu1 %v6077_v53  ;;  %2623 = vmatpush1.msra.mxu0 %v3435_v17  ;;  %v3440_v53 = vld [vmem:[#allocation2 + $0x268] sm:$0xff]  ;;  %v8279_v6 = vld [vmem:[#allocation146_spill] sm:$0xff] }
 0x7a5   :  { %2529 = vmatprep.subr.mxu1 %v6081_v42  ;;  %2624 = vmatprep.subr.mxu0 %v3436_v2  ;;  %v3441_v42 = vld [vmem:[#allocation2 + $0x260] sm:$0xff]  ;;  %v3480_v17 = vld [vmem:[#allocation2 + $0x328] sm:$0xff] }
 0x7a6   :  { %2530 = vmatpush1.msra.mxu1 %v6085_v11  ;;  %2625 = vmatpush1.msra.mxu0 %v3437_v41  ;;  %v3442_v11 = vld [vmem:[#allocation2 + $0x258] sm:$0xff]  ;;  %v3481_v41 = vld [vmem:[#allocation2 + $0x320] sm:$0xff] }
 0x7a7   :  { %2531 = vmatprep.subr.mxu1 %v6089_v58  ;;  %2626 = vmatprep.subr.mxu0 %v3438_v1  ;;  %v3443_v58 = vld [vmem:[#allocation2 + $0x250] sm:$0xff]  ;;  %v8280_v2 = vld [vmem:[#allocation147_spill] sm:$0xff]  ;;  %v8281_v1 = vld [vmem:[#allocation148_spill] sm:$0xff] }
 0x7a8   :  { %2532 = vmatpush1.msra.mxu1 %v6093_v12  ;;  %2627 = vmatpush1.msra.mxu0 %v3439_v46  ;;  %v3444_v12 = vld [vmem:[#allocation2 + $0x248] sm:$0xff]  ;;  %v3482_v46 = vld [vmem:[#allocation2 + $0x318] sm:$0xff] }
 0x7a9   :  { %2533 = vmatprep.subr.mxu1 %v6097_v9  ;;  %2628 = vmatprep.subr.mxu0 %v3440_v53  ;;  %v3445_v9 = vld [vmem:[#allocation2 + $0x240] sm:$0xff]  ;;  %v8282_v53 = vld [vmem:[#allocation149_spill] sm:$0xff] }
 0x7aa   :  { %2534 = vmatpush1.msra.mxu1 %v6101_v44  ;;  %2629 = vmatpush1.msra.mxu0 %v3441_v42  ;;  %v3446_v44 = vld [vmem:[#allocation2 + $0x238] sm:$0xff]  ;;  %v3483_v42 = vld [vmem:[#allocation2 + $0x310] sm:$0xff] }
 0x7ab   :  { %2535 = vmatprep.subr.mxu1 %v6105_v5  ;;  %2630 = vmatprep.subr.mxu0 %v3442_v11  ;;  %v3447_v5 = vld [vmem:[#allocation2 + $0x230] sm:$0xff] }
 0x7ac   :  { %2536 = vmatpush1.msra.mxu1 %v6109_v35  ;;  %2631 = vmatpush1.msra.mxu0 %v3443_v58  ;;  %v3448_v35 = vld [vmem:[#allocation2 + $0x228] sm:$0xff]  ;;  %v8283_v11 = vld [vmem:[#allocation150_spill] sm:$0xff] }
 0x7ad   :  { %2537 = vmatprep.subr.mxu1 %v6113_v45  ;;  %2632 = vmatprep.subr.mxu0 %v3444_v12  ;;  %v3449_v45 = vld [vmem:[#allocation2 + $0x220] sm:$0xff]  ;;  %v3484_v58 = vld [vmem:[#allocation2 + $0x308] sm:$0xff] }
 0x7ae   :  { %2538 = vmatpush1.msra.mxu1 %v6117_v13  ;;  %2633 = vmatpush1.msra.mxu0 %v3445_v9  ;;  %v3450_v13 = vld [vmem:[#allocation2 + $0x218] sm:$0xff]  ;;  %v3485_v9 = vld [vmem:[#allocation2 + $0x300] sm:$0xff] }
 0x7af   :  { %2539 = vmatprep.subr.mxu1 %v8116_v56  ;;  %2634 = vmatprep.subr.mxu0 %v3446_v44  ;;  %v3451_v56 = vld [vmem:[#allocation2 + $0x210] sm:$0xff]  ;;  %v8284_v12 = vld [vmem:[#allocation151_spill] sm:$0xff]  ;;  %v8285_v44 = vld [vmem:[#allocation152_spill] sm:$0xff] }
 0x7b0   :  { %2540 = vmatpush1.msra.mxu1 %v8118_v29  ;;  %2635 = vmatpush1.msra.mxu0 %v3447_v5  ;;  %v3452_v29 = vld [vmem:[#allocation2 + $0x208] sm:$0xff]  ;;  %v2513_v5 = vrot.slane %v6593_v33, 4  ;;  %v3488_v33 = vld [vmem:[#allocation2 + $0xc0] sm:$0xff] }
 0x7b1   :  { %2541 = vmatprep.subr.mxu1 %v8120_v54  ;;  %2636 = vmatprep.subr.mxu0 %v3448_v35  ;;  %v3453_v54 = vld [vmem:[#allocation2 + $0x200] sm:$0xff]  ;;  %v3486_v35 = vld [vmem:[#allocation2 + $0x4f8] sm:$0xff] }
 0x7b2   :  { %2542 = vmatpush1.msra.mxu1 %v8122_v15  ;;  %2637 = vmatpush1.msra.mxu0 %v3449_v45  ;;  %v3454_v15 = vld [vmem:[#allocation2 + $0x3f8] sm:$0xff]  ;;  %v8286_v45 = vld [vmem:[#allocation153_spill] sm:$0xff] }
 0x7b3   :  { %2543 = vmatprep.subr.mxu1 %v8124_v62  ;;  %2638 = vmatprep.subr.mxu0 %v3450_v13  ;;  %v3455_v62 = vld [vmem:[#allocation2 + $0x3f0] sm:$0xff] }
 0x7b4   :  { %2544 = vmatpush1.msra.mxu1 %v8126_v14  ;;  %2639 = vmatpush1.msra.mxu0 %v3451_v56  ;;  %v3456_v14 = vld [vmem:[#allocation2 + $0x3e8] sm:$0xff]  ;;  %v8287_v13 = vld [vmem:[#allocation154_spill] sm:$0xff]  ;;  %v8288_v56 = vld [vmem:[#allocation155_spill] sm:$0xff] }
 0x7b5   :  { %2545 = vmatprep.subr.mxu1 %v8128_v27  ;;  %2640 = vmatprep.subr.mxu0 %v3452_v29  ;;  %v3457_v27 = vld [vmem:[#allocation2 + $0x3e0] sm:$0xff] }
 0x7b6   :  { %2546 = vmatpush1.msra.mxu1 %v8130_v32  ;;  %2641 = vmatpush1.msra.mxu0 %v3453_v54  ;;  %v3458_v32 = vld [vmem:[#allocation2 + $0x3d8] sm:$0xff]  ;;  %v8289_v29 = vld [vmem:[#allocation156_spill] sm:$0xff]  ;;  %v8290_v54 = vld [vmem:[#allocation157_spill] sm:$0xff] }
 0x7b7   :  { %2547 = vmatprep.subr.mxu1 %v8132_v63  ;;  %2642 = vmatprep.subr.mxu0 %v3454_v15  ;;  %v3459_v63 = vld [vmem:[#allocation2 + $0x3d0] sm:$0xff] }
 0x7b8   :  { %2548 = vmatpush1.msra.mxu1 %v8134_v31  ;;  %2643 = vmatpush2.msra.mxu0 %v3455_v62  ;;  %v3460_v31 = vld [vmem:[#allocation2 + $0x3c8] sm:$0xff]  ;;  %v8291_v15 = vld [vmem:[#allocation158_spill] sm:$0xff]  ;;  %v8292_v62 = vld [vmem:[#allocation159_spill] sm:$0xff] }
 0x7b9   :  { %2549 = vmatprep.subr.mxu1 %v8136_v21  ;;  %2644 = vmatprep.subr.mxu0 %v3456_v14  ;;  %v3461_v21 = vld [vmem:[#allocation2 + $0x3c0] sm:$0xff]  ;;  %v3487_v14 = vld [vmem:[#allocation2 + $0xc8] sm:$0xff] }
 0x7ba   :  { %2550 = vmatpush2.msra.mxu1 %v8138_v36  ;;  %2645 = vmatpush2.msra.mxu0 %v3457_v27  ;;  %v3462_v36 = vld [vmem:[#allocation2 + $0x3b8] sm:$0xff] }
 0x7bb   :  { %2551 = vmatprep.subr.mxu1 %v8140_v40  ;;  %2646 = vmatprep.subr.mxu0 %v3458_v32  ;;  %v3463_v40 = vld [vmem:[#allocation2 + $0x3b0] sm:$0xff]  ;;  %v3489_v27 = vld [vmem:[#allocation2 + $0xb8] sm:$0xff] }
 0x7bc   :  { %2552 = vmatpush2.msra.mxu1 %v8142_v25  ;;  %2647 = vmatpush2.msra.mxu0 %v3459_v63  ;;  %v3464_v25 = vld [vmem:[#allocation2 + $0x3a8] sm:$0xff]  ;;  %v3490_v32 = vld [vmem:[#allocation2 + $0xb0] sm:$0xff] }
 0x7bd   :  { %2553 = vmatprep.subr.mxu1 %v8144_v8  ;;  %2648 = vmatprep.subr.mxu0 %v3460_v31  ;;  %v3465_v8 = vld [vmem:[#allocation2 + $0x3a0] sm:$0xff]  ;;  %v3491_v63 = vld [vmem:[#allocation2 + $0xa8] sm:$0xff] }
 0x7be   :  { %2554 = vmatpush2.msra.mxu1 %v8146_v26  ;;  %2649 = vmatpush2.msra.mxu0 %v3461_v21  ;;  %v3466_v26 = vld [vmem:[#allocation2 + $0x398] sm:$0xff]  ;;  %v3492_v31 = vld [vmem:[#allocation2 + $0xa0] sm:$0xff] }
 0x7bf   :  { %2555 = vmatprep.subr.mxu1 %v8148_v47  ;;  %2650 = vmatprep.subr.mxu0 %v3462_v36  ;;  %v3467_v47 = vld [vmem:[#allocation2 + $0x390] sm:$0xff]  ;;  %v3493_v21 = vld [vmem:[#allocation2 + $0x98] sm:$0xff] }
 0x7c0   :  { %2556 = vmatpush2.msra.mxu1 %v8150_v18  ;;  %2651 = vmatpush2.msra.mxu0 %v3463_v40  ;;  %v3468_v18 = vld [vmem:[#allocation2 + $0x388] sm:$0xff]  ;;  %v3494_v36 = vld [vmem:[#allocation2 + $0x90] sm:$0xff] }
 0x7c1   :  { %2557 = vmatprep.subr.mxu1 %v8152_v23  ;;  %2652 = vmatprep.subr.mxu0 %v3464_v25  ;;  %v3469_v23 = vld [vmem:[#allocation2 + $0x380] sm:$0xff]  ;;  %v3495_v40 = vld [vmem:[#allocation2 + $0x88] sm:$0xff] }
 0x7c2   :  { %2558 = vmatpush2.msra.mxu1 %v8154_v59  ;;  %2653 = vmatpush2.msra.mxu0 %v3465_v8  ;;  %v3470_v59 = vld [vmem:[#allocation2 + $0x378] sm:$0xff]  ;;  %v3496_v25 = vld [vmem:[#allocation2 + $0x80] sm:$0xff] }
 0x7c3   :  { %2559 = vmatprep.subr.mxu1 %v8156_v39  ;;  %2654 = vmatprep.subr.mxu0 %v3466_v26  ;;  %v3471_v39 = vld [vmem:[#allocation2 + $0x370] sm:$0xff]  ;;  %v3497_v8 = vld [vmem:[#allocation2 + $0x78] sm:$0xff] }
 0x7c4   :  { %2560 = vmatpush2.msra.mxu1 %v8266_v43  ;;  %2655 = vmatpush2.msra.mxu0 %v3467_v47  ;;  %v3498_v26 = vld [vmem:[#allocation2 + $0x70] sm:$0xff]  ;;  %v3499_v43 = vld [vmem:[#allocation2 + $0x68] sm:$0xff]  ;;  %v3500_v47 = vld [vmem:[#allocation2 + $0x60] sm:$0xff] }
 0x7c5   :  { %2561 = vmatprep.subr.mxu1 %v8267_v48  ;;  %2656 = vmatprep.subr.mxu0 %v3468_v18  ;;  %v3501_v48 = vld [vmem:[#allocation2 + $0x58] sm:$0xff]  ;;  %v3502_v18 = vld [vmem:[#allocation2 + $0x50] sm:$0xff] }
 0x7c6   :  { %2562 = vmatpush2.msra.mxu1 %v8268_v0  ;;  %2657 = vmatpush2.msra.mxu0 %v3469_v23  ;;  %v3503_v0 = vld [vmem:[#allocation2 + $0x48] sm:$0xff]  ;;  %v3504_v23 = vld [vmem:[#allocation2 + $0x40] sm:$0xff] }
 0x7c7   :  { %2563 = vmatprep.subr.mxu1 %v8269_v57  ;;  %2658 = vmatprep.subr.mxu0 %v3470_v59  ;;  %v3505_v57 = vld [vmem:[#allocation2 + $0x38] sm:$0xff]  ;;  %v3506_v59 = vld [vmem:[#allocation2 + $0x30] sm:$0xff] }
 0x7c8   :  { %2564 = vmatpush2.msra.mxu1 %v8270_v34  ;;  %2659 = vmatpush2.msra.mxu0 %v3471_v39  ;;  %v3507_v34 = vld [vmem:[#allocation2 + $0x28] sm:$0xff]  ;;  %v3508_v39 = vld [vmem:[#allocation2 + $0x20] sm:$0xff] }
 0x7c9   :  { %2565 = vmatprep.subr.mxu1 %v8271_v38  ;;  %2660 = vmatprep.subr.mxu0 %v3472_v61  ;;  %v3509_v38 = vld [vmem:[#allocation2 + $0x18] sm:$0xff]  ;;  %v3510_v61 = vld [vmem:[#allocation2 + $0x10] sm:$0xff] }
 0x7ca   :  { %2566 = vmatpush2.msra.mxu1 %v8272_v7  ;;  %2661 = vmatpush2.msra.mxu0 %v3473_v50  ;;  %v3511_v7 = vld [vmem:[#allocation2 + $0x8] sm:$0xff]  ;;  %v3512_v50 = vld [vmem:[#allocation2] sm:$0xff] }
 0x7cb   :  { %2567 = vmatprep.subr.mxu1 %v8273_v28  ;;  %2662 = vmatprep.subr.mxu0 %v3474_v30  ;;  %v3513_v28 = vld [vmem:[#allocation2 + $0x1f8] sm:$0xff]  ;;  %v3514_v30 = vld [vmem:[#allocation2 + $0x1f0] sm:$0xff] }
 0x7cc   :  { %2568 = vmatpush2.msra.mxu1 %v8274_v10  ;;  %2663 = vmatpush2.msra.mxu0 %v3475_v60  ;;  %v3515_v10 = vld [vmem:[#allocation2 + $0x1e8] sm:$0xff]  ;;  %v3516_v60 = vld [vmem:[#allocation2 + $0x1e0] sm:$0xff] }
 0x7cd   :  { %2569 = vmatprep.subr.mxu1 %v8275_v22  ;;  %2664 = vmatprep.subr.mxu0 %v3476_v16  ;;  %v3517_v22 = vld [vmem:[#allocation2 + $0x1d8] sm:$0xff]  ;;  %v3518_v16 = vld [vmem:[#allocation2 + $0x1d0] sm:$0xff] }
 0x7ce   :  { %2570 = vmatpush2.msra.mxu1 %v8276_v37  ;;  %2665 = vmatpush2.msra.mxu0 %v3477_v55  ;;  %v3519_v37 = vld [vmem:[#allocation2 + $0x1c8] sm:$0xff]  ;;  %v3520_v55 = vld [vmem:[#allocation2 + $0x1c0] sm:$0xff] }
 0x7cf   :  { %2571 = vmatprep.subr.mxu1 %v8277_v3  ;;  %2666 = vmatprep.subr.mxu0 %v3478_v52  ;;  %v3521_v3 = vld [vmem:[#allocation2 + $0x1b8] sm:$0xff]  ;;  %v3522_v52 = vld [vmem:[#allocation2 + $0x1b0] sm:$0xff] }
 0x7d0   :  { %2572 = vmatpush2.msra.mxu1 %v8278_v19  ;;  %2667 = vmatpush2.msra.mxu0 %v3479_v24  ;;  %v3523_v19 = vld [vmem:[#allocation2 + $0x1a8] sm:$0xff]  ;;  %v3524_v24 = vld [vmem:[#allocation2 + $0x1a0] sm:$0xff] }
 0x7d1   :  { %2573 = vmatprep.subr.mxu1 %v8279_v6  ;;  %2668 = vmatprep.subr.mxu0 %v3480_v17  ;;  %v3525_v6 = vld [vmem:[#allocation2 + $0x198] sm:$0xff]  ;;  %v3526_v17 = vld [vmem:[#allocation2 + $0x190] sm:$0xff] }
 0x7d2   :  { %2574 = vmatpush2.msra.mxu1 %v8280_v2  ;;  %2669 = vmatpush2.msra.mxu0 %v3481_v41  ;;  %v3527_v2 = vld [vmem:[#allocation2 + $0x188] sm:$0xff]  ;;  %v3528_v41 = vld [vmem:[#allocation2 + $0x180] sm:$0xff] }
 0x7d3   :  { %2575 = vmatprep.subr.mxu1 %v8281_v1  ;;  %2670 = vmatprep.subr.mxu0 %v3482_v46  ;;  %v3529_v1 = vld [vmem:[#allocation2 + $0x178] sm:$0xff]  ;;  %v3530_v46 = vld [vmem:[#allocation2 + $0x170] sm:$0xff] }
 0x7d4   :  { %2576 = vmatpush2.msra.mxu1 %v8282_v53  ;;  %2671 = vmatpush2.msra.mxu0 %v3483_v42  ;;  %v3531_v53 = vld [vmem:[#allocation2 + $0x168] sm:$0xff]  ;;  %v3532_v42 = vld [vmem:[#allocation2 + $0x160] sm:$0xff] }
 0x7d5   :  { %2577 = vmatprep.subr.mxu1 %v8283_v11  ;;  %2672 = vmatprep.subr.mxu0 %v3484_v58  ;;  %v3533_v11 = vld [vmem:[#allocation2 + $0x158] sm:$0xff]  ;;  %v3534_v58 = vld [vmem:[#allocation2 + $0x150] sm:$0xff] }
 0x7d6   :  { %2578 = vmatpush2.msra.mxu1 %v8284_v12  ;;  %2673 = vmatpush2.msra.mxu0 %v3485_v9  ;;  %v3535_v12 = vld [vmem:[#allocation2 + $0x148] sm:$0xff]  ;;  %v3536_v9 = vld [vmem:[#allocation2 + $0x140] sm:$0xff] }
 0x7d7   :  { %2579 = vmatprep.subr.mxu1 %v8285_v44  ;;  %2756 = vmatprep.subr.mxu0 %v3486_v35  ;;  %v3537_v44 = vld [vmem:[#allocation2 + $0x138] sm:$0xff]  ;;  %v3539_v35 = vld [vmem:[#allocation2 + $0x128] sm:$0xff] }
 0x7d8   :  { %2580 = vmatpush2.msra.mxu1 %v8286_v45  ;;  %v3540_v45 = vld [vmem:[#allocation2 + $0x120] sm:$0xff] }
 0x7d9   :  { %2582 = vmatmul.mubr.f32.vlgmr.msra.gmra.mxu1 %v2513_v5  ;;  %2681 = vmatprep.subr.mxu1 %v8287_v13  ;;  %v3538_v5 = vld [vmem:[#allocation2 + $0x130] sm:$0xff]  ;;  %v3541_v13 = vld [vmem:[#allocation2 + $0x118] sm:$0xff] }
 0x7da   :  { %2682 = vmatpush1.msra.mxu1 %v8288_v56  ;;  %v3542_v56 = vld [vmem:[#allocation2 + $0x110] sm:$0xff] }
 0x7db   :  { %2683 = vmatprep.subr.mxu1 %v8289_v29  ;;  %v3543_v29 = vld [vmem:[#allocation2 + $0x108] sm:$0xff] }
 0x7dc   :  { %2684 = vmatpush1.msra.mxu1 %v8290_v54  ;;  %v3544_v54 = vld [vmem:[#allocation2 + $0x100] sm:$0xff] }
 0x7dd   :  { %2685 = vmatprep.subr.mxu1 %v8291_v15 }
 0x7de   :  { %2686 = vmatpush1.msra.mxu1 %v8292_v62 }
 0x7df   :  { %2687 = vmatprep.subr.mxu1 %v3487_v14 }
 0x7e0   :  { %2688 = vmatpush1.msra.mxu1 %v3488_v33 }
 0x7e1   :  { %2689 = vmatprep.subr.mxu1 %v3489_v27 }
 0x7e2   :  { %2690 = vmatpush1.msra.mxu1 %v3490_v32 }
 0x7e3   :  { %2691 = vmatprep.subr.mxu1 %v3491_v63 }
 0x7e4   :  { %2692 = vmatpush1.msra.mxu1 %v3492_v31 }
 0x7e5   :  { %2693 = vmatprep.subr.mxu1 %v3493_v21 }
 0x7e6   :  { %2694 = vmatpush1.msra.mxu1 %v3494_v36 }
 0x7e7   :  { %2695 = vmatprep.subr.mxu1 %v3495_v40 }
 0x7e8   :  { %2696 = vmatpush1.msra.mxu1 %v3496_v25 }
 0x7e9   :  { %2697 = vmatprep.subr.mxu1 %v3497_v8 }
 0x7ea   :  { %2698 = vmatpush1.msra.mxu1 %v3498_v26 }
 0x7eb   :  { %2699 = vmatprep.subr.mxu1 %v3499_v43 }
 0x7ec   :  { %2700 = vmatpush1.msra.mxu1 %v3500_v47 }
 0x7ed   :  { %2701 = vmatprep.subr.mxu1 %v3501_v48 }
 0x7ee   :  { %2702 = vmatpush1.msra.mxu1 %v3502_v18 }
 0x7ef   :  { %2703 = vmatprep.subr.mxu1 %v3503_v0 }
 0x7f0   :  { %2704 = vmatpush1.msra.mxu1 %v3504_v23 }
 0x7f1   :  { %2705 = vmatprep.subr.mxu1 %v3505_v57 }
 0x7f2   :  { %2706 = vmatpush1.msra.mxu1 %v3506_v59 }
 0x7f3   :  { %2707 = vmatprep.subr.mxu1 %v3507_v34 }
 0x7f4   :  { %2708 = vmatpush1.msra.mxu1 %v3508_v39  ;;  %v3545_v39 = vld [vmem:[#allocation2 + $0x4f0] sm:$0xff] }
 0x7f5   :  { %2709 = vmatprep.subr.mxu1 %v3509_v38  ;;  %v3546_v38 = vld [vmem:[#allocation2 + $0x4e8] sm:$0xff] }
 0x7f6   :  { %2710 = vmatpush1.msra.mxu1 %v3510_v61  ;;  %v3547_v61 = vld [vmem:[#allocation2 + $0x4e0] sm:$0xff] }
 0x7f7   :  { %2711 = vmatprep.subr.mxu1 %v3511_v7  ;;  %v3548_v7 = vld [vmem:[#allocation2 + $0x4d8] sm:$0xff] }
 0x7f8   :  { %2712 = vmatpush1.msra.mxu1 %v3512_v50  ;;  %v3549_v50 = vld [vmem:[#allocation2 + $0x4d0] sm:$0xff] }
 0x7f9   :  { %2713 = vmatprep.subr.mxu1 %v3513_v28  ;;  %v3550_v28 = vld [vmem:[#allocation2 + $0x4c8] sm:$0xff] }
 0x7fa   :  { %2714 = vmatpush2.msra.mxu1 %v3514_v30  ;;  %v3551_v30 = vld [vmem:[#allocation2 + $0x4c0] sm:$0xff] }
 0x7fb   :  { %2715 = vmatprep.subr.mxu1 %v3515_v10  ;;  %v3552_v10 = vld [vmem:[#allocation2 + $0x4b8] sm:$0xff] }
 0x7fc   :  { %2716 = vmatpush2.msra.mxu1 %v3516_v60  ;;  %v3553_v60 = vld [vmem:[#allocation2 + $0x4b0] sm:$0xff] }
 0x7fd   :  { %2717 = vmatprep.subr.mxu1 %v3517_v22  ;;  %v3554_v22 = vld [vmem:[#allocation2 + $0x4a8] sm:$0xff] }
 0x7fe   :  { %2718 = vmatpush2.msra.mxu1 %v3518_v16  ;;  %v3555_v16 = vld [vmem:[#allocation2 + $0x4a0] sm:$0xff] }
 0x7ff   :  { %2719 = vmatprep.subr.mxu1 %v3519_v37  ;;  %v3556_v37 = vld [vmem:[#allocation2 + $0x498] sm:$0xff] }
 0x800   :  { %2720 = vmatpush2.msra.mxu1 %v3520_v55  ;;  %v3557_v55 = vld [vmem:[#allocation2 + $0x490] sm:$0xff] }
 0x801   :  { %2721 = vmatprep.subr.mxu1 %v3521_v3  ;;  %v3558_v3 = vld [vmem:[#allocation2 + $0x488] sm:$0xff] }
 0x802   :  { %2722 = vmatpush2.msra.mxu1 %v3522_v52  ;;  %v3559_v52 = vld [vmem:[#allocation2 + $0x480] sm:$0xff] }
 0x803   :  { %2723 = vmatprep.subr.mxu1 %v3523_v19  ;;  %v3560_v19 = vld [vmem:[#allocation2 + $0x478] sm:$0xff] }
 0x804   :  { %2724 = vmatpush2.msra.mxu1 %v3524_v24  ;;  %v3561_v24 = vld [vmem:[#allocation2 + $0x470] sm:$0xff] }
 0x805   :  { %2725 = vmatprep.subr.mxu1 %v3525_v6  ;;  %v3562_v6 = vld [vmem:[#allocation2 + $0x468] sm:$0xff] }
 0x806   :  { %2726 = vmatpush2.msra.mxu1 %v3526_v17  ;;  %v3563_v17 = vld [vmem:[#allocation2 + $0x460] sm:$0xff] }
 0x807   :  { %2727 = vmatprep.subr.mxu1 %v3527_v2  ;;  %v3564_v2 = vld [vmem:[#allocation2 + $0x458] sm:$0xff] }
 0x808   :  { %2728 = vmatpush2.msra.mxu1 %v3528_v41  ;;  %v3565_v41 = vld [vmem:[#allocation2 + $0x450] sm:$0xff] }
 0x809   :  { %2729 = vmatprep.subr.mxu1 %v3529_v1  ;;  %v3566_v1 = vld [vmem:[#allocation2 + $0x448] sm:$0xff] }
 0x80a   :  { %2730 = vmatpush2.msra.mxu1 %v3530_v46  ;;  %v3567_v46 = vld [vmem:[#allocation2 + $0x440] sm:$0xff] }
 0x80b   :  { %2731 = vmatprep.subr.mxu1 %v3531_v53  ;;  %v3568_v53 = vld [vmem:[#allocation2 + $0x438] sm:$0xff] }
 0x80c   :  { %2732 = vmatpush2.msra.mxu1 %v3532_v42  ;;  %v3569_v42 = vld [vmem:[#allocation2 + $0x430] sm:$0xff] }
 0x80d   :  { %2733 = vmatprep.subr.mxu1 %v3533_v11  ;;  %v3570_v11 = vld [vmem:[#allocation2 + $0x428] sm:$0xff] }
 0x80e   :  { %2734 = vmatpush2.msra.mxu1 %v3534_v58  ;;  %v3571_v58 = vld [vmem:[#allocation2 + $0x420] sm:$0xff] }
 0x80f   :  { %2735 = vmatprep.subr.mxu1 %v3535_v12  ;;  %v3572_v12 = vld [vmem:[#allocation2 + $0x418] sm:$0xff] }
 0x810   :  { %2736 = vmatpush2.msra.mxu1 %v3536_v9  ;;  %v3573_v9 = vld [vmem:[#allocation2 + $0x410] sm:$0xff] }
 0x811   :  { %2737 = vmatprep.subr.mxu1 %v3537_v44  ;;  %v3574_v44 = vld [vmem:[#allocation2 + $0x408] sm:$0xff] }
 0x812   :  { %2738 = vmatpush2.msra.mxu1 %v3538_v5  ;;  %v3575_v5 = vld [vmem:[#allocation2 + $0x400] sm:$0xff] }
 0x813   :  { %2739 = vmatprep.subr.mxu1 %v3539_v35  ;;  %v3576_v35 = vld [vmem:[#allocation2 + $0x5f8] sm:$0xff] }
 0x814   :  { %2740 = vmatpush2.msra.mxu1 %v3540_v45  ;;  %v3577_v45 = vld [vmem:[#allocation2 + $0x5f0] sm:$0xff] }
 0x815   :  { %2741 = vmatprep.subr.mxu1 %v3541_v13  ;;  %v3578_v13 = vld [vmem:[#allocation2 + $0x5e8] sm:$0xff] }
 0x816   :  { %2742 = vmatpush2.msra.mxu1 %v3542_v56  ;;  %v3579_v56 = vld [vmem:[#allocation2 + $0x5e0] sm:$0xff] }
 0x817   :  { %2743 = vmatprep.subr.mxu1 %v3543_v29  ;;  %v3580_v29 = vld [vmem:[#allocation2 + $0x5d8] sm:$0xff] }
 0x818   :  { %2744 = vmatpush2.msra.mxu1 %v3544_v54  ;;  %v3581_v54 = vld [vmem:[#allocation2 + $0x5d0] sm:$0xff] }
 0x856   :  { %v2508_v62 = vpop.f32.mrf.mxu0 }
 0x858   :  { %v2510_v27 = vpop.f32.mrf.mxu0 }
 0x859   :  { %v2437_v15 = vpop.f32.mrf.mxu1 }
 0x85a   :  { %v2509_v33 = vadd.f32 %v2508_v62, %v2437_v15  ;;  %v3582_v15 = vld [vmem:[#allocation2 + $0x5c8] sm:$0xff]  ;;  %v3583_v62 = vld [vmem:[#allocation2 + $0x5c0] sm:$0xff] }
 0x85b   :  { %v2439_v14 = vpop.f32.mrf.mxu1 }
 0x85c   :  { %v2511_v63 = vadd.f32 %v2510_v27, %v2439_v14  ;;  %v3584_v14 = vld [vmem:[#allocation2 + $0x5b8] sm:$0xff]  ;;  %v3586_v27 = vld [vmem:[#allocation2 + $0x5a8] sm:$0xff] }
 0x899   :  { %v2583_v32 = vpop.f32.mrf.mxu1 }
 0x89a   :  { %v2588_v31 = vadd.f32 %v2583_v32, %v2509_v33  ;;  %v3585_v33 = vld [vmem:[#allocation2 + $0x5b0] sm:$0xff]  ;;  %v3587_v32 = vld [vmem:[#allocation2 + $0x5a0] sm:$0xff] }
 0x89b   :  { %v2585_v21 = vpop.f32.mrf.mxu1 }
 0x89c   :  { %v2590_v36 = vadd.f32 %v2588_v31, %v8113_v4  ;;  %v2589_v40 = vadd.f32 %v2585_v21, %v2511_v63  ;;  %v3588_v63 = vld [vmem:[#allocation2 + $0x598] sm:$0xff]  ;;  %v3589_v31 = vld [vmem:[#allocation2 + $0x590] sm:$0xff]  ;;  %v3590_v21 = vld [vmem:[#allocation2 + $0x588] sm:$0xff] }
 0x89e   :  { %v2592_v25 = vmax.f32 %v2590_v36, 0.0  ;;  %v2591_v8 = vadd.f32 %v2589_v40, %v8114_v20  ;;  %v3591_v36 = vld [vmem:[#allocation2 + $0x580] sm:$0xff]  ;;  %v3592_v40 = vld [vmem:[#allocation2 + $0x578] sm:$0xff] }
 0x8a0   :  { %v2596_v26 = vrot.slane %v2592_v25, 6  ;;  %v2593_v43 = vmax.f32 %v2591_v8, 0.0  ;;  %v3593_v25 = vld [vmem:[#allocation2 + $0x570] sm:$0xff]  ;;  %v3594_v8 = vld [vmem:[#allocation2 + $0x568] sm:$0xff] }
 0x8a2   :  { %v2600_v47 = vsel %vm194_vm0, 0.0, %v2596_v26  ;;  %v2597_v48 = vrot.slane %v2593_v43, 6  ;;  %v3595_v26 = vld [vmem:[#allocation2 + $0x560] sm:$0xff]  ;;  %v3596_v43 = vld [vmem:[#allocation2 + $0x558] sm:$0xff] }
 0x8a3   :  { %v6673_v18 = vsel %vm620_vm2, %v2600_v47, 0.0 }
 0x8a4   :  { %v2601_v0 = vsel %vm194_vm0, 0.0, %v2597_v48  ;;  %v2606_v59 = vrot.slane %v6673_v18, 2  ;;  %v3598_v48 = vld [vmem:[#allocation2 + $0x548] sm:$0xff] }
 0x8a5   :  { %v2603_v23 = vsel %vm620_vm2, %v2601_v0, 0.0  ;;  %2989 = vmatprep.mubr.msk.f32.mxu1 %vm620_vm2, %v2601_v0  ;;  %v3599_v0 = vld [vmem:[#allocation2 + $0x540] sm:$0xff] }
 0x8a6   :  { %2990 = vmatmul.mubr.msk.f32.vlgmr.msra.gmra.mxu1 %vm620_vm2, %v2600_v47  ;;  %v2607_v57 = vrot.slane %v2603_v23, 2  ;;  %v2753_v34 = vrot.slane %v2603_v23, 4  ;;  %v3597_v47 = vld [vmem:[#allocation2 + $0x550] sm:$0xff]  ;;  %v3600_v23 = vld [vmem:[#allocation2 + $0x538] sm:$0xff] }
 0x8a8   :  { %2674 = vmatprep.mubr.f32.mxu0 %v2607_v57  ;;  %v3601_v57 = vld [vmem:[#allocation2 + $0x530] sm:$0xff] }
 0x8a9   :  { %2675 = vmatmul.mubr.f32.vlgmr.msra.gmra.mxu0 %v2606_v59  ;;  %v3602_v59 = vld [vmem:[#allocation2 + $0x528] sm:$0xff] }
 0x8aa   :  { %2757 = vmatpush1.msra.mxu0 %v3545_v39  ;;  %2820 = vmatprep.mubr.f32.mxu0 %v2753_v34  ;;  %v3603_v34 = vld [vmem:[#allocation2 + $0x520] sm:$0xff]  ;;  %v3604_v39 = vld [vmem:[#allocation2 + $0x518] sm:$0xff] }
 0x8ab   :  { %2758 = vmatprep.subr.mxu0 %v3546_v38  ;;  %v3605_v38 = vld [vmem:[#allocation2 + $0x510] sm:$0xff] }
 0x8ac   :  { %2759 = vmatpush1.msra.mxu0 %v3547_v61  ;;  %v3606_v61 = vld [vmem:[#allocation2 + $0x508] sm:$0xff] }
 0x8ad   :  { %2760 = vmatprep.subr.mxu0 %v3548_v7  ;;  %v2752_v7 = vrot.slane %v6673_v18, 4  ;;  %v2847_v18 = vld [vmem:[%s6792_s5 + $0x70] sm:$0xff] }
 0x8ae   :  { %2761 = vmatpush1.msra.mxu0 %v3549_v50  ;;  %v3607_v50 = vld [vmem:[#allocation2 + $0x500] sm:$0xff] }
 0x8af   :  { %2762 = vmatprep.subr.mxu0 %v3550_v28  ;;  %v2864_v28 = vld [vmem:[%s6792_s5 + $0xf8] sm:$0xff] }
 0x8b0   :  { %2763 = vmatpush1.msra.mxu0 %v3551_v30  ;;  %v2848_v30 = vld [vmem:[%s6792_s5 + $0x78] sm:$0xff]  ;;  %2992 = vmatprep.subr.mxu1 %v2864_v28 }
 0x8b1   :  { %2764 = vmatprep.subr.mxu0 %v3552_v10  ;;  %v2863_v10 = vld [vmem:[%s6792_s5 + $0xf0] sm:$0xff]  ;;  %2993 = vmatpush3.msra.mxu1 %v2848_v30 }
 0x8b2   :  { %2765 = vmatpush1.msra.mxu0 %v3553_v60  ;;  %v2862_v60 = vld [vmem:[%s6792_s5 + $0xe8] sm:$0xff]  ;;  %2994 = vmatprep.subr.mxu1 %v2863_v10 }
 0x8b3   :  { %2766 = vmatprep.subr.mxu0 %v3554_v22  ;;  %v2846_v22 = vld [vmem:[%s6792_s5 + $0x68] sm:$0xff]  ;;  %2995 = vmatpush3.msra.mxu1 %v2847_v18 }
 0x8b4   :  { %2767 = vmatpush1.msra.mxu0 %v3555_v16  ;;  %v2861_v16 = vld [vmem:[%s6792_s5 + $0xe0] sm:$0xff]  ;;  %2996 = vmatprep.subr.mxu1 %v2862_v60 }
 0x8b5   :  { %2768 = vmatprep.subr.mxu0 %v3556_v37  ;;  %v2845_v37 = vld [vmem:[%s6792_s5 + $0x60] sm:$0xff]  ;;  %2997 = vmatpush3.msra.mxu1 %v2846_v22 }
 0x8b6   :  { %2769 = vmatpush1.msra.mxu0 %v3557_v55  ;;  %v2860_v55 = vld [vmem:[%s6792_s5 + $0xd8] sm:$0xff]  ;;  %2998 = vmatprep.subr.mxu1 %v2861_v16 }
 0x8b7   :  { %2770 = vmatprep.subr.mxu0 %v3558_v3  ;;  %v2844_v3 = vld [vmem:[%s6792_s5 + $0x58] sm:$0xff]  ;;  %2999 = vmatpush3.msra.mxu1 %v2845_v37 }
 0x8b8   :  { %2771 = vmatpush1.msra.mxu0 %v3559_v52  ;;  %v2859_v52 = vld [vmem:[%s6792_s5 + $0xd0] sm:$0xff]  ;;  %3000 = vmatprep.subr.mxu1 %v2860_v55 }
 0x8b9   :  { %2772 = vmatprep.subr.mxu0 %v3560_v19  ;;  %v2843_v19 = vld [vmem:[%s6792_s5 + $0x50] sm:$0xff]  ;;  %3001 = vmatpush3.msra.mxu1 %v2844_v3 }
 0x8ba   :  { %2773 = vmatpush1.msra.mxu0 %v3561_v24  ;;  %v2858_v24 = vld [vmem:[%s6792_s5 + $0xc8] sm:$0xff]  ;;  %3002 = vmatprep.subr.mxu1 %v2859_v52 }
 0x8bb   :  { %2774 = vmatprep.subr.mxu0 %v3562_v6  ;;  %v2842_v6 = vld [vmem:[%s6792_s5 + $0x48] sm:$0xff]  ;;  %3003 = vmatpush3.msra.mxu1 %v2843_v19 }
 0x8bc   :  { %2775 = vmatpush1.msra.mxu0 %v3563_v17  ;;  %v2857_v17 = vld [vmem:[%s6792_s5 + $0xc0] sm:$0xff]  ;;  %3004 = vmatprep.subr.mxu1 %v2858_v24 }
 0x8bd   :  { %2776 = vmatprep.subr.mxu0 %v3564_v2  ;;  %v2841_v2 = vld [vmem:[%s6792_s5 + $0x40] sm:$0xff]  ;;  %3005 = vmatpush3.msra.mxu1 %v2842_v6 }
 0x8be   :  { %2777 = vmatpush1.msra.mxu0 %v3565_v41  ;;  %v2856_v41 = vld [vmem:[%s6792_s5 + $0xb8] sm:$0xff]  ;;  %3006 = vmatprep.subr.mxu1 %v2857_v17 }
 0x8bf   :  { %2778 = vmatprep.subr.mxu0 %v3566_v1  ;;  %v2840_v1 = vld [vmem:[%s6792_s5 + $0x38] sm:$0xff]  ;;  %3007 = vmatpush3.msra.mxu1 %v2841_v2 }
 0x8c0   :  { %2779 = vmatpush1.msra.mxu0 %v3567_v46  ;;  %v2855_v46 = vld [vmem:[%s6792_s5 + $0xb0] sm:$0xff]  ;;  %3008 = vmatprep.subr.mxu1 %v2856_v41 }
 0x8c1   :  { %2780 = vmatprep.subr.mxu0 %v3568_v53  ;;  %v2839_v53 = vld [vmem:[%s6792_s5 + $0x30] sm:$0xff]  ;;  %3009 = vmatpush3.msra.mxu1 %v2840_v1 }
 0x8c2   :  { %2781 = vmatpush1.msra.mxu0 %v3569_v42  ;;  %v2854_v42 = vld [vmem:[%s6792_s5 + $0xa8] sm:$0xff]  ;;  %3010 = vmatprep.subr.mxu1 %v2855_v46 }
 0x8c3   :  { %2782 = vmatprep.subr.mxu0 %v3570_v11  ;;  %v2838_v11 = vld [vmem:[%s6792_s5 + $0x28] sm:$0xff]  ;;  %3011 = vmatpush3.msra.mxu1 %v2839_v53 }
 0x8c4   :  { %2783 = vmatpush1.msra.mxu0 %v3571_v58  ;;  %3012 = vmatprep.subr.mxu1 %v2854_v42  ;;  %v2853_v58 = vld [vmem:[%s6792_s5 + $0xa0] sm:$0xff] }
 0x8c5   :  { %2784 = vmatprep.subr.mxu0 %v3572_v12  ;;  %3013 = vmatpush3.msra.mxu1 %v2838_v11  ;;  %v2837_v12 = vld [vmem:[%s6792_s5 + $0x20] sm:$0xff] }
 0x8c6   :  { %2785 = vmatpush1.msra.mxu0 %v3573_v9  ;;  %3014 = vmatprep.subr.mxu1 %v2853_v58  ;;  %v2852_v9 = vld [vmem:[%s6792_s5 + $0x98] sm:$0xff] }
 0x8c7   :  { %2786 = vmatprep.subr.mxu0 %v3574_v44  ;;  %3015 = vmatpush3.msra.mxu1 %v2837_v12  ;;  %v2836_v44 = vld [vmem:[%s6792_s5 + $0x18] sm:$0xff] }
 0x8c8   :  { %2787 = vmatpush1.msra.mxu0 %v3575_v5  ;;  %3016 = vmatprep.subr.mxu1 %v2852_v9  ;;  %v2851_v5 = vld [vmem:[%s6792_s5 + $0x90] sm:$0xff] }
 0x8c9   :  { %2788 = vmatprep.subr.mxu0 %v3576_v35  ;;  %3017 = vmatpush3.msra.mxu1 %v2836_v44  ;;  %v2835_v35 = vld [vmem:[%s6792_s5 + $0x10] sm:$0xff] }
 0x8ca   :  { %2789 = vmatpush2.msra.mxu0 %v3577_v45  ;;  %3018 = vmatprep.subr.mxu1 %v2851_v5  ;;  %v2850_v45 = vld [vmem:[%s6792_s5 + $0x88] sm:$0xff] }
 0x8cb   :  { %2790 = vmatprep.subr.mxu0 %v3578_v13  ;;  %3019 = vmatpush3.msra.mxu1 %v2835_v35  ;;  %v2834_v13 = vld [vmem:[%s6792_s5 + $0x8] sm:$0xff] }
 0x8cc   :  { %2791 = vmatpush2.msra.mxu0 %v3579_v56  ;;  %v2849_v56 = vld [vmem:[%s6792_s5 + $0x80] sm:$0xff]  ;;  %3020 = vmatprep.subr.mxu1 %v2850_v45 }
 0x8cd   :  { %2792 = vmatprep.subr.mxu0 %v3580_v29  ;;  %v2833_v29 = vld [vmem:[%s6792_s5] sm:$0xff]  ;;  %3021 = vmatpush3.msra.mxu1 %v2834_v13 }
 0x8ce   :  { %2793 = vmatpush2.msra.mxu0 %v3581_v54  ;;  %3022 = vmatprep.subr.mxu1 %v2849_v56 }
 0x8cf   :  { %2794 = vmatprep.subr.mxu0 %v3582_v15  ;;  %3023 = vmatpush3.msra.mxu1 %v2833_v29 }
 0x8d0   :  { %2795 = vmatpush2.msra.mxu0 %v3583_v62 }
 0x8d1   :  { %2796 = vmatprep.subr.mxu0 %v3584_v14 }
 0x8d2   :  { %2797 = vmatpush2.msra.mxu0 %v3585_v33 }
 0x8d3   :  { %2798 = vmatprep.subr.mxu0 %v3586_v27 }
 0x8d4   :  { %2799 = vmatpush2.msra.mxu0 %v3587_v32 }
 0x8d5   :  { %2800 = vmatprep.subr.mxu0 %v3588_v63 }
 0x8d6   :  { %2801 = vmatpush2.msra.mxu0 %v3589_v31 }
 0x8d7   :  { %2802 = vmatprep.subr.mxu0 %v3590_v21 }
 0x8d8   :  { %2803 = vmatpush2.msra.mxu0 %v3591_v36 }
 0x8d9   :  { %2804 = vmatprep.subr.mxu0 %v3592_v40 }
 0x8da   :  { %2805 = vmatpush2.msra.mxu0 %v3593_v25 }
 0x8db   :  { %2806 = vmatprep.subr.mxu0 %v3594_v8 }
 0x8dc   :  { %2807 = vmatpush2.msra.mxu0 %v3595_v26 }
 0x8dd   :  { %2808 = vmatprep.subr.mxu0 %v3596_v43  ;;  %v2991_v43 = vld [vmem:[%s6793_s6] ss:$0 sm:$0xff] }
 0x8de   :  { %2809 = vmatpush2.msra.mxu0 %v3597_v47 }
 0x8df   :  { %2810 = vmatprep.subr.mxu0 %v3598_v48 }
 0x8e0   :  { %2811 = vmatpush2.msra.mxu0 %v3599_v0 }
 0x8e1   :  { %2812 = vmatprep.subr.mxu0 %v3600_v23 }
 0x8e2   :  { %2813 = vmatpush2.msra.mxu0 %v3601_v57 }
 0x8e3   :  { %2814 = vmatprep.subr.mxu0 %v3602_v59 }
 0x8e4   :  { %2815 = vmatpush2.msra.mxu0 %v3603_v34 }
 0x8e5   :  { %2816 = vmatprep.subr.mxu0 %v3604_v39 }
 0x8e6   :  { %2817 = vmatpush2.msra.mxu0 %v3605_v38 }
 0x8e7   :  { %2818 = vmatprep.subr.mxu0 %v3606_v61 }
 0x8e8   :  { %2819 = vmatpush2.msra.mxu0 %v3607_v50 }
 0x8e9   :  { %2821 = vmatmul.mubr.f32.vlgmr.msra.gmra.mxu0 %v2752_v7 }
 0x966   :  { %v2747_v15 = vpop.f32.mrf.mxu1 }
 0x968   :  { %v2749_v33 = vpop.f32.mrf.mxu1 }
 0x969   :  { %v2676_v54 = vpop.f32.mrf.mxu0 }
 0x96a   :  { %v2748_v14 = vadd.f32 %v2747_v15, %v2676_v54 }
 0x96b   :  { %v2678_v62 = vpop.f32.mrf.mxu0 }
 0x96c   :  { %v2750_v32 = vadd.f32 %v2749_v33, %v2678_v62 }
 0x9a9   :  { %v2822_v27 = vpop.f32.mrf.mxu0 }
 0x9aa   :  { %v2827_v63 = vadd.f32 %v2822_v27, %v2748_v14 }
 0x9ab   :  { %v2824_v31 = vpop.f32.mrf.mxu0 }
 0x9ac   :  { %v2828_v21 = vadd.f32 %v2824_v31, %v2750_v32  ;;  %v2829_v36 = vadd.f32 %v2827_v63, %v8113_v4 }
 0x9ae   :  { %v2830_v40 = vadd.f32 %v2828_v21, %v8114_v20  ;;  %v2831_v8 = vadd.f32 %v2829_v36, %v6584_v51 }
 0x9b0   :  { %v2832_v25 = vadd.f32 %v2830_v40, %v6586_v49 }
 0x9b2   :  { %2936 = vmatprep.mubr.f32.mxu1 %v2832_v25 }
 0x9b3   :  { %2937 = vmatmul.mubr.f32.vlgmr.msra.gmra.mxu1 %v2831_v8 }
 0xa73   :  { %v3024_v26 = vpop.f32.mrf.mxu1 }
 0xa75   :  { %v3025_v47 = vpop.f32.mrf.mxu1 }
 0xa76   :  { %v3026_v48 = vadd.f32 %v3025_v47, %v3024_v26 }
 0xa78   :  { %v2939_v0 = vadd.f32 %v3026_v48, %v2991_v43 }
 0xa7a   :  { %2943 = vst.msk [vmem:[#allocation5] sm:$0x3] %vm2942_vm4, %v2939_v0 }
 0xa7b   :  { %3639 = shalt.err (!%p3636_p9)
}
 0xa7c   :  { %2953 = dma.vmem_to_hbm [thread:$0]  %s2951_s17, 32, %s6794_s7, [#allocation4]  }
 0xa7d   :  { %3650 = dma.done.wait [#allocation4], 32  }
 0xa7e   :  { %3651 = vsyncadd [#allocation4], 4294967264 }
 0xa7f   :  { %2957 = vsyncpa [#allocation3], 1 }
 0xa80   :  { %2958 = vsyncpa [#allocation4], 1 }

</bundles_post_ra>
